<compile_context>
chip_gen: v7x
topology: tpu7x:2x2x1
jax: 0.10.0
libtpu: 0.0.40
codegen_flags: <defaults>
</compile_context>

<pallas_src>
import jax
import jax.numpy as jnp
from jax import lax
from jax.experimental import pallas as pl
from jax.experimental.pallas import tpu as pltpu


def _round_up(x, m):
    return (x + m - 1) // m * m


# ----------------------------- in-kernel helpers ------------------------------

def _zero_halo(p_ref, w_valid):
    """Zero only the halo strips of a padded (Hp, Wp, C) buffer.

    The interior is overwritten by the caller, so it is never written twice.
    """
    hp, wp, c = p_ref.shape
    f32 = jnp.float32
    p_ref[0:2, :, :] = jnp.zeros((2, wp, c), f32)
    p_ref[hp - 2:hp, :, :] = jnp.zeros((2, wp, c), f32)
    p_ref[:, 0:2, :] = jnp.zeros((hp, 2, c), f32)
    p_ref[:, w_valid + 2:wp, :] = jnp.zeros((hp, wp - w_valid - 2, c), f32)


def _conv5x5_relu(p_ref, w_ref, b_ref, a_ref):
    """5x5 / pad=2 conv + bias + ReLU via shift-and-accumulate on the MXU.

    p_ref: (H+4, Ws+4, Cin) zero-haloed input, Ws a multiple of 8 (>= valid W).
    w_ref: (25*Cin, Cout), rows ordered as (ky*5 + kx)*Cin + ci.
    a_ref: (H, Ws, Cout) output (columns beyond the valid W are don't-care).
    """
    hp, wps, cin = p_ref.shape
    h, ws = hp - 4, wps - 4
    cout = w_ref.shape[1]
    # Rows per GEMM chunk so M = hc*Ws stays <= 128 (keeps the f32 accumulator
    # + slab footprint comfortably inside the register file).
    hc = min(h, max(1, 128 // ws))
    while h % hc:
        hc -= 1
    for h0 in range(0, h, hc):
        acc = jnp.zeros((hc * ws, cout), jnp.float32) + b_ref[...]
        for ky in range(5):
            for kx in range(5):
                t = ky * 5 + kx
                slab = p_ref[h0 + ky:h0 + ky + hc, kx:kx + ws, :]
                acc = acc + jnp.dot(slab.reshape(hc * ws, cin),
                                    w_ref[t * cin:(t + 1) * cin, :],
                                    preferred_element_type=jnp.float32)
        a_ref[h0:h0 + hc, :, :] = jnp.maximum(acc, 0.0).reshape(hc, ws, cout)


def _pool2x2(a_ref, w_valid):
    """2x2 / stride-2 max pool of the valid (H, w_valid, C) region of a_ref.

    Column pairs: two sublane-strided ref reads + max.
    Row pairs:    leading-dim reshape + max (pure tile selection).
    """
    h, _, c = a_ref.shape
    w2 = w_valid // 2
    c_even = a_ref[:, pl.ds(0, w2, stride=2), :]
    c_odd = a_ref[:, pl.ds(1, w2, stride=2), :]
    cm = jnp.maximum(c_even, c_odd).reshape(h // 2, 2, w2, c)
    return jnp.maximum(cm[:, 0], cm[:, 1])          # (H//2, W//2, C)


# --------------------------------- the kernel ---------------------------------

def _fused_cnn_kernel(x_ref, w1_ref, b1_ref, w2_ref, b2_ref, w3_ref, b3_ref,
                      w1p_ref, fb1_ref, w2p_ref, fb2_ref, out_ref,
                      p1, a1, p2, a2, p3, a3):
    f32 = jnp.float32
    _, H, W, _ = x_ref.shape
    H2, W2, H3, W3 = H // 2, W // 2, H // 4, W // 4
    H4, W4 = H // 8, W // 8
    C3 = w3_ref.shape[1]

    # ---- layer 1: conv(C0->C1) + relu + 2x2 maxpool ---------------------------
    _zero_halo(p1, W)
    p1[2:2 + H, 2:2 + W, :] = x_ref[0]
    _conv5x5_relu(p1, w1_ref, b1_ref, a1)
    pooled1 = _pool2x2(a1, W)                        # (H2, W2, C1)

    # ---- layer 2 --------------------------------------------------------------
    _zero_halo(p2, W2)
    p2[2:2 + H2, 2:2 + W2, :] = pooled1
    _conv5x5_relu(p2, w2_ref, b2_ref, a2)
    pooled2 = _pool2x2(a2, W2)                       # (H3, W3, C2)

    # ---- layer 3: same single-GEMM conv + pool path ---------------------------
    _zero_halo(p3, W3)
    p3[2:2 + H3, 2:2 + W3, :] = pooled2
    _conv5x5_relu(p3, w3_ref, b3_ref, a3)
    pooled3 = _pool2x2(a3, W3)                       # (H4, W4, C3)

    # ---- FC head: NHWC flatten folded algebraically into fc1 ------------------
    h1 = fb1_ref[...]                                # (1, 64)
    for hh in range(H4):
        for ww in range(W4):
            k = hh * W4 + ww
            h1 = h1 + jnp.dot(pooled3[hh, ww:ww + 1, :],
                              w1p_ref[k * C3:(k + 1) * C3, :],
                              preferred_element_type=f32)
    h1 = jnp.maximum(h1, 0.0)
    out = jnp.dot(h1, w2p_ref[...], preferred_element_type=f32) + fb2_ref[...]
    out_ref[...] = out.reshape(1, 1, out.shape[-1])


# ------------------------------- host-side glue --------------------------------

def prepare_params(params, pooled_hw):
    """One-time weight re-layout so the fused kernel needs no in-kernel transposes."""
    def conv_mat(w):  # OIHW -> ((ky*5 + kx)*Cin + ci, Cout), matches the tap order
        o, i, kh, kw = w.shape
        return jnp.transpose(w, (2, 3, 1, 0)).reshape(kh * kw * i, o)

    ph, pw = pooled_hw
    c3 = params["conv3_w"].shape[0]
    n1 = params["fc1_w"].shape[0]
    # fold PyTorch's NCHW flatten order (c*ph*pw + h*pw + w) into fc1's weight so
    # the kernel's NHWC features ((h*pw + w)*c3 + c) feed it directly.
    w1p = jnp.transpose(params["fc1_w"].reshape(n1, c3, ph, pw),
                        (2, 3, 1, 0)).reshape(ph * pw * c3, n1)
    return {
        "w1": conv_mat(params["conv1_w"]), "b1": params["conv1_b"].reshape(1, -1),
        "w2": conv_mat(params["conv2_w"]), "b2": params["conv2_b"].reshape(1, -1),
        "w3": conv_mat(params["conv3_w"]), "b3": params["conv3_b"].reshape(1, -1),
        "w1p": w1p, "fb1": params["fc1_b"].reshape(1, -1),
        "w2p": params["fc2_w"].T, "fb2": params["fc2_b"].reshape(1, -1),
    }


def convolutional_network_forward(x_nchw, prepped, num_char, num_dim):
    B, C0, H, W = x_nchw.shape
    assert H % 8 == 0 and W % 8 == 0, "spatial dims must be divisible by 8"
    C1 = prepped["w1"].shape[1]
    C2 = prepped["w2"].shape[1]
    C3 = prepped["w3"].shape[1]
    H2, W2, H3, W3 = H // 2, W // 2, H // 4, W // 4
    Ws1, Ws2, Ws3 = _round_up(W, 8), _round_up(W2, 8), _round_up(W3, 8)
    out_dim = num_char * num_dim

    x_nhwc = jnp.transpose(x_nchw, (0, 2, 3, 1))     # single tiny transpose

    def full_spec(arr):  # whole (small) parameter array resident in VMEM
        nd = arr.ndim
        return pl.BlockSpec(arr.shape, lambda b, _nd=nd: (0,) * _nd)

    weights = (prepped["w1"], prepped["b1"], prepped["w2"], prepped["b2"],
               prepped["w3"], prepped["b3"], prepped["w1p"], prepped["fb1"],
               prepped["w2p"], prepped["fb2"])

    out = pl.pallas_call(
        _fused_cnn_kernel,
        out_shape=jax.ShapeDtypeStruct((B, 1, out_dim), jnp.float32),
        grid=(B,),
        in_specs=[pl.BlockSpec((1, H, W, C0), lambda b: (b, 0, 0, 0))]
                 + [full_spec(w) for w in weights],
        out_specs=pl.BlockSpec((1, 1, out_dim), lambda b: (b, 0, 0)),
        scratch_shapes=[
            pltpu.VMEM((H + 4, Ws1 + 4, C0), jnp.float32),    # padded conv1 input
            pltpu.VMEM((H, Ws1, C1), jnp.float32),            # conv1 output
            pltpu.VMEM((H2 + 4, Ws2 + 4, C1), jnp.float32),   # padded conv2 input
            pltpu.VMEM((H2, Ws2, C2), jnp.float32),           # conv2 output
            pltpu.VMEM((H3 + 4, Ws3 + 4, C2), jnp.float32),   # padded conv3 input
            pltpu.VMEM((H3, Ws3, C3), jnp.float32),           # conv3 output
        ],
        compiler_params=pltpu.CompilerParams(
            dimension_semantics=("parallel",)),
    )(x_nhwc, *weights)
    return out.reshape(B, num_char, num_dim)


# ------------------------- pure-JAX reference (correctness) --------------------

def _reference_forward(x_nchw, params, num_char, num_dim):
    def conv(x, w, bias):
        y = lax.conv_general_dilated(x, w, (1, 1), [(2, 2), (2, 2)],
                                     dimension_numbers=("NCHW", "OIHW", "NCHW"))
        return jnp.maximum(y + bias[None, :, None, None], 0.0)

    def pool(x):
        return lax.reduce_window(x, -jnp.inf, lax.max,
                                 (1, 1, 2, 2), (1, 1, 2, 2), "VALID")

    b = x_nchw.shape[0]
    out = pool(conv(x_nchw, params["conv1_w"], params["conv1_b"]))
    out = pool(conv(out, params["conv2_w"], params["conv2_b"]))
    out = pool(conv(out, params["conv3_w"], params["conv3_b"]))
    out = out.reshape(b, -1)
    out = jnp.maximum(out @ params["fc1_w"].T + params["fc1_b"], 0.0)
    out = out @ params["fc2_w"].T + params["fc2_b"]
    return out.reshape(b, num_char, num_dim)


# ------------------------------------ main --------------------------------------

if __name__ == "__main__":
    B, C, H, W = 2, 4, 16, 16            # input_shape = (b, c, h, w)
    NUM_CHAR, NUM_DIM = 4, 8

    # shapes implied by build_module(): 16x16 -> 8 -> 4 -> 2 spatial, 16 channels
    flat_dim = 16 * (H // 8) * (W // 8)  # 64

    key = jax.random.PRNGKey(0)
    ks = jax.random.split(key, 11)
    s = 0.05
    params = {
        "conv1_w": s * jax.random.normal(ks[0], (8, C, 5, 5), jnp.float32),
        "conv1_b": s * jax.random.normal(ks[1], (8,), jnp.float32),
        "conv2_w": s * jax.random.normal(ks[2], (12, 8, 5, 5), jnp.float32),
        "conv2_b": s * jax.random.normal(ks[3], (12,), jnp.float32),
        "conv3_w": s * jax.random.normal(ks[4], (16, 12, 5, 5), jnp.float32),
        "conv3_b": s * jax.random.normal(ks[5], (16,), jnp.float32),
        "fc1_w": s * jax.random.normal(ks[6], (64, flat_dim), jnp.float32),
        "fc1_b": s * jax.random.normal(ks[7], (64,), jnp.float32),
        "fc2_w": s * jax.random.normal(ks[8], (NUM_CHAR * NUM_DIM, 64), jnp.float32),
        "fc2_b": s * jax.random.normal(ks[9], (NUM_CHAR * NUM_DIM,), jnp.float32),
    }

    x = jax.random.normal(ks[10], (B, C, H, W), jnp.float32)

    prepped = prepare_params(params, pooled_hw=(H // 8, W // 8))
    fwd = jax.jit(convolutional_network_forward, static_argnums=(2, 3))

    out = jax.block_until_ready(fwd(x, prepped, NUM_CHAR, NUM_DIM))
    ref = jax.block_until_ready(_reference_forward(x, params, NUM_CHAR, NUM_DIM))

    assert out.shape == (B, NUM_CHAR, NUM_DIM), out.shape
    assert jnp.allclose(out, ref, atol=1e-4, rtol=1e-4), float(jnp.max(jnp.abs(out - ref)))
    print("KERNEL_OK")
</pallas_src>

<mosaic_0001>
module attributes {stable_mosaic.version = 11 : i64} {
  func.func @_fused_cnn_kernel(%arg0: i32, %arg1: memref<1x16x16x4xf32, #tpu.memory_space<vmem>>, %arg2: memref<100x8xf32, #tpu.memory_space<vmem>>, %arg3: memref<1x8xf32, #tpu.memory_space<vmem>>, %arg4: memref<200x12xf32, #tpu.memory_space<vmem>>, %arg5: memref<1x12xf32, #tpu.memory_space<vmem>>, %arg6: memref<300x16xf32, #tpu.memory_space<vmem>>, %arg7: memref<1x16xf32, #tpu.memory_space<vmem>>, %arg8: memref<64x64xf32, #tpu.memory_space<vmem>>, %arg9: memref<1x64xf32, #tpu.memory_space<vmem>>, %arg10: memref<64x32xf32, #tpu.memory_space<vmem>>, %arg11: memref<1x32xf32, #tpu.memory_space<vmem>>, %arg12: memref<1x1x32xf32, #tpu.memory_space<vmem>>, %arg13: memref<20x20x4xf32, #tpu.memory_space<vmem>>, %arg14: memref<16x16x8xf32, #tpu.memory_space<vmem>>, %arg15: memref<12x12x8xf32, #tpu.memory_space<vmem>>, %arg16: memref<8x8x12xf32, #tpu.memory_space<vmem>>, %arg17: memref<8x12x12xf32, #tpu.memory_space<vmem>>, %arg18: memref<4x8x16xf32, #tpu.memory_space<vmem>>) attributes {dimension_semantics = [#tpu.dimension_semantics<parallel>], iteration_bounds = array<i64: 2>, scalar_prefetch = 0 : i64, scratch_operands = 6 : i64, tpu.core_type = #tpu.core_type<tc>, window_params = [{transform_indices = @transform_0, window_bounds = array<i64: 1, 16, 16, 4>}, {pipeline_mode = #tpu.pipeline_mode<synchronous>, transform_indices = @transform_1, window_bounds = array<i64: 100, 8>}, {pipeline_mode = #tpu.pipeline_mode<synchronous>, transform_indices = @transform_2, window_bounds = array<i64: 1, 8>}, {pipeline_mode = #tpu.pipeline_mode<synchronous>, transform_indices = @transform_3, window_bounds = array<i64: 200, 12>}, {pipeline_mode = #tpu.pipeline_mode<synchronous>, transform_indices = @transform_4, window_bounds = array<i64: 1, 12>}, {pipeline_mode = #tpu.pipeline_mode<synchronous>, transform_indices = @transform_5, window_bounds = array<i64: 300, 16>}, {pipeline_mode = #tpu.pipeline_mode<synchronous>, transform_indices = @transform_6, window_bounds = array<i64: 1, 16>}, {pipeline_mode = #tpu.pipeline_mode<synchronous>, transform_indices = @transform_7, window_bounds = array<i64: 64, 64>}, {pipeline_mode = #tpu.pipeline_mode<synchronous>, transform_indices = @transform_8, window_bounds = array<i64: 1, 64>}, {pipeline_mode = #tpu.pipeline_mode<synchronous>, transform_indices = @transform_9, window_bounds = array<i64: 64, 32>}, {pipeline_mode = #tpu.pipeline_mode<synchronous>, transform_indices = @transform_10, window_bounds = array<i64: 1, 32>}, {transform_indices = @transform_11, window_bounds = array<i64: 1, 1, 32>}]} {
    %cst = arith.constant 0.000000e+00 : f32
    %0 = vector.broadcast %cst : f32 to vector<2x20x4xf32>
    %c0 = arith.constant 0 : index
    %c0_0 = arith.constant 0 : index
    %c0_1 = arith.constant 0 : index
    %1 = vector.load %arg13[%c0, %c0_0, %c0_1] : memref<20x20x4xf32, #tpu.memory_space<vmem>>, vector<2x20x4xf32>
    tpu.vector_store %arg13[%c0, %c0_0, %c0_1], %0 {strides = array<i32>} : memref<20x20x4xf32, #tpu.memory_space<vmem>>, vector<2x20x4xf32>,
    %cst_2 = arith.constant 0.000000e+00 : f32
    %2 = vector.broadcast %cst_2 : f32 to vector<2x20x4xf32>
    %c18 = arith.constant 18 : index
    %c0_3 = arith.constant 0 : index
    %c0_4 = arith.constant 0 : index
    %3 = vector.load %arg13[%c18, %c0_3, %c0_4] : memref<20x20x4xf32, #tpu.memory_space<vmem>>, vector<2x20x4xf32>
    tpu.vector_store %arg13[%c18, %c0_3, %c0_4], %2 {strides = array<i32>} : memref<20x20x4xf32, #tpu.memory_space<vmem>>, vector<2x20x4xf32>,
    %cst_5 = arith.constant 0.000000e+00 : f32
    %4 = vector.broadcast %cst_5 : f32 to vector<20x2x4xf32>
    %c0_6 = arith.constant 0 : index
    %c0_7 = arith.constant 0 : index
    %c0_8 = arith.constant 0 : index
    %5 = vector.load %arg13[%c0_6, %c0_7, %c0_8] : memref<20x20x4xf32, #tpu.memory_space<vmem>>, vector<20x2x4xf32>
    tpu.vector_store %arg13[%c0_6, %c0_7, %c0_8], %4 {strides = array<i32>} : memref<20x20x4xf32, #tpu.memory_space<vmem>>, vector<20x2x4xf32>,
    %cst_9 = arith.constant 0.000000e+00 : f32
    %6 = vector.broadcast %cst_9 : f32 to vector<20x2x4xf32>
    %c0_10 = arith.constant 0 : index
    %c18_11 = arith.constant 18 : index
    %c0_12 = arith.constant 0 : index
    %7 = vector.load %arg13[%c0_10, %c18_11, %c0_12] : memref<20x20x4xf32, #tpu.memory_space<vmem>>, vector<20x2x4xf32>
    tpu.vector_store %arg13[%c0_10, %c18_11, %c0_12], %6 {strides = array<i32>} : memref<20x20x4xf32, #tpu.memory_space<vmem>>, vector<20x2x4xf32>,
    %c0_13 = arith.constant 0 : index
    %c0_14 = arith.constant 0 : index
    %c0_15 = arith.constant 0 : index
    %c0_16 = arith.constant 0 : index
    %8 = vector.load %arg1[%c0_13, %c0_14, %c0_15, %c0_16] : memref<1x16x16x4xf32, #tpu.memory_space<vmem>>, vector<1x16x16x4xf32>
    %9 = vector.shape_cast %8 : vector<1x16x16x4xf32> to vector<16x16x4xf32>
    %c2 = arith.constant 2 : index
    %c2_17 = arith.constant 2 : index
    %c0_18 = arith.constant 0 : index
    %10 = vector.load %arg13[%c2, %c2_17, %c0_18] : memref<20x20x4xf32, #tpu.memory_space<vmem>>, vector<16x16x4xf32>
    tpu.vector_store %arg13[%c2, %c2_17, %c0_18], %9 {strides = array<i32>} : memref<20x20x4xf32, #tpu.memory_space<vmem>>, vector<16x16x4xf32>,
    %cst_19 = arith.constant 0.000000e+00 : f32
    %11 = vector.broadcast %cst_19 : f32 to vector<128x8xf32>
    %c0_20 = arith.constant 0 : index
    %c0_21 = arith.constant 0 : index
    %12 = vector.load %arg3[%c0_20, %c0_21] : memref<1x8xf32, #tpu.memory_space<vmem>>, vector<1x8xf32>
    %13 = vector.broadcast %12 : vector<1x8xf32> to vector<128x8xf32>
    %14 = arith.addf %11, %13 : vector<128x8xf32>
    %c0_22 = arith.constant 0 : index
    %c0_23 = arith.constant 0 : index
    %c0_24 = arith.constant 0 : index
    %15 = vector.load %arg13[%c0_22, %c0_23, %c0_24] : memref<20x20x4xf32, #tpu.memory_space<vmem>>, vector<8x16x4xf32>
    %16 = vector.shape_cast %15 : vector<8x16x4xf32> to vector<128x4xf32>
    %c0_25 = arith.constant 0 : index
    %c0_26 = arith.constant 0 : index
    %17 = vector.load %arg2[%c0_25, %c0_26] : memref<100x8xf32, #tpu.memory_space<vmem>>, vector<4x8xf32>
    %cst_27 = arith.constant dense<0.000000e+00> : vector<128x8xf32>
    %18 = tpu.matmul %16, %17, %cst_27 {dimension_numbers = #tpu.dot_dimension_numbers<[1], [0], [0], [1], [0, 0, 1, 1], [], []>} : vector<128x4xf32>, vector<4x8xf32>, vector<128x8xf32> -> vector<128x8xf32>
    %19 = arith.addf %14, %18 : vector<128x8xf32>
    %c0_28 = arith.constant 0 : index
    %c1 = arith.constant 1 : index
    %c0_29 = arith.constant 0 : index
    %20 = vector.load %arg13[%c0_28, %c1, %c0_29] : memref<20x20x4xf32, #tpu.memory_space<vmem>>, vector<8x16x4xf32>
    %21 = vector.shape_cast %20 : vector<8x16x4xf32> to vector<128x4xf32>
    %c4 = arith.constant 4 : index
    %c0_30 = arith.constant 0 : index
    %22 = vector.load %arg2[%c4, %c0_30] : memref<100x8xf32, #tpu.memory_space<vmem>>, vector<4x8xf32>
    %cst_31 = arith.constant dense<0.000000e+00> : vector<128x8xf32>
    %23 = tpu.matmul %21, %22, %cst_31 {dimension_numbers = #tpu.dot_dimension_numbers<[1], [0], [0], [1], [0, 0, 1, 1], [], []>} : vector<128x4xf32>, vector<4x8xf32>, vector<128x8xf32> -> vector<128x8xf32>
    %24 = arith.addf %19, %23 : vector<128x8xf32>
    %c0_32 = arith.constant 0 : index
    %c2_33 = arith.constant 2 : index
    %c0_34 = arith.constant 0 : index
    %25 = vector.load %arg13[%c0_32, %c2_33, %c0_34] : memref<20x20x4xf32, #tpu.memory_space<vmem>>, vector<8x16x4xf32>
    %26 = vector.shape_cast %25 : vector<8x16x4xf32> to vector<128x4xf32>
    %c8 = arith.constant 8 : index
    %c0_35 = arith.constant 0 : index
    %27 = vector.load %arg2[%c8, %c0_35] : memref<100x8xf32, #tpu.memory_space<vmem>>, vector<4x8xf32>
    %cst_36 = arith.constant dense<0.000000e+00> : vector<128x8xf32>
    %28 = tpu.matmul %26, %27, %cst_36 {dimension_numbers = #tpu.dot_dimension_numbers<[1], [0], [0], [1], [0, 0, 1, 1], [], []>} : vector<128x4xf32>, vector<4x8xf32>, vector<128x8xf32> -> vector<128x8xf32>
    %29 = arith.addf %24, %28 : vector<128x8xf32>
    %c0_37 = arith.constant 0 : index
    %c3 = arith.constant 3 : index
    %c0_38 = arith.constant 0 : index
    %30 = vector.load %arg13[%c0_37, %c3, %c0_38] : memref<20x20x4xf32, #tpu.memory_space<vmem>>, vector<8x16x4xf32>
    %31 = vector.shape_cast %30 : vector<8x16x4xf32> to vector<128x4xf32>
    %c12 = arith.constant 12 : index
    %c0_39 = arith.constant 0 : index
    %32 = vector.load %arg2[%c12, %c0_39] : memref<100x8xf32, #tpu.memory_space<vmem>>, vector<4x8xf32>
    %cst_40 = arith.constant dense<0.000000e+00> : vector<128x8xf32>
    %33 = tpu.matmul %31, %32, %cst_40 {dimension_numbers = #tpu.dot_dimension_numbers<[1], [0], [0], [1], [0, 0, 1, 1], [], []>} : vector<128x4xf32>, vector<4x8xf32>, vector<128x8xf32> -> vector<128x8xf32>
    %34 = arith.addf %29, %33 : vector<128x8xf32>
    %c0_41 = arith.constant 0 : index
    %c4_42 = arith.constant 4 : index
    %c0_43 = arith.constant 0 : index
    %35 = vector.load %arg13[%c0_41, %c4_42, %c0_43] : memref<20x20x4xf32, #tpu.memory_space<vmem>>, vector<8x16x4xf32>
    %36 = vector.shape_cast %35 : vector<8x16x4xf32> to vector<128x4xf32>
    %c16 = arith.constant 16 : index
    %c0_44 = arith.constant 0 : index
    %37 = vector.load %arg2[%c16, %c0_44] : memref<100x8xf32, #tpu.memory_space<vmem>>, vector<4x8xf32>
    %cst_45 = arith.constant dense<0.000000e+00> : vector<128x8xf32>
    %38 = tpu.matmul %36, %37, %cst_45 {dimension_numbers = #tpu.dot_dimension_numbers<[1], [0], [0], [1], [0, 0, 1, 1], [], []>} : vector<128x4xf32>, vector<4x8xf32>, vector<128x8xf32> -> vector<128x8xf32>
    %39 = arith.addf %34, %38 : vector<128x8xf32>
    %c1_46 = arith.constant 1 : index
    %c0_47 = arith.constant 0 : index
    %c0_48 = arith.constant 0 : index
    %40 = vector.load %arg13[%c1_46, %c0_47, %c0_48] : memref<20x20x4xf32, #tpu.memory_space<vmem>>, vector<8x16x4xf32>
    %41 = vector.shape_cast %40 : vector<8x16x4xf32> to vector<128x4xf32>
    %c20 = arith.constant 20 : index
    %c0_49 = arith.constant 0 : index
    %42 = vector.load %arg2[%c20, %c0_49] : memref<100x8xf32, #tpu.memory_space<vmem>>, vector<4x8xf32>
    %cst_50 = arith.constant dense<0.000000e+00> : vector<128x8xf32>
    %43 = tpu.matmul %41, %42, %cst_50 {dimension_numbers = #tpu.dot_dimension_numbers<[1], [0], [0], [1], [0, 0, 1, 1], [], []>} : vector<128x4xf32>, vector<4x8xf32>, vector<128x8xf32> -> vector<128x8xf32>
    %44 = arith.addf %39, %43 : vector<128x8xf32>
    %c1_51 = arith.constant 1 : index
    %c1_52 = arith.constant 1 : index
    %c0_53 = arith.constant 0 : index
    %45 = vector.load %arg13[%c1_51, %c1_52, %c0_53] : memref<20x20x4xf32, #tpu.memory_space<vmem>>, vector<8x16x4xf32>
    %46 = vector.shape_cast %45 : vector<8x16x4xf32> to vector<128x4xf32>
    %c24 = arith.constant 24 : index
    %c0_54 = arith.constant 0 : index
    %47 = vector.load %arg2[%c24, %c0_54] : memref<100x8xf32, #tpu.memory_space<vmem>>, vector<4x8xf32>
    %cst_55 = arith.constant dense<0.000000e+00> : vector<128x8xf32>
    %48 = tpu.matmul %46, %47, %cst_55 {dimension_numbers = #tpu.dot_dimension_numbers<[1], [0], [0], [1], [0, 0, 1, 1], [], []>} : vector<128x4xf32>, vector<4x8xf32>, vector<128x8xf32> -> vector<128x8xf32>
    %49 = arith.addf %44, %48 : vector<128x8xf32>
    %c1_56 = arith.constant 1 : index
    %c2_57 = arith.constant 2 : index
    %c0_58 = arith.constant 0 : index
    %50 = vector.load %arg13[%c1_56, %c2_57, %c0_58] : memref<20x20x4xf32, #tpu.memory_space<vmem>>, vector<8x16x4xf32>
    %51 = vector.shape_cast %50 : vector<8x16x4xf32> to vector<128x4xf32>
    %c28 = arith.constant 28 : index
    %c0_59 = arith.constant 0 : index
    %52 = vector.load %arg2[%c28, %c0_59] : memref<100x8xf32, #tpu.memory_space<vmem>>, vector<4x8xf32>
    %cst_60 = arith.constant dense<0.000000e+00> : vector<128x8xf32>
    %53 = tpu.matmul %51, %52, %cst_60 {dimension_numbers = #tpu.dot_dimension_numbers<[1], [0], [0], [1], [0, 0, 1, 1], [], []>} : vector<128x4xf32>, vector<4x8xf32>, vector<128x8xf32> -> vector<128x8xf32>
    %54 = arith.addf %49, %53 : vector<128x8xf32>
    %c1_61 = arith.constant 1 : index
    %c3_62 = arith.constant 3 : index
    %c0_63 = arith.constant 0 : index
    %55 = vector.load %arg13[%c1_61, %c3_62, %c0_63] : memref<20x20x4xf32, #tpu.memory_space<vmem>>, vector<8x16x4xf32>
    %56 = vector.shape_cast %55 : vector<8x16x4xf32> to vector<128x4xf32>
    %c32 = arith.constant 32 : index
    %c0_64 = arith.constant 0 : index
    %57 = vector.load %arg2[%c32, %c0_64] : memref<100x8xf32, #tpu.memory_space<vmem>>, vector<4x8xf32>
    %cst_65 = arith.constant dense<0.000000e+00> : vector<128x8xf32>
    %58 = tpu.matmul %56, %57, %cst_65 {dimension_numbers = #tpu.dot_dimension_numbers<[1], [0], [0], [1], [0, 0, 1, 1], [], []>} : vector<128x4xf32>, vector<4x8xf32>, vector<128x8xf32> -> vector<128x8xf32>
    %59 = arith.addf %54, %58 : vector<128x8xf32>
    %c1_66 = arith.constant 1 : index
    %c4_67 = arith.constant 4 : index
    %c0_68 = arith.constant 0 : index
    %60 = vector.load %arg13[%c1_66, %c4_67, %c0_68] : memref<20x20x4xf32, #tpu.memory_space<vmem>>, vector<8x16x4xf32>
    %61 = vector.shape_cast %60 : vector<8x16x4xf32> to vector<128x4xf32>
    %c36 = arith.constant 36 : index
    %c0_69 = arith.constant 0 : index
    %62 = vector.load %arg2[%c36, %c0_69] : memref<100x8xf32, #tpu.memory_space<vmem>>, vector<4x8xf32>
    %cst_70 = arith.constant dense<0.000000e+00> : vector<128x8xf32>
    %63 = tpu.matmul %61, %62, %cst_70 {dimension_numbers = #tpu.dot_dimension_numbers<[1], [0], [0], [1], [0, 0, 1, 1], [], []>} : vector<128x4xf32>, vector<4x8xf32>, vector<128x8xf32> -> vector<128x8xf32>
    %64 = arith.addf %59, %63 : vector<128x8xf32>
    %c2_71 = arith.constant 2 : index
    %c0_72 = arith.constant 0 : index
    %c0_73 = arith.constant 0 : index
    %65 = vector.load %arg13[%c2_71, %c0_72, %c0_73] : memref<20x20x4xf32, #tpu.memory_space<vmem>>, vector<8x16x4xf32>
    %66 = vector.shape_cast %65 : vector<8x16x4xf32> to vector<128x4xf32>
    %c40 = arith.constant 40 : index
    %c0_74 = arith.constant 0 : index
    %67 = vector.load %arg2[%c40, %c0_74] : memref<100x8xf32, #tpu.memory_space<vmem>>, vector<4x8xf32>
    %cst_75 = arith.constant dense<0.000000e+00> : vector<128x8xf32>
    %68 = tpu.matmul %66, %67, %cst_75 {dimension_numbers = #tpu.dot_dimension_numbers<[1], [0], [0], [1], [0, 0, 1, 1], [], []>} : vector<128x4xf32>, vector<4x8xf32>, vector<128x8xf32> -> vector<128x8xf32>
    %69 = arith.addf %64, %68 : vector<128x8xf32>
    %c2_76 = arith.constant 2 : index
    %c1_77 = arith.constant 1 : index
    %c0_78 = arith.constant 0 : index
    %70 = vector.load %arg13[%c2_76, %c1_77, %c0_78] : memref<20x20x4xf32, #tpu.memory_space<vmem>>, vector<8x16x4xf32>
    %71 = vector.shape_cast %70 : vector<8x16x4xf32> to vector<128x4xf32>
    %c44 = arith.constant 44 : index
    %c0_79 = arith.constant 0 : index
    %72 = vector.load %arg2[%c44, %c0_79] : memref<100x8xf32, #tpu.memory_space<vmem>>, vector<4x8xf32>
    %cst_80 = arith.constant dense<0.000000e+00> : vector<128x8xf32>
    %73 = tpu.matmul %71, %72, %cst_80 {dimension_numbers = #tpu.dot_dimension_numbers<[1], [0], [0], [1], [0, 0, 1, 1], [], []>} : vector<128x4xf32>, vector<4x8xf32>, vector<128x8xf32> -> vector<128x8xf32>
    %74 = arith.addf %69, %73 : vector<128x8xf32>
    %c2_81 = arith.constant 2 : index
    %c2_82 = arith.constant 2 : index
    %c0_83 = arith.constant 0 : index
    %75 = vector.load %arg13[%c2_81, %c2_82, %c0_83] : memref<20x20x4xf32, #tpu.memory_space<vmem>>, vector<8x16x4xf32>
    %76 = vector.shape_cast %75 : vector<8x16x4xf32> to vector<128x4xf32>
    %c48 = arith.constant 48 : index
    %c0_84 = arith.constant 0 : index
    %77 = vector.load %arg2[%c48, %c0_84] : memref<100x8xf32, #tpu.memory_space<vmem>>, vector<4x8xf32>
    %cst_85 = arith.constant dense<0.000000e+00> : vector<128x8xf32>
    %78 = tpu.matmul %76, %77, %cst_85 {dimension_numbers = #tpu.dot_dimension_numbers<[1], [0], [0], [1], [0, 0, 1, 1], [], []>} : vector<128x4xf32>, vector<4x8xf32>, vector<128x8xf32> -> vector<128x8xf32>
    %79 = arith.addf %74, %78 : vector<128x8xf32>
    %c2_86 = arith.constant 2 : index
    %c3_87 = arith.constant 3 : index
    %c0_88 = arith.constant 0 : index
    %80 = vector.load %arg13[%c2_86, %c3_87, %c0_88] : memref<20x20x4xf32, #tpu.memory_space<vmem>>, vector<8x16x4xf32>
    %81 = vector.shape_cast %80 : vector<8x16x4xf32> to vector<128x4xf32>
    %c52 = arith.constant 52 : index
    %c0_89 = arith.constant 0 : index
    %82 = vector.load %arg2[%c52, %c0_89] : memref<100x8xf32, #tpu.memory_space<vmem>>, vector<4x8xf32>
    %cst_90 = arith.constant dense<0.000000e+00> : vector<128x8xf32>
    %83 = tpu.matmul %81, %82, %cst_90 {dimension_numbers = #tpu.dot_dimension_numbers<[1], [0], [0], [1], [0, 0, 1, 1], [], []>} : vector<128x4xf32>, vector<4x8xf32>, vector<128x8xf32> -> vector<128x8xf32>
    %84 = arith.addf %79, %83 : vector<128x8xf32>
    %c2_91 = arith.constant 2 : index
    %c4_92 = arith.constant 4 : index
    %c0_93 = arith.constant 0 : index
    %85 = vector.load %arg13[%c2_91, %c4_92, %c0_93] : memref<20x20x4xf32, #tpu.memory_space<vmem>>, vector<8x16x4xf32>
    %86 = vector.shape_cast %85 : vector<8x16x4xf32> to vector<128x4xf32>
    %c56 = arith.constant 56 : index
    %c0_94 = arith.constant 0 : index
    %87 = vector.load %arg2[%c56, %c0_94] : memref<100x8xf32, #tpu.memory_space<vmem>>, vector<4x8xf32>
    %cst_95 = arith.constant dense<0.000000e+00> : vector<128x8xf32>
    %88 = tpu.matmul %86, %87, %cst_95 {dimension_numbers = #tpu.dot_dimension_numbers<[1], [0], [0], [1], [0, 0, 1, 1], [], []>} : vector<128x4xf32>, vector<4x8xf32>, vector<128x8xf32> -> vector<128x8xf32>
    %89 = arith.addf %84, %88 : vector<128x8xf32>
    %c3_96 = arith.constant 3 : index
    %c0_97 = arith.constant 0 : index
    %c0_98 = arith.constant 0 : index
    %90 = vector.load %arg13[%c3_96, %c0_97, %c0_98] : memref<20x20x4xf32, #tpu.memory_space<vmem>>, vector<8x16x4xf32>
    %91 = vector.shape_cast %90 : vector<8x16x4xf32> to vector<128x4xf32>
    %c60 = arith.constant 60 : index
    %c0_99 = arith.constant 0 : index
    %92 = vector.load %arg2[%c60, %c0_99] : memref<100x8xf32, #tpu.memory_space<vmem>>, vector<4x8xf32>
    %cst_100 = arith.constant dense<0.000000e+00> : vector<128x8xf32>
    %93 = tpu.matmul %91, %92, %cst_100 {dimension_numbers = #tpu.dot_dimension_numbers<[1], [0], [0], [1], [0, 0, 1, 1], [], []>} : vector<128x4xf32>, vector<4x8xf32>, vector<128x8xf32> -> vector<128x8xf32>
    %94 = arith.addf %89, %93 : vector<128x8xf32>
    %c3_101 = arith.constant 3 : index
    %c1_102 = arith.constant 1 : index
    %c0_103 = arith.constant 0 : index
    %95 = vector.load %arg13[%c3_101, %c1_102, %c0_103] : memref<20x20x4xf32, #tpu.memory_space<vmem>>, vector<8x16x4xf32>
    %96 = vector.shape_cast %95 : vector<8x16x4xf32> to vector<128x4xf32>
    %c64 = arith.constant 64 : index
    %c0_104 = arith.constant 0 : index
    %97 = vector.load %arg2[%c64, %c0_104] : memref<100x8xf32, #tpu.memory_space<vmem>>, vector<4x8xf32>
    %cst_105 = arith.constant dense<0.000000e+00> : vector<128x8xf32>
    %98 = tpu.matmul %96, %97, %cst_105 {dimension_numbers = #tpu.dot_dimension_numbers<[1], [0], [0], [1], [0, 0, 1, 1], [], []>} : vector<128x4xf32>, vector<4x8xf32>, vector<128x8xf32> -> vector<128x8xf32>
    %99 = arith.addf %94, %98 : vector<128x8xf32>
    %c3_106 = arith.constant 3 : index
    %c2_107 = arith.constant 2 : index
    %c0_108 = arith.constant 0 : index
    %100 = vector.load %arg13[%c3_106, %c2_107, %c0_108] : memref<20x20x4xf32, #tpu.memory_space<vmem>>, vector<8x16x4xf32>
    %101 = vector.shape_cast %100 : vector<8x16x4xf32> to vector<128x4xf32>
    %c68 = arith.constant 68 : index
    %c0_109 = arith.constant 0 : index
    %102 = vector.load %arg2[%c68, %c0_109] : memref<100x8xf32, #tpu.memory_space<vmem>>, vector<4x8xf32>
    %cst_110 = arith.constant dense<0.000000e+00> : vector<128x8xf32>
    %103 = tpu.matmul %101, %102, %cst_110 {dimension_numbers = #tpu.dot_dimension_numbers<[1], [0], [0], [1], [0, 0, 1, 1], [], []>} : vector<128x4xf32>, vector<4x8xf32>, vector<128x8xf32> -> vector<128x8xf32>
    %104 = arith.addf %99, %103 : vector<128x8xf32>
    %c3_111 = arith.constant 3 : index
    %c3_112 = arith.constant 3 : index
    %c0_113 = arith.constant 0 : index
    %105 = vector.load %arg13[%c3_111, %c3_112, %c0_113] : memref<20x20x4xf32, #tpu.memory_space<vmem>>, vector<8x16x4xf32>
    %106 = vector.shape_cast %105 : vector<8x16x4xf32> to vector<128x4xf32>
    %c72 = arith.constant 72 : index
    %c0_114 = arith.constant 0 : index
    %107 = vector.load %arg2[%c72, %c0_114] : memref<100x8xf32, #tpu.memory_space<vmem>>, vector<4x8xf32>
    %cst_115 = arith.constant dense<0.000000e+00> : vector<128x8xf32>
    %108 = tpu.matmul %106, %107, %cst_115 {dimension_numbers = #tpu.dot_dimension_numbers<[1], [0], [0], [1], [0, 0, 1, 1], [], []>} : vector<128x4xf32>, vector<4x8xf32>, vector<128x8xf32> -> vector<128x8xf32>
    %109 = arith.addf %104, %108 : vector<128x8xf32>
    %c3_116 = arith.constant 3 : index
    %c4_117 = arith.constant 4 : index
    %c0_118 = arith.constant 0 : index
    %110 = vector.load %arg13[%c3_116, %c4_117, %c0_118] : memref<20x20x4xf32, #tpu.memory_space<vmem>>, vector<8x16x4xf32>
    %111 = vector.shape_cast %110 : vector<8x16x4xf32> to vector<128x4xf32>
    %c76 = arith.constant 76 : index
    %c0_119 = arith.constant 0 : index
    %112 = vector.load %arg2[%c76, %c0_119] : memref<100x8xf32, #tpu.memory_space<vmem>>, vector<4x8xf32>
    %cst_120 = arith.constant dense<0.000000e+00> : vector<128x8xf32>
    %113 = tpu.matmul %111, %112, %cst_120 {dimension_numbers = #tpu.dot_dimension_numbers<[1], [0], [0], [1], [0, 0, 1, 1], [], []>} : vector<128x4xf32>, vector<4x8xf32>, vector<128x8xf32> -> vector<128x8xf32>
    %114 = arith.addf %109, %113 : vector<128x8xf32>
    %c4_121 = arith.constant 4 : index
    %c0_122 = arith.constant 0 : index
    %c0_123 = arith.constant 0 : index
    %115 = vector.load %arg13[%c4_121, %c0_122, %c0_123] : memref<20x20x4xf32, #tpu.memory_space<vmem>>, vector<8x16x4xf32>
    %116 = vector.shape_cast %115 : vector<8x16x4xf32> to vector<128x4xf32>
    %c80 = arith.constant 80 : index
    %c0_124 = arith.constant 0 : index
    %117 = vector.load %arg2[%c80, %c0_124] : memref<100x8xf32, #tpu.memory_space<vmem>>, vector<4x8xf32>
    %cst_125 = arith.constant dense<0.000000e+00> : vector<128x8xf32>
    %118 = tpu.matmul %116, %117, %cst_125 {dimension_numbers = #tpu.dot_dimension_numbers<[1], [0], [0], [1], [0, 0, 1, 1], [], []>} : vector<128x4xf32>, vector<4x8xf32>, vector<128x8xf32> -> vector<128x8xf32>
    %119 = arith.addf %114, %118 : vector<128x8xf32>
    %c4_126 = arith.constant 4 : index
    %c1_127 = arith.constant 1 : index
    %c0_128 = arith.constant 0 : index
    %120 = vector.load %arg13[%c4_126, %c1_127, %c0_128] : memref<20x20x4xf32, #tpu.memory_space<vmem>>, vector<8x16x4xf32>
    %121 = vector.shape_cast %120 : vector<8x16x4xf32> to vector<128x4xf32>
    %c84 = arith.constant 84 : index
    %c0_129 = arith.constant 0 : index
    %122 = vector.load %arg2[%c84, %c0_129] : memref<100x8xf32, #tpu.memory_space<vmem>>, vector<4x8xf32>
    %cst_130 = arith.constant dense<0.000000e+00> : vector<128x8xf32>
    %123 = tpu.matmul %121, %122, %cst_130 {dimension_numbers = #tpu.dot_dimension_numbers<[1], [0], [0], [1], [0, 0, 1, 1], [], []>} : vector<128x4xf32>, vector<4x8xf32>, vector<128x8xf32> -> vector<128x8xf32>
    %124 = arith.addf %119, %123 : vector<128x8xf32>
    %c4_131 = arith.constant 4 : index
    %c2_132 = arith.constant 2 : index
    %c0_133 = arith.constant 0 : index
    %125 = vector.load %arg13[%c4_131, %c2_132, %c0_133] : memref<20x20x4xf32, #tpu.memory_space<vmem>>, vector<8x16x4xf32>
    %126 = vector.shape_cast %125 : vector<8x16x4xf32> to vector<128x4xf32>
    %c88 = arith.constant 88 : index
    %c0_134 = arith.constant 0 : index
    %127 = vector.load %arg2[%c88, %c0_134] : memref<100x8xf32, #tpu.memory_space<vmem>>, vector<4x8xf32>
    %cst_135 = arith.constant dense<0.000000e+00> : vector<128x8xf32>
    %128 = tpu.matmul %126, %127, %cst_135 {dimension_numbers = #tpu.dot_dimension_numbers<[1], [0], [0], [1], [0, 0, 1, 1], [], []>} : vector<128x4xf32>, vector<4x8xf32>, vector<128x8xf32> -> vector<128x8xf32>
    %129 = arith.addf %124, %128 : vector<128x8xf32>
    %c4_136 = arith.constant 4 : index
    %c3_137 = arith.constant 3 : index
    %c0_138 = arith.constant 0 : index
    %130 = vector.load %arg13[%c4_136, %c3_137, %c0_138] : memref<20x20x4xf32, #tpu.memory_space<vmem>>, vector<8x16x4xf32>
    %131 = vector.shape_cast %130 : vector<8x16x4xf32> to vector<128x4xf32>
    %c92 = arith.constant 92 : index
    %c0_139 = arith.constant 0 : index
    %132 = vector.load %arg2[%c92, %c0_139] : memref<100x8xf32, #tpu.memory_space<vmem>>, vector<4x8xf32>
    %cst_140 = arith.constant dense<0.000000e+00> : vector<128x8xf32>
    %133 = tpu.matmul %131, %132, %cst_140 {dimension_numbers = #tpu.dot_dimension_numbers<[1], [0], [0], [1], [0, 0, 1, 1], [], []>} : vector<128x4xf32>, vector<4x8xf32>, vector<128x8xf32> -> vector<128x8xf32>
    %134 = arith.addf %129, %133 : vector<128x8xf32>
    %c4_141 = arith.constant 4 : index
    %c4_142 = arith.constant 4 : index
    %c0_143 = arith.constant 0 : index
    %135 = vector.load %arg13[%c4_141, %c4_142, %c0_143] : memref<20x20x4xf32, #tpu.memory_space<vmem>>, vector<8x16x4xf32>
    %136 = vector.shape_cast %135 : vector<8x16x4xf32> to vector<128x4xf32>
    %c96 = arith.constant 96 : index
    %c0_144 = arith.constant 0 : index
    %137 = vector.load %arg2[%c96, %c0_144] : memref<100x8xf32, #tpu.memory_space<vmem>>, vector<4x8xf32>
    %cst_145 = arith.constant dense<0.000000e+00> : vector<128x8xf32>
    %138 = tpu.matmul %136, %137, %cst_145 {dimension_numbers = #tpu.dot_dimension_numbers<[1], [0], [0], [1], [0, 0, 1, 1], [], []>} : vector<128x4xf32>, vector<4x8xf32>, vector<128x8xf32> -> vector<128x8xf32>
    %139 = arith.addf %134, %138 : vector<128x8xf32>
    %cst_146 = arith.constant 0.000000e+00 : f32
    %140 = vector.broadcast %cst_146 : f32 to vector<128x8xf32>
    %141 = arith.maximumf %139, %140 : vector<128x8xf32>
    %142 = vector.shape_cast %141 : vector<128x8xf32> to vector<8x16x8xf32>
    %c0_147 = arith.constant 0 : index
    %c0_148 = arith.constant 0 : index
    %c0_149 = arith.constant 0 : index
    %143 = vector.load %arg14[%c0_147, %c0_148, %c0_149] : memref<16x16x8xf32, #tpu.memory_space<vmem>>, vector<8x16x8xf32>
    tpu.vector_store %arg14[%c0_147, %c0_148, %c0_149], %142 {strides = array<i32>} : memref<16x16x8xf32, #tpu.memory_space<vmem>>, vector<8x16x8xf32>,
    %cst_150 = arith.constant 0.000000e+00 : f32
    %144 = vector.broadcast %cst_150 : f32 to vector<128x8xf32>
    %c0_151 = arith.constant 0 : index
    %c0_152 = arith.constant 0 : index
    %145 = vector.load %arg3[%c0_151, %c0_152] : memref<1x8xf32, #tpu.memory_space<vmem>>, vector<1x8xf32>
    %146 = vector.broadcast %145 : vector<1x8xf32> to vector<128x8xf32>
    %147 = arith.addf %144, %146 : vector<128x8xf32>
    %c8_153 = arith.constant 8 : index
    %c0_154 = arith.constant 0 : index
    %c0_155 = arith.constant 0 : index
    %148 = vector.load %arg13[%c8_153, %c0_154, %c0_155] : memref<20x20x4xf32, #tpu.memory_space<vmem>>, vector<8x16x4xf32>
    %149 = vector.shape_cast %148 : vector<8x16x4xf32> to vector<128x4xf32>
    %c0_156 = arith.constant 0 : index
    %c0_157 = arith.constant 0 : index
    %150 = vector.load %arg2[%c0_156, %c0_157] : memref<100x8xf32, #tpu.memory_space<vmem>>, vector<4x8xf32>
    %cst_158 = arith.constant dense<0.000000e+00> : vector<128x8xf32>
    %151 = tpu.matmul %149, %150, %cst_158 {dimension_numbers = #tpu.dot_dimension_numbers<[1], [0], [0], [1], [0, 0, 1, 1], [], []>} : vector<128x4xf32>, vector<4x8xf32>, vector<128x8xf32> -> vector<128x8xf32>
    %152 = arith.addf %147, %151 : vector<128x8xf32>
    %c8_159 = arith.constant 8 : index
    %c1_160 = arith.constant 1 : index
    %c0_161 = arith.constant 0 : index
    %153 = vector.load %arg13[%c8_159, %c1_160, %c0_161] : memref<20x20x4xf32, #tpu.memory_space<vmem>>, vector<8x16x4xf32>
    %154 = vector.shape_cast %153 : vector<8x16x4xf32> to vector<128x4xf32>
    %c4_162 = arith.constant 4 : index
    %c0_163 = arith.constant 0 : index
    %155 = vector.load %arg2[%c4_162, %c0_163] : memref<100x8xf32, #tpu.memory_space<vmem>>, vector<4x8xf32>
    %cst_164 = arith.constant dense<0.000000e+00> : vector<128x8xf32>
    %156 = tpu.matmul %154, %155, %cst_164 {dimension_numbers = #tpu.dot_dimension_numbers<[1], [0], [0], [1], [0, 0, 1, 1], [], []>} : vector<128x4xf32>, vector<4x8xf32>, vector<128x8xf32> -> vector<128x8xf32>
    %157 = arith.addf %152, %156 : vector<128x8xf32>
    %c8_165 = arith.constant 8 : index
    %c2_166 = arith.constant 2 : index
    %c0_167 = arith.constant 0 : index
    %158 = vector.load %arg13[%c8_165, %c2_166, %c0_167] : memref<20x20x4xf32, #tpu.memory_space<vmem>>, vector<8x16x4xf32>
    %159 = vector.shape_cast %158 : vector<8x16x4xf32> to vector<128x4xf32>
    %c8_168 = arith.constant 8 : index
    %c0_169 = arith.constant 0 : index
    %160 = vector.load %arg2[%c8_168, %c0_169] : memref<100x8xf32, #tpu.memory_space<vmem>>, vector<4x8xf32>
    %cst_170 = arith.constant dense<0.000000e+00> : vector<128x8xf32>
    %161 = tpu.matmul %159, %160, %cst_170 {dimension_numbers = #tpu.dot_dimension_numbers<[1], [0], [0], [1], [0, 0, 1, 1], [], []>} : vector<128x4xf32>, vector<4x8xf32>, vector<128x8xf32> -> vector<128x8xf32>
    %162 = arith.addf %157, %161 : vector<128x8xf32>
    %c8_171 = arith.constant 8 : index
    %c3_172 = arith.constant 3 : index
    %c0_173 = arith.constant 0 : index
    %163 = vector.load %arg13[%c8_171, %c3_172, %c0_173] : memref<20x20x4xf32, #tpu.memory_space<vmem>>, vector<8x16x4xf32>
    %164 = vector.shape_cast %163 : vector<8x16x4xf32> to vector<128x4xf32>
    %c12_174 = arith.constant 12 : index
    %c0_175 = arith.constant 0 : index
    %165 = vector.load %arg2[%c12_174, %c0_175] : memref<100x8xf32, #tpu.memory_space<vmem>>, vector<4x8xf32>
    %cst_176 = arith.constant dense<0.000000e+00> : vector<128x8xf32>
    %166 = tpu.matmul %164, %165, %cst_176 {dimension_numbers = #tpu.dot_dimension_numbers<[1], [0], [0], [1], [0, 0, 1, 1], [], []>} : vector<128x4xf32>, vector<4x8xf32>, vector<128x8xf32> -> vector<128x8xf32>
    %167 = arith.addf %162, %166 : vector<128x8xf32>
    %c8_177 = arith.constant 8 : index
    %c4_178 = arith.constant 4 : index
    %c0_179 = arith.constant 0 : index
    %168 = vector.load %arg13[%c8_177, %c4_178, %c0_179] : memref<20x20x4xf32, #tpu.memory_space<vmem>>, vector<8x16x4xf32>
    %169 = vector.shape_cast %168 : vector<8x16x4xf32> to vector<128x4xf32>
    %c16_180 = arith.constant 16 : index
    %c0_181 = arith.constant 0 : index
    %170 = vector.load %arg2[%c16_180, %c0_181] : memref<100x8xf32, #tpu.memory_space<vmem>>, vector<4x8xf32>
    %cst_182 = arith.constant dense<0.000000e+00> : vector<128x8xf32>
    %171 = tpu.matmul %169, %170, %cst_182 {dimension_numbers = #tpu.dot_dimension_numbers<[1], [0], [0], [1], [0, 0, 1, 1], [], []>} : vector<128x4xf32>, vector<4x8xf32>, vector<128x8xf32> -> vector<128x8xf32>
    %172 = arith.addf %167, %171 : vector<128x8xf32>
    %c9 = arith.constant 9 : index
    %c0_183 = arith.constant 0 : index
    %c0_184 = arith.constant 0 : index
    %173 = vector.load %arg13[%c9, %c0_183, %c0_184] : memref<20x20x4xf32, #tpu.memory_space<vmem>>, vector<8x16x4xf32>
    %174 = vector.shape_cast %173 : vector<8x16x4xf32> to vector<128x4xf32>
    %c20_185 = arith.constant 20 : index
    %c0_186 = arith.constant 0 : index
    %175 = vector.load %arg2[%c20_185, %c0_186] : memref<100x8xf32, #tpu.memory_space<vmem>>, vector<4x8xf32>
    %cst_187 = arith.constant dense<0.000000e+00> : vector<128x8xf32>
    %176 = tpu.matmul %174, %175, %cst_187 {dimension_numbers = #tpu.dot_dimension_numbers<[1], [0], [0], [1], [0, 0, 1, 1], [], []>} : vector<128x4xf32>, vector<4x8xf32>, vector<128x8xf32> -> vector<128x8xf32>
    %177 = arith.addf %172, %176 : vector<128x8xf32>
    %c9_188 = arith.constant 9 : index
    %c1_189 = arith.constant 1 : index
    %c0_190 = arith.constant 0 : index
    %178 = vector.load %arg13[%c9_188, %c1_189, %c0_190] : memref<20x20x4xf32, #tpu.memory_space<vmem>>, vector<8x16x4xf32>
    %179 = vector.shape_cast %178 : vector<8x16x4xf32> to vector<128x4xf32>
    %c24_191 = arith.constant 24 : index
    %c0_192 = arith.constant 0 : index
    %180 = vector.load %arg2[%c24_191, %c0_192] : memref<100x8xf32, #tpu.memory_space<vmem>>, vector<4x8xf32>
    %cst_193 = arith.constant dense<0.000000e+00> : vector<128x8xf32>
    %181 = tpu.matmul %179, %180, %cst_193 {dimension_numbers = #tpu.dot_dimension_numbers<[1], [0], [0], [1], [0, 0, 1, 1], [], []>} : vector<128x4xf32>, vector<4x8xf32>, vector<128x8xf32> -> vector<128x8xf32>
    %182 = arith.addf %177, %181 : vector<128x8xf32>
    %c9_194 = arith.constant 9 : index
    %c2_195 = arith.constant 2 : index
    %c0_196 = arith.constant 0 : index
    %183 = vector.load %arg13[%c9_194, %c2_195, %c0_196] : memref<20x20x4xf32, #tpu.memory_space<vmem>>, vector<8x16x4xf32>
    %184 = vector.shape_cast %183 : vector<8x16x4xf32> to vector<128x4xf32>
    %c28_197 = arith.constant 28 : index
    %c0_198 = arith.constant 0 : index
    %185 = vector.load %arg2[%c28_197, %c0_198] : memref<100x8xf32, #tpu.memory_space<vmem>>, vector<4x8xf32>
    %cst_199 = arith.constant dense<0.000000e+00> : vector<128x8xf32>
    %186 = tpu.matmul %184, %185, %cst_199 {dimension_numbers = #tpu.dot_dimension_numbers<[1], [0], [0], [1], [0, 0, 1, 1], [], []>} : vector<128x4xf32>, vector<4x8xf32>, vector<128x8xf32> -> vector<128x8xf32>
    %187 = arith.addf %182, %186 : vector<128x8xf32>
    %c9_200 = arith.constant 9 : index
    %c3_201 = arith.constant 3 : index
    %c0_202 = arith.constant 0 : index
    %188 = vector.load %arg13[%c9_200, %c3_201, %c0_202] : memref<20x20x4xf32, #tpu.memory_space<vmem>>, vector<8x16x4xf32>
    %189 = vector.shape_cast %188 : vector<8x16x4xf32> to vector<128x4xf32>
    %c32_203 = arith.constant 32 : index
    %c0_204 = arith.constant 0 : index
    %190 = vector.load %arg2[%c32_203, %c0_204] : memref<100x8xf32, #tpu.memory_space<vmem>>, vector<4x8xf32>
    %cst_205 = arith.constant dense<0.000000e+00> : vector<128x8xf32>
    %191 = tpu.matmul %189, %190, %cst_205 {dimension_numbers = #tpu.dot_dimension_numbers<[1], [0], [0], [1], [0, 0, 1, 1], [], []>} : vector<128x4xf32>, vector<4x8xf32>, vector<128x8xf32> -> vector<128x8xf32>
    %192 = arith.addf %187, %191 : vector<128x8xf32>
    %c9_206 = arith.constant 9 : index
    %c4_207 = arith.constant 4 : index
    %c0_208 = arith.constant 0 : index
    %193 = vector.load %arg13[%c9_206, %c4_207, %c0_208] : memref<20x20x4xf32, #tpu.memory_space<vmem>>, vector<8x16x4xf32>
    %194 = vector.shape_cast %193 : vector<8x16x4xf32> to vector<128x4xf32>
    %c36_209 = arith.constant 36 : index
    %c0_210 = arith.constant 0 : index
    %195 = vector.load %arg2[%c36_209, %c0_210] : memref<100x8xf32, #tpu.memory_space<vmem>>, vector<4x8xf32>
    %cst_211 = arith.constant dense<0.000000e+00> : vector<128x8xf32>
    %196 = tpu.matmul %194, %195, %cst_211 {dimension_numbers = #tpu.dot_dimension_numbers<[1], [0], [0], [1], [0, 0, 1, 1], [], []>} : vector<128x4xf32>, vector<4x8xf32>, vector<128x8xf32> -> vector<128x8xf32>
    %197 = arith.addf %192, %196 : vector<128x8xf32>
    %c10 = arith.constant 10 : index
    %c0_212 = arith.constant 0 : index
    %c0_213 = arith.constant 0 : index
    %198 = vector.load %arg13[%c10, %c0_212, %c0_213] : memref<20x20x4xf32, #tpu.memory_space<vmem>>, vector<8x16x4xf32>
    %199 = vector.shape_cast %198 : vector<8x16x4xf32> to vector<128x4xf32>
    %c40_214 = arith.constant 40 : index
    %c0_215 = arith.constant 0 : index
    %200 = vector.load %arg2[%c40_214, %c0_215] : memref<100x8xf32, #tpu.memory_space<vmem>>, vector<4x8xf32>
    %cst_216 = arith.constant dense<0.000000e+00> : vector<128x8xf32>
    %201 = tpu.matmul %199, %200, %cst_216 {dimension_numbers = #tpu.dot_dimension_numbers<[1], [0], [0], [1], [0, 0, 1, 1], [], []>} : vector<128x4xf32>, vector<4x8xf32>, vector<128x8xf32> -> vector<128x8xf32>
    %202 = arith.addf %197, %201 : vector<128x8xf32>
    %c10_217 = arith.constant 10 : index
    %c1_218 = arith.constant 1 : index
    %c0_219 = arith.constant 0 : index
    %203 = vector.load %arg13[%c10_217, %c1_218, %c0_219] : memref<20x20x4xf32, #tpu.memory_space<vmem>>, vector<8x16x4xf32>
    %204 = vector.shape_cast %203 : vector<8x16x4xf32> to vector<128x4xf32>
    %c44_220 = arith.constant 44 : index
    %c0_221 = arith.constant 0 : index
    %205 = vector.load %arg2[%c44_220, %c0_221] : memref<100x8xf32, #tpu.memory_space<vmem>>, vector<4x8xf32>
    %cst_222 = arith.constant dense<0.000000e+00> : vector<128x8xf32>
    %206 = tpu.matmul %204, %205, %cst_222 {dimension_numbers = #tpu.dot_dimension_numbers<[1], [0], [0], [1], [0, 0, 1, 1], [], []>} : vector<128x4xf32>, vector<4x8xf32>, vector<128x8xf32> -> vector<128x8xf32>
    %207 = arith.addf %202, %206 : vector<128x8xf32>
    %c10_223 = arith.constant 10 : index
    %c2_224 = arith.constant 2 : index
    %c0_225 = arith.constant 0 : index
    %208 = vector.load %arg13[%c10_223, %c2_224, %c0_225] : memref<20x20x4xf32, #tpu.memory_space<vmem>>, vector<8x16x4xf32>
    %209 = vector.shape_cast %208 : vector<8x16x4xf32> to vector<128x4xf32>
    %c48_226 = arith.constant 48 : index
    %c0_227 = arith.constant 0 : index
    %210 = vector.load %arg2[%c48_226, %c0_227] : memref<100x8xf32, #tpu.memory_space<vmem>>, vector<4x8xf32>
    %cst_228 = arith.constant dense<0.000000e+00> : vector<128x8xf32>
    %211 = tpu.matmul %209, %210, %cst_228 {dimension_numbers = #tpu.dot_dimension_numbers<[1], [0], [0], [1], [0, 0, 1, 1], [], []>} : vector<128x4xf32>, vector<4x8xf32>, vector<128x8xf32> -> vector<128x8xf32>
    %212 = arith.addf %207, %211 : vector<128x8xf32>
    %c10_229 = arith.constant 10 : index
    %c3_230 = arith.constant 3 : index
    %c0_231 = arith.constant 0 : index
    %213 = vector.load %arg13[%c10_229, %c3_230, %c0_231] : memref<20x20x4xf32, #tpu.memory_space<vmem>>, vector<8x16x4xf32>
    %214 = vector.shape_cast %213 : vector<8x16x4xf32> to vector<128x4xf32>
    %c52_232 = arith.constant 52 : index
    %c0_233 = arith.constant 0 : index
    %215 = vector.load %arg2[%c52_232, %c0_233] : memref<100x8xf32, #tpu.memory_space<vmem>>, vector<4x8xf32>
    %cst_234 = arith.constant dense<0.000000e+00> : vector<128x8xf32>
    %216 = tpu.matmul %214, %215, %cst_234 {dimension_numbers = #tpu.dot_dimension_numbers<[1], [0], [0], [1], [0, 0, 1, 1], [], []>} : vector<128x4xf32>, vector<4x8xf32>, vector<128x8xf32> -> vector<128x8xf32>
    %217 = arith.addf %212, %216 : vector<128x8xf32>
    %c10_235 = arith.constant 10 : index
    %c4_236 = arith.constant 4 : index
    %c0_237 = arith.constant 0 : index
    %218 = vector.load %arg13[%c10_235, %c4_236, %c0_237] : memref<20x20x4xf32, #tpu.memory_space<vmem>>, vector<8x16x4xf32>
    %219 = vector.shape_cast %218 : vector<8x16x4xf32> to vector<128x4xf32>
    %c56_238 = arith.constant 56 : index
    %c0_239 = arith.constant 0 : index
    %220 = vector.load %arg2[%c56_238, %c0_239] : memref<100x8xf32, #tpu.memory_space<vmem>>, vector<4x8xf32>
    %cst_240 = arith.constant dense<0.000000e+00> : vector<128x8xf32>
    %221 = tpu.matmul %219, %220, %cst_240 {dimension_numbers = #tpu.dot_dimension_numbers<[1], [0], [0], [1], [0, 0, 1, 1], [], []>} : vector<128x4xf32>, vector<4x8xf32>, vector<128x8xf32> -> vector<128x8xf32>
    %222 = arith.addf %217, %221 : vector<128x8xf32>
    %c11 = arith.constant 11 : index
    %c0_241 = arith.constant 0 : index
    %c0_242 = arith.constant 0 : index
    %223 = vector.load %arg13[%c11, %c0_241, %c0_242] : memref<20x20x4xf32, #tpu.memory_space<vmem>>, vector<8x16x4xf32>
    %224 = vector.shape_cast %223 : vector<8x16x4xf32> to vector<128x4xf32>
    %c60_243 = arith.constant 60 : index
    %c0_244 = arith.constant 0 : index
    %225 = vector.load %arg2[%c60_243, %c0_244] : memref<100x8xf32, #tpu.memory_space<vmem>>, vector<4x8xf32>
    %cst_245 = arith.constant dense<0.000000e+00> : vector<128x8xf32>
    %226 = tpu.matmul %224, %225, %cst_245 {dimension_numbers = #tpu.dot_dimension_numbers<[1], [0], [0], [1], [0, 0, 1, 1], [], []>} : vector<128x4xf32>, vector<4x8xf32>, vector<128x8xf32> -> vector<128x8xf32>
    %227 = arith.addf %222, %226 : vector<128x8xf32>
    %c11_246 = arith.constant 11 : index
    %c1_247 = arith.constant 1 : index
    %c0_248 = arith.constant 0 : index
    %228 = vector.load %arg13[%c11_246, %c1_247, %c0_248] : memref<20x20x4xf32, #tpu.memory_space<vmem>>, vector<8x16x4xf32>
    %229 = vector.shape_cast %228 : vector<8x16x4xf32> to vector<128x4xf32>
    %c64_249 = arith.constant 64 : index
    %c0_250 = arith.constant 0 : index
    %230 = vector.load %arg2[%c64_249, %c0_250] : memref<100x8xf32, #tpu.memory_space<vmem>>, vector<4x8xf32>
    %cst_251 = arith.constant dense<0.000000e+00> : vector<128x8xf32>
    %231 = tpu.matmul %229, %230, %cst_251 {dimension_numbers = #tpu.dot_dimension_numbers<[1], [0], [0], [1], [0, 0, 1, 1], [], []>} : vector<128x4xf32>, vector<4x8xf32>, vector<128x8xf32> -> vector<128x8xf32>
    %232 = arith.addf %227, %231 : vector<128x8xf32>
    %c11_252 = arith.constant 11 : index
    %c2_253 = arith.constant 2 : index
    %c0_254 = arith.constant 0 : index
    %233 = vector.load %arg13[%c11_252, %c2_253, %c0_254] : memref<20x20x4xf32, #tpu.memory_space<vmem>>, vector<8x16x4xf32>
    %234 = vector.shape_cast %233 : vector<8x16x4xf32> to vector<128x4xf32>
    %c68_255 = arith.constant 68 : index
    %c0_256 = arith.constant 0 : index
    %235 = vector.load %arg2[%c68_255, %c0_256] : memref<100x8xf32, #tpu.memory_space<vmem>>, vector<4x8xf32>
    %cst_257 = arith.constant dense<0.000000e+00> : vector<128x8xf32>
    %236 = tpu.matmul %234, %235, %cst_257 {dimension_numbers = #tpu.dot_dimension_numbers<[1], [0], [0], [1], [0, 0, 1, 1], [], []>} : vector<128x4xf32>, vector<4x8xf32>, vector<128x8xf32> -> vector<128x8xf32>
    %237 = arith.addf %232, %236 : vector<128x8xf32>
    %c11_258 = arith.constant 11 : index
    %c3_259 = arith.constant 3 : index
    %c0_260 = arith.constant 0 : index
    %238 = vector.load %arg13[%c11_258, %c3_259, %c0_260] : memref<20x20x4xf32, #tpu.memory_space<vmem>>, vector<8x16x4xf32>
    %239 = vector.shape_cast %238 : vector<8x16x4xf32> to vector<128x4xf32>
    %c72_261 = arith.constant 72 : index
    %c0_262 = arith.constant 0 : index
    %240 = vector.load %arg2[%c72_261, %c0_262] : memref<100x8xf32, #tpu.memory_space<vmem>>, vector<4x8xf32>
    %cst_263 = arith.constant dense<0.000000e+00> : vector<128x8xf32>
    %241 = tpu.matmul %239, %240, %cst_263 {dimension_numbers = #tpu.dot_dimension_numbers<[1], [0], [0], [1], [0, 0, 1, 1], [], []>} : vector<128x4xf32>, vector<4x8xf32>, vector<128x8xf32> -> vector<128x8xf32>
    %242 = arith.addf %237, %241 : vector<128x8xf32>
    %c11_264 = arith.constant 11 : index
    %c4_265 = arith.constant 4 : index
    %c0_266 = arith.constant 0 : index
    %243 = vector.load %arg13[%c11_264, %c4_265, %c0_266] : memref<20x20x4xf32, #tpu.memory_space<vmem>>, vector<8x16x4xf32>
    %244 = vector.shape_cast %243 : vector<8x16x4xf32> to vector<128x4xf32>
    %c76_267 = arith.constant 76 : index
    %c0_268 = arith.constant 0 : index
    %245 = vector.load %arg2[%c76_267, %c0_268] : memref<100x8xf32, #tpu.memory_space<vmem>>, vector<4x8xf32>
    %cst_269 = arith.constant dense<0.000000e+00> : vector<128x8xf32>
    %246 = tpu.matmul %244, %245, %cst_269 {dimension_numbers = #tpu.dot_dimension_numbers<[1], [0], [0], [1], [0, 0, 1, 1], [], []>} : vector<128x4xf32>, vector<4x8xf32>, vector<128x8xf32> -> vector<128x8xf32>
    %247 = arith.addf %242, %246 : vector<128x8xf32>
    %c12_270 = arith.constant 12 : index
    %c0_271 = arith.constant 0 : index
    %c0_272 = arith.constant 0 : index
    %248 = vector.load %arg13[%c12_270, %c0_271, %c0_272] : memref<20x20x4xf32, #tpu.memory_space<vmem>>, vector<8x16x4xf32>
    %249 = vector.shape_cast %248 : vector<8x16x4xf32> to vector<128x4xf32>
    %c80_273 = arith.constant 80 : index
    %c0_274 = arith.constant 0 : index
    %250 = vector.load %arg2[%c80_273, %c0_274] : memref<100x8xf32, #tpu.memory_space<vmem>>, vector<4x8xf32>
    %cst_275 = arith.constant dense<0.000000e+00> : vector<128x8xf32>
    %251 = tpu.matmul %249, %250, %cst_275 {dimension_numbers = #tpu.dot_dimension_numbers<[1], [0], [0], [1], [0, 0, 1, 1], [], []>} : vector<128x4xf32>, vector<4x8xf32>, vector<128x8xf32> -> vector<128x8xf32>
    %252 = arith.addf %247, %251 : vector<128x8xf32>
    %c12_276 = arith.constant 12 : index
    %c1_277 = arith.constant 1 : index
    %c0_278 = arith.constant 0 : index
    %253 = vector.load %arg13[%c12_276, %c1_277, %c0_278] : memref<20x20x4xf32, #tpu.memory_space<vmem>>, vector<8x16x4xf32>
    %254 = vector.shape_cast %253 : vector<8x16x4xf32> to vector<128x4xf32>
    %c84_279 = arith.constant 84 : index
    %c0_280 = arith.constant 0 : index
    %255 = vector.load %arg2[%c84_279, %c0_280] : memref<100x8xf32, #tpu.memory_space<vmem>>, vector<4x8xf32>
    %cst_281 = arith.constant dense<0.000000e+00> : vector<128x8xf32>
    %256 = tpu.matmul %254, %255, %cst_281 {dimension_numbers = #tpu.dot_dimension_numbers<[1], [0], [0], [1], [0, 0, 1, 1], [], []>} : vector<128x4xf32>, vector<4x8xf32>, vector<128x8xf32> -> vector<128x8xf32>
    %257 = arith.addf %252, %256 : vector<128x8xf32>
    %c12_282 = arith.constant 12 : index
    %c2_283 = arith.constant 2 : index
    %c0_284 = arith.constant 0 : index
    %258 = vector.load %arg13[%c12_282, %c2_283, %c0_284] : memref<20x20x4xf32, #tpu.memory_space<vmem>>, vector<8x16x4xf32>
    %259 = vector.shape_cast %258 : vector<8x16x4xf32> to vector<128x4xf32>
    %c88_285 = arith.constant 88 : index
    %c0_286 = arith.constant 0 : index
    %260 = vector.load %arg2[%c88_285, %c0_286] : memref<100x8xf32, #tpu.memory_space<vmem>>, vector<4x8xf32>
    %cst_287 = arith.constant dense<0.000000e+00> : vector<128x8xf32>
    %261 = tpu.matmul %259, %260, %cst_287 {dimension_numbers = #tpu.dot_dimension_numbers<[1], [0], [0], [1], [0, 0, 1, 1], [], []>} : vector<128x4xf32>, vector<4x8xf32>, vector<128x8xf32> -> vector<128x8xf32>
    %262 = arith.addf %257, %261 : vector<128x8xf32>
    %c12_288 = arith.constant 12 : index
    %c3_289 = arith.constant 3 : index
    %c0_290 = arith.constant 0 : index
    %263 = vector.load %arg13[%c12_288, %c3_289, %c0_290] : memref<20x20x4xf32, #tpu.memory_space<vmem>>, vector<8x16x4xf32>
    %264 = vector.shape_cast %263 : vector<8x16x4xf32> to vector<128x4xf32>
    %c92_291 = arith.constant 92 : index
    %c0_292 = arith.constant 0 : index
    %265 = vector.load %arg2[%c92_291, %c0_292] : memref<100x8xf32, #tpu.memory_space<vmem>>, vector<4x8xf32>
    %cst_293 = arith.constant dense<0.000000e+00> : vector<128x8xf32>
    %266 = tpu.matmul %264, %265, %cst_293 {dimension_numbers = #tpu.dot_dimension_numbers<[1], [0], [0], [1], [0, 0, 1, 1], [], []>} : vector<128x4xf32>, vector<4x8xf32>, vector<128x8xf32> -> vector<128x8xf32>
    %267 = arith.addf %262, %266 : vector<128x8xf32>
    %c12_294 = arith.constant 12 : index
    %c4_295 = arith.constant 4 : index
    %c0_296 = arith.constant 0 : index
    %268 = vector.load %arg13[%c12_294, %c4_295, %c0_296] : memref<20x20x4xf32, #tpu.memory_space<vmem>>, vector<8x16x4xf32>
    %269 = vector.shape_cast %268 : vector<8x16x4xf32> to vector<128x4xf32>
    %c96_297 = arith.constant 96 : index
    %c0_298 = arith.constant 0 : index
    %270 = vector.load %arg2[%c96_297, %c0_298] : memref<100x8xf32, #tpu.memory_space<vmem>>, vector<4x8xf32>
    %cst_299 = arith.constant dense<0.000000e+00> : vector<128x8xf32>
    %271 = tpu.matmul %269, %270, %cst_299 {dimension_numbers = #tpu.dot_dimension_numbers<[1], [0], [0], [1], [0, 0, 1, 1], [], []>} : vector<128x4xf32>, vector<4x8xf32>, vector<128x8xf32> -> vector<128x8xf32>
    %272 = arith.addf %267, %271 : vector<128x8xf32>
    %cst_300 = arith.constant 0.000000e+00 : f32
    %273 = vector.broadcast %cst_300 : f32 to vector<128x8xf32>
    %274 = arith.maximumf %272, %273 : vector<128x8xf32>
    %275 = vector.shape_cast %274 : vector<128x8xf32> to vector<8x16x8xf32>
    %c8_301 = arith.constant 8 : index
    %c0_302 = arith.constant 0 : index
    %c0_303 = arith.constant 0 : index
    %276 = vector.load %arg14[%c8_301, %c0_302, %c0_303] : memref<16x16x8xf32, #tpu.memory_space<vmem>>, vector<8x16x8xf32>
    tpu.vector_store %arg14[%c8_301, %c0_302, %c0_303], %275 {strides = array<i32>} : memref<16x16x8xf32, #tpu.memory_space<vmem>>, vector<8x16x8xf32>,
    %c0_304 = arith.constant 0 : index
    %c0_305 = arith.constant 0 : index
    %c0_306 = arith.constant 0 : index
    %277 = tpu.strided_load %arg14[%c0_304, %c0_305, %c0_306] {strides = array<i32: 1, 2, 1>} : memref<16x16x8xf32, #tpu.memory_space<vmem>>, vector<16x8x8xf32>
    %c0_307 = arith.constant 0 : index
    %c1_308 = arith.constant 1 : index
    %c0_309 = arith.constant 0 : index
    %278 = tpu.strided_load %arg14[%c0_307, %c1_308, %c0_309] {strides = array<i32: 1, 2, 1>} : memref<16x16x8xf32, #tpu.memory_space<vmem>>, vector<16x8x8xf32>
    %279 = arith.maximumf %277, %278 : vector<16x8x8xf32>
    %280 = vector.shape_cast %279 : vector<16x8x8xf32> to vector<8x2x8x8xf32>
    %281 = vector.extract_strided_slice %280 {offsets = [0, 0, 0, 0], sizes = [8, 1, 8, 8], strides = [1, 1, 1, 1]} : vector<8x2x8x8xf32> to vector<8x1x8x8xf32>
    %282 = vector.shape_cast %281 : vector<8x1x8x8xf32> to vector<8x8x8xf32>
    %283 = vector.extract_strided_slice %280 {offsets = [0, 1, 0, 0], sizes = [8, 1, 8, 8], strides = [1, 1, 1, 1]} : vector<8x2x8x8xf32> to vector<8x1x8x8xf32>
    %284 = vector.shape_cast %283 : vector<8x1x8x8xf32> to vector<8x8x8xf32>
    %285 = arith.maximumf %282, %284 : vector<8x8x8xf32>
    %cst_310 = arith.constant 0.000000e+00 : f32
    %286 = vector.broadcast %cst_310 : f32 to vector<2x12x8xf32>
    %c0_311 = arith.constant 0 : index
    %c0_312 = arith.constant 0 : index
    %c0_313 = arith.constant 0 : index
    %287 = vector.load %arg15[%c0_311, %c0_312, %c0_313] : memref<12x12x8xf32, #tpu.memory_space<vmem>>, vector<2x12x8xf32>
    tpu.vector_store %arg15[%c0_311, %c0_312, %c0_313], %286 {strides = array<i32>} : memref<12x12x8xf32, #tpu.memory_space<vmem>>, vector<2x12x8xf32>,
    %cst_314 = arith.constant 0.000000e+00 : f32
    %288 = vector.broadcast %cst_314 : f32 to vector<2x12x8xf32>
    %c10_315 = arith.constant 10 : index
    %c0_316 = arith.constant 0 : index
    %c0_317 = arith.constant 0 : index
    %289 = vector.load %arg15[%c10_315, %c0_316, %c0_317] : memref<12x12x8xf32, #tpu.memory_space<vmem>>, vector<2x12x8xf32>
    tpu.vector_store %arg15[%c10_315, %c0_316, %c0_317], %288 {strides = array<i32>} : memref<12x12x8xf32, #tpu.memory_space<vmem>>, vector<2x12x8xf32>,
    %cst_318 = arith.constant 0.000000e+00 : f32
    %290 = vector.broadcast %cst_318 : f32 to vector<12x2x8xf32>
    %c0_319 = arith.constant 0 : index
    %c0_320 = arith.constant 0 : index
    %c0_321 = arith.constant 0 : index
    %291 = vector.load %arg15[%c0_319, %c0_320, %c0_321] : memref<12x12x8xf32, #tpu.memory_space<vmem>>, vector<12x2x8xf32>
    tpu.vector_store %arg15[%c0_319, %c0_320, %c0_321], %290 {strides = array<i32>} : memref<12x12x8xf32, #tpu.memory_space<vmem>>, vector<12x2x8xf32>,
    %cst_322 = arith.constant 0.000000e+00 : f32
    %292 = vector.broadcast %cst_322 : f32 to vector<12x2x8xf32>
    %c0_323 = arith.constant 0 : index
    %c10_324 = arith.constant 10 : index
    %c0_325 = arith.constant 0 : index
    %293 = vector.load %arg15[%c0_323, %c10_324, %c0_325] : memref<12x12x8xf32, #tpu.memory_space<vmem>>, vector<12x2x8xf32>
    tpu.vector_store %arg15[%c0_323, %c10_324, %c0_325], %292 {strides = array<i32>} : memref<12x12x8xf32, #tpu.memory_space<vmem>>, vector<12x2x8xf32>,
    %c2_326 = arith.constant 2 : index
    %c2_327 = arith.constant 2 : index
    %c0_328 = arith.constant 0 : index
    %294 = vector.load %arg15[%c2_326, %c2_327, %c0_328] : memref<12x12x8xf32, #tpu.memory_space<vmem>>, vector<8x8x8xf32>
    tpu.vector_store %arg15[%c2_326, %c2_327, %c0_328], %285 {strides = array<i32>} : memref<12x12x8xf32, #tpu.memory_space<vmem>>, vector<8x8x8xf32>,
    %cst_329 = arith.constant 0.000000e+00 : f32
    %295 = vector.broadcast %cst_329 : f32 to vector<64x12xf32>
    %c0_330 = arith.constant 0 : index
    %c0_331 = arith.constant 0 : index
    %296 = vector.load %arg5[%c0_330, %c0_331] : memref<1x12xf32, #tpu.memory_space<vmem>>, vector<1x12xf32>
    %297 = vector.broadcast %296 : vector<1x12xf32> to vector<64x12xf32>
    %298 = arith.addf %295, %297 : vector<64x12xf32>
    %c0_332 = arith.constant 0 : index
    %c0_333 = arith.constant 0 : index
    %c0_334 = arith.constant 0 : index
    %299 = vector.load %arg15[%c0_332, %c0_333, %c0_334] : memref<12x12x8xf32, #tpu.memory_space<vmem>>, vector<8x8x8xf32>
    %300 = vector.shape_cast %299 : vector<8x8x8xf32> to vector<64x8xf32>
    %c0_335 = arith.constant 0 : index
    %c0_336 = arith.constant 0 : index
    %301 = vector.load %arg4[%c0_335, %c0_336] : memref<200x12xf32, #tpu.memory_space<vmem>>, vector<8x12xf32>
    %cst_337 = arith.constant dense<0.000000e+00> : vector<64x12xf32>
    %302 = tpu.matmul %300, %301, %cst_337 {dimension_numbers = #tpu.dot_dimension_numbers<[1], [0], [0], [1], [0, 0, 1, 1], [], []>} : vector<64x8xf32>, vector<8x12xf32>, vector<64x12xf32> -> vector<64x12xf32>
    %303 = arith.addf %298, %302 : vector<64x12xf32>
    %c0_338 = arith.constant 0 : index
    %c1_339 = arith.constant 1 : index
    %c0_340 = arith.constant 0 : index
    %304 = vector.load %arg15[%c0_338, %c1_339, %c0_340] : memref<12x12x8xf32, #tpu.memory_space<vmem>>, vector<8x8x8xf32>
    %305 = vector.shape_cast %304 : vector<8x8x8xf32> to vector<64x8xf32>
    %c8_341 = arith.constant 8 : index
    %c0_342 = arith.constant 0 : index
    %306 = vector.load %arg4[%c8_341, %c0_342] : memref<200x12xf32, #tpu.memory_space<vmem>>, vector<8x12xf32>
    %cst_343 = arith.constant dense<0.000000e+00> : vector<64x12xf32>
    %307 = tpu.matmul %305, %306, %cst_343 {dimension_numbers = #tpu.dot_dimension_numbers<[1], [0], [0], [1], [0, 0, 1, 1], [], []>} : vector<64x8xf32>, vector<8x12xf32>, vector<64x12xf32> -> vector<64x12xf32>
    %308 = arith.addf %303, %307 : vector<64x12xf32>
    %c0_344 = arith.constant 0 : index
    %c2_345 = arith.constant 2 : index
    %c0_346 = arith.constant 0 : index
    %309 = vector.load %arg15[%c0_344, %c2_345, %c0_346] : memref<12x12x8xf32, #tpu.memory_space<vmem>>, vector<8x8x8xf32>
    %310 = vector.shape_cast %309 : vector<8x8x8xf32> to vector<64x8xf32>
    %c16_347 = arith.constant 16 : index
    %c0_348 = arith.constant 0 : index
    %311 = vector.load %arg4[%c16_347, %c0_348] : memref<200x12xf32, #tpu.memory_space<vmem>>, vector<8x12xf32>
    %cst_349 = arith.constant dense<0.000000e+00> : vector<64x12xf32>
    %312 = tpu.matmul %310, %311, %cst_349 {dimension_numbers = #tpu.dot_dimension_numbers<[1], [0], [0], [1], [0, 0, 1, 1], [], []>} : vector<64x8xf32>, vector<8x12xf32>, vector<64x12xf32> -> vector<64x12xf32>
    %313 = arith.addf %308, %312 : vector<64x12xf32>
    %c0_350 = arith.constant 0 : index
    %c3_351 = arith.constant 3 : index
    %c0_352 = arith.constant 0 : index
    %314 = vector.load %arg15[%c0_350, %c3_351, %c0_352] : memref<12x12x8xf32, #tpu.memory_space<vmem>>, vector<8x8x8xf32>
    %315 = vector.shape_cast %314 : vector<8x8x8xf32> to vector<64x8xf32>
    %c24_353 = arith.constant 24 : index
    %c0_354 = arith.constant 0 : index
    %316 = vector.load %arg4[%c24_353, %c0_354] : memref<200x12xf32, #tpu.memory_space<vmem>>, vector<8x12xf32>
    %cst_355 = arith.constant dense<0.000000e+00> : vector<64x12xf32>
    %317 = tpu.matmul %315, %316, %cst_355 {dimension_numbers = #tpu.dot_dimension_numbers<[1], [0], [0], [1], [0, 0, 1, 1], [], []>} : vector<64x8xf32>, vector<8x12xf32>, vector<64x12xf32> -> vector<64x12xf32>
    %318 = arith.addf %313, %317 : vector<64x12xf32>
    %c0_356 = arith.constant 0 : index
    %c4_357 = arith.constant 4 : index
    %c0_358 = arith.constant 0 : index
    %319 = vector.load %arg15[%c0_356, %c4_357, %c0_358] : memref<12x12x8xf32, #tpu.memory_space<vmem>>, vector<8x8x8xf32>
    %320 = vector.shape_cast %319 : vector<8x8x8xf32> to vector<64x8xf32>
    %c32_359 = arith.constant 32 : index
    %c0_360 = arith.constant 0 : index
    %321 = vector.load %arg4[%c32_359, %c0_360] : memref<200x12xf32, #tpu.memory_space<vmem>>, vector<8x12xf32>
    %cst_361 = arith.constant dense<0.000000e+00> : vector<64x12xf32>
    %322 = tpu.matmul %320, %321, %cst_361 {dimension_numbers = #tpu.dot_dimension_numbers<[1], [0], [0], [1], [0, 0, 1, 1], [], []>} : vector<64x8xf32>, vector<8x12xf32>, vector<64x12xf32> -> vector<64x12xf32>
    %323 = arith.addf %318, %322 : vector<64x12xf32>
    %c1_362 = arith.constant 1 : index
    %c0_363 = arith.constant 0 : index
    %c0_364 = arith.constant 0 : index
    %324 = vector.load %arg15[%c1_362, %c0_363, %c0_364] : memref<12x12x8xf32, #tpu.memory_space<vmem>>, vector<8x8x8xf32>
    %325 = vector.shape_cast %324 : vector<8x8x8xf32> to vector<64x8xf32>
    %c40_365 = arith.constant 40 : index
    %c0_366 = arith.constant 0 : index
    %326 = vector.load %arg4[%c40_365, %c0_366] : memref<200x12xf32, #tpu.memory_space<vmem>>, vector<8x12xf32>
    %cst_367 = arith.constant dense<0.000000e+00> : vector<64x12xf32>
    %327 = tpu.matmul %325, %326, %cst_367 {dimension_numbers = #tpu.dot_dimension_numbers<[1], [0], [0], [1], [0, 0, 1, 1], [], []>} : vector<64x8xf32>, vector<8x12xf32>, vector<64x12xf32> -> vector<64x12xf32>
    %328 = arith.addf %323, %327 : vector<64x12xf32>
    %c1_368 = arith.constant 1 : index
    %c1_369 = arith.constant 1 : index
    %c0_370 = arith.constant 0 : index
    %329 = vector.load %arg15[%c1_368, %c1_369, %c0_370] : memref<12x12x8xf32, #tpu.memory_space<vmem>>, vector<8x8x8xf32>
    %330 = vector.shape_cast %329 : vector<8x8x8xf32> to vector<64x8xf32>
    %c48_371 = arith.constant 48 : index
    %c0_372 = arith.constant 0 : index
    %331 = vector.load %arg4[%c48_371, %c0_372] : memref<200x12xf32, #tpu.memory_space<vmem>>, vector<8x12xf32>
    %cst_373 = arith.constant dense<0.000000e+00> : vector<64x12xf32>
    %332 = tpu.matmul %330, %331, %cst_373 {dimension_numbers = #tpu.dot_dimension_numbers<[1], [0], [0], [1], [0, 0, 1, 1], [], []>} : vector<64x8xf32>, vector<8x12xf32>, vector<64x12xf32> -> vector<64x12xf32>
    %333 = arith.addf %328, %332 : vector<64x12xf32>
    %c1_374 = arith.constant 1 : index
    %c2_375 = arith.constant 2 : index
    %c0_376 = arith.constant 0 : index
    %334 = vector.load %arg15[%c1_374, %c2_375, %c0_376] : memref<12x12x8xf32, #tpu.memory_space<vmem>>, vector<8x8x8xf32>
    %335 = vector.shape_cast %334 : vector<8x8x8xf32> to vector<64x8xf32>
    %c56_377 = arith.constant 56 : index
    %c0_378 = arith.constant 0 : index
    %336 = vector.load %arg4[%c56_377, %c0_378] : memref<200x12xf32, #tpu.memory_space<vmem>>, vector<8x12xf32>
    %cst_379 = arith.constant dense<0.000000e+00> : vector<64x12xf32>
    %337 = tpu.matmul %335, %336, %cst_379 {dimension_numbers = #tpu.dot_dimension_numbers<[1], [0], [0], [1], [0, 0, 1, 1], [], []>} : vector<64x8xf32>, vector<8x12xf32>, vector<64x12xf32> -> vector<64x12xf32>
    %338 = arith.addf %333, %337 : vector<64x12xf32>
    %c1_380 = arith.constant 1 : index
    %c3_381 = arith.constant 3 : index
    %c0_382 = arith.constant 0 : index
    %339 = vector.load %arg15[%c1_380, %c3_381, %c0_382] : memref<12x12x8xf32, #tpu.memory_space<vmem>>, vector<8x8x8xf32>
    %340 = vector.shape_cast %339 : vector<8x8x8xf32> to vector<64x8xf32>
    %c64_383 = arith.constant 64 : index
    %c0_384 = arith.constant 0 : index
    %341 = vector.load %arg4[%c64_383, %c0_384] : memref<200x12xf32, #tpu.memory_space<vmem>>, vector<8x12xf32>
    %cst_385 = arith.constant dense<0.000000e+00> : vector<64x12xf32>
    %342 = tpu.matmul %340, %341, %cst_385 {dimension_numbers = #tpu.dot_dimension_numbers<[1], [0], [0], [1], [0, 0, 1, 1], [], []>} : vector<64x8xf32>, vector<8x12xf32>, vector<64x12xf32> -> vector<64x12xf32>
    %343 = arith.addf %338, %342 : vector<64x12xf32>
    %c1_386 = arith.constant 1 : index
    %c4_387 = arith.constant 4 : index
    %c0_388 = arith.constant 0 : index
    %344 = vector.load %arg15[%c1_386, %c4_387, %c0_388] : memref<12x12x8xf32, #tpu.memory_space<vmem>>, vector<8x8x8xf32>
    %345 = vector.shape_cast %344 : vector<8x8x8xf32> to vector<64x8xf32>
    %c72_389 = arith.constant 72 : index
    %c0_390 = arith.constant 0 : index
    %346 = vector.load %arg4[%c72_389, %c0_390] : memref<200x12xf32, #tpu.memory_space<vmem>>, vector<8x12xf32>
    %cst_391 = arith.constant dense<0.000000e+00> : vector<64x12xf32>
    %347 = tpu.matmul %345, %346, %cst_391 {dimension_numbers = #tpu.dot_dimension_numbers<[1], [0], [0], [1], [0, 0, 1, 1], [], []>} : vector<64x8xf32>, vector<8x12xf32>, vector<64x12xf32> -> vector<64x12xf32>
    %348 = arith.addf %343, %347 : vector<64x12xf32>
    %c2_392 = arith.constant 2 : index
    %c0_393 = arith.constant 0 : index
    %c0_394 = arith.constant 0 : index
    %349 = vector.load %arg15[%c2_392, %c0_393, %c0_394] : memref<12x12x8xf32, #tpu.memory_space<vmem>>, vector<8x8x8xf32>
    %350 = vector.shape_cast %349 : vector<8x8x8xf32> to vector<64x8xf32>
    %c80_395 = arith.constant 80 : index
    %c0_396 = arith.constant 0 : index
    %351 = vector.load %arg4[%c80_395, %c0_396] : memref<200x12xf32, #tpu.memory_space<vmem>>, vector<8x12xf32>
    %cst_397 = arith.constant dense<0.000000e+00> : vector<64x12xf32>
    %352 = tpu.matmul %350, %351, %cst_397 {dimension_numbers = #tpu.dot_dimension_numbers<[1], [0], [0], [1], [0, 0, 1, 1], [], []>} : vector<64x8xf32>, vector<8x12xf32>, vector<64x12xf32> -> vector<64x12xf32>
    %353 = arith.addf %348, %352 : vector<64x12xf32>
    %c2_398 = arith.constant 2 : index
    %c1_399 = arith.constant 1 : index
    %c0_400 = arith.constant 0 : index
    %354 = vector.load %arg15[%c2_398, %c1_399, %c0_400] : memref<12x12x8xf32, #tpu.memory_space<vmem>>, vector<8x8x8xf32>
    %355 = vector.shape_cast %354 : vector<8x8x8xf32> to vector<64x8xf32>
    %c88_401 = arith.constant 88 : index
    %c0_402 = arith.constant 0 : index
    %356 = vector.load %arg4[%c88_401, %c0_402] : memref<200x12xf32, #tpu.memory_space<vmem>>, vector<8x12xf32>
    %cst_403 = arith.constant dense<0.000000e+00> : vector<64x12xf32>
    %357 = tpu.matmul %355, %356, %cst_403 {dimension_numbers = #tpu.dot_dimension_numbers<[1], [0], [0], [1], [0, 0, 1, 1], [], []>} : vector<64x8xf32>, vector<8x12xf32>, vector<64x12xf32> -> vector<64x12xf32>
    %358 = arith.addf %353, %357 : vector<64x12xf32>
    %c2_404 = arith.constant 2 : index
    %c2_405 = arith.constant 2 : index
    %c0_406 = arith.constant 0 : index
    %359 = vector.load %arg15[%c2_404, %c2_405, %c0_406] : memref<12x12x8xf32, #tpu.memory_space<vmem>>, vector<8x8x8xf32>
    %360 = vector.shape_cast %359 : vector<8x8x8xf32> to vector<64x8xf32>
    %c96_407 = arith.constant 96 : index
    %c0_408 = arith.constant 0 : index
    %361 = vector.load %arg4[%c96_407, %c0_408] : memref<200x12xf32, #tpu.memory_space<vmem>>, vector<8x12xf32>
    %cst_409 = arith.constant dense<0.000000e+00> : vector<64x12xf32>
    %362 = tpu.matmul %360, %361, %cst_409 {dimension_numbers = #tpu.dot_dimension_numbers<[1], [0], [0], [1], [0, 0, 1, 1], [], []>} : vector<64x8xf32>, vector<8x12xf32>, vector<64x12xf32> -> vector<64x12xf32>
    %363 = arith.addf %358, %362 : vector<64x12xf32>
    %c2_410 = arith.constant 2 : index
    %c3_411 = arith.constant 3 : index
    %c0_412 = arith.constant 0 : index
    %364 = vector.load %arg15[%c2_410, %c3_411, %c0_412] : memref<12x12x8xf32, #tpu.memory_space<vmem>>, vector<8x8x8xf32>
    %365 = vector.shape_cast %364 : vector<8x8x8xf32> to vector<64x8xf32>
    %c104 = arith.constant 104 : index
    %c0_413 = arith.constant 0 : index
    %366 = vector.load %arg4[%c104, %c0_413] : memref<200x12xf32, #tpu.memory_space<vmem>>, vector<8x12xf32>
    %cst_414 = arith.constant dense<0.000000e+00> : vector<64x12xf32>
    %367 = tpu.matmul %365, %366, %cst_414 {dimension_numbers = #tpu.dot_dimension_numbers<[1], [0], [0], [1], [0, 0, 1, 1], [], []>} : vector<64x8xf32>, vector<8x12xf32>, vector<64x12xf32> -> vector<64x12xf32>
    %368 = arith.addf %363, %367 : vector<64x12xf32>
    %c2_415 = arith.constant 2 : index
    %c4_416 = arith.constant 4 : index
    %c0_417 = arith.constant 0 : index
    %369 = vector.load %arg15[%c2_415, %c4_416, %c0_417] : memref<12x12x8xf32, #tpu.memory_space<vmem>>, vector<8x8x8xf32>
    %370 = vector.shape_cast %369 : vector<8x8x8xf32> to vector<64x8xf32>
    %c112 = arith.constant 112 : index
    %c0_418 = arith.constant 0 : index
    %371 = vector.load %arg4[%c112, %c0_418] : memref<200x12xf32, #tpu.memory_space<vmem>>, vector<8x12xf32>
    %cst_419 = arith.constant dense<0.000000e+00> : vector<64x12xf32>
    %372 = tpu.matmul %370, %371, %cst_419 {dimension_numbers = #tpu.dot_dimension_numbers<[1], [0], [0], [1], [0, 0, 1, 1], [], []>} : vector<64x8xf32>, vector<8x12xf32>, vector<64x12xf32> -> vector<64x12xf32>
    %373 = arith.addf %368, %372 : vector<64x12xf32>
    %c3_420 = arith.constant 3 : index
    %c0_421 = arith.constant 0 : index
    %c0_422 = arith.constant 0 : index
    %374 = vector.load %arg15[%c3_420, %c0_421, %c0_422] : memref<12x12x8xf32, #tpu.memory_space<vmem>>, vector<8x8x8xf32>
    %375 = vector.shape_cast %374 : vector<8x8x8xf32> to vector<64x8xf32>
    %c120 = arith.constant 120 : index
    %c0_423 = arith.constant 0 : index
    %376 = vector.load %arg4[%c120, %c0_423] : memref<200x12xf32, #tpu.memory_space<vmem>>, vector<8x12xf32>
    %cst_424 = arith.constant dense<0.000000e+00> : vector<64x12xf32>
    %377 = tpu.matmul %375, %376, %cst_424 {dimension_numbers = #tpu.dot_dimension_numbers<[1], [0], [0], [1], [0, 0, 1, 1], [], []>} : vector<64x8xf32>, vector<8x12xf32>, vector<64x12xf32> -> vector<64x12xf32>
    %378 = arith.addf %373, %377 : vector<64x12xf32>
    %c3_425 = arith.constant 3 : index
    %c1_426 = arith.constant 1 : index
    %c0_427 = arith.constant 0 : index
    %379 = vector.load %arg15[%c3_425, %c1_426, %c0_427] : memref<12x12x8xf32, #tpu.memory_space<vmem>>, vector<8x8x8xf32>
    %380 = vector.shape_cast %379 : vector<8x8x8xf32> to vector<64x8xf32>
    %c128 = arith.constant 128 : index
    %c0_428 = arith.constant 0 : index
    %381 = vector.load %arg4[%c128, %c0_428] : memref<200x12xf32, #tpu.memory_space<vmem>>, vector<8x12xf32>
    %cst_429 = arith.constant dense<0.000000e+00> : vector<64x12xf32>
    %382 = tpu.matmul %380, %381, %cst_429 {dimension_numbers = #tpu.dot_dimension_numbers<[1], [0], [0], [1], [0, 0, 1, 1], [], []>} : vector<64x8xf32>, vector<8x12xf32>, vector<64x12xf32> -> vector<64x12xf32>
    %383 = arith.addf %378, %382 : vector<64x12xf32>
    %c3_430 = arith.constant 3 : index
    %c2_431 = arith.constant 2 : index
    %c0_432 = arith.constant 0 : index
    %384 = vector.load %arg15[%c3_430, %c2_431, %c0_432] : memref<12x12x8xf32, #tpu.memory_space<vmem>>, vector<8x8x8xf32>
    %385 = vector.shape_cast %384 : vector<8x8x8xf32> to vector<64x8xf32>
    %c136 = arith.constant 136 : index
    %c0_433 = arith.constant 0 : index
    %386 = vector.load %arg4[%c136, %c0_433] : memref<200x12xf32, #tpu.memory_space<vmem>>, vector<8x12xf32>
    %cst_434 = arith.constant dense<0.000000e+00> : vector<64x12xf32>
    %387 = tpu.matmul %385, %386, %cst_434 {dimension_numbers = #tpu.dot_dimension_numbers<[1], [0], [0], [1], [0, 0, 1, 1], [], []>} : vector<64x8xf32>, vector<8x12xf32>, vector<64x12xf32> -> vector<64x12xf32>
    %388 = arith.addf %383, %387 : vector<64x12xf32>
    %c3_435 = arith.constant 3 : index
    %c3_436 = arith.constant 3 : index
    %c0_437 = arith.constant 0 : index
    %389 = vector.load %arg15[%c3_435, %c3_436, %c0_437] : memref<12x12x8xf32, #tpu.memory_space<vmem>>, vector<8x8x8xf32>
    %390 = vector.shape_cast %389 : vector<8x8x8xf32> to vector<64x8xf32>
    %c144 = arith.constant 144 : index
    %c0_438 = arith.constant 0 : index
    %391 = vector.load %arg4[%c144, %c0_438] : memref<200x12xf32, #tpu.memory_space<vmem>>, vector<8x12xf32>
    %cst_439 = arith.constant dense<0.000000e+00> : vector<64x12xf32>
    %392 = tpu.matmul %390, %391, %cst_439 {dimension_numbers = #tpu.dot_dimension_numbers<[1], [0], [0], [1], [0, 0, 1, 1], [], []>} : vector<64x8xf32>, vector<8x12xf32>, vector<64x12xf32> -> vector<64x12xf32>
    %393 = arith.addf %388, %392 : vector<64x12xf32>
    %c3_440 = arith.constant 3 : index
    %c4_441 = arith.constant 4 : index
    %c0_442 = arith.constant 0 : index
    %394 = vector.load %arg15[%c3_440, %c4_441, %c0_442] : memref<12x12x8xf32, #tpu.memory_space<vmem>>, vector<8x8x8xf32>
    %395 = vector.shape_cast %394 : vector<8x8x8xf32> to vector<64x8xf32>
    %c152 = arith.constant 152 : index
    %c0_443 = arith.constant 0 : index
    %396 = vector.load %arg4[%c152, %c0_443] : memref<200x12xf32, #tpu.memory_space<vmem>>, vector<8x12xf32>
    %cst_444 = arith.constant dense<0.000000e+00> : vector<64x12xf32>
    %397 = tpu.matmul %395, %396, %cst_444 {dimension_numbers = #tpu.dot_dimension_numbers<[1], [0], [0], [1], [0, 0, 1, 1], [], []>} : vector<64x8xf32>, vector<8x12xf32>, vector<64x12xf32> -> vector<64x12xf32>
    %398 = arith.addf %393, %397 : vector<64x12xf32>
    %c4_445 = arith.constant 4 : index
    %c0_446 = arith.constant 0 : index
    %c0_447 = arith.constant 0 : index
    %399 = vector.load %arg15[%c4_445, %c0_446, %c0_447] : memref<12x12x8xf32, #tpu.memory_space<vmem>>, vector<8x8x8xf32>
    %400 = vector.shape_cast %399 : vector<8x8x8xf32> to vector<64x8xf32>
    %c160 = arith.constant 160 : index
    %c0_448 = arith.constant 0 : index
    %401 = vector.load %arg4[%c160, %c0_448] : memref<200x12xf32, #tpu.memory_space<vmem>>, vector<8x12xf32>
    %cst_449 = arith.constant dense<0.000000e+00> : vector<64x12xf32>
    %402 = tpu.matmul %400, %401, %cst_449 {dimension_numbers = #tpu.dot_dimension_numbers<[1], [0], [0], [1], [0, 0, 1, 1], [], []>} : vector<64x8xf32>, vector<8x12xf32>, vector<64x12xf32> -> vector<64x12xf32>
    %403 = arith.addf %398, %402 : vector<64x12xf32>
    %c4_450 = arith.constant 4 : index
    %c1_451 = arith.constant 1 : index
    %c0_452 = arith.constant 0 : index
    %404 = vector.load %arg15[%c4_450, %c1_451, %c0_452] : memref<12x12x8xf32, #tpu.memory_space<vmem>>, vector<8x8x8xf32>
    %405 = vector.shape_cast %404 : vector<8x8x8xf32> to vector<64x8xf32>
    %c168 = arith.constant 168 : index
    %c0_453 = arith.constant 0 : index
    %406 = vector.load %arg4[%c168, %c0_453] : memref<200x12xf32, #tpu.memory_space<vmem>>, vector<8x12xf32>
    %cst_454 = arith.constant dense<0.000000e+00> : vector<64x12xf32>
    %407 = tpu.matmul %405, %406, %cst_454 {dimension_numbers = #tpu.dot_dimension_numbers<[1], [0], [0], [1], [0, 0, 1, 1], [], []>} : vector<64x8xf32>, vector<8x12xf32>, vector<64x12xf32> -> vector<64x12xf32>
    %408 = arith.addf %403, %407 : vector<64x12xf32>
    %c4_455 = arith.constant 4 : index
    %c2_456 = arith.constant 2 : index
    %c0_457 = arith.constant 0 : index
    %409 = vector.load %arg15[%c4_455, %c2_456, %c0_457] : memref<12x12x8xf32, #tpu.memory_space<vmem>>, vector<8x8x8xf32>
    %410 = vector.shape_cast %409 : vector<8x8x8xf32> to vector<64x8xf32>
    %c176 = arith.constant 176 : index
    %c0_458 = arith.constant 0 : index
    %411 = vector.load %arg4[%c176, %c0_458] : memref<200x12xf32, #tpu.memory_space<vmem>>, vector<8x12xf32>
    %cst_459 = arith.constant dense<0.000000e+00> : vector<64x12xf32>
    %412 = tpu.matmul %410, %411, %cst_459 {dimension_numbers = #tpu.dot_dimension_numbers<[1], [0], [0], [1], [0, 0, 1, 1], [], []>} : vector<64x8xf32>, vector<8x12xf32>, vector<64x12xf32> -> vector<64x12xf32>
    %413 = arith.addf %408, %412 : vector<64x12xf32>
    %c4_460 = arith.constant 4 : index
    %c3_461 = arith.constant 3 : index
    %c0_462 = arith.constant 0 : index
    %414 = vector.load %arg15[%c4_460, %c3_461, %c0_462] : memref<12x12x8xf32, #tpu.memory_space<vmem>>, vector<8x8x8xf32>
    %415 = vector.shape_cast %414 : vector<8x8x8xf32> to vector<64x8xf32>
    %c184 = arith.constant 184 : index
    %c0_463 = arith.constant 0 : index
    %416 = vector.load %arg4[%c184, %c0_463] : memref<200x12xf32, #tpu.memory_space<vmem>>, vector<8x12xf32>
    %cst_464 = arith.constant dense<0.000000e+00> : vector<64x12xf32>
    %417 = tpu.matmul %415, %416, %cst_464 {dimension_numbers = #tpu.dot_dimension_numbers<[1], [0], [0], [1], [0, 0, 1, 1], [], []>} : vector<64x8xf32>, vector<8x12xf32>, vector<64x12xf32> -> vector<64x12xf32>
    %418 = arith.addf %413, %417 : vector<64x12xf32>
    %c4_465 = arith.constant 4 : index
    %c4_466 = arith.constant 4 : index
    %c0_467 = arith.constant 0 : index
    %419 = vector.load %arg15[%c4_465, %c4_466, %c0_467] : memref<12x12x8xf32, #tpu.memory_space<vmem>>, vector<8x8x8xf32>
    %420 = vector.shape_cast %419 : vector<8x8x8xf32> to vector<64x8xf32>
    %c192 = arith.constant 192 : index
    %c0_468 = arith.constant 0 : index
    %421 = vector.load %arg4[%c192, %c0_468] : memref<200x12xf32, #tpu.memory_space<vmem>>, vector<8x12xf32>
    %cst_469 = arith.constant dense<0.000000e+00> : vector<64x12xf32>
    %422 = tpu.matmul %420, %421, %cst_469 {dimension_numbers = #tpu.dot_dimension_numbers<[1], [0], [0], [1], [0, 0, 1, 1], [], []>} : vector<64x8xf32>, vector<8x12xf32>, vector<64x12xf32> -> vector<64x12xf32>
    %423 = arith.addf %418, %422 : vector<64x12xf32>
    %cst_470 = arith.constant 0.000000e+00 : f32
    %424 = vector.broadcast %cst_470 : f32 to vector<64x12xf32>
    %425 = arith.maximumf %423, %424 : vector<64x12xf32>
    %426 = vector.shape_cast %425 : vector<64x12xf32> to vector<8x8x12xf32>
    %c0_471 = arith.constant 0 : index
    %c0_472 = arith.constant 0 : index
    %c0_473 = arith.constant 0 : index
    %427 = vector.load %arg16[%c0_471, %c0_472, %c0_473] : memref<8x8x12xf32, #tpu.memory_space<vmem>>, vector<8x8x12xf32>
    tpu.vector_store %arg16[%c0_471, %c0_472, %c0_473], %426 {strides = array<i32>} : memref<8x8x12xf32, #tpu.memory_space<vmem>>, vector<8x8x12xf32>,
    %c0_474 = arith.constant 0 : index
    %c0_475 = arith.constant 0 : index
    %c0_476 = arith.constant 0 : index
    %428 = tpu.strided_load %arg16[%c0_474, %c0_475, %c0_476] {strides = array<i32: 1, 2, 1>} : memref<8x8x12xf32, #tpu.memory_space<vmem>>, vector<8x4x12xf32>
    %c0_477 = arith.constant 0 : index
    %c1_478 = arith.constant 1 : index
    %c0_479 = arith.constant 0 : index
    %429 = tpu.strided_load %arg16[%c0_477, %c1_478, %c0_479] {strides = array<i32: 1, 2, 1>} : memref<8x8x12xf32, #tpu.memory_space<vmem>>, vector<8x4x12xf32>
    %430 = arith.maximumf %428, %429 : vector<8x4x12xf32>
    %431 = vector.shape_cast %430 : vector<8x4x12xf32> to vector<4x2x4x12xf32>
    %432 = vector.extract_strided_slice %431 {offsets = [0, 0, 0, 0], sizes = [4, 1, 4, 12], strides = [1, 1, 1, 1]} : vector<4x2x4x12xf32> to vector<4x1x4x12xf32>
    %433 = vector.shape_cast %432 : vector<4x1x4x12xf32> to vector<4x4x12xf32>
    %434 = vector.extract_strided_slice %431 {offsets = [0, 1, 0, 0], sizes = [4, 1, 4, 12], strides = [1, 1, 1, 1]} : vector<4x2x4x12xf32> to vector<4x1x4x12xf32>
    %435 = vector.shape_cast %434 : vector<4x1x4x12xf32> to vector<4x4x12xf32>
    %436 = arith.maximumf %433, %435 : vector<4x4x12xf32>
    %cst_480 = arith.constant 0.000000e+00 : f32
    %437 = vector.broadcast %cst_480 : f32 to vector<2x12x12xf32>
    %c0_481 = arith.constant 0 : index
    %c0_482 = arith.constant 0 : index
    %c0_483 = arith.constant 0 : index
    %438 = vector.load %arg17[%c0_481, %c0_482, %c0_483] : memref<8x12x12xf32, #tpu.memory_space<vmem>>, vector<2x12x12xf32>
    tpu.vector_store %arg17[%c0_481, %c0_482, %c0_483], %437 {strides = array<i32>} : memref<8x12x12xf32, #tpu.memory_space<vmem>>, vector<2x12x12xf32>,
    %cst_484 = arith.constant 0.000000e+00 : f32
    %439 = vector.broadcast %cst_484 : f32 to vector<2x12x12xf32>
    %c6 = arith.constant 6 : index
    %c0_485 = arith.constant 0 : index
    %c0_486 = arith.constant 0 : index
    %440 = vector.load %arg17[%c6, %c0_485, %c0_486] : memref<8x12x12xf32, #tpu.memory_space<vmem>>, vector<2x12x12xf32>
    tpu.vector_store %arg17[%c6, %c0_485, %c0_486], %439 {strides = array<i32>} : memref<8x12x12xf32, #tpu.memory_space<vmem>>, vector<2x12x12xf32>,
    %cst_487 = arith.constant 0.000000e+00 : f32
    %441 = vector.broadcast %cst_487 : f32 to vector<8x2x12xf32>
    %c0_488 = arith.constant 0 : index
    %c0_489 = arith.constant 0 : index
    %c0_490 = arith.constant 0 : index
    %442 = vector.load %arg17[%c0_488, %c0_489, %c0_490] : memref<8x12x12xf32, #tpu.memory_space<vmem>>, vector<8x2x12xf32>
    tpu.vector_store %arg17[%c0_488, %c0_489, %c0_490], %441 {strides = array<i32>} : memref<8x12x12xf32, #tpu.memory_space<vmem>>, vector<8x2x12xf32>,
    %cst_491 = arith.constant 0.000000e+00 : f32
    %443 = vector.broadcast %cst_491 : f32 to vector<8x6x12xf32>
    %c0_492 = arith.constant 0 : index
    %c6_493 = arith.constant 6 : index
    %c0_494 = arith.constant 0 : index
    %444 = vector.load %arg17[%c0_492, %c6_493, %c0_494] : memref<8x12x12xf32, #tpu.memory_space<vmem>>, vector<8x6x12xf32>
    tpu.vector_store %arg17[%c0_492, %c6_493, %c0_494], %443 {strides = array<i32>} : memref<8x12x12xf32, #tpu.memory_space<vmem>>, vector<8x6x12xf32>,
    %c2_495 = arith.constant 2 : index
    %c2_496 = arith.constant 2 : index
    %c0_497 = arith.constant 0 : index
    %445 = vector.load %arg17[%c2_495, %c2_496, %c0_497] : memref<8x12x12xf32, #tpu.memory_space<vmem>>, vector<4x4x12xf32>
    tpu.vector_store %arg17[%c2_495, %c2_496, %c0_497], %436 {strides = array<i32>} : memref<8x12x12xf32, #tpu.memory_space<vmem>>, vector<4x4x12xf32>,
    %cst_498 = arith.constant 0.000000e+00 : f32
    %446 = vector.broadcast %cst_498 : f32 to vector<32x16xf32>
    %c0_499 = arith.constant 0 : index
    %c0_500 = arith.constant 0 : index
    %447 = vector.load %arg7[%c0_499, %c0_500] : memref<1x16xf32, #tpu.memory_space<vmem>>, vector<1x16xf32>
    %448 = vector.broadcast %447 : vector<1x16xf32> to vector<32x16xf32>
    %449 = arith.addf %446, %448 : vector<32x16xf32>
    %c0_501 = arith.constant 0 : index
    %c0_502 = arith.constant 0 : index
    %c0_503 = arith.constant 0 : index
    %450 = vector.load %arg17[%c0_501, %c0_502, %c0_503] : memref<8x12x12xf32, #tpu.memory_space<vmem>>, vector<4x8x12xf32>
    %451 = vector.shape_cast %450 : vector<4x8x12xf32> to vector<32x12xf32>
    %c0_504 = arith.constant 0 : index
    %c0_505 = arith.constant 0 : index
    %452 = vector.load %arg6[%c0_504, %c0_505] : memref<300x16xf32, #tpu.memory_space<vmem>>, vector<12x16xf32>
    %cst_506 = arith.constant dense<0.000000e+00> : vector<32x16xf32>
    %453 = tpu.matmul %451, %452, %cst_506 {dimension_numbers = #tpu.dot_dimension_numbers<[1], [0], [0], [1], [0, 0, 1, 1], [], []>} : vector<32x12xf32>, vector<12x16xf32>, vector<32x16xf32> -> vector<32x16xf32>
    %454 = arith.addf %449, %453 : vector<32x16xf32>
    %c0_507 = arith.constant 0 : index
    %c1_508 = arith.constant 1 : index
    %c0_509 = arith.constant 0 : index
    %455 = vector.load %arg17[%c0_507, %c1_508, %c0_509] : memref<8x12x12xf32, #tpu.memory_space<vmem>>, vector<4x8x12xf32>
    %456 = vector.shape_cast %455 : vector<4x8x12xf32> to vector<32x12xf32>
    %c12_510 = arith.constant 12 : index
    %c0_511 = arith.constant 0 : index
    %457 = vector.load %arg6[%c12_510, %c0_511] : memref<300x16xf32, #tpu.memory_space<vmem>>, vector<12x16xf32>
    %cst_512 = arith.constant dense<0.000000e+00> : vector<32x16xf32>
    %458 = tpu.matmul %456, %457, %cst_512 {dimension_numbers = #tpu.dot_dimension_numbers<[1], [0], [0], [1], [0, 0, 1, 1], [], []>} : vector<32x12xf32>, vector<12x16xf32>, vector<32x16xf32> -> vector<32x16xf32>
    %459 = arith.addf %454, %458 : vector<32x16xf32>
    %c0_513 = arith.constant 0 : index
    %c2_514 = arith.constant 2 : index
    %c0_515 = arith.constant 0 : index
    %460 = vector.load %arg17[%c0_513, %c2_514, %c0_515] : memref<8x12x12xf32, #tpu.memory_space<vmem>>, vector<4x8x12xf32>
    %461 = vector.shape_cast %460 : vector<4x8x12xf32> to vector<32x12xf32>
    %c24_516 = arith.constant 24 : index
    %c0_517 = arith.constant 0 : index
    %462 = vector.load %arg6[%c24_516, %c0_517] : memref<300x16xf32, #tpu.memory_space<vmem>>, vector<12x16xf32>
    %cst_518 = arith.constant dense<0.000000e+00> : vector<32x16xf32>
    %463 = tpu.matmul %461, %462, %cst_518 {dimension_numbers = #tpu.dot_dimension_numbers<[1], [0], [0], [1], [0, 0, 1, 1], [], []>} : vector<32x12xf32>, vector<12x16xf32>, vector<32x16xf32> -> vector<32x16xf32>
    %464 = arith.addf %459, %463 : vector<32x16xf32>
    %c0_519 = arith.constant 0 : index
    %c3_520 = arith.constant 3 : index
    %c0_521 = arith.constant 0 : index
    %465 = vector.load %arg17[%c0_519, %c3_520, %c0_521] : memref<8x12x12xf32, #tpu.memory_space<vmem>>, vector<4x8x12xf32>
    %466 = vector.shape_cast %465 : vector<4x8x12xf32> to vector<32x12xf32>
    %c36_522 = arith.constant 36 : index
    %c0_523 = arith.constant 0 : index
    %467 = vector.load %arg6[%c36_522, %c0_523] : memref<300x16xf32, #tpu.memory_space<vmem>>, vector<12x16xf32>
    %cst_524 = arith.constant dense<0.000000e+00> : vector<32x16xf32>
    %468 = tpu.matmul %466, %467, %cst_524 {dimension_numbers = #tpu.dot_dimension_numbers<[1], [0], [0], [1], [0, 0, 1, 1], [], []>} : vector<32x12xf32>, vector<12x16xf32>, vector<32x16xf32> -> vector<32x16xf32>
    %469 = arith.addf %464, %468 : vector<32x16xf32>
    %c0_525 = arith.constant 0 : index
    %c4_526 = arith.constant 4 : index
    %c0_527 = arith.constant 0 : index
    %470 = vector.load %arg17[%c0_525, %c4_526, %c0_527] : memref<8x12x12xf32, #tpu.memory_space<vmem>>, vector<4x8x12xf32>
    %471 = vector.shape_cast %470 : vector<4x8x12xf32> to vector<32x12xf32>
    %c48_528 = arith.constant 48 : index
    %c0_529 = arith.constant 0 : index
    %472 = vector.load %arg6[%c48_528, %c0_529] : memref<300x16xf32, #tpu.memory_space<vmem>>, vector<12x16xf32>
    %cst_530 = arith.constant dense<0.000000e+00> : vector<32x16xf32>
    %473 = tpu.matmul %471, %472, %cst_530 {dimension_numbers = #tpu.dot_dimension_numbers<[1], [0], [0], [1], [0, 0, 1, 1], [], []>} : vector<32x12xf32>, vector<12x16xf32>, vector<32x16xf32> -> vector<32x16xf32>
    %474 = arith.addf %469, %473 : vector<32x16xf32>
    %c1_531 = arith.constant 1 : index
    %c0_532 = arith.constant 0 : index
    %c0_533 = arith.constant 0 : index
    %475 = vector.load %arg17[%c1_531, %c0_532, %c0_533] : memref<8x12x12xf32, #tpu.memory_space<vmem>>, vector<4x8x12xf32>
    %476 = vector.shape_cast %475 : vector<4x8x12xf32> to vector<32x12xf32>
    %c60_534 = arith.constant 60 : index
    %c0_535 = arith.constant 0 : index
    %477 = vector.load %arg6[%c60_534, %c0_535] : memref<300x16xf32, #tpu.memory_space<vmem>>, vector<12x16xf32>
    %cst_536 = arith.constant dense<0.000000e+00> : vector<32x16xf32>
    %478 = tpu.matmul %476, %477, %cst_536 {dimension_numbers = #tpu.dot_dimension_numbers<[1], [0], [0], [1], [0, 0, 1, 1], [], []>} : vector<32x12xf32>, vector<12x16xf32>, vector<32x16xf32> -> vector<32x16xf32>
    %479 = arith.addf %474, %478 : vector<32x16xf32>
    %c1_537 = arith.constant 1 : index
    %c1_538 = arith.constant 1 : index
    %c0_539 = arith.constant 0 : index
    %480 = vector.load %arg17[%c1_537, %c1_538, %c0_539] : memref<8x12x12xf32, #tpu.memory_space<vmem>>, vector<4x8x12xf32>
    %481 = vector.shape_cast %480 : vector<4x8x12xf32> to vector<32x12xf32>
    %c72_540 = arith.constant 72 : index
    %c0_541 = arith.constant 0 : index
    %482 = vector.load %arg6[%c72_540, %c0_541] : memref<300x16xf32, #tpu.memory_space<vmem>>, vector<12x16xf32>
    %cst_542 = arith.constant dense<0.000000e+00> : vector<32x16xf32>
    %483 = tpu.matmul %481, %482, %cst_542 {dimension_numbers = #tpu.dot_dimension_numbers<[1], [0], [0], [1], [0, 0, 1, 1], [], []>} : vector<32x12xf32>, vector<12x16xf32>, vector<32x16xf32> -> vector<32x16xf32>
    %484 = arith.addf %479, %483 : vector<32x16xf32>
    %c1_543 = arith.constant 1 : index
    %c2_544 = arith.constant 2 : index
    %c0_545 = arith.constant 0 : index
    %485 = vector.load %arg17[%c1_543, %c2_544, %c0_545] : memref<8x12x12xf32, #tpu.memory_space<vmem>>, vector<4x8x12xf32>
    %486 = vector.shape_cast %485 : vector<4x8x12xf32> to vector<32x12xf32>
    %c84_546 = arith.constant 84 : index
    %c0_547 = arith.constant 0 : index
    %487 = vector.load %arg6[%c84_546, %c0_547] : memref<300x16xf32, #tpu.memory_space<vmem>>, vector<12x16xf32>
    %cst_548 = arith.constant dense<0.000000e+00> : vector<32x16xf32>
    %488 = tpu.matmul %486, %487, %cst_548 {dimension_numbers = #tpu.dot_dimension_numbers<[1], [0], [0], [1], [0, 0, 1, 1], [], []>} : vector<32x12xf32>, vector<12x16xf32>, vector<32x16xf32> -> vector<32x16xf32>
    %489 = arith.addf %484, %488 : vector<32x16xf32>
    %c1_549 = arith.constant 1 : index
    %c3_550 = arith.constant 3 : index
    %c0_551 = arith.constant 0 : index
    %490 = vector.load %arg17[%c1_549, %c3_550, %c0_551] : memref<8x12x12xf32, #tpu.memory_space<vmem>>, vector<4x8x12xf32>
    %491 = vector.shape_cast %490 : vector<4x8x12xf32> to vector<32x12xf32>
    %c96_552 = arith.constant 96 : index
    %c0_553 = arith.constant 0 : index
    %492 = vector.load %arg6[%c96_552, %c0_553] : memref<300x16xf32, #tpu.memory_space<vmem>>, vector<12x16xf32>
    %cst_554 = arith.constant dense<0.000000e+00> : vector<32x16xf32>
    %493 = tpu.matmul %491, %492, %cst_554 {dimension_numbers = #tpu.dot_dimension_numbers<[1], [0], [0], [1], [0, 0, 1, 1], [], []>} : vector<32x12xf32>, vector<12x16xf32>, vector<32x16xf32> -> vector<32x16xf32>
    %494 = arith.addf %489, %493 : vector<32x16xf32>
    %c1_555 = arith.constant 1 : index
    %c4_556 = arith.constant 4 : index
    %c0_557 = arith.constant 0 : index
    %495 = vector.load %arg17[%c1_555, %c4_556, %c0_557] : memref<8x12x12xf32, #tpu.memory_space<vmem>>, vector<4x8x12xf32>
    %496 = vector.shape_cast %495 : vector<4x8x12xf32> to vector<32x12xf32>
    %c108 = arith.constant 108 : index
    %c0_558 = arith.constant 0 : index
    %497 = vector.load %arg6[%c108, %c0_558] : memref<300x16xf32, #tpu.memory_space<vmem>>, vector<12x16xf32>
    %cst_559 = arith.constant dense<0.000000e+00> : vector<32x16xf32>
    %498 = tpu.matmul %496, %497, %cst_559 {dimension_numbers = #tpu.dot_dimension_numbers<[1], [0], [0], [1], [0, 0, 1, 1], [], []>} : vector<32x12xf32>, vector<12x16xf32>, vector<32x16xf32> -> vector<32x16xf32>
    %499 = arith.addf %494, %498 : vector<32x16xf32>
    %c2_560 = arith.constant 2 : index
    %c0_561 = arith.constant 0 : index
    %c0_562 = arith.constant 0 : index
    %500 = vector.load %arg17[%c2_560, %c0_561, %c0_562] : memref<8x12x12xf32, #tpu.memory_space<vmem>>, vector<4x8x12xf32>
    %501 = vector.shape_cast %500 : vector<4x8x12xf32> to vector<32x12xf32>
    %c120_563 = arith.constant 120 : index
    %c0_564 = arith.constant 0 : index
    %502 = vector.load %arg6[%c120_563, %c0_564] : memref<300x16xf32, #tpu.memory_space<vmem>>, vector<12x16xf32>
    %cst_565 = arith.constant dense<0.000000e+00> : vector<32x16xf32>
    %503 = tpu.matmul %501, %502, %cst_565 {dimension_numbers = #tpu.dot_dimension_numbers<[1], [0], [0], [1], [0, 0, 1, 1], [], []>} : vector<32x12xf32>, vector<12x16xf32>, vector<32x16xf32> -> vector<32x16xf32>
    %504 = arith.addf %499, %503 : vector<32x16xf32>
    %c2_566 = arith.constant 2 : index
    %c1_567 = arith.constant 1 : index
    %c0_568 = arith.constant 0 : index
    %505 = vector.load %arg17[%c2_566, %c1_567, %c0_568] : memref<8x12x12xf32, #tpu.memory_space<vmem>>, vector<4x8x12xf32>
    %506 = vector.shape_cast %505 : vector<4x8x12xf32> to vector<32x12xf32>
    %c132 = arith.constant 132 : index
    %c0_569 = arith.constant 0 : index
    %507 = vector.load %arg6[%c132, %c0_569] : memref<300x16xf32, #tpu.memory_space<vmem>>, vector<12x16xf32>
    %cst_570 = arith.constant dense<0.000000e+00> : vector<32x16xf32>
    %508 = tpu.matmul %506, %507, %cst_570 {dimension_numbers = #tpu.dot_dimension_numbers<[1], [0], [0], [1], [0, 0, 1, 1], [], []>} : vector<32x12xf32>, vector<12x16xf32>, vector<32x16xf32> -> vector<32x16xf32>
    %509 = arith.addf %504, %508 : vector<32x16xf32>
    %c2_571 = arith.constant 2 : index
    %c2_572 = arith.constant 2 : index
    %c0_573 = arith.constant 0 : index
    %510 = vector.load %arg17[%c2_571, %c2_572, %c0_573] : memref<8x12x12xf32, #tpu.memory_space<vmem>>, vector<4x8x12xf32>
    %511 = vector.shape_cast %510 : vector<4x8x12xf32> to vector<32x12xf32>
    %c144_574 = arith.constant 144 : index
    %c0_575 = arith.constant 0 : index
    %512 = vector.load %arg6[%c144_574, %c0_575] : memref<300x16xf32, #tpu.memory_space<vmem>>, vector<12x16xf32>
    %cst_576 = arith.constant dense<0.000000e+00> : vector<32x16xf32>
    %513 = tpu.matmul %511, %512, %cst_576 {dimension_numbers = #tpu.dot_dimension_numbers<[1], [0], [0], [1], [0, 0, 1, 1], [], []>} : vector<32x12xf32>, vector<12x16xf32>, vector<32x16xf32> -> vector<32x16xf32>
    %514 = arith.addf %509, %513 : vector<32x16xf32>
    %c2_577 = arith.constant 2 : index
    %c3_578 = arith.constant 3 : index
    %c0_579 = arith.constant 0 : index
    %515 = vector.load %arg17[%c2_577, %c3_578, %c0_579] : memref<8x12x12xf32, #tpu.memory_space<vmem>>, vector<4x8x12xf32>
    %516 = vector.shape_cast %515 : vector<4x8x12xf32> to vector<32x12xf32>
    %c156 = arith.constant 156 : index
    %c0_580 = arith.constant 0 : index
    %517 = vector.load %arg6[%c156, %c0_580] : memref<300x16xf32, #tpu.memory_space<vmem>>, vector<12x16xf32>
    %cst_581 = arith.constant dense<0.000000e+00> : vector<32x16xf32>
    %518 = tpu.matmul %516, %517, %cst_581 {dimension_numbers = #tpu.dot_dimension_numbers<[1], [0], [0], [1], [0, 0, 1, 1], [], []>} : vector<32x12xf32>, vector<12x16xf32>, vector<32x16xf32> -> vector<32x16xf32>
    %519 = arith.addf %514, %518 : vector<32x16xf32>
    %c2_582 = arith.constant 2 : index
    %c4_583 = arith.constant 4 : index
    %c0_584 = arith.constant 0 : index
    %520 = vector.load %arg17[%c2_582, %c4_583, %c0_584] : memref<8x12x12xf32, #tpu.memory_space<vmem>>, vector<4x8x12xf32>
    %521 = vector.shape_cast %520 : vector<4x8x12xf32> to vector<32x12xf32>
    %c168_585 = arith.constant 168 : index
    %c0_586 = arith.constant 0 : index
    %522 = vector.load %arg6[%c168_585, %c0_586] : memref<300x16xf32, #tpu.memory_space<vmem>>, vector<12x16xf32>
    %cst_587 = arith.constant dense<0.000000e+00> : vector<32x16xf32>
    %523 = tpu.matmul %521, %522, %cst_587 {dimension_numbers = #tpu.dot_dimension_numbers<[1], [0], [0], [1], [0, 0, 1, 1], [], []>} : vector<32x12xf32>, vector<12x16xf32>, vector<32x16xf32> -> vector<32x16xf32>
    %524 = arith.addf %519, %523 : vector<32x16xf32>
    %c3_588 = arith.constant 3 : index
    %c0_589 = arith.constant 0 : index
    %c0_590 = arith.constant 0 : index
    %525 = vector.load %arg17[%c3_588, %c0_589, %c0_590] : memref<8x12x12xf32, #tpu.memory_space<vmem>>, vector<4x8x12xf32>
    %526 = vector.shape_cast %525 : vector<4x8x12xf32> to vector<32x12xf32>
    %c180 = arith.constant 180 : index
    %c0_591 = arith.constant 0 : index
    %527 = vector.load %arg6[%c180, %c0_591] : memref<300x16xf32, #tpu.memory_space<vmem>>, vector<12x16xf32>
    %cst_592 = arith.constant dense<0.000000e+00> : vector<32x16xf32>
    %528 = tpu.matmul %526, %527, %cst_592 {dimension_numbers = #tpu.dot_dimension_numbers<[1], [0], [0], [1], [0, 0, 1, 1], [], []>} : vector<32x12xf32>, vector<12x16xf32>, vector<32x16xf32> -> vector<32x16xf32>
    %529 = arith.addf %524, %528 : vector<32x16xf32>
    %c3_593 = arith.constant 3 : index
    %c1_594 = arith.constant 1 : index
    %c0_595 = arith.constant 0 : index
    %530 = vector.load %arg17[%c3_593, %c1_594, %c0_595] : memref<8x12x12xf32, #tpu.memory_space<vmem>>, vector<4x8x12xf32>
    %531 = vector.shape_cast %530 : vector<4x8x12xf32> to vector<32x12xf32>
    %c192_596 = arith.constant 192 : index
    %c0_597 = arith.constant 0 : index
    %532 = vector.load %arg6[%c192_596, %c0_597] : memref<300x16xf32, #tpu.memory_space<vmem>>, vector<12x16xf32>
    %cst_598 = arith.constant dense<0.000000e+00> : vector<32x16xf32>
    %533 = tpu.matmul %531, %532, %cst_598 {dimension_numbers = #tpu.dot_dimension_numbers<[1], [0], [0], [1], [0, 0, 1, 1], [], []>} : vector<32x12xf32>, vector<12x16xf32>, vector<32x16xf32> -> vector<32x16xf32>
    %534 = arith.addf %529, %533 : vector<32x16xf32>
    %c3_599 = arith.constant 3 : index
    %c2_600 = arith.constant 2 : index
    %c0_601 = arith.constant 0 : index
    %535 = vector.load %arg17[%c3_599, %c2_600, %c0_601] : memref<8x12x12xf32, #tpu.memory_space<vmem>>, vector<4x8x12xf32>
    %536 = vector.shape_cast %535 : vector<4x8x12xf32> to vector<32x12xf32>
    %c204 = arith.constant 204 : index
    %c0_602 = arith.constant 0 : index
    %537 = vector.load %arg6[%c204, %c0_602] : memref<300x16xf32, #tpu.memory_space<vmem>>, vector<12x16xf32>
    %cst_603 = arith.constant dense<0.000000e+00> : vector<32x16xf32>
    %538 = tpu.matmul %536, %537, %cst_603 {dimension_numbers = #tpu.dot_dimension_numbers<[1], [0], [0], [1], [0, 0, 1, 1], [], []>} : vector<32x12xf32>, vector<12x16xf32>, vector<32x16xf32> -> vector<32x16xf32>
    %539 = arith.addf %534, %538 : vector<32x16xf32>
    %c3_604 = arith.constant 3 : index
    %c3_605 = arith.constant 3 : index
    %c0_606 = arith.constant 0 : index
    %540 = vector.load %arg17[%c3_604, %c3_605, %c0_606] : memref<8x12x12xf32, #tpu.memory_space<vmem>>, vector<4x8x12xf32>
    %541 = vector.shape_cast %540 : vector<4x8x12xf32> to vector<32x12xf32>
    %c216 = arith.constant 216 : index
    %c0_607 = arith.constant 0 : index
    %542 = vector.load %arg6[%c216, %c0_607] : memref<300x16xf32, #tpu.memory_space<vmem>>, vector<12x16xf32>
    %cst_608 = arith.constant dense<0.000000e+00> : vector<32x16xf32>
    %543 = tpu.matmul %541, %542, %cst_608 {dimension_numbers = #tpu.dot_dimension_numbers<[1], [0], [0], [1], [0, 0, 1, 1], [], []>} : vector<32x12xf32>, vector<12x16xf32>, vector<32x16xf32> -> vector<32x16xf32>
    %544 = arith.addf %539, %543 : vector<32x16xf32>
    %c3_609 = arith.constant 3 : index
    %c4_610 = arith.constant 4 : index
    %c0_611 = arith.constant 0 : index
    %545 = vector.load %arg17[%c3_609, %c4_610, %c0_611] : memref<8x12x12xf32, #tpu.memory_space<vmem>>, vector<4x8x12xf32>
    %546 = vector.shape_cast %545 : vector<4x8x12xf32> to vector<32x12xf32>
    %c228 = arith.constant 228 : index
    %c0_612 = arith.constant 0 : index
    %547 = vector.load %arg6[%c228, %c0_612] : memref<300x16xf32, #tpu.memory_space<vmem>>, vector<12x16xf32>
    %cst_613 = arith.constant dense<0.000000e+00> : vector<32x16xf32>
    %548 = tpu.matmul %546, %547, %cst_613 {dimension_numbers = #tpu.dot_dimension_numbers<[1], [0], [0], [1], [0, 0, 1, 1], [], []>} : vector<32x12xf32>, vector<12x16xf32>, vector<32x16xf32> -> vector<32x16xf32>
    %549 = arith.addf %544, %548 : vector<32x16xf32>
    %c4_614 = arith.constant 4 : index
    %c0_615 = arith.constant 0 : index
    %c0_616 = arith.constant 0 : index
    %550 = vector.load %arg17[%c4_614, %c0_615, %c0_616] : memref<8x12x12xf32, #tpu.memory_space<vmem>>, vector<4x8x12xf32>
    %551 = vector.shape_cast %550 : vector<4x8x12xf32> to vector<32x12xf32>
    %c240 = arith.constant 240 : index
    %c0_617 = arith.constant 0 : index
    %552 = vector.load %arg6[%c240, %c0_617] : memref<300x16xf32, #tpu.memory_space<vmem>>, vector<12x16xf32>
    %cst_618 = arith.constant dense<0.000000e+00> : vector<32x16xf32>
    %553 = tpu.matmul %551, %552, %cst_618 {dimension_numbers = #tpu.dot_dimension_numbers<[1], [0], [0], [1], [0, 0, 1, 1], [], []>} : vector<32x12xf32>, vector<12x16xf32>, vector<32x16xf32> -> vector<32x16xf32>
    %554 = arith.addf %549, %553 : vector<32x16xf32>
    %c4_619 = arith.constant 4 : index
    %c1_620 = arith.constant 1 : index
    %c0_621 = arith.constant 0 : index
    %555 = vector.load %arg17[%c4_619, %c1_620, %c0_621] : memref<8x12x12xf32, #tpu.memory_space<vmem>>, vector<4x8x12xf32>
    %556 = vector.shape_cast %555 : vector<4x8x12xf32> to vector<32x12xf32>
    %c252 = arith.constant 252 : index
    %c0_622 = arith.constant 0 : index
    %557 = vector.load %arg6[%c252, %c0_622] : memref<300x16xf32, #tpu.memory_space<vmem>>, vector<12x16xf32>
    %cst_623 = arith.constant dense<0.000000e+00> : vector<32x16xf32>
    %558 = tpu.matmul %556, %557, %cst_623 {dimension_numbers = #tpu.dot_dimension_numbers<[1], [0], [0], [1], [0, 0, 1, 1], [], []>} : vector<32x12xf32>, vector<12x16xf32>, vector<32x16xf32> -> vector<32x16xf32>
    %559 = arith.addf %554, %558 : vector<32x16xf32>
    %c4_624 = arith.constant 4 : index
    %c2_625 = arith.constant 2 : index
    %c0_626 = arith.constant 0 : index
    %560 = vector.load %arg17[%c4_624, %c2_625, %c0_626] : memref<8x12x12xf32, #tpu.memory_space<vmem>>, vector<4x8x12xf32>
    %561 = vector.shape_cast %560 : vector<4x8x12xf32> to vector<32x12xf32>
    %c264 = arith.constant 264 : index
    %c0_627 = arith.constant 0 : index
    %562 = vector.load %arg6[%c264, %c0_627] : memref<300x16xf32, #tpu.memory_space<vmem>>, vector<12x16xf32>
    %cst_628 = arith.constant dense<0.000000e+00> : vector<32x16xf32>
    %563 = tpu.matmul %561, %562, %cst_628 {dimension_numbers = #tpu.dot_dimension_numbers<[1], [0], [0], [1], [0, 0, 1, 1], [], []>} : vector<32x12xf32>, vector<12x16xf32>, vector<32x16xf32> -> vector<32x16xf32>
    %564 = arith.addf %559, %563 : vector<32x16xf32>
    %c4_629 = arith.constant 4 : index
    %c3_630 = arith.constant 3 : index
    %c0_631 = arith.constant 0 : index
    %565 = vector.load %arg17[%c4_629, %c3_630, %c0_631] : memref<8x12x12xf32, #tpu.memory_space<vmem>>, vector<4x8x12xf32>
    %566 = vector.shape_cast %565 : vector<4x8x12xf32> to vector<32x12xf32>
    %c276 = arith.constant 276 : index
    %c0_632 = arith.constant 0 : index
    %567 = vector.load %arg6[%c276, %c0_632] : memref<300x16xf32, #tpu.memory_space<vmem>>, vector<12x16xf32>
    %cst_633 = arith.constant dense<0.000000e+00> : vector<32x16xf32>
    %568 = tpu.matmul %566, %567, %cst_633 {dimension_numbers = #tpu.dot_dimension_numbers<[1], [0], [0], [1], [0, 0, 1, 1], [], []>} : vector<32x12xf32>, vector<12x16xf32>, vector<32x16xf32> -> vector<32x16xf32>
    %569 = arith.addf %564, %568 : vector<32x16xf32>
    %c4_634 = arith.constant 4 : index
    %c4_635 = arith.constant 4 : index
    %c0_636 = arith.constant 0 : index
    %570 = vector.load %arg17[%c4_634, %c4_635, %c0_636] : memref<8x12x12xf32, #tpu.memory_space<vmem>>, vector<4x8x12xf32>
    %571 = vector.shape_cast %570 : vector<4x8x12xf32> to vector<32x12xf32>
    %c288 = arith.constant 288 : index
    %c0_637 = arith.constant 0 : index
    %572 = vector.load %arg6[%c288, %c0_637] : memref<300x16xf32, #tpu.memory_space<vmem>>, vector<12x16xf32>
    %cst_638 = arith.constant dense<0.000000e+00> : vector<32x16xf32>
    %573 = tpu.matmul %571, %572, %cst_638 {dimension_numbers = #tpu.dot_dimension_numbers<[1], [0], [0], [1], [0, 0, 1, 1], [], []>} : vector<32x12xf32>, vector<12x16xf32>, vector<32x16xf32> -> vector<32x16xf32>
    %574 = arith.addf %569, %573 : vector<32x16xf32>
    %cst_639 = arith.constant 0.000000e+00 : f32
    %575 = vector.broadcast %cst_639 : f32 to vector<32x16xf32>
    %576 = arith.maximumf %574, %575 : vector<32x16xf32>
    %577 = vector.shape_cast %576 : vector<32x16xf32> to vector<4x8x16xf32>
    %c0_640 = arith.constant 0 : index
    %c0_641 = arith.constant 0 : index
    %c0_642 = arith.constant 0 : index
    %578 = vector.load %arg18[%c0_640, %c0_641, %c0_642] : memref<4x8x16xf32, #tpu.memory_space<vmem>>, vector<4x8x16xf32>
    tpu.vector_store %arg18[%c0_640, %c0_641, %c0_642], %577 {strides = array<i32>} : memref<4x8x16xf32, #tpu.memory_space<vmem>>, vector<4x8x16xf32>,
    %c0_643 = arith.constant 0 : index
    %c0_644 = arith.constant 0 : index
    %c0_645 = arith.constant 0 : index
    %579 = tpu.strided_load %arg18[%c0_643, %c0_644, %c0_645] {strides = array<i32: 1, 2, 1>} : memref<4x8x16xf32, #tpu.memory_space<vmem>>, vector<4x2x16xf32>
    %c0_646 = arith.constant 0 : index
    %c1_647 = arith.constant 1 : index
    %c0_648 = arith.constant 0 : index
    %580 = tpu.strided_load %arg18[%c0_646, %c1_647, %c0_648] {strides = array<i32: 1, 2, 1>} : memref<4x8x16xf32, #tpu.memory_space<vmem>>, vector<4x2x16xf32>
    %581 = arith.maximumf %579, %580 : vector<4x2x16xf32>
    %582 = vector.shape_cast %581 : vector<4x2x16xf32> to vector<2x2x2x16xf32>
    %583 = vector.extract_strided_slice %582 {offsets = [0, 0, 0, 0], sizes = [2, 1, 2, 16], strides = [1, 1, 1, 1]} : vector<2x2x2x16xf32> to vector<2x1x2x16xf32>
    %584 = vector.shape_cast %583 : vector<2x1x2x16xf32> to vector<2x2x16xf32>
    %585 = vector.extract_strided_slice %582 {offsets = [0, 1, 0, 0], sizes = [2, 1, 2, 16], strides = [1, 1, 1, 1]} : vector<2x2x2x16xf32> to vector<2x1x2x16xf32>
    %586 = vector.shape_cast %585 : vector<2x1x2x16xf32> to vector<2x2x16xf32>
    %587 = arith.maximumf %584, %586 : vector<2x2x16xf32>
    %c0_649 = arith.constant 0 : index
    %c0_650 = arith.constant 0 : index
    %588 = vector.load %arg9[%c0_649, %c0_650] : memref<1x64xf32, #tpu.memory_space<vmem>>, vector<1x64xf32>
    %589 = vector.extract_strided_slice %587 {offsets = [0, 0, 0], sizes = [1, 1, 16], strides = [1, 1, 1]} : vector<2x2x16xf32> to vector<1x1x16xf32>
    %590 = vector.shape_cast %589 : vector<1x1x16xf32> to vector<1x16xf32>
    %c0_651 = arith.constant 0 : index
    %c0_652 = arith.constant 0 : index
    %591 = vector.load %arg8[%c0_651, %c0_652] : memref<64x64xf32, #tpu.memory_space<vmem>>, vector<16x64xf32>
    %cst_653 = arith.constant dense<0.000000e+00> : vector<1x64xf32>
    %592 = tpu.matmul %590, %591, %cst_653 {dimension_numbers = #tpu.dot_dimension_numbers<[1], [0], [0], [1], [0, 0, 1, 1], [], []>} : vector<1x16xf32>, vector<16x64xf32>, vector<1x64xf32> -> vector<1x64xf32>
    %593 = arith.addf %588, %592 : vector<1x64xf32>
    %594 = vector.extract_strided_slice %587 {offsets = [0, 1, 0], sizes = [1, 1, 16], strides = [1, 1, 1]} : vector<2x2x16xf32> to vector<1x1x16xf32>
    %595 = vector.shape_cast %594 : vector<1x1x16xf32> to vector<1x16xf32>
    %c16_654 = arith.constant 16 : index
    %c0_655 = arith.constant 0 : index
    %596 = vector.load %arg8[%c16_654, %c0_655] : memref<64x64xf32, #tpu.memory_space<vmem>>, vector<16x64xf32>
    %cst_656 = arith.constant dense<0.000000e+00> : vector<1x64xf32>
    %597 = tpu.matmul %595, %596, %cst_656 {dimension_numbers = #tpu.dot_dimension_numbers<[1], [0], [0], [1], [0, 0, 1, 1], [], []>} : vector<1x16xf32>, vector<16x64xf32>, vector<1x64xf32> -> vector<1x64xf32>
    %598 = arith.addf %593, %597 : vector<1x64xf32>
    %599 = vector.extract_strided_slice %587 {offsets = [1, 0, 0], sizes = [1, 1, 16], strides = [1, 1, 1]} : vector<2x2x16xf32> to vector<1x1x16xf32>
    %600 = vector.shape_cast %599 : vector<1x1x16xf32> to vector<1x16xf32>
    %c32_657 = arith.constant 32 : index
    %c0_658 = arith.constant 0 : index
    %601 = vector.load %arg8[%c32_657, %c0_658] : memref<64x64xf32, #tpu.memory_space<vmem>>, vector<16x64xf32>
    %cst_659 = arith.constant dense<0.000000e+00> : vector<1x64xf32>
    %602 = tpu.matmul %600, %601, %cst_659 {dimension_numbers = #tpu.dot_dimension_numbers<[1], [0], [0], [1], [0, 0, 1, 1], [], []>} : vector<1x16xf32>, vector<16x64xf32>, vector<1x64xf32> -> vector<1x64xf32>
    %603 = arith.addf %598, %602 : vector<1x64xf32>
    %604 = vector.extract_strided_slice %587 {offsets = [1, 1, 0], sizes = [1, 1, 16], strides = [1, 1, 1]} : vector<2x2x16xf32> to vector<1x1x16xf32>
    %605 = vector.shape_cast %604 : vector<1x1x16xf32> to vector<1x16xf32>
    %c48_660 = arith.constant 48 : index
    %c0_661 = arith.constant 0 : index
    %606 = vector.load %arg8[%c48_660, %c0_661] : memref<64x64xf32, #tpu.memory_space<vmem>>, vector<16x64xf32>
    %cst_662 = arith.constant dense<0.000000e+00> : vector<1x64xf32>
    %607 = tpu.matmul %605, %606, %cst_662 {dimension_numbers = #tpu.dot_dimension_numbers<[1], [0], [0], [1], [0, 0, 1, 1], [], []>} : vector<1x16xf32>, vector<16x64xf32>, vector<1x64xf32> -> vector<1x64xf32>
    %608 = arith.addf %603, %607 : vector<1x64xf32>
    %cst_663 = arith.constant 0.000000e+00 : f32
    %609 = vector.broadcast %cst_663 : f32 to vector<1x64xf32>
    %610 = arith.maximumf %608, %609 : vector<1x64xf32>
    %c0_664 = arith.constant 0 : index
    %c0_665 = arith.constant 0 : index
    %611 = vector.load %arg10[%c0_664, %c0_665] : memref<64x32xf32, #tpu.memory_space<vmem>>, vector<64x32xf32>
    %cst_666 = arith.constant dense<0.000000e+00> : vector<1x32xf32>
    %612 = tpu.matmul %610, %611, %cst_666 {dimension_numbers = #tpu.dot_dimension_numbers<[1], [0], [0], [1], [0, 0, 1, 1], [], []>} : vector<1x64xf32>, vector<64x32xf32>, vector<1x32xf32> -> vector<1x32xf32>
    %c0_667 = arith.constant 0 : index
    %c0_668 = arith.constant 0 : index
    %613 = vector.load %arg11[%c0_667, %c0_668] : memref<1x32xf32, #tpu.memory_space<vmem>>, vector<1x32xf32>
    %614 = arith.addf %612, %613 : vector<1x32xf32>
    %615 = vector.shape_cast %614 : vector<1x32xf32> to vector<1x1x32xf32>
    %c0_669 = arith.constant 0 : index
    %c0_670 = arith.constant 0 : index
    %c0_671 = arith.constant 0 : index
    %616 = vector.load %arg12[%c0_669, %c0_670, %c0_671] : memref<1x1x32xf32, #tpu.memory_space<vmem>>, vector<1x1x32xf32>
    tpu.vector_store %arg12[%c0_669, %c0_670, %c0_671], %615 {strides = array<i32>} : memref<1x1x32xf32, #tpu.memory_space<vmem>>, vector<1x1x32xf32>,
    return
  }
  func.func @transform_0(%arg0: i32) -> (i32, i32, i32, i32) {
    %c0_i32 = arith.constant 0 : i32
    %c0_i32_0 = arith.constant 0 : i32
    %c0_i32_1 = arith.constant 0 : i32
    %c0_i32_2 = arith.constant 0 : i32
    return %arg0, %c0_i32, %c0_i32_0, %c0_i32_1 : i32, i32, i32, i32
  }
  func.func @transform_1(%arg0: i32) -> (i32, i32) {
    %c0_i32 = arith.constant 0 : i32
    %c0_i32_0 = arith.constant 0 : i32
    %c0_i32_1 = arith.constant 0 : i32
    return %c0_i32, %c0_i32_0 : i32, i32
  }
  func.func @transform_2(%arg0: i32) -> (i32, i32) {
    %c0_i32 = arith.constant 0 : i32
    %c0_i32_0 = arith.constant 0 : i32
    %c0_i32_1 = arith.constant 0 : i32
    return %c0_i32, %c0_i32_0 : i32, i32
  }
  func.func @transform_3(%arg0: i32) -> (i32, i32) {
    %c0_i32 = arith.constant 0 : i32
    %c0_i32_0 = arith.constant 0 : i32
    %c0_i32_1 = arith.constant 0 : i32
    return %c0_i32, %c0_i32_0 : i32, i32
  }
  func.func @transform_4(%arg0: i32) -> (i32, i32) {
    %c0_i32 = arith.constant 0 : i32
    %c0_i32_0 = arith.constant 0 : i32
    %c0_i32_1 = arith.constant 0 : i32
    return %c0_i32, %c0_i32_0 : i32, i32
  }
  func.func @transform_5(%arg0: i32) -> (i32, i32) {
    %c0_i32 = arith.constant 0 : i32
    %c0_i32_0 = arith.constant 0 : i32
    %c0_i32_1 = arith.constant 0 : i32
    return %c0_i32, %c0_i32_0 : i32, i32
  }
  func.func @transform_6(%arg0: i32) -> (i32, i32) {
    %c0_i32 = arith.constant 0 : i32
    %c0_i32_0 = arith.constant 0 : i32
    %c0_i32_1 = arith.constant 0 : i32
    return %c0_i32, %c0_i32_0 : i32, i32
  }
  func.func @transform_7(%arg0: i32) -> (i32, i32) {
    %c0_i32 = arith.constant 0 : i32
    %c0_i32_0 = arith.constant 0 : i32
    %c0_i32_1 = arith.constant 0 : i32
    return %c0_i32, %c0_i32_0 : i32, i32
  }
  func.func @transform_8(%arg0: i32) -> (i32, i32) {
    %c0_i32 = arith.constant 0 : i32
    %c0_i32_0 = arith.constant 0 : i32
    %c0_i32_1 = arith.constant 0 : i32
    return %c0_i32, %c0_i32_0 : i32, i32
  }
  func.func @transform_9(%arg0: i32) -> (i32, i32) {
    %c0_i32 = arith.constant 0 : i32
    %c0_i32_0 = arith.constant 0 : i32
    %c0_i32_1 = arith.constant 0 : i32
    return %c0_i32, %c0_i32_0 : i32, i32
  }
  func.func @transform_10(%arg0: i32) -> (i32, i32) {
    %c0_i32 = arith.constant 0 : i32
    %c0_i32_0 = arith.constant 0 : i32
    %c0_i32_1 = arith.constant 0 : i32
    return %c0_i32, %c0_i32_0 : i32, i32
  }
  func.func @transform_11(%arg0: i32) -> (i32, i32, i32) {
    %c0_i32 = arith.constant 0 : i32
    %c0_i32_0 = arith.constant 0 : i32
    %c0_i32_1 = arith.constant 0 : i32
    return %arg0, %c0_i32, %c0_i32_0 : i32, i32, i32
  }
}

</mosaic_0001>

<bundles_post_ra>
// kernel: convolutional_network_forward.1
= control target key start
LH: loop header
LB: loop body
LE: loop exit
PB: predicated region body
PF: predicated region fallthrough
CT: control target
= control target key end

     0   :  { %s24913_s17 = smov 0   ;;  %s28904_s0 = inlined_call_operand.vmem [shape: f32[2,16,16,4], index: 0, kind: input, shape index: {}]   ;;  %s28905_s1 = inlined_call_operand.vmem [shape: f32[100,8], index: 1, kind: input, shape index: {}]   ;;  %s28906_s2 = inlined_call_operand.vmem [shape: f32[1,8], index: 2, kind: input, shape index: {}]   ;;  %s28907_s3 = inlined_call_operand.vmem [shape: f32[200,12], index: 3, kind: input, shape index: {}]   ;;  %s28908_s4 = inlined_call_operand.vmem [shape: f32[1,12], index: 4, kind: input, shape index: {}]   ;;  %s28909_s5 = inlined_call_operand.vmem [shape: f32[300,16], index: 5, kind: input, shape index: {}]   ;;  %s28910_s6 = inlined_call_operand.vmem [shape: f32[1,16], index: 6, kind: input, shape index: {}]   ;;  %s28911_s7 = inlined_call_operand.vmem [shape: f32[64,64], index: 7, kind: input, shape index: {}]   ;;  %s28912_s8 = inlined_call_operand.vmem [shape: f32[1,64], index: 8, kind: input, shape index: {}]   ;;  %s28913_s9 = inlined_call_operand.vmem [shape: f32[64,32], index: 9, kind: input, shape index: {}]   ;;  %s28914_s10 = inlined_call_operand.vmem [shape: f32[1,32], index: 10, kind: input, shape index: {}]   ;;  %s28915_s11 = inlined_call_operand.vmem [shape: f32[2,1,32], index: 11, kind: output, shape index: {}]  }
   0x1 LB: > { %s19159_s18 = sadd.s32 4294967295, %s24847_s17   ;;  %p19163_p0 = scmp.ge.s32.totalorder %s24847_s17, 1  ;;  %s24847_s17 = sphi %s24913_s17, %s21_s17  }
   0x2   : > { %p337_p1 = scmp.lt.s32.totalorder %s24847_s17, 3 }
   0x4   : > { %p338_p2 = pnand %p19163_p0, %p337_p1 }
   0x6   : > { %341 = sbr.rel (%p338_p2) target bundleno = 2633 (0xa49), region = 64 }
   0xd   : > { %v528_v0 = vld [vmem:[%s28905_s1] sm:$0xf]  ;;  %vm577_vm0 = vcmask 1043456   ;;  %v24927_v1 = vld [vmem:[%s28905_s1 + $0x8] sm:$0xf]  ;;  %vm383_vm1 = vcmask 31744  }
   0xe   : > { %21599 = vmatprep.subr.msk.mxu1 %vm577_vm0, %v528_v0  ;;  %21651 = vmatprep.subr.msk.mxu0 %vm577_vm0, %v24927_v1  ;;  %vm398_vm2 = vcmask 25600   ;;  %v24935_v2 = vld [vmem:[%s28905_s1 + $0x4] sm:$0xf]  ;;  %vm386_vm3 = vcmask 27648   ;;  %p24939_p3 = scmp.lt.s32.totalorder %s19159_s18, 1  ;;  %v28916_v3 = vmov 0.0  }
   0xf   : > { %21600 = vmatpush3.msk.msra.mxu1 %vm577_vm0, %v528_v0  ;;  %21652 = vmatpush3.msk.msra.mxu0 %vm577_vm0, %v24927_v1  ;;  %384 = vst.msk [vmem:[#allocation2] sm:$0xff] %vm383_vm1, %v28916_v3  ;;  %385 = vst.msk [vmem:[#allocation2 + $0x8] sm:$0xff] %vm383_vm1, %v28916_v3  ;;  %v1216_v4 = vld [vmem:[%s28905_s1 + $0xc] sm:$0xf]  ;;  %v1445_v19 = vld [vmem:[%s28905_s1 + $0x10] sm:$0xf] }
  0x10   : > { %388 = vst.msk [vmem:[#allocation2 + $0x18] sm:$0xff] %vm383_vm1, %v28916_v3  ;;  %389 = vst.msk [vmem:[#allocation2 + $0x20] sm:$0xff] %vm383_vm1, %v28916_v3  ;;  %21625 = vmatprep.subr.msk.mxu1 %vm577_vm0, %v24935_v2  ;;  %s29177_s18 = smov (!%p24939_p3, %s19159_s18), 1  ;;  %21677 = vmatprep.subr.msk.mxu0 %vm577_vm0, %v1216_v4  ;;  %v25152_v36 = vld [vmem:[%s28905_s1 + $0x14] sm:$0xf]  ;;  %vm6257_vm4 = vcmask 64512  }
  0x11   : > { %392 = vst.msk [vmem:[#allocation2 + $0x1b0] sm:$0xff] %vm383_vm1, %v28916_v3  ;;  %393 = vst.msk [vmem:[#allocation2 + $0x1b8] sm:$0xff] %vm383_vm1, %v28916_v3  ;;  %s20352_s28 = sshll.u32 %s29177_s18, 8  ;;  %vm12142_vm5 = vcmask 58368   ;;  %vm12133_vm6 = vcmask 60416   ;;  %vm24850_vm7 = vmmov 1   ;;  %s382_s14 = scalar_lea.vmem %s28915_s11, %s29177_s18 }
  0x12   : > { %395 = vst.msk [vmem:[#allocation2 + $0x1c8] sm:$0xff] %vm383_vm1, %v28916_v3  ;;  %396 = vst.msk [vmem:[#allocation2 + $0x1d0] sm:$0xff] %vm383_vm1, %v28916_v3  ;;  %s25066_s12 = scalar_lea.vmem %s28904_s0, %s20352_s28  ;;  %vm15845_vm9 = vcmask 97280   ;;  %vm15898_vm10 = vcmask 93184   ;;  %vm15907_vm11 = vcmask 91136   ;;  %vm15916_vm12 = vcmask 95232  }
  0x13   : > { %401 = vst.msk [vmem:[#allocation2 + $0x30] sm:$0x3] %vm398_vm2, %v28916_v3  ;;  %402 = vst.msk [vmem:[#allocation2 + $0x48] sm:$0x3] %vm398_vm2, %v28916_v3  ;;  %v439_v5 = vld [vmem:[%s25066_s12] sm:$0xff]  ;;  %v440_v6 = vld [vmem:[%s25066_s12 + $0x8] sm:$0xff] }
  0x14   : > { %403 = vst.msk [vmem:[#allocation2 + $0x60] sm:$0x3] %vm398_vm2, %v28916_v3  ;;  %404 = vst.msk [vmem:[#allocation2 + $0x78] sm:$0x3] %vm398_vm2, %v28916_v3  ;;  %v441_v7 = vld [vmem:[%s25066_s12 + $0x10] sm:$0xff]  ;;  %v442_v8 = vld [vmem:[%s25066_s12 + $0x18] sm:$0xff] }
  0x15   : > { %405 = vst.msk [vmem:[#allocation2 + $0x90] sm:$0x3] %vm398_vm2, %v28916_v3  ;;  %406 = vst.msk [vmem:[#allocation2 + $0xa8] sm:$0x3] %vm398_vm2, %v28916_v3  ;;  %v443_v9 = vld [vmem:[%s25066_s12 + $0x20] sm:$0xff]  ;;  %v444_v10 = vld [vmem:[%s25066_s12 + $0x28] sm:$0xff] }
  0x16   : > { %407 = vst.msk [vmem:[#allocation2 + $0xc0] sm:$0x3] %vm398_vm2, %v28916_v3  ;;  %408 = vst.msk [vmem:[#allocation2 + $0xd8] sm:$0x3] %vm398_vm2, %v28916_v3  ;;  %v971_v11 = vld [vmem:[#allocation2 + $0x2] sm:$0xff]  ;;  %v445_v20 = vld [vmem:[%s25066_s12 + $0x30] sm:$0xff] }
  0x17   : > { %409 = vst.msk [vmem:[#allocation2 + $0xf0] sm:$0x3] %vm398_vm2, %v28916_v3  ;;  %410 = vst.msk [vmem:[#allocation2 + $0x108] sm:$0x3] %vm398_vm2, %v28916_v3  ;;  %v513_v13 = vld [vmem:[#allocation2 + $0x8] sm:$0xff]  ;;  %21653 = vmatprep.mubr.msk.f32.mxu0 %vm383_vm1, %v971_v11  ;;  %v25081_v15 = vld [vmem:[#allocation2 + $0x1a] sm:$0xff] }
  0x18   : > { %411 = vst.msk [vmem:[#allocation2 + $0x120] sm:$0x3] %vm398_vm2, %v28916_v3  ;;  %412 = vst.msk [vmem:[#allocation2 + $0x138] sm:$0x3] %vm398_vm2, %v28916_v3  ;;  %v25092_v18 = vld [vmem:[#allocation2 + $0x20] sm:$0xff]  ;;  %v446_v21 = vld [vmem:[%s25066_s12 + $0x38] sm:$0xff] }
  0x19   : > { %413 = vst.msk [vmem:[#allocation2 + $0x150] sm:$0x3] %vm398_vm2, %v28916_v3  ;;  %414 = vst.msk [vmem:[#allocation2 + $0x168] sm:$0x3] %vm398_vm2, %v28916_v3  ;;  %v447_v22 = vld [vmem:[%s25066_s12 + $0x40] sm:$0xff]  ;;  %v448_v23 = vld [vmem:[%s25066_s12 + $0x48] sm:$0xff] }
  0x1a   : > { %415 = vst.msk [vmem:[#allocation2 + $0x180] sm:$0x3] %vm398_vm2, %v28916_v3  ;;  %416 = vst.msk [vmem:[#allocation2 + $0x198] sm:$0x3] %vm398_vm2, %v28916_v3  ;;  %v449_v24 = vld [vmem:[%s25066_s12 + $0x50] sm:$0xff]  ;;  %v450_v25 = vld [vmem:[%s25066_s12 + $0x58] sm:$0xff] }
  0x1b   : > { %421 = vst.msk [vmem:[#allocation2 + $0x42] sm:$0x3] %vm398_vm2, %v28916_v3  ;;  %422 = vst.msk [vmem:[#allocation2 + $0x5a] sm:$0x3] %vm398_vm2, %v28916_v3  ;;  %v1200_v30 = vld [vmem:[#allocation2 + $0x3] sm:$0xff]  ;;  %v25144_v34 = vld [vmem:[#allocation2 + $0x1b] sm:$0xff] }
  0x1c   : > { %423 = vst.msk [vmem:[#allocation2 + $0x72] sm:$0x3] %vm398_vm2, %v28916_v3  ;;  %424 = vst.msk [vmem:[#allocation2 + $0x8a] sm:$0x3] %vm398_vm2, %v28916_v3  ;;  %v451_v53 = vld [vmem:[%s25066_s12 + $0x60] sm:$0xff]  ;;  %v452_v55 = vld [vmem:[%s25066_s12 + $0x68] sm:$0xff] }
  0x1d   : > { %425 = vst.msk [vmem:[#allocation2 + $0xa2] sm:$0x3] %vm398_vm2, %v28916_v3  ;;  %426 = vst.msk [vmem:[#allocation2 + $0xba] sm:$0x3] %vm398_vm2, %v28916_v3  ;;  %v453_v56 = vld [vmem:[%s25066_s12 + $0x70] sm:$0xff]  ;;  %v454_v57 = vld [vmem:[%s25066_s12 + $0x78] sm:$0xff] }
  0x1e   : > { %427 = vst.msk [vmem:[#allocation2 + $0xd2] sm:$0x3] %vm398_vm2, %v28916_v3  ;;  %428 = vst.msk [vmem:[#allocation2 + $0xea] sm:$0x3] %vm398_vm2, %v28916_v3  ;;  %v455_v60 = vld [vmem:[%s25066_s12 + $0x80] sm:$0xff]  ;;  %v456_v61 = vld [vmem:[%s25066_s12 + $0x88] sm:$0xff] }
  0x1f   : > { %429 = vst.msk [vmem:[#allocation2 + $0x102] sm:$0x3] %vm398_vm2, %v28916_v3  ;;  %430 = vst.msk [vmem:[#allocation2 + $0x11a] sm:$0x3] %vm398_vm2, %v28916_v3  ;;  %v457_v62 = vld [vmem:[%s25066_s12 + $0x90] sm:$0xff]  ;;  %v458_v0 = vld [vmem:[%s25066_s12 + $0x98] sm:$0xff] }
  0x20   : > { %431 = vst.msk [vmem:[#allocation2 + $0x132] sm:$0x3] %vm398_vm2, %v28916_v3  ;;  %432 = vst.msk [vmem:[#allocation2 + $0x14a] sm:$0x3] %vm398_vm2, %v28916_v3  ;;  %v25264_v11 = vld [vmem:[%s28905_s1] sm:$0xf] }
  0x21   : > { %433 = vst.msk [vmem:[#allocation2 + $0x162] sm:$0x3] %vm398_vm2, %v28916_v3  ;;  %434 = vst.msk [vmem:[#allocation2 + $0x17a] sm:$0x3] %vm398_vm2, %v28916_v3  ;;  %vm24852_vm13 = vmmov 0   ;;  %vm18695_vm14 = vcmask 130048  }
  0x22   : > { %435 = vst.msk [vmem:[#allocation2 + $0x192] sm:$0x3] %vm398_vm2, %v28916_v3  ;;  %436 = vst.msk [vmem:[#allocation2 + $0x1aa] sm:$0x3] %vm398_vm2, %v28916_v3  ;;  %vm19036_vm15 = vcmask 523264  }
  0x23   : > { %387 = vst.msk [vmem:[#allocation2 + $0x10] sm:$0xf] %vm386_vm3, %v28916_v3  ;;  %390 = vst.msk [vmem:[#allocation2 + $0x28] sm:$0xf] %vm386_vm3, %v28916_v3 }
  0x24   : > { %394 = vst.msk [vmem:[#allocation2 + $0x1c0] sm:$0xf] %vm386_vm3, %v28916_v3  ;;  %397 = vst.msk [vmem:[#allocation2 + $0x1d8] sm:$0xf] %vm386_vm3, %v28916_v3 }
  0x25   : > { %399 = vst.msk [vmem:[#allocation2] sm:$0x3] %vm398_vm2, %v28916_v3  ;;  %400 = vst.msk [vmem:[#allocation2 + $0x18] sm:$0x3] %vm398_vm2, %v28916_v3 }
  0x26   : > { %417 = vst.msk [vmem:[#allocation2 + $0x1b0] sm:$0x3] %vm398_vm2, %v28916_v3  ;;  %418 = vst.msk [vmem:[#allocation2 + $0x1c8] sm:$0x3] %vm398_vm2, %v28916_v3 }
  0x27   : > { %419 = vst.msk [vmem:[#allocation2 + $0x12] sm:$0x3] %vm398_vm2, %v28916_v3  ;;  %420 = vst.msk [vmem:[#allocation2 + $0x2a] sm:$0x3] %vm398_vm2, %v28916_v3 }
  0x28   : > { %437 = vst.msk [vmem:[#allocation2 + $0x1c2] sm:$0x3] %vm398_vm2, %v28916_v3  ;;  %438 = vst.msk [vmem:[#allocation2 + $0x1da] sm:$0x3] %vm398_vm2, %v28916_v3 }
  0x29   : > { %472 = vst.msk [vmem:[#allocation2 + $0x32] sm:$0xff] %vm383_vm1, %v439_v5  ;;  %473 = vst.msk [vmem:[#allocation2 + $0x3a] sm:$0xff] %vm383_vm1, %v440_v6  ;;  %v461_v5 = vld [vmem:[%s25066_s12 + $0xb0] sm:$0xff]  ;;  %v462_v6 = vld [vmem:[%s25066_s12 + $0xb8] sm:$0xff] }
  0x2a   : > { %474 = vst.msk [vmem:[#allocation2 + $0x4a] sm:$0xff] %vm383_vm1, %v441_v7  ;;  %v972_v12 = vld [vmem:[#allocation2 + $0xa] sm:$0xff]  ;;  %475 = vst.msk [vmem:[#allocation2 + $0x52] sm:$0xff] %vm383_vm1, %v442_v8  ;;  %v25090_v17 = vld [vmem:[#allocation2 + $0x22] sm:$0xff] }
  0x2b   : > { %476 = vst.msk [vmem:[#allocation2 + $0x62] sm:$0xff] %vm383_vm1, %v443_v9  ;;  %477 = vst.msk [vmem:[#allocation2 + $0x6a] sm:$0xff] %vm383_vm1, %v444_v10  ;;  %21654 = vmatmul.mubr.msk.f32.vlgmr.msra.gmra.mrb[0].mxu0 %vm383_vm1, %v972_v12  ;;  %v743_v58 = vld [vmem:[#allocation2 + $0x9] sm:$0xff]  ;;  %v463_v7 = vld [vmem:[%s25066_s12 + $0xc0] sm:$0xff] }
  0x2c   : > { %v512_v14 = vld [vmem:[#allocation2] sm:$0xff]  ;;  %v25083_v16 = vld [vmem:[#allocation2 + $0x18] sm:$0xff]  ;;  %21656 = vmatprep.mubr.msk.f32.mxu0 %vm383_vm1, %v25081_v15  ;;  %21678 = vmatpush3.msk.msra.mxu0 %vm577_vm0, %v1216_v4  ;;  %478 = vst.msk [vmem:[#allocation2 + $0x7a] sm:$0xff] %vm383_vm1, %v445_v20  ;;  %479 = vst.msk [vmem:[#allocation2 + $0x82] sm:$0xff] %vm383_vm1, %v446_v21 }
  0x2d   : > { %21601 = vmatprep.mubr.msk.f32.mxu1 %vm383_vm1, %v512_v14  ;;  %480 = vst.msk [vmem:[#allocation2 + $0x92] sm:$0xff] %vm383_vm1, %v447_v22  ;;  %481 = vst.msk [vmem:[#allocation2 + $0x9a] sm:$0xff] %vm383_vm1, %v448_v23  ;;  %21703 = vmatprep.subr.msk.mxu0 %vm577_vm0, %v1445_v19  ;;  %v742_v50 = vld [vmem:[#allocation2 + $0x1] sm:$0xff]  ;;  %v25238_v63 = vld [vmem:[#allocation2 + $0x19] sm:$0xff] }
  0x2e   : > { %21602 = vmatmul.mubr.msk.f32.vlgmr.msra.gmra.mrb[0].mxu1 %vm383_vm1, %v513_v13  ;;  %482 = vst.msk [vmem:[#allocation2 + $0xaa] sm:$0xff] %vm383_vm1, %v449_v24  ;;  %483 = vst.msk [vmem:[#allocation2 + $0xb2] sm:$0xff] %vm383_vm1, %v450_v25  ;;  %v1201_v32 = vld [vmem:[#allocation2 + $0xb] sm:$0xff]  ;;  %v25158_v37 = vld [vmem:[#allocation2 + $0x23] sm:$0xff] }
  0x2f   : > { %21626 = vmatpush3.msk.msra.mxu1 %vm577_vm0, %v24935_v2  ;;  %21604 = vmatprep.mubr.msk.f32.mxu1 %vm383_vm1, %v25083_v16  ;;  %484 = vst.msk [vmem:[#allocation2 + $0xc2] sm:$0xff] %vm383_vm1, %v451_v53  ;;  %485 = vst.msk [vmem:[#allocation2 + $0xca] sm:$0xff] %vm383_vm1, %v452_v55  ;;  %v459_v2 = vld [vmem:[%s25066_s12 + $0xa0] sm:$0xff]  ;;  %v460_v4 = vld [vmem:[%s25066_s12 + $0xa8] sm:$0xff] }
  0x30   : > { %23720 = vmatprep.subr.msk.mxu1 %vm577_vm0, %v24927_v1  ;;  %21657 = vmatmul.mubr.msk.f32.gmra.mrb[2].mxu0 %vm383_vm1, %v25090_v17  ;;  %v25115_v26 = vld [vmem:[#allocation2 + $0x32] sm:$0xff]  ;;  %v25127_v28 = vld [vmem:[#allocation2 + $0x3a] sm:$0xff]  ;;  %486 = vst.msk [vmem:[#allocation2 + $0xda] sm:$0xff] %vm383_vm1, %v453_v56  ;;  %487 = vst.msk [vmem:[#allocation2 + $0xe2] sm:$0xff] %vm383_vm1, %v454_v57 }
  0x31   : > { %v25117_v27 = vld [vmem:[#allocation2 + $0x30] sm:$0xff]  ;;  %21659 = vmatprep.mubr.msk.f32.mxu0 %vm383_vm1, %v25115_v26  ;;  %v25131_v29 = vld [vmem:[#allocation2 + $0x38] sm:$0xff]  ;;  %v25133_v31 = vld [vmem:[#allocation2 + $0x48] sm:$0xff]  ;;  %488 = vst.msk [vmem:[#allocation2 + $0xf2] sm:$0xff] %vm383_vm1, %v455_v60 }
  0x32   : > { %21605 = vmatmul.mubr.msk.f32.gmra.mrb[2].mxu1 %vm383_vm1, %v25092_v18  ;;  %v25142_v33 = vld [vmem:[#allocation2 + $0x50] sm:$0xff]  ;;  %v25146_v35 = vld [vmem:[#allocation2 + $0x60] sm:$0xff]  ;;  %v25162_v38 = vld [vmem:[#allocation2 + $0x68] sm:$0xff]  ;;  %489 = vst.msk [vmem:[#allocation2 + $0xfa] sm:$0xff] %vm383_vm1, %v456_v61 }
  0x33   : > { %21607 = vmatprep.mubr.msk.f32.mxu1 %vm383_vm1, %v25117_v27  ;;  %v25164_v39 = vld [vmem:[#allocation2 + $0x33] sm:$0xff]  ;;  %v25177_v41 = vld [vmem:[#allocation2 + $0x3b] sm:$0xff]  ;;  %v25183_v43 = vld [vmem:[#allocation2 + $0x4b] sm:$0xff]  ;;  %490 = vst.msk [vmem:[#allocation2 + $0x10a] sm:$0xff] %vm383_vm1, %v457_v62 }
  0x34   : > { %21660 = vmatmul.mubr.msk.f32.gmra.mrb[4].mxu0 %vm383_vm1, %v25127_v28  ;;  %v25167_v40 = vld [vmem:[#allocation2 + $0x78] sm:$0xff]  ;;  %v25181_v42 = vld [vmem:[#allocation2 + $0x80] sm:$0xff]  ;;  %v25185_v44 = vld [vmem:[#allocation2 + $0x90] sm:$0xff]  ;;  %491 = vst.msk [vmem:[#allocation2 + $0x112] sm:$0xff] %vm383_vm1, %v458_v0 }
  0x35   : > { %21679 = vmatprep.mubr.msk.f32.mxu0 %vm383_vm1, %v1200_v30  ;;  %v25193_v45 = vld [vmem:[#allocation2 + $0x53] sm:$0xff]  ;;  %v25199_v47 = vld [vmem:[#allocation2 + $0x63] sm:$0xff]  ;;  %v25209_v49 = vld [vmem:[#allocation2 + $0x6b] sm:$0xff]  ;;  %492 = vst.msk [vmem:[#allocation2 + $0x122] sm:$0xff] %vm383_vm1, %v459_v2 }
  0x36   : > { %21608 = vmatmul.mubr.msk.f32.gmra.mrb[4].mxu1 %vm383_vm1, %v25131_v29  ;;  %v25197_v46 = vld [vmem:[#allocation2 + $0x98] sm:$0xff]  ;;  %v25201_v48 = vld [vmem:[#allocation2 + $0xa8] sm:$0xff]  ;;  %v25213_v51 = vld [vmem:[#allocation2 + $0xb0] sm:$0xff]  ;;  %493 = vst.msk [vmem:[#allocation2 + $0x12a] sm:$0xff] %vm383_vm1, %v460_v4 }
  0x37   : > { %21610 = vmatprep.mubr.msk.f32.mxu1 %vm383_vm1, %v25133_v31  ;;  %v25215_v52 = vld [vmem:[#allocation2 + $0x7b] sm:$0xff]  ;;  %v25218_v54 = vld [vmem:[#allocation2 + $0x83] sm:$0xff]  ;;  %v25226_v59 = vld [vmem:[#allocation2 + $0x93] sm:$0xff]  ;;  %494 = vst.msk [vmem:[#allocation2 + $0x13a] sm:$0xff] %vm383_vm1, %v461_v5 }
  0x38   : > { %21680 = vmatmul.mubr.msk.f32.vlgmr.msra.gmra.mrb[0].mxu0 %vm383_vm1, %v1201_v32  ;;  %495 = vst.msk [vmem:[#allocation2 + $0x142] sm:$0xff] %vm383_vm1, %v462_v6  ;;  %496 = vst.msk [vmem:[#allocation2 + $0x152] sm:$0xff] %vm383_vm1, %v463_v7  ;;  %v464_v8 = vld [vmem:[%s25066_s12 + $0xc8] sm:$0xff]  ;;  %v465_v9 = vld [vmem:[%s25066_s12 + $0xd0] sm:$0xff] }
  0x39   : > { %21682 = vmatprep.mubr.msk.f32.mxu0 %vm383_vm1, %v25144_v34  ;;  %21704 = vmatpush3.msk.msra.mxu0 %vm577_vm0, %v1445_v19  ;;  %v466_v10 = vld [vmem:[%s25066_s12 + $0xd8] sm:$0xff]  ;;  %497 = vst.msk [vmem:[#allocation2 + $0x15a] sm:$0xff] %vm383_vm1, %v464_v8  ;;  %498 = vst.msk [vmem:[#allocation2 + $0x16a] sm:$0xff] %vm383_vm1, %v465_v9  ;;  %v25278_v13 = vld [vmem:[#allocation2 + $0x21] sm:$0xff] }
  0x3a   : > { %21611 = vmatmul.mubr.msk.f32.gmra.mrb[6].mxu1 %vm383_vm1, %v25142_v33  ;;  %21729 = vmatprep.subr.msk.mxu0 %vm577_vm0, %v25152_v36  ;;  %499 = vst.msk [vmem:[#allocation2 + $0x172] sm:$0xff] %vm383_vm1, %v466_v10  ;;  %v25272_v12 = vld [vmem:[#allocation2 + $0x9b] sm:$0xff]  ;;  %v25280_v14 = vld [vmem:[#allocation2 + $0xab] sm:$0xff]  ;;  %vm28160_vm8 = vmpackc.low %vm577_vm0, %vm24850_vm7 }
  0x3b   : > { %21613 = vmatprep.mubr.msk.f32.mxu1 %vm383_vm1, %v25146_v35  ;;  %v25282_v19 = vld [vmem:[#allocation2 + $0x31] sm:$0xff]  ;;  %v25296_v20 = vld [vmem:[#allocation2 + $0x39] sm:$0xff]  ;;  %v1429_v21 = vld [vmem:[#allocation2 + $0x4] sm:$0xff] }
  0x3c   : > { %21683 = vmatmul.mubr.msk.f32.gmra.mrb[2].mxu0 %vm383_vm1, %v25158_v37  ;;  %v25298_v22 = vld [vmem:[#allocation2 + $0x49] sm:$0xff]  ;;  %v25307_v24 = vld [vmem:[#allocation2 + $0x51] sm:$0xff]  ;;  %v25309_v25 = vld [vmem:[#allocation2 + $0x1c] sm:$0xff] }
  0x3d   : > { %21685 = vmatprep.mubr.msk.f32.mxu0 %vm383_vm1, %v25164_v39  ;;  %v1430_v23 = vld [vmem:[#allocation2 + $0xc] sm:$0xff]  ;;  %v25311_v30 = vld [vmem:[#allocation2 + $0x61] sm:$0xff]  ;;  %v25317_v32 = vld [vmem:[%s28905_s1 + $0x18] sm:$0xf] }
  0x3e   : > { %21614 = vmatmul.mubr.msk.f32.gmra.mrb[8].mxu1 %vm383_vm1, %v25162_v38  ;;  %v25327_v53 = vld [vmem:[#allocation2 + $0x69] sm:$0xff]  ;;  %v25329_v55 = vld [vmem:[#allocation2 + $0x34] sm:$0xff]  ;;  %v25343_v57 = vld [vmem:[#allocation2 + $0x3c] sm:$0xff] }
  0x3f   : > { %21616 = vmatprep.mubr.msk.f32.mxu1 %vm383_vm1, %v25167_v40  ;;  %v25333_v56 = vld [vmem:[#allocation2 + $0x79] sm:$0xff]  ;;  %v25351_v60 = vld [vmem:[#allocation2 + $0x91] sm:$0xff]  ;;  %v25365_v0 = vld [vmem:[#allocation2 + $0x64] sm:$0xff] }
  0x40   : > { %21686 = vmatmul.mubr.msk.f32.gmra.mrb[4].mxu0 %vm383_vm1, %v25177_v41  ;;  %v25359_v61 = vld [vmem:[#allocation2 + $0x54] sm:$0xff]  ;;  %28996 = vst [vmem:[#allocation9_spill] sm:$0xff] %v25365_v0  ;;  %v25367_v2 = vld [vmem:[#allocation2 + $0xa9] sm:$0xff]  ;;  %v25381_v6 = vld [vmem:[#allocation2 + $0x7c] sm:$0xff] }
  0x41   : > { %21688 = vmatprep.mubr.msk.f32.mxu0 %vm383_vm1, %v25183_v43  ;;  %28995 = vst [vmem:[#allocation8_spill] sm:$0xff] %v25359_v61  ;;  %v25363_v62 = vld [vmem:[#allocation2 + $0x99] sm:$0xff]  ;;  %v25375_v4 = vld [vmem:[#allocation2 + $0x6c] sm:$0xff]  ;;  %28998 = vst [vmem:[#allocation11_spill] sm:$0xff] %v25381_v6 }
  0x42   : > { %21617 = vmatmul.mubr.msk.f32.gmra.mrb[10].mxu1 %vm383_vm1, %v25181_v42  ;;  %28997 = vst [vmem:[#allocation10_spill] sm:$0xff] %v25375_v4  ;;  %v25379_v5 = vld [vmem:[#allocation2 + $0xb1] sm:$0xff]  ;;  %v25391_v8 = vld [vmem:[#allocation2 + $0x84] sm:$0xff]  ;;  %v25410_v3 = vld [vmem:[#allocation2 + $0x9c] sm:$0xff] }
  0x43   : > { %21619 = vmatprep.mubr.msk.f32.mxu1 %vm383_vm1, %v25185_v44  ;;  %v25383_v7 = vld [vmem:[#allocation2 + $0x4a] sm:$0xff]  ;;  %28999 = vst [vmem:[#allocation12_spill] sm:$0xff] %v25391_v8  ;;  %v25395_v9 = vld [vmem:[#allocation2 + $0x52] sm:$0xff]  ;;  %29001 = vst [vmem:[#allocation14_spill] sm:$0xff] %v25410_v3 }
  0x44   : > { %21689 = vmatmul.mubr.msk.f32.gmra.mrb[6].mxu0 %vm383_vm1, %v25193_v45  ;;  %v25397_v10 = vld [vmem:[#allocation2 + $0x94] sm:$0xff] }
  0x45   : > { %21691 = vmatprep.mubr.msk.f32.mxu0 %vm383_vm1, %v25199_v47  ;;  %29000 = vst [vmem:[#allocation13_spill] sm:$0xff] %v25397_v10 }
  0x46   : > { %21620 = vmatmul.mubr.msk.f32.gmra.mrb[12].mxu1 %vm383_vm1, %v25197_v46 }
  0x47   : > { %21622 = vmatprep.mubr.msk.f32.mxu1 %vm383_vm1, %v25201_v48 }
  0x48   : > { %21692 = vmatmul.mubr.msk.f32.gmra.mrb[8].mxu0 %vm383_vm1, %v25209_v49 }
  0x49   : > { %21694 = vmatprep.mubr.msk.f32.mxu0 %vm383_vm1, %v25215_v52 }
  0x4a   : > { %21623 = vmatmul.mubr.msk.f32.gmra.mrb[14].mxu1 %vm383_vm1, %v25213_v51 }
  0x4b   : > { %21627 = vmatprep.mubr.msk.f32.mxu1 %vm383_vm1, %v742_v50  ;;  %v25323_v50 = vld [vmem:[#allocation2 + $0x24] sm:$0xff] }
  0x4c   : > { %21695 = vmatmul.mubr.msk.f32.gmra.mrb[10].mxu0 %vm383_vm1, %v25218_v54 }
  0x4d   : > { %21697 = vmatprep.mubr.msk.f32.mxu0 %vm383_vm1, %v25226_v59 }
  0x4e   : > { %21628 = vmatmul.mubr.msk.f32.vlgmr.msra.gmra.mrb[0].mxu1 %vm383_vm1, %v743_v58  ;;  %v25349_v58 = vld [vmem:[#allocation2 + $0x4c] sm:$0xff] }
  0x4f   : > { %23721 = vmatpush3.msk.msra.mxu1 %vm577_vm0, %v24927_v1  ;;  %21630 = vmatprep.mubr.msk.f32.mxu1 %vm383_vm1, %v25238_v63  ;;  %v25292_v1 = vld [vmem:[#allocation2 + $0xb3] sm:$0xff] }
  0x50   : > { %22249 = vmatprep.subr.msk.mxu1 %vm577_vm0, %v25264_v11  ;;  %21698 = vmatmul.mubr.msk.f32.gmra.mrb[12].mxu0 %vm383_vm1, %v25272_v12 }
  0x51   : > { %21700 = vmatprep.mubr.msk.f32.mxu0 %vm383_vm1, %v25280_v14 }
  0x52   : > { %21631 = vmatmul.mubr.msk.f32.gmra.mrb[2].mxu1 %vm383_vm1, %v25278_v13 }
  0x53   : > { %21633 = vmatprep.mubr.msk.f32.mxu1 %vm383_vm1, %v25282_v19 }
  0x54   : > { %21701 = vmatmul.mubr.msk.f32.gmra.mrb[14].mxu0 %vm383_vm1, %v25292_v1 }
  0x55   : > { %21705 = vmatprep.mubr.msk.f32.mxu0 %vm383_vm1, %v1429_v21  ;;  %v25399_v21 = vld [vmem:[#allocation2 + $0x62] sm:$0xff] }
  0x56   : > { %21634 = vmatmul.mubr.msk.f32.gmra.mrb[4].mxu1 %vm383_vm1, %v25296_v20 }
  0x57   : > { %21636 = vmatprep.mubr.msk.f32.mxu1 %vm383_vm1, %v25298_v22 }
  0x58   : > { %21706 = vmatmul.mubr.msk.f32.vlgmr.msra.gmra.mrb[0].mxu0 %vm383_vm1, %v1430_v23  ;;  %v6528_v23 = vld [vmem:[%s28905_s1 + $0x4] sm:$0xf] }
  0x59   : > { %21708 = vmatprep.mubr.msk.f32.mxu0 %vm383_vm1, %v25309_v25  ;;  %21730 = vmatpush3.msk.msra.mxu0 %vm577_vm0, %v25152_v36  ;;  %v25347_v36 = vld [vmem:[#allocation2 + $0x81] sm:$0xff] }
  0x5a   : > { %21637 = vmatmul.mubr.msk.f32.gmra.mrb[6].mxu1 %vm383_vm1, %v25307_v24  ;;  %21755 = vmatprep.subr.msk.mxu0 %vm577_vm0, %v25317_v32 }
  0x5b   : > { %21639 = vmatprep.mubr.msk.f32.mxu1 %vm383_vm1, %v25311_v30 }
  0x5c   : > { %21709 = vmatmul.mubr.msk.f32.gmra.mrb[2].mxu0 %vm383_vm1, %v25323_v50 }
  0x5d   : > { %21711 = vmatprep.mubr.msk.f32.mxu0 %vm383_vm1, %v25329_v55 }
  0x5e   : > { %21640 = vmatmul.mubr.msk.f32.gmra.mrb[8].mxu1 %vm383_vm1, %v25327_v53 }
  0x5f   : > { %21642 = vmatprep.mubr.msk.f32.mxu1 %vm383_vm1, %v25333_v56 }
  0x60   : > { %21712 = vmatmul.mubr.msk.f32.gmra.mrb[4].mxu0 %vm383_vm1, %v25343_v57 }
  0x61   : > { %21714 = vmatprep.mubr.msk.f32.mxu0 %vm383_vm1, %v25349_v58 }
  0x62   : > { %21643 = vmatmul.mubr.msk.f32.gmra.mrb[10].mxu1 %vm383_vm1, %v25347_v36 }
  0x63   : > { %21645 = vmatprep.mubr.msk.f32.mxu1 %vm383_vm1, %v25351_v60 }
  0x64   : > { %21715 = vmatmul.mubr.msk.f32.gmra.mrb[6].mxu0 %vm383_vm1, %v25359_v61  ;;  %v25464_v61 = vld [vmem:[#allocation2 + $0xc0] sm:$0xff] }
  0x65   : > { %21717 = vmatprep.mubr.msk.f32.mxu0 %vm383_vm1, %v25365_v0  ;;  %v25435_v0 = vld [vmem:[#allocation2 + $0x92] sm:$0xff] }
  0x66   : > { %21646 = vmatmul.mubr.msk.f32.gmra.mrb[12].mxu1 %vm383_vm1, %v25363_v62 }
  0x67   : > { %21648 = vmatprep.mubr.msk.f32.mxu1 %vm383_vm1, %v25367_v2 }
  0x68   : > { %21718 = vmatmul.mubr.msk.f32.gmra.mrb[8].mxu0 %vm383_vm1, %v25375_v4  ;;  %v25420_v4 = vld [vmem:[#allocation2 + $0x7a] sm:$0xff] }
  0x69   : > { %21720 = vmatprep.mubr.msk.f32.mxu0 %vm383_vm1, %v25381_v6  ;;  %v25416_v6 = vld [vmem:[#allocation2 + $0x6a] sm:$0xff] }
  0x6a   : > { %21649 = vmatmul.mubr.msk.f32.gmra.mrb[14].mxu1 %vm383_vm1, %v25379_v5 }
  0x6b   : > { %21662 = vmatprep.mubr.msk.f32.mxu1 %vm383_vm1, %v25383_v7 }
  0x6c   : > { %21721 = vmatmul.mubr.msk.f32.gmra.mrb[10].mxu0 %vm383_vm1, %v25391_v8  ;;  %v25418_v8 = vld [vmem:[#allocation2 + $0xac] sm:$0xff] }
  0x6d   : > { %21723 = vmatprep.mubr.msk.f32.mxu0 %vm383_vm1, %v25397_v10  ;;  %29002 = vst [vmem:[#allocation15_spill] sm:$0xff] %v25418_v8  ;;  %v25433_v10 = vld [vmem:[#allocation2 + $0x82] sm:$0xff] }
  0x6e   : > { %21663 = vmatmul.mubr.msk.f32.vlgmr.msra.gmra.mrb[6].mxu1 %vm383_vm1, %v25395_v9 }
  0x6f   : > { %22250 = vmatpush3.msk.msra.mxu1 %vm577_vm0, %v25264_v11  ;;  %21665 = vmatprep.mubr.msk.f32.mxu1 %vm383_vm1, %v25399_v21  ;;  %v25429_v11 = vld [vmem:[#allocation2 + $0xb4] sm:$0xff] }
  0x70   : > { %22275 = vmatprep.subr.msk.mxu1 %vm577_vm0, %v6528_v23  ;;  %21724 = vmatmul.mubr.msk.f32.gmra.mrb[12].mxu0 %vm383_vm1, %v25410_v3  ;;  %29003 = vst [vmem:[#allocation16_spill] sm:$0xff] %v25429_v11  ;;  %v25447_v3 = vld [vmem:[#allocation2 + $0xaa] sm:$0xff] }
  0x71   : > { %21726 = vmatprep.mubr.msk.f32.mxu0 %vm383_vm1, %v25418_v8  ;;  %v25445_v8 = vld [vmem:[#allocation2 + $0x9a] sm:$0xff] }
  0x72   : > { %21666 = vmatmul.mubr.msk.f32.gmra.mrb[8].mxu1 %vm383_vm1, %v25416_v6 }
  0x73   : > { %21668 = vmatprep.mubr.msk.f32.mxu1 %vm383_vm1, %v25420_v4 }
  0x74   : > { %21727 = vmatmul.mubr.msk.f32.gmra.mrb[14].mxu0 %vm383_vm1, %v25429_v11  ;;  %v2133_v11 = vld [vmem:[%s28905_s1 + $0x1c] sm:$0xf] }
  0x75   : > { %21731 = vmatprep.mubr.msk.f32.mxu0 %vm383_vm1, %v25083_v16  ;;  %v25460_v16 = vld [vmem:[#allocation2 + $0xb2] sm:$0xff] }
  0x76   : > { %21669 = vmatmul.mubr.msk.f32.gmra.mrb[10].mxu1 %vm383_vm1, %v25433_v10 }
  0x77   : > { %21671 = vmatprep.mubr.msk.f32.mxu1 %vm383_vm1, %v25435_v0 }
  0x78   : > { %21732 = vmatmul.mubr.msk.f32.vlgmr.msra.gmra.mrb[0].mxu0 %vm383_vm1, %v25092_v18  ;;  %v25475_v18 = vld [vmem:[#allocation2 + $0xc8] sm:$0xff] }
  0x79   : > { %21734 = vmatprep.mubr.msk.f32.mxu0 %vm383_vm1, %v25117_v27  ;;  %21756 = vmatpush3.msk.msra.mxu0 %vm577_vm0, %v25317_v32  ;;  %29004 = vst [vmem:[#allocation17_spill] sm:$0xff] %v25475_v18  ;;  %v25477_v27 = vld [vmem:[#allocation2 + $0xd8] sm:$0xff]  ;;  %v25493_v32 = vld [vmem:[#allocation2 + $0xf0] sm:$0xff] }
  0x7a   : > { %21672 = vmatmul.mubr.msk.f32.gmra.mrb[12].mxu1 %vm383_vm1, %v25445_v8  ;;  %21781 = vmatprep.subr.msk.mxu0 %vm577_vm0, %v2133_v11 }
  0x7b   : > { %21674 = vmatprep.mubr.msk.f32.mxu1 %vm383_vm1, %v25447_v3 }
  0x7c   : > { %21735 = vmatmul.mubr.msk.f32.gmra.mrb[2].mxu0 %vm383_vm1, %v25131_v29  ;;  %v6757_v29 = vld [vmem:[%s28905_s1 + $0x8] sm:$0xf] }
  0x7d   : > { %21737 = vmatprep.mubr.msk.f32.mxu0 %vm383_vm1, %v25133_v31  ;;  %v25491_v31 = vld [vmem:[#allocation2 + $0xe0] sm:$0xff] }
  0x7e   : > { %21675 = vmatmul.mubr.msk.f32.gmra.mrb[14].mxu1 %vm383_vm1, %v25460_v16 }
  0x7f   : > { %22251 = vmatprep.mubr.msk.f32.mxu1 %vm383_vm1, %v25464_v61 }
  0x80   : > { %21738 = vmatmul.mubr.msk.f32.gmra.mrb[4].mxu0 %vm383_vm1, %v25142_v33  ;;  %v25504_v33 = vld [vmem:[#allocation2 + $0xf8] sm:$0xff] }
  0x81   : > { %21740 = vmatprep.mubr.msk.f32.mxu0 %vm383_vm1, %v25146_v35  ;;  %v25506_v35 = vld [vmem:[#allocation2 + $0x108] sm:$0xff] }
  0x82   : > { %22252 = vmatmul.mubr.msk.f32.vlgmr.msra.gmra.mrb[16].mxu1 %vm383_vm1, %v25475_v18 }
  0x83   : > { %22276 = vmatpush3.msk.msra.mxu1 %vm577_vm0, %v6528_v23  ;;  %22254 = vmatprep.mubr.msk.f32.mxu1 %vm383_vm1, %v25477_v27  ;;  %v25554_v23 = vld [vmem:[#allocation2 + $0x168] sm:$0xff] }
  0x84   : > { %22301 = vmatprep.subr.msk.mxu1 %vm577_vm0, %v6757_v29  ;;  %21741 = vmatmul.mubr.msk.f32.gmra.mrb[6].mxu0 %vm383_vm1, %v25162_v38  ;;  %v25516_v38 = vld [vmem:[#allocation2 + $0x110] sm:$0xff] }
  0x85   : > { %21743 = vmatprep.mubr.msk.f32.mxu0 %vm383_vm1, %v25167_v40  ;;  %v25518_v40 = vld [vmem:[#allocation2 + $0x120] sm:$0xff] }
  0x86   : > { %22255 = vmatmul.mubr.msk.f32.gmra.mrb[18].mxu1 %vm383_vm1, %v25491_v31 }
  0x87   : > { %22257 = vmatprep.mubr.msk.f32.mxu1 %vm383_vm1, %v25493_v32 }
  0x88   : > { %21744 = vmatmul.mubr.msk.f32.gmra.mrb[8].mxu0 %vm383_vm1, %v25181_v42  ;;  %v25528_v42 = vld [vmem:[#allocation2 + $0x128] sm:$0xff] }
  0x89   : > { %21746 = vmatprep.mubr.msk.f32.mxu0 %vm383_vm1, %v25185_v44  ;;  %v25530_v44 = vld [vmem:[#allocation2 + $0x138] sm:$0xff] }
  0x8a   : > { %22258 = vmatmul.mubr.msk.f32.gmra.mrb[20].mxu1 %vm383_vm1, %v25504_v33 }
  0x8b   : > { %22260 = vmatprep.mubr.msk.f32.mxu1 %vm383_vm1, %v25506_v35 }
  0x8c   : > { %21747 = vmatmul.mubr.msk.f32.gmra.mrb[10].mxu0 %vm383_vm1, %v25197_v46  ;;  %v25540_v46 = vld [vmem:[#allocation2 + $0x140] sm:$0xff] }
  0x8d   : > { %21749 = vmatprep.mubr.msk.f32.mxu0 %vm383_vm1, %v25201_v48  ;;  %v25542_v48 = vld [vmem:[#allocation2 + $0x150] sm:$0xff] }
  0x8e   : > { %22261 = vmatmul.mubr.msk.f32.gmra.mrb[22].mxu1 %vm383_vm1, %v25516_v38  ;;  %29005 = vst [vmem:[#allocation18_spill] sm:$0xff] %v25542_v48 }
  0x8f   : > { %22263 = vmatprep.mubr.msk.f32.mxu1 %vm383_vm1, %v25518_v40 }
  0x90   : > { %21750 = vmatmul.mubr.msk.f32.gmra.mrb[12].mxu0 %vm383_vm1, %v25213_v51  ;;  %v25552_v51 = vld [vmem:[#allocation2 + $0x158] sm:$0xff] }
  0x91   : > { %21752 = vmatprep.mubr.msk.f32.mxu0 %vm383_vm1, %v25464_v61 }
  0x92   : > { %22264 = vmatmul.mubr.msk.f32.gmra.mrb[24].mxu1 %vm383_vm1, %v25528_v42 }
  0x93   : > { %22266 = vmatprep.mubr.msk.f32.mxu1 %vm383_vm1, %v25530_v44 }
  0x94   : > { %21753 = vmatmul.mubr.msk.f32.gmra.mrb[14].mxu0 %vm383_vm1, %v25475_v18  ;;  %v25561_v18 = vld [vmem:[%s28905_s1 + $0x20] sm:$0xf] }
  0x95   : > { %21757 = vmatprep.mubr.msk.f32.mxu0 %vm383_vm1, %v25238_v63  ;;  %v25569_v63 = vld [vmem:[#allocation2 + $0x170] sm:$0xff] }
  0x96   : > { %22267 = vmatmul.mubr.msk.f32.gmra.mrb[26].mxu1 %vm383_vm1, %v25540_v46 }
  0x97   : > { %22269 = vmatprep.mubr.msk.f32.mxu1 %vm383_vm1, %v25542_v48  ;;  %v25572_v48 = vld [vmem:[#allocation2 + $0xc1] sm:$0xff] }
  0x98   : > { %21758 = vmatmul.mubr.msk.f32.vlgmr.msra.gmra.mrb[0].mxu0 %vm383_vm1, %v25278_v13  ;;  %29006 = vst [vmem:[#allocation19_spill] sm:$0xff] %v25572_v48  ;;  %v25584_v13 = vld [vmem:[#allocation2 + $0xc9] sm:$0xff] }
  0x99   : > { %21760 = vmatprep.mubr.msk.f32.mxu0 %vm383_vm1, %v25282_v19  ;;  %21782 = vmatpush3.msk.msra.mxu0 %vm577_vm0, %v2133_v11  ;;  %v25586_v19 = vld [vmem:[#allocation2 + $0xd9] sm:$0xff]  ;;  %v25602_v11 = vld [vmem:[#allocation2 + $0xf1] sm:$0xff] }
  0x9a   : > { %22270 = vmatmul.mubr.msk.f32.gmra.mrb[28].mxu1 %vm383_vm1, %v25552_v51  ;;  %21807 = vmatprep.subr.msk.mxu0 %vm577_vm0, %v25561_v18 }
  0x9b   : > { %22272 = vmatprep.mubr.msk.f32.mxu1 %vm383_vm1, %v25554_v23 }
  0x9c   : > { %21761 = vmatmul.mubr.msk.f32.gmra.mrb[2].mxu0 %vm383_vm1, %v25296_v20  ;;  %v6986_v20 = vld [vmem:[%s28905_s1 + $0xc] sm:$0xf] }
  0x9d   : > { %21763 = vmatprep.mubr.msk.f32.mxu0 %vm383_vm1, %v25298_v22  ;;  %v25600_v22 = vld [vmem:[#allocation2 + $0xe1] sm:$0xff] }
  0x9e   : > { %22273 = vmatmul.mubr.msk.f32.gmra.mrb[30].mxu1 %vm383_vm1, %v25569_v63 }
  0x9f   : > { %22277 = vmatprep.mubr.msk.f32.mxu1 %vm383_vm1, %v25572_v48 }
  0xa0   : > { %21764 = vmatmul.mubr.msk.f32.gmra.mrb[4].mxu0 %vm383_vm1, %v25307_v24  ;;  %v25613_v24 = vld [vmem:[#allocation2 + $0xf9] sm:$0xff] }
  0xa1   : > { %21766 = vmatprep.mubr.msk.f32.mxu0 %vm383_vm1, %v25311_v30  ;;  %v25615_v30 = vld [vmem:[#allocation2 + $0x109] sm:$0xff] }
  0xa2   : > { %22278 = vmatmul.mubr.msk.f32.vlgmr.msra.gmra.mrb[16].mxu1 %vm383_vm1, %v25584_v13 }
  0xa3   : > { %22302 = vmatpush3.msk.msra.mxu1 %vm577_vm0, %v6757_v29  ;;  %22280 = vmatprep.mubr.msk.f32.mxu1 %vm383_vm1, %v25586_v19  ;;  %v467_v29 = vld [vmem:[%s25066_s12 + $0xe0] sm:$0xff] }
  0xa4   : > { %22327 = vmatprep.subr.msk.mxu1 %vm577_vm0, %v6986_v20  ;;  %21767 = vmatmul.mubr.msk.f32.gmra.mrb[6].mxu0 %vm383_vm1, %v25327_v53  ;;  %v25625_v53 = vld [vmem:[#allocation2 + $0x111] sm:$0xff]  ;;  %500 = vst.msk [vmem:[#allocation2 + $0x182] sm:$0xff] %vm383_vm1, %v467_v29  ;;  %v2591_v29 = vld [vmem:[%s28905_s1 + $0x24] sm:$0xf] }
  0xa5   : > { %21769 = vmatprep.mubr.msk.f32.mxu0 %vm383_vm1, %v25333_v56  ;;  %v25627_v56 = vld [vmem:[#allocation2 + $0x121] sm:$0xff] }
  0xa6   : > { %22281 = vmatmul.mubr.msk.f32.gmra.mrb[18].mxu1 %vm383_vm1, %v25600_v22 }
  0xa7   : > { %22283 = vmatprep.mubr.msk.f32.mxu1 %vm383_vm1, %v25602_v11 }
  0xa8   : > { %21770 = vmatmul.mubr.msk.f32.gmra.mrb[8].mxu0 %vm383_vm1, %v25347_v36  ;;  %v25637_v36 = vld [vmem:[#allocation2 + $0x129] sm:$0xff] }
  0xa9   : > { %21772 = vmatprep.mubr.msk.f32.mxu0 %vm383_vm1, %v25351_v60  ;;  %v25639_v60 = vld [vmem:[#allocation2 + $0x139] sm:$0xff] }
  0xaa   : > { %22284 = vmatmul.mubr.msk.f32.gmra.mrb[20].mxu1 %vm383_vm1, %v25613_v24  ;;  %29007 = vst [vmem:[#allocation20_spill] sm:$0xff] %v25639_v60 }
  0xab   : > { %22286 = vmatprep.mubr.msk.f32.mxu1 %vm383_vm1, %v25615_v30 }
  0xac   : > { %21773 = vmatmul.mubr.msk.f32.gmra.mrb[10].mxu0 %vm383_vm1, %v25363_v62  ;;  %v25649_v62 = vld [vmem:[#allocation2 + $0x141] sm:$0xff] }
  0xad   : > { %21775 = vmatprep.mubr.msk.f32.mxu0 %vm383_vm1, %v25367_v2  ;;  %v25651_v2 = vld [vmem:[#allocation2 + $0x151] sm:$0xff] }
  0xae   : > { %22287 = vmatmul.mubr.msk.f32.gmra.mrb[22].mxu1 %vm383_vm1, %v25625_v53 }
  0xaf   : > { %22289 = vmatprep.mubr.msk.f32.mxu1 %vm383_vm1, %v25627_v56 }
  0xb0   : > { %21776 = vmatmul.mubr.msk.f32.gmra.mrb[12].mxu0 %vm383_vm1, %v25379_v5  ;;  %v468_v5 = vld [vmem:[%s25066_s12 + $0xe8] sm:$0xff] }
  0xb1   : > { %21778 = vmatprep.mubr.msk.f32.mxu0 %vm383_vm1, %v25572_v48  ;;  %501 = vst.msk [vmem:[#allocation2 + $0x18a] sm:$0xff] %vm383_vm1, %v468_v5  ;;  %v25667_v48 = vld [vmem:[#allocation2 + $0x169] sm:$0xff] }
  0xb2   : > { %22290 = vmatmul.mubr.msk.f32.gmra.mrb[24].mxu1 %vm383_vm1, %v25637_v36  ;;  %v25684_v5 = vld [vmem:[#allocation2 + $0xc2] sm:$0xff] }
  0xb3   : > { %22292 = vmatprep.mubr.msk.f32.mxu1 %vm383_vm1, %v25639_v60  ;;  %v25665_v60 = vld [vmem:[#allocation2 + $0x159] sm:$0xff] }
  0xb4   : > { %21779 = vmatmul.mubr.msk.f32.gmra.mrb[14].mxu0 %vm383_vm1, %v25584_v13 }
  0xb5   : > { %21783 = vmatprep.mubr.msk.f32.mxu0 %vm383_vm1, %v25081_v15  ;;  %v25680_v15 = vld [vmem:[#allocation2 + $0x171] sm:$0xff] }
  0xb6   : > { %22293 = vmatmul.mubr.msk.f32.gmra.mrb[26].mxu1 %vm383_vm1, %v25649_v62 }
  0xb7   : > { %22295 = vmatprep.mubr.msk.f32.mxu1 %vm383_vm1, %v25651_v2 }
  0xb8   : > { %21784 = vmatmul.mubr.msk.f32.vlgmr.msra.gmra.mrb[0].mxu0 %vm383_vm1, %v25090_v17  ;;  %v25695_v17 = vld [vmem:[#allocation2 + $0xca] sm:$0xff] }
  0xb9   : > { %21786 = vmatprep.mubr.msk.f32.mxu0 %vm383_vm1, %v25115_v26  ;;  %21808 = vmatpush3.msk.msra.mxu0 %vm577_vm0, %v25561_v18  ;;  %29008 = vst [vmem:[#allocation21_spill] sm:$0xff] %v25695_v17  ;;  %v25697_v26 = vld [vmem:[#allocation2 + $0xda] sm:$0xff]  ;;  %v25713_v18 = vld [vmem:[#allocation2 + $0xf2] sm:$0xff] }
  0xba   : > { %22296 = vmatmul.mubr.msk.f32.gmra.mrb[28].mxu1 %vm383_vm1, %v25665_v60  ;;  %21833 = vmatprep.subr.msk.mxu0 %vm577_vm0, %v2591_v29 }
  0xbb   : > { %22298 = vmatprep.mubr.msk.f32.mxu1 %vm383_vm1, %v25667_v48 }
  0xbc   : > { %21787 = vmatmul.mubr.msk.f32.gmra.mrb[2].mxu0 %vm383_vm1, %v25127_v28  ;;  %v7215_v28 = vld [vmem:[%s28905_s1 + $0x10] sm:$0xf] }
  0xbd   : > { %21789 = vmatprep.mubr.msk.f32.mxu0 %vm383_vm1, %v25383_v7  ;;  %v25711_v7 = vld [vmem:[#allocation2 + $0xe2] sm:$0xff] }
  0xbe   : > { %22299 = vmatmul.mubr.msk.f32.gmra.mrb[30].mxu1 %vm383_vm1, %v25680_v15 }
  0xbf   : > { %22303 = vmatprep.mubr.msk.f32.mxu1 %vm383_vm1, %v25684_v5 }
  0xc0   : > { %21790 = vmatmul.mubr.msk.f32.gmra.mrb[4].mxu0 %vm383_vm1, %v25395_v9  ;;  %v25724_v9 = vld [vmem:[#allocation2 + $0xfa] sm:$0xff] }
  0xc1   : > { %21792 = vmatprep.mubr.msk.f32.mxu0 %vm383_vm1, %v25399_v21  ;;  %v25726_v21 = vld [vmem:[#allocation2 + $0x10a] sm:$0xff] }
  0xc2   : > { %22304 = vmatmul.mubr.msk.f32.vlgmr.msra.gmra.mrb[16].mxu1 %vm383_vm1, %v25695_v17 }
  0xc3   : > { %22328 = vmatpush3.msk.msra.mxu1 %vm577_vm0, %v6986_v20  ;;  %22306 = vmatprep.mubr.msk.f32.mxu1 %vm383_vm1, %v25697_v26  ;;  %v25774_v20 = vld [vmem:[#allocation2 + $0x16a] sm:$0xff] }
  0xc4   : > { %22353 = vmatprep.subr.msk.mxu1 %vm577_vm0, %v7215_v28  ;;  %21793 = vmatmul.mubr.msk.f32.gmra.mrb[6].mxu0 %vm383_vm1, %v25416_v6  ;;  %v25738_v6 = vld [vmem:[#allocation2 + $0x122] sm:$0xff] }
  0xc5   : > { %21795 = vmatprep.mubr.msk.f32.mxu0 %vm383_vm1, %v25420_v4  ;;  %v25736_v4 = vld [vmem:[#allocation2 + $0x112] sm:$0xff] }
  0xc6   : > { %22307 = vmatmul.mubr.msk.f32.gmra.mrb[18].mxu1 %vm383_vm1, %v25711_v7 }
  0xc7   : > { %22309 = vmatprep.mubr.msk.f32.mxu1 %vm383_vm1, %v25713_v18 }
  0xc8   : > { %21796 = vmatmul.mubr.msk.f32.gmra.mrb[8].mxu0 %vm383_vm1, %v25433_v10  ;;  %v25750_v10 = vld [vmem:[#allocation2 + $0x13a] sm:$0xff] }
  0xc9   : > { %21798 = vmatprep.mubr.msk.f32.mxu0 %vm383_vm1, %v25435_v0  ;;  %v25748_v0 = vld [vmem:[#allocation2 + $0x12a] sm:$0xff] }
  0xca   : > { %22310 = vmatmul.mubr.msk.f32.gmra.mrb[20].mxu1 %vm383_vm1, %v25724_v9 }
  0xcb   : > { %22312 = vmatprep.mubr.msk.f32.mxu1 %vm383_vm1, %v25726_v21 }
  0xcc   : > { %21799 = vmatmul.mubr.msk.f32.gmra.mrb[10].mxu0 %vm383_vm1, %v25445_v8  ;;  %v25762_v8 = vld [vmem:[#allocation2 + $0x152] sm:$0xff] }
  0xcd   : > { %21801 = vmatprep.mubr.msk.f32.mxu0 %vm383_vm1, %v25447_v3  ;;  %v25760_v3 = vld [vmem:[#allocation2 + $0x142] sm:$0xff]  ;;  %29009 = vst [vmem:[#allocation22_spill] sm:$0xff] %v25762_v8 }
  0xce   : > { %22313 = vmatmul.mubr.msk.f32.gmra.mrb[22].mxu1 %vm383_vm1, %v25736_v4 }
  0xcf   : > { %22315 = vmatprep.mubr.msk.f32.mxu1 %vm383_vm1, %v25738_v6 }
  0xd0   : > { %21802 = vmatmul.mubr.msk.f32.gmra.mrb[12].mxu0 %vm383_vm1, %v25460_v16  ;;  %v25772_v16 = vld [vmem:[#allocation2 + $0x15a] sm:$0xff] }
  0xd1   : > { %21804 = vmatprep.mubr.msk.f32.mxu0 %vm383_vm1, %v25684_v5 }
  0xd2   : > { %22316 = vmatmul.mubr.msk.f32.gmra.mrb[24].mxu1 %vm383_vm1, %v25748_v0 }
  0xd3   : > { %22318 = vmatprep.mubr.msk.f32.mxu1 %vm383_vm1, %v25750_v10 }
  0xd4   : > { %21805 = vmatmul.mubr.msk.f32.gmra.mrb[14].mxu0 %vm383_vm1, %v25695_v17  ;;  %v2820_v17 = vld [vmem:[%s28905_s1 + $0x28] sm:$0xf] }
  0xd5   : > { %21809 = vmatprep.mubr.msk.f32.mxu0 %vm383_vm1, %v25144_v34  ;;  %v25787_v34 = vld [vmem:[#allocation2 + $0x172] sm:$0xff] }
  0xd6   : > { %22319 = vmatmul.mubr.msk.f32.gmra.mrb[26].mxu1 %vm383_vm1, %v25760_v3 }
  0xd7   : > { %22321 = vmatprep.mubr.msk.f32.mxu1 %vm383_vm1, %v25762_v8  ;;  %v25790_v8 = vld [vmem:[#allocation2 + $0xc3] sm:$0xff] }
  0xd8   : > { %21810 = vmatmul.mubr.msk.f32.vlgmr.msra.gmra.mrb[0].mxu0 %vm383_vm1, %v25158_v37  ;;  %v25801_v37 = vld [vmem:[#allocation2 + $0xcb] sm:$0xff] }
  0xd9   : > { %21812 = vmatprep.mubr.msk.f32.mxu0 %vm383_vm1, %v25164_v39  ;;  %21834 = vmatpush3.msk.msra.mxu0 %vm577_vm0, %v2591_v29  ;;  %29010 = vst [vmem:[#allocation23_spill] sm:$0xff] %v25801_v37  ;;  %v25803_v39 = vld [vmem:[#allocation2 + $0xdb] sm:$0xff]  ;;  %v25819_v29 = vld [vmem:[#allocation2 + $0xf3] sm:$0xff] }
  0xda   : > { %22322 = vmatmul.mubr.msk.f32.gmra.mrb[28].mxu1 %vm383_vm1, %v25772_v16  ;;  %21859 = vmatprep.subr.msk.mxu0 %vm577_vm0, %v2820_v17 }
  0xdb   : > { %22324 = vmatprep.mubr.msk.f32.mxu1 %vm383_vm1, %v25774_v20 }
  0xdc   : > { %21813 = vmatmul.mubr.msk.f32.gmra.mrb[2].mxu0 %vm383_vm1, %v25177_v41  ;;  %v7445_v41 = vld [vmem:[%s28905_s1 + $0x14] sm:$0xf] }
  0xdd   : > { %21815 = vmatprep.mubr.msk.f32.mxu0 %vm383_vm1, %v25183_v43  ;;  %v25817_v43 = vld [vmem:[#allocation2 + $0xe3] sm:$0xff] }
  0xde   : > { %22325 = vmatmul.mubr.msk.f32.gmra.mrb[30].mxu1 %vm383_vm1, %v25787_v34 }
  0xdf   : > { %22329 = vmatprep.mubr.msk.f32.mxu1 %vm383_vm1, %v25790_v8 }
  0xe0   : > { %21816 = vmatmul.mubr.msk.f32.gmra.mrb[4].mxu0 %vm383_vm1, %v25193_v45  ;;  %v25830_v45 = vld [vmem:[#allocation2 + $0xfb] sm:$0xff] }
  0xe1   : > { %21818 = vmatprep.mubr.msk.f32.mxu0 %vm383_vm1, %v25199_v47  ;;  %v25832_v47 = vld [vmem:[#allocation2 + $0x10b] sm:$0xff] }
  0xe2   : > { %22330 = vmatmul.mubr.msk.f32.vlgmr.msra.gmra.mrb[16].mxu1 %vm383_vm1, %v25801_v37 }
  0xe3   : > { %22354 = vmatpush3.msk.msra.mxu1 %vm577_vm0, %v7215_v28  ;;  %22332 = vmatprep.mubr.msk.f32.mxu1 %vm383_vm1, %v25803_v39  ;;  %v25880_v28 = vld [vmem:[#allocation2 + $0x16b] sm:$0xff] }
  0xe4   : > { %22379 = vmatprep.subr.msk.mxu1 %vm577_vm0, %v7445_v41  ;;  %21819 = vmatmul.mubr.msk.f32.gmra.mrb[6].mxu0 %vm383_vm1, %v25209_v49  ;;  %v25842_v49 = vld [vmem:[#allocation2 + $0x113] sm:$0xff]  ;;  %29013 = vst [vmem:[#allocation26_spill] sm:$0xff] %v25880_v28 }
  0xe5   : > { %21821 = vmatprep.mubr.msk.f32.mxu0 %vm383_vm1, %v25215_v52  ;;  %v25844_v52 = vld [vmem:[#allocation2 + $0x123] sm:$0xff] }
  0xe6   : > { %22333 = vmatmul.mubr.msk.f32.gmra.mrb[18].mxu1 %vm383_vm1, %v25817_v43 }
  0xe7   : > { %22335 = vmatprep.mubr.msk.f32.mxu1 %vm383_vm1, %v25819_v29 }
  0xe8   : > { %21822 = vmatmul.mubr.msk.f32.gmra.mrb[8].mxu0 %vm383_vm1, %v25218_v54  ;;  %v25854_v54 = vld [vmem:[#allocation2 + $0x12b] sm:$0xff] }
  0xe9   : > { %21824 = vmatprep.mubr.msk.f32.mxu0 %vm383_vm1, %v25226_v59  ;;  %v25856_v59 = vld [vmem:[#allocation2 + $0x13b] sm:$0xff] }
  0xea   : > { %22336 = vmatmul.mubr.msk.f32.gmra.mrb[20].mxu1 %vm383_vm1, %v25830_v45 }
  0xeb   : > { %22338 = vmatprep.mubr.msk.f32.mxu1 %vm383_vm1, %v25832_v47 }
  0xec   : > { %21825 = vmatmul.mubr.msk.f32.gmra.mrb[10].mxu0 %vm383_vm1, %v25272_v12  ;;  %v25866_v12 = vld [vmem:[#allocation2 + $0x143] sm:$0xff] }
  0xed   : > { %21827 = vmatprep.mubr.msk.f32.mxu0 %vm383_vm1, %v25280_v14  ;;  %v25868_v14 = vld [vmem:[#allocation2 + $0x153] sm:$0xff] }
  0xee   : > { %22339 = vmatmul.mubr.msk.f32.gmra.mrb[22].mxu1 %vm383_vm1, %v25842_v49  ;;  %29011 = vst [vmem:[#allocation24_spill] sm:$0xff] %v25868_v14 }
  0xef   : > { %22341 = vmatprep.mubr.msk.f32.mxu1 %vm383_vm1, %v25844_v52 }
  0xf0   : > { %21828 = vmatmul.mubr.msk.f32.gmra.mrb[12].mxu0 %vm383_vm1, %v25292_v1  ;;  %v25878_v1 = vld [vmem:[#allocation2 + $0x15b] sm:$0xff] }
  0xf1   : > { %21830 = vmatprep.mubr.msk.f32.mxu0 %vm383_vm1, %v25790_v8  ;;  %29012 = vst [vmem:[#allocation25_spill] sm:$0xff] %v25878_v1 }
  0xf2   : > { %22342 = vmatmul.mubr.msk.f32.gmra.mrb[24].mxu1 %vm383_vm1, %v25854_v54 }
  0xf3   : > { %22344 = vmatprep.mubr.msk.f32.mxu1 %vm383_vm1, %v25856_v59 }
  0xf4   : > { %21831 = vmatmul.mubr.msk.f32.gmra.mrb[14].mxu0 %vm383_vm1, %v25801_v37  ;;  %v25887_v37 = vld [vmem:[%s28905_s1 + $0x2c] sm:$0xf] }
  0xf5   : > { %21835 = vmatprep.mubr.msk.f32.mxu0 %vm383_vm1, %v25309_v25  ;;  %v25895_v25 = vld [vmem:[#allocation2 + $0x173] sm:$0xff] }
  0xf6   : > { %22345 = vmatmul.mubr.msk.f32.gmra.mrb[26].mxu1 %vm383_vm1, %v25866_v12  ;;  %29014 = vst [vmem:[#allocation27_spill] sm:$0xff] %v25895_v25 }
  0xf7   : > { %22347 = vmatprep.mubr.msk.f32.mxu1 %vm383_vm1, %v25868_v14  ;;  %v25898_v14 = vld [vmem:[#allocation2 + $0xc4] sm:$0xff] }
  0xf8   : > { %21836 = vmatmul.mubr.msk.f32.vlgmr.msra.gmra.mrb[0].mxu0 %vm383_vm1, %v25323_v50  ;;  %29015 = vst [vmem:[#allocation28_spill] sm:$0xff] %v25898_v14  ;;  %v25910_v50 = vld [vmem:[#allocation2 + $0xcc] sm:$0xff] }
  0xf9   : > { %21838 = vmatprep.mubr.msk.f32.mxu0 %vm383_vm1, %v25329_v55  ;;  %21860 = vmatpush3.msk.msra.mxu0 %vm577_vm0, %v2820_v17  ;;  %29016 = vst [vmem:[#allocation29_spill] sm:$0xff] %v25910_v50  ;;  %v25912_v55 = vld [vmem:[#allocation2 + $0xdc] sm:$0xff] }
  0xfa   : > { %22348 = vmatmul.mubr.msk.f32.gmra.mrb[28].mxu1 %vm383_vm1, %v25878_v1  ;;  %21885 = vmatprep.subr.msk.mxu0 %vm577_vm0, %v25887_v37  ;;  %29017 = vst [vmem:[#allocation30_spill] sm:$0xff] %v25912_v55  ;;  %v29018_v17 = vld [vmem:[#allocation8_spill] sm:$0xff]  ;;  %v29023_v1 = vld [vmem:[#allocation11_spill] sm:$0xff] }
  0xfb   : > { %22350 = vmatprep.mubr.msk.f32.mxu1 %vm383_vm1, %v25880_v28  ;;  %v25930_v28 = vld [vmem:[#allocation2 + $0xf4] sm:$0xff] }
  0xfc   : > { %21839 = vmatmul.mubr.msk.f32.gmra.mrb[2].mxu0 %vm383_vm1, %v25343_v57  ;;  %v25919_v57 = vld [vmem:[%s28905_s1 + $0x18] sm:$0xf] }
  0xfd   : > { %21841 = vmatprep.mubr.msk.f32.mxu0 %vm383_vm1, %v25349_v58  ;;  %v25928_v58 = vld [vmem:[#allocation2 + $0xe4] sm:$0xff] }
  0xfe   : > { %22351 = vmatmul.mubr.msk.f32.gmra.mrb[30].mxu1 %vm383_vm1, %v25895_v25  ;;  %v29019_v25 = vld [vmem:[#allocation9_spill] sm:$0xff]  ;;  %29020 = vst [vmem:[#allocation8_spill] sm:$0xff] %v25928_v58 }
  0xff   : > { %22355 = vmatprep.mubr.msk.f32.mxu1 %vm383_vm1, %v25898_v14  ;;  %29021 = vst [vmem:[#allocation9_spill] sm:$0xff] %v25930_v28 }
 0x100   : > { %21842 = vmatmul.mubr.msk.f32.gmra.mrb[4].mxu0 %vm383_vm1, %v29018_v17  ;;  %v29022_v17 = vld [vmem:[#allocation10_spill] sm:$0xff] }
 0x101   : > { %21844 = vmatprep.mubr.msk.f32.mxu0 %vm383_vm1, %v29019_v25  ;;  %v25944_v25 = vld [vmem:[#allocation2 + $0x10c] sm:$0xff] }
 0x102   : > { %22356 = vmatmul.mubr.msk.f32.vlgmr.msra.gmra.mrb[16].mxu1 %vm383_vm1, %v25910_v50  ;;  %29025 = vst [vmem:[#allocation11_spill] sm:$0xff] %v25944_v25 }
 0x103   : > { %22380 = vmatpush3.msk.msra.mxu1 %vm577_vm0, %v7445_v41  ;;  %22358 = vmatprep.mubr.msk.f32.mxu1 %vm383_vm1, %v25912_v55  ;;  %v25942_v41 = vld [vmem:[#allocation2 + $0xfc] sm:$0xff] }
 0x104   : > { %22405 = vmatprep.subr.msk.mxu1 %vm577_vm0, %v25919_v57  ;;  %21845 = vmatmul.mubr.msk.f32.gmra.mrb[6].mxu0 %vm383_vm1, %v29022_v17  ;;  %29024 = vst [vmem:[#allocation10_spill] sm:$0xff] %v25942_v41  ;;  %v29026_v55 = vld [vmem:[#allocation12_spill] sm:$0xff]  ;;  %v29027_v17 = vld [vmem:[#allocation13_spill] sm:$0xff] }
 0x105   : > { %21847 = vmatprep.mubr.msk.f32.mxu0 %vm383_vm1, %v29023_v1  ;;  %v25954_v1 = vld [vmem:[#allocation2 + $0x114] sm:$0xff] }
 0x106   : > { %22359 = vmatmul.mubr.msk.f32.gmra.mrb[18].mxu1 %vm383_vm1, %v25928_v58  ;;  %v25956_v58 = vld [vmem:[#allocation2 + $0x124] sm:$0xff] }
 0x107   : > { %22361 = vmatprep.mubr.msk.f32.mxu1 %vm383_vm1, %v25930_v28  ;;  %29028 = vst [vmem:[#allocation12_spill] sm:$0xff] %v25956_v58  ;;  %v29029_v28 = vld [vmem:[#allocation14_spill] sm:$0xff] }
 0x108   : > { %21848 = vmatmul.mubr.msk.f32.gmra.mrb[8].mxu0 %vm383_vm1, %v29026_v55  ;;  %v29030_v55 = vld [vmem:[#allocation15_spill] sm:$0xff] }
 0x109   : > { %21850 = vmatprep.mubr.msk.f32.mxu0 %vm383_vm1, %v29027_v17  ;;  %v25966_v17 = vld [vmem:[#allocation2 + $0x12c] sm:$0xff] }
 0x10a   : > { %22362 = vmatmul.mubr.msk.f32.gmra.mrb[20].mxu1 %vm383_vm1, %v25942_v41  ;;  %29031 = vst [vmem:[#allocation13_spill] sm:$0xff] %v25966_v17  ;;  %v25968_v41 = vld [vmem:[#allocation2 + $0x13c] sm:$0xff] }
 0x10b   : > { %22364 = vmatprep.mubr.msk.f32.mxu1 %vm383_vm1, %v25944_v25  ;;  %29032 = vst [vmem:[#allocation14_spill] sm:$0xff] %v25968_v41  ;;  %v29033_v25 = vld [vmem:[#allocation16_spill] sm:$0xff] }
 0x10c   : > { %21851 = vmatmul.mubr.msk.f32.gmra.mrb[10].mxu0 %vm383_vm1, %v29029_v28  ;;  %v25978_v28 = vld [vmem:[#allocation2 + $0x144] sm:$0xff] }
 0x10d   : > { %21853 = vmatprep.mubr.msk.f32.mxu0 %vm383_vm1, %v29030_v55  ;;  %29034 = vst [vmem:[#allocation15_spill] sm:$0xff] %v25978_v28  ;;  %v2804_v55 = vld [vmem:[#allocation2 + $0x30] sm:$0xff] }
 0x10e   : > { %22365 = vmatmul.mubr.msk.f32.gmra.mrb[22].mxu1 %vm383_vm1, %v25954_v1 }
 0x10f   : > { %22367 = vmatprep.mubr.msk.f32.mxu1 %vm383_vm1, %v25956_v58  ;;  %v25980_v58 = vld [vmem:[#allocation2 + $0x154] sm:$0xff] }
 0x110   : > { %21854 = vmatmul.mubr.msk.f32.gmra.mrb[12].mxu0 %vm383_vm1, %v29033_v25  ;;  %29035 = vst [vmem:[#allocation16_spill] sm:$0xff] %v25980_v58  ;;  %v2805_v25 = vld [vmem:[#allocation2 + $0x38] sm:$0xff] }
 0x111   : > { %21856 = vmatprep.mubr.msk.f32.mxu0 %vm383_vm1, %v25898_v14  ;;  %v25989_v14 = vld [vmem:[#allocation2 + $0x15c] sm:$0xff] }
 0x112   : > { %22368 = vmatmul.mubr.msk.f32.gmra.mrb[24].mxu1 %vm383_vm1, %v25966_v17  ;;  %v25993_v17 = vld [vmem:[#allocation2 + $0x16c] sm:$0xff] }
 0x113   : > { %22370 = vmatprep.mubr.msk.f32.mxu1 %vm383_vm1, %v25968_v41  ;;  %v25991_v41 = vld [vmem:[#allocation2 + $0x48] sm:$0xff]  ;;  %29036 = vst [vmem:[#allocation31_spill] sm:$0xff] %v25993_v17 }
 0x114   : > { %21857 = vmatmul.mubr.msk.f32.gmra.mrb[14].mxu0 %vm383_vm1, %v25910_v50  ;;  %v25999_v50 = vld [vmem:[%s28905_s1 + $0x30] sm:$0xf] }
 0x115   : > { %21861 = vmatprep.mubr.msk.f32.mxu0 %vm383_vm1, %v2804_v55  ;;  %v26005_v55 = vld [vmem:[#allocation2 + $0x50] sm:$0xff] }
 0x116   : > { %22371 = vmatmul.mubr.msk.f32.gmra.mrb[26].mxu1 %vm383_vm1, %v25978_v28  ;;  %29037 = vst [vmem:[#allocation32_spill] sm:$0xff] %v26005_v55  ;;  %v26011_v28 = vld [vmem:[#allocation2 + $0x60] sm:$0xff] }
 0x117   : > { %22373 = vmatprep.mubr.msk.f32.mxu1 %vm383_vm1, %v25980_v58  ;;  %v26009_v58 = vld [vmem:[#allocation2 + $0x174] sm:$0xff]  ;;  %29039 = vst [vmem:[#allocation34_spill] sm:$0xff] %v26011_v28 }
 0x118   : > { %21862 = vmatmul.mubr.msk.f32.vlgmr.msra.gmra.mrb[0].mxu0 %vm383_vm1, %v2805_v25  ;;  %29038 = vst [vmem:[#allocation33_spill] sm:$0xff] %v26009_v58  ;;  %v26023_v25 = vld [vmem:[#allocation2 + $0x68] sm:$0xff] }
 0x119   : > { %21864 = vmatprep.mubr.msk.f32.mxu0 %vm383_vm1, %v25991_v41  ;;  %21886 = vmatpush3.msk.msra.mxu0 %vm577_vm0, %v25887_v37  ;;  %29040 = vst [vmem:[#allocation35_spill] sm:$0xff] %v26023_v25 }
 0x11a   : > { %22374 = vmatmul.mubr.msk.f32.gmra.mrb[28].mxu1 %vm383_vm1, %v25989_v14  ;;  %21911 = vmatprep.subr.msk.mxu0 %vm577_vm0, %v25999_v50 }
 0x11b   : > { %22376 = vmatprep.mubr.msk.f32.mxu1 %vm383_vm1, %v25993_v17  ;;  %v26027_v17 = vld [vmem:[#allocation2 + $0x78] sm:$0xff] }
 0x11c   : > { %21865 = vmatmul.mubr.msk.f32.gmra.mrb[2].mxu0 %vm383_vm1, %v26005_v55  ;;  %29041 = vst [vmem:[#allocation36_spill] sm:$0xff] %v26027_v17  ;;  %v26036_v55 = vld [vmem:[%s28905_s1 + $0x1c] sm:$0xf] }
 0x11d   : > { %21867 = vmatprep.mubr.msk.f32.mxu0 %vm383_vm1, %v26011_v28  ;;  %v26044_v28 = vld [vmem:[#allocation2 + $0x80] sm:$0xff] }
 0x11e   : > { %22377 = vmatmul.mubr.msk.f32.gmra.mrb[30].mxu1 %vm383_vm1, %v26009_v58 }
 0x11f   : > { %22381 = vmatprep.mubr.msk.f32.mxu1 %vm383_vm1, %v25477_v27 }
 0x120   : > { %21868 = vmatmul.mubr.msk.f32.gmra.mrb[4].mxu0 %vm383_vm1, %v26023_v25 }
 0x121   : > { %v26029_v37 = vpop.f32.mrb[0].mxu1  ;;  %21870 = vmatprep.mubr.msk.f32.mxu0 %vm383_vm1, %v26027_v17 }
 0x122   : > { %29042 = vst [vmem:[#allocation37_spill] sm:$0xff] %v26029_v37  ;;  %v26038_v58 = vpop.f32.mrb[1].mxu1  ;;  %22382 = vmatmul.mubr.msk.f32.vlgmr.msra.gmra.mrb[16].mxu1 %vm383_vm1, %v25491_v31  ;;  %v26050_v37 = vld [vmem:[#allocation2 + $0x90] sm:$0xff] }
 0x123   : > { %29043 = vst [vmem:[#allocation38_spill] sm:$0xff] %v26038_v58  ;;  %22406 = vmatpush3.msk.msra.mxu1 %vm577_vm0, %v25919_v57  ;;  %22384 = vmatprep.mubr.msk.f32.mxu1 %vm383_vm1, %v25493_v32  ;;  %v26064_v57 = vld [vmem:[#allocation2 + $0x98] sm:$0xff]  ;;  %v26068_v32 = vld [vmem:[#allocation2 + $0xa8] sm:$0xff] }
 0x124   : > { %22431 = vmatprep.subr.msk.mxu1 %vm577_vm0, %v26036_v55  ;;  %21871 = vmatmul.mubr.msk.f32.gmra.mrb[6].mxu0 %vm383_vm1, %v26044_v28 }
 0x125   : > { %v26054_v58 = vpop.f32.mrb[2].mxu1  ;;  %21873 = vmatprep.mubr.msk.f32.mxu0 %vm383_vm1, %v26050_v37 }
 0x126   : > { %29044 = vst [vmem:[#allocation39_spill] sm:$0xff] %v26054_v58  ;;  %v26058_v25 = vpop.f32.mrb[3].mxu1  ;;  %22385 = vmatmul.mubr.msk.f32.gmra.mrb[18].mxu1 %vm383_vm1, %v25504_v33  ;;  %v26080_v33 = vld [vmem:[#allocation2 + $0xb0] sm:$0xff] }
 0x127   : > { %29045 = vst [vmem:[#allocation40_spill] sm:$0xff] %v26058_v25  ;;  %22387 = vmatprep.mubr.msk.f32.mxu1 %vm383_vm1, %v25506_v35  ;;  %v29048_v35 = vld [vmem:[#allocation17_spill] sm:$0xff]  ;;  %v29078_v25 = vld [vmem:[#allocation14_spill] sm:$0xff] }
 0x128   : > { %21874 = vmatmul.mubr.msk.f32.gmra.mrb[8].mxu0 %vm383_vm1, %v26064_v57 }
 0x129   : > { %v26070_v17 = vpop.f32.mrb[4].mxu1  ;;  %21876 = vmatprep.mubr.msk.f32.mxu0 %vm383_vm1, %v26068_v32 }
 0x12a   : > { %29046 = vst [vmem:[#allocation41_spill] sm:$0xff] %v26070_v17  ;;  %v26074_v58 = vpop.f32.mrb[5].mxu1  ;;  %22388 = vmatmul.mubr.msk.f32.gmra.mrb[20].mxu1 %vm383_vm1, %v25516_v38  ;;  %v29049_v38 = vld [vmem:[#allocation18_spill] sm:$0xff]  ;;  %v29077_v17 = vld [vmem:[#allocation28_spill] sm:$0xff] }
 0x12b   : > { %29047 = vst [vmem:[#allocation42_spill] sm:$0xff] %v26074_v58  ;;  %22390 = vmatprep.mubr.msk.f32.mxu1 %vm383_vm1, %v25518_v40  ;;  %v3033_v40 = vld [vmem:[#allocation2 + $0x31] sm:$0xff] }
 0x12c   : > { %21877 = vmatmul.mubr.msk.f32.gmra.mrb[10].mxu0 %vm383_vm1, %v26080_v33 }
 0x12d   : > { %21879 = vmatprep.mubr.msk.f32.mxu0 %vm383_vm1, %v25464_v61  ;;  %v3034_v61 = vld [vmem:[#allocation2 + $0x39] sm:$0xff] }
 0x12e   : > { %22391 = vmatmul.mubr.msk.f32.gmra.mrb[22].mxu1 %vm383_vm1, %v25528_v42  ;;  %v26107_v42 = vld [vmem:[#allocation2 + $0x49] sm:$0xff] }
 0x12f   : > { %22393 = vmatprep.mubr.msk.f32.mxu1 %vm383_vm1, %v25530_v44  ;;  %v26109_v44 = vld [vmem:[#allocation2 + $0x180] sm:$0xff] }
 0x130   : > { %21880 = vmatmul.mubr.msk.f32.gmra.mrb[12].mxu0 %vm383_vm1, %v29048_v35  ;;  %v26152_v35 = vld [vmem:[%s28905_s1 + $0x20] sm:$0xf] }
 0x131   : > { %21882 = vmatprep.mubr.msk.f32.mxu0 %vm383_vm1, %v25477_v27  ;;  %v26115_v27 = vld [vmem:[%s28905_s1 + $0x34] sm:$0xf] }
 0x132   : > { %22394 = vmatmul.mubr.msk.f32.gmra.mrb[24].mxu1 %vm383_vm1, %v25540_v46  ;;  %v26125_v46 = vld [vmem:[#allocation2 + $0x188] sm:$0xff] }
 0x133   : > { %22396 = vmatprep.mubr.msk.f32.mxu1 %vm383_vm1, %v29049_v38 }
 0x134   : > { %21883 = vmatmul.mubr.msk.f32.gmra.mrb[14].mxu0 %vm383_vm1, %v25491_v31  ;;  %v26121_v31 = vld [vmem:[#allocation2 + $0x51] sm:$0xff] }
 0x135   : > { %21887 = vmatprep.mubr.msk.f32.mxu0 %vm383_vm1, %v3033_v40  ;;  %v26160_v40 = vld [vmem:[#allocation2 + $0x81] sm:$0xff] }
 0x136   : > { %22397 = vmatmul.mubr.msk.f32.gmra.mrb[26].mxu1 %vm383_vm1, %v25552_v51  ;;  %v26127_v51 = vld [vmem:[#allocation2 + $0x61] sm:$0xff] }
 0x137   : > { %22399 = vmatprep.mubr.msk.f32.mxu1 %vm383_vm1, %v25554_v23  ;;  %v26139_v23 = vld [vmem:[#allocation2 + $0x69] sm:$0xff] }
 0x138   : > { %21888 = vmatmul.mubr.msk.f32.vlgmr.msra.gmra.mrb[0].mxu0 %vm383_vm1, %v3034_v61  ;;  %v26166_v61 = vld [vmem:[#allocation2 + $0x91] sm:$0xff] }
 0x139   : > { %21890 = vmatprep.mubr.msk.f32.mxu0 %vm383_vm1, %v26107_v42  ;;  %21912 = vmatpush3.msk.msra.mxu0 %vm577_vm0, %v25999_v50 }
 0x13a   : > { %22400 = vmatmul.mubr.msk.f32.gmra.mrb[28].mxu1 %vm383_vm1, %v25569_v63  ;;  %21937 = vmatprep.subr.msk.mxu0 %vm577_vm0, %v26115_v27  ;;  %v26143_v63 = vld [vmem:[#allocation2 + $0x79] sm:$0xff] }
 0x13b   : > { %22402 = vmatprep.mubr.msk.f32.mxu1 %vm383_vm1, %v26109_v44 }
 0x13c   : > { %21891 = vmatmul.mubr.msk.f32.gmra.mrb[2].mxu0 %vm383_vm1, %v26121_v31 }
 0x13d   : > { %21893 = vmatprep.mubr.msk.f32.mxu0 %vm383_vm1, %v26127_v51 }
 0x13e   : > { %22403 = vmatmul.mubr.msk.f32.gmra.mrb[30].mxu1 %vm383_vm1, %v26125_v46 }
 0x13f   : > { %22407 = vmatprep.mubr.msk.f32.mxu1 %vm383_vm1, %v25586_v19 }
 0x140   : > { %21894 = vmatmul.mubr.msk.f32.gmra.mrb[4].mxu0 %vm383_vm1, %v26139_v23 }
 0x141   : > { %v26145_v50 = vpop.f32.mrb[6].mxu1  ;;  %21896 = vmatprep.mubr.msk.f32.mxu0 %vm383_vm1, %v26143_v63 }
 0x142   : > { %29050 = vst [vmem:[#allocation17_spill] sm:$0xff] %v26145_v50  ;;  %v26154_v38 = vpop.f32.mrb[7].mxu1  ;;  %22408 = vmatmul.mubr.msk.f32.vlgmr.msra.gmra.mrb[16].mxu1 %vm383_vm1, %v25600_v22 }
 0x143   : > { %29051 = vst [vmem:[#allocation18_spill] sm:$0xff] %v26154_v38  ;;  %22432 = vmatpush3.msk.msra.mxu1 %vm577_vm0, %v26036_v55  ;;  %22410 = vmatprep.mubr.msk.f32.mxu1 %vm383_vm1, %v25602_v11  ;;  %v26180_v55 = vld [vmem:[#allocation2 + $0x99] sm:$0xff]  ;;  %v26184_v11 = vld [vmem:[#allocation2 + $0xa9] sm:$0xff] }
 0x144   : > { %22457 = vmatprep.subr.msk.mxu1 %vm577_vm0, %v26152_v35  ;;  %21897 = vmatmul.mubr.msk.f32.gmra.mrb[6].mxu0 %vm383_vm1, %v26160_v40 }
 0x145   : > { %v26170_v38 = vpop.f32.mrb[8].mxu1  ;;  %21899 = vmatprep.mubr.msk.f32.mxu0 %vm383_vm1, %v26166_v61 }
 0x146   : > { %29052 = vst [vmem:[#allocation43_spill] sm:$0xff] %v26170_v38  ;;  %v26174_v50 = vpop.f32.mrb[9].mxu1  ;;  %22411 = vmatmul.mubr.msk.f32.gmra.mrb[18].mxu1 %vm383_vm1, %v25613_v24  ;;  %v26196_v24 = vld [vmem:[#allocation2 + $0xb1] sm:$0xff] }
 0x147   : > { %29053 = vst [vmem:[#allocation44_spill] sm:$0xff] %v26174_v50  ;;  %22413 = vmatprep.mubr.msk.f32.mxu1 %vm383_vm1, %v25615_v30 }
 0x148   : > { %21900 = vmatmul.mubr.msk.f32.gmra.mrb[8].mxu0 %vm383_vm1, %v26180_v55 }
 0x149   : > { %v26186_v58 = vpop.f32.mrb[10].mxu1  ;;  %21902 = vmatprep.mubr.msk.f32.mxu0 %vm383_vm1, %v26184_v11 }
 0x14a   : > { %29054 = vst [vmem:[#allocation45_spill] sm:$0xff] %v26186_v58  ;;  %v26190_v38 = vpop.f32.mrb[11].mxu1  ;;  %22414 = vmatmul.mubr.msk.f32.gmra.mrb[20].mxu1 %vm383_vm1, %v25625_v53  ;;  %v29058_v53 = vld [vmem:[#allocation19_spill] sm:$0xff] }
 0x14b   : > { %29055 = vst [vmem:[#allocation46_spill] sm:$0xff] %v26190_v38  ;;  %22416 = vmatprep.mubr.msk.f32.mxu1 %vm383_vm1, %v25627_v56  ;;  %v29059_v38 = vld [vmem:[#allocation20_spill] sm:$0xff] }
 0x14c   : > { %21903 = vmatmul.mubr.msk.f32.gmra.mrb[10].mxu0 %vm383_vm1, %v26196_v24 }
 0x14d   : > { %v26200_v30 = vpop.f32.mrb[12].mxu1  ;;  %21905 = vmatprep.mubr.msk.f32.mxu0 %vm383_vm1, %v29058_v53  ;;  %v469_v53 = vld [vmem:[%s25066_s12 + $0xf0] sm:$0xff] }
 0x14e   : > { %29056 = vst [vmem:[#allocation47_spill] sm:$0xff] %v26200_v30  ;;  %v26204_v58 = vpop.f32.mrb[13].mxu1  ;;  %22417 = vmatmul.mubr.msk.f32.gmra.mrb[22].mxu1 %vm383_vm1, %v25637_v36  ;;  %v3262_v36 = vld [vmem:[#allocation2 + $0x32] sm:$0xff]  ;;  %502 = vst.msk [vmem:[#allocation2 + $0x19a] sm:$0xff] %vm383_vm1, %v469_v53  ;;  %v26279_v53 = vld [vmem:[#allocation2 + $0x82] sm:$0xff] }
 0x14f   : > { %29057 = vst [vmem:[#allocation48_spill] sm:$0xff] %v26204_v58  ;;  %22419 = vmatprep.mubr.msk.f32.mxu1 %vm383_vm1, %v29059_v38  ;;  %v470_v38 = vld [vmem:[%s25066_s12 + $0xf8] sm:$0xff] }
 0x150   : > { %21906 = vmatmul.mubr.msk.f32.gmra.mrb[12].mxu0 %vm383_vm1, %v25584_v13  ;;  %v3263_v13 = vld [vmem:[#allocation2 + $0x3a] sm:$0xff]  ;;  %503 = vst.msk [vmem:[#allocation2 + $0x1a2] sm:$0xff] %vm383_vm1, %v470_v38  ;;  %v26285_v38 = vld [vmem:[#allocation2 + $0x92] sm:$0xff] }
 0x151   : > { %v26212_v50 = vpop.f32.mrb[14].mxu1  ;;  %21908 = vmatprep.mubr.msk.f32.mxu0 %vm383_vm1, %v25586_v19  ;;  %v26235_v19 = vld [vmem:[#allocation2 + $0x4a] sm:$0xff]  ;;  %v26486_v58 = vld [vmem:[#allocation2 + $0x9c] sm:$0xff] }
 0x152   : > { %29060 = vst [vmem:[#allocation19_spill] sm:$0xff] %v26212_v50  ;;  %v26216_v56 = vpop.f32.mrb[15].mxu1  ;;  %22420 = vmatmul.mubr.msk.f32.gmra.mrb[24].mxu1 %vm383_vm1, %v25649_v62  ;;  %v26237_v62 = vld [vmem:[#allocation2 + $0x181] sm:$0xff]  ;;  %v29072_v50 = vld [vmem:[#allocation10_spill] sm:$0xff]  ;;  %v29073_v30 = vld [vmem:[#allocation11_spill] sm:$0xff] }
 0x153   : > { %29061 = vst [vmem:[#allocation20_spill] sm:$0xff] %v26216_v56  ;;  %22422 = vmatprep.mubr.msk.f32.mxu1 %vm383_vm1, %v25651_v2  ;;  %v26253_v2 = vld [vmem:[#allocation2 + $0x62] sm:$0xff]  ;;  %v26477_v56 = vld [vmem:[#allocation2 + $0x94] sm:$0xff] }
 0x154   : > { %21909 = vmatmul.mubr.msk.f32.gmra.mrb[14].mxu0 %vm383_vm1, %v25600_v22  ;;  %v3736_v22 = vld [vmem:[%s28905_s1 + $0x38] sm:$0xf] }
 0x155   : > { %21913 = vmatprep.mubr.msk.f32.mxu0 %vm383_vm1, %v3262_v36  ;;  %v26268_v36 = vld [vmem:[#allocation2 + $0x7a] sm:$0xff] }
 0x156   : > { %22423 = vmatmul.mubr.msk.f32.gmra.mrb[26].mxu1 %vm383_vm1, %v25665_v60  ;;  %v26247_v60 = vld [vmem:[#allocation2 + $0x52] sm:$0xff] }
 0x157   : > { %22425 = vmatprep.mubr.msk.f32.mxu1 %vm383_vm1, %v25667_v48  ;;  %v26251_v48 = vld [vmem:[#allocation2 + $0x189] sm:$0xff] }
 0x158   : > { %21914 = vmatmul.mubr.msk.f32.vlgmr.msra.gmra.mrb[0].mxu0 %vm383_vm1, %v3263_v13  ;;  %v26294_v13 = vld [vmem:[#allocation2 + $0x9a] sm:$0xff] }
 0x159   : > { %21916 = vmatprep.mubr.msk.f32.mxu0 %vm383_vm1, %v26235_v19  ;;  %21938 = vmatpush3.msk.msra.mxu0 %vm577_vm0, %v26115_v27  ;;  %v8361_v27 = vld [vmem:[%s28905_s1 + $0x24] sm:$0xf] }
 0x15a   : > { %22426 = vmatmul.mubr.msk.f32.gmra.mrb[28].mxu1 %vm383_vm1, %v25680_v15  ;;  %21963 = vmatprep.subr.msk.mxu0 %vm577_vm0, %v3736_v22  ;;  %v26264_v15 = vld [vmem:[#allocation2 + $0x6a] sm:$0xff] }
 0x15b   : > { %22428 = vmatprep.mubr.msk.f32.mxu1 %vm383_vm1, %v26237_v62 }
 0x15c   : > { %21917 = vmatmul.mubr.msk.f32.gmra.mrb[2].mxu0 %vm383_vm1, %v26247_v60 }
 0x15d   : > { %21919 = vmatprep.mubr.msk.f32.mxu0 %vm383_vm1, %v26253_v2 }
 0x15e   : > { %22429 = vmatmul.mubr.msk.f32.gmra.mrb[30].mxu1 %vm383_vm1, %v26251_v48 }
 0x15f   : > { %22433 = vmatprep.mubr.msk.f32.mxu1 %vm383_vm1, %v25697_v26 }
 0x160   : > { %21920 = vmatmul.mubr.msk.f32.gmra.mrb[4].mxu0 %vm383_vm1, %v26264_v15 }
 0x161   : > { %21922 = vmatprep.mubr.msk.f32.mxu0 %vm383_vm1, %v26268_v36 }
 0x162   : > { %22434 = vmatmul.mubr.msk.f32.vlgmr.msra.gmra.mrb[16].mxu1 %vm383_vm1, %v25711_v7 }
 0x163   : > { %22458 = vmatpush3.msk.msra.mxu1 %vm577_vm0, %v26152_v35  ;;  %22436 = vmatprep.mubr.msk.f32.mxu1 %vm383_vm1, %v25713_v18  ;;  %v26298_v35 = vld [vmem:[#allocation2 + $0xaa] sm:$0xff]  ;;  %v26306_v18 = vld [vmem:[#allocation2 + $0xb2] sm:$0xff] }
 0x164   : > { %22483 = vmatprep.subr.msk.mxu1 %vm577_vm0, %v8361_v27  ;;  %21923 = vmatmul.mubr.msk.f32.gmra.mrb[6].mxu0 %vm383_vm1, %v26279_v53 }
 0x165   : > { %21925 = vmatprep.mubr.msk.f32.mxu0 %vm383_vm1, %v26285_v38 }
 0x166   : > { %22437 = vmatmul.mubr.msk.f32.gmra.mrb[18].mxu1 %vm383_vm1, %v25724_v9  ;;  %v29062_v9 = vld [vmem:[#allocation21_spill] sm:$0xff] }
 0x167   : > { %22439 = vmatprep.mubr.msk.f32.mxu1 %vm383_vm1, %v25726_v21  ;;  %v29063_v21 = vld [vmem:[#allocation22_spill] sm:$0xff] }
 0x168   : > { %21926 = vmatmul.mubr.msk.f32.gmra.mrb[8].mxu0 %vm383_vm1, %v26294_v13 }
 0x169   : > { %21928 = vmatprep.mubr.msk.f32.mxu0 %vm383_vm1, %v26298_v35 }
 0x16a   : > { %22440 = vmatmul.mubr.msk.f32.gmra.mrb[20].mxu1 %vm383_vm1, %v25736_v4  ;;  %v3491_v4 = vld [vmem:[#allocation2 + $0x33] sm:$0xff] }
 0x16b   : > { %22442 = vmatprep.mubr.msk.f32.mxu1 %vm383_vm1, %v25738_v6  ;;  %v26333_v6 = vld [vmem:[#allocation2 + $0x4b] sm:$0xff] }
 0x16c   : > { %21929 = vmatmul.mubr.msk.f32.gmra.mrb[10].mxu0 %vm383_vm1, %v26306_v18 }
 0x16d   : > { %21931 = vmatprep.mubr.msk.f32.mxu0 %vm383_vm1, %v25684_v5  ;;  %v3492_v5 = vld [vmem:[#allocation2 + $0x3b] sm:$0xff] }
 0x16e   : > { %22443 = vmatmul.mubr.msk.f32.gmra.mrb[22].mxu1 %vm383_vm1, %v25748_v0  ;;  %v26335_v0 = vld [vmem:[#allocation2 + $0x182] sm:$0xff] }
 0x16f   : > { %22445 = vmatprep.mubr.msk.f32.mxu1 %vm383_vm1, %v25750_v10  ;;  %v26349_v10 = vld [vmem:[#allocation2 + $0x18a] sm:$0xff] }
 0x170   : > { %21932 = vmatmul.mubr.msk.f32.gmra.mrb[12].mxu0 %vm383_vm1, %v29062_v9  ;;  %v26381_v9 = vld [vmem:[#allocation2 + $0x93] sm:$0xff] }
 0x171   : > { %21934 = vmatprep.mubr.msk.f32.mxu0 %vm383_vm1, %v25697_v26  ;;  %v3966_v26 = vld [vmem:[%s28905_s1 + $0x3c] sm:$0xf] }
 0x172   : > { %22446 = vmatmul.mubr.msk.f32.gmra.mrb[24].mxu1 %vm383_vm1, %v25760_v3  ;;  %v26351_v3 = vld [vmem:[#allocation2 + $0x63] sm:$0xff] }
 0x173   : > { %22448 = vmatprep.mubr.msk.f32.mxu1 %vm383_vm1, %v29063_v21  ;;  %v26390_v21 = vld [vmem:[#allocation2 + $0x9b] sm:$0xff] }
 0x174   : > { %21935 = vmatmul.mubr.msk.f32.gmra.mrb[14].mxu0 %vm383_vm1, %v25711_v7  ;;  %v26345_v7 = vld [vmem:[#allocation2 + $0x53] sm:$0xff] }
 0x175   : > { %21939 = vmatprep.mubr.msk.f32.mxu0 %vm383_vm1, %v3491_v4  ;;  %v26441_v4 = vld [vmem:[#allocation2 + $0x54] sm:$0xff] }
 0x176   : > { %22449 = vmatmul.mubr.msk.f32.gmra.mrb[26].mxu1 %vm383_vm1, %v25772_v16  ;;  %v26361_v16 = vld [vmem:[#allocation2 + $0x6b] sm:$0xff] }
 0x177   : > { %22451 = vmatprep.mubr.msk.f32.mxu1 %vm383_vm1, %v25774_v20  ;;  %v26365_v20 = vld [vmem:[#allocation2 + $0x7b] sm:$0xff] }
 0x178   : > { %21940 = vmatmul.mubr.msk.f32.vlgmr.msra.gmra.mrb[0].mxu0 %vm383_vm1, %v3492_v5  ;;  %v26445_v5 = vld [vmem:[#allocation2 + $0x18b] sm:$0xff] }
 0x179   : > { %21942 = vmatprep.mubr.msk.f32.mxu0 %vm383_vm1, %v26333_v6  ;;  %21964 = vmatpush3.msk.msra.mxu0 %vm577_vm0, %v3736_v22  ;;  %v26376_v22 = vld [vmem:[#allocation2 + $0x83] sm:$0xff] }
 0x17a   : > { %22452 = vmatmul.mubr.msk.f32.gmra.mrb[28].mxu1 %vm383_vm1, %v25787_v34  ;;  %21989 = vmatprep.subr.msk.mxu0 %vm577_vm0, %v3966_v26  ;;  %v8591_v34 = vld [vmem:[%s28905_s1 + $0x28] sm:$0xf] }
 0x17b   : > { %22454 = vmatprep.mubr.msk.f32.mxu1 %vm383_vm1, %v26335_v0 }
 0x17c   : > { %21943 = vmatmul.mubr.msk.f32.gmra.mrb[2].mxu0 %vm383_vm1, %v26345_v7 }
 0x17d   : > { %21945 = vmatprep.mubr.msk.f32.mxu0 %vm383_vm1, %v26351_v3 }
 0x17e   : > { %22455 = vmatmul.mubr.msk.f32.gmra.mrb[30].mxu1 %vm383_vm1, %v26349_v10 }
 0x17f   : > { %22459 = vmatprep.mubr.msk.f32.mxu1 %vm383_vm1, %v25803_v39 }
 0x180   : > { %21946 = vmatmul.mubr.msk.f32.gmra.mrb[4].mxu0 %vm383_vm1, %v26361_v16 }
 0x181   : > { %21948 = vmatprep.mubr.msk.f32.mxu0 %vm383_vm1, %v26365_v20 }
 0x182   : > { %22460 = vmatmul.mubr.msk.f32.vlgmr.msra.gmra.mrb[16].mxu1 %vm383_vm1, %v25817_v43 }
 0x183   : > { %22484 = vmatpush3.msk.msra.mxu1 %vm577_vm0, %v8361_v27  ;;  %22462 = vmatprep.mubr.msk.f32.mxu1 %vm383_vm1, %v25819_v29  ;;  %v26394_v27 = vld [vmem:[#allocation2 + $0xab] sm:$0xff]  ;;  %v26402_v29 = vld [vmem:[#allocation2 + $0xb3] sm:$0xff] }
 0x184   : > { %22509 = vmatprep.subr.msk.mxu1 %vm577_vm0, %v8591_v34  ;;  %21949 = vmatmul.mubr.msk.f32.gmra.mrb[6].mxu0 %vm383_vm1, %v26376_v22 }
 0x185   : > { %21951 = vmatprep.mubr.msk.f32.mxu0 %vm383_vm1, %v26381_v9 }
 0x186   : > { %22463 = vmatmul.mubr.msk.f32.gmra.mrb[18].mxu1 %vm383_vm1, %v25830_v45  ;;  %v29064_v45 = vld [vmem:[#allocation23_spill] sm:$0xff] }
 0x187   : > { %22465 = vmatprep.mubr.msk.f32.mxu1 %vm383_vm1, %v25832_v47  ;;  %v29065_v47 = vld [vmem:[#allocation24_spill] sm:$0xff] }
 0x188   : > { %21952 = vmatmul.mubr.msk.f32.gmra.mrb[8].mxu0 %vm383_vm1, %v26390_v21 }
 0x189   : > { %21954 = vmatprep.mubr.msk.f32.mxu0 %vm383_vm1, %v26394_v27 }
 0x18a   : > { %22466 = vmatmul.mubr.msk.f32.gmra.mrb[20].mxu1 %vm383_vm1, %v25842_v49  ;;  %v3720_v49 = vld [vmem:[#allocation2 + $0x34] sm:$0xff] }
 0x18b   : > { %22468 = vmatprep.mubr.msk.f32.mxu1 %vm383_vm1, %v25844_v52  ;;  %v3721_v52 = vld [vmem:[#allocation2 + $0x3c] sm:$0xff] }
 0x18c   : > { %21955 = vmatmul.mubr.msk.f32.gmra.mrb[10].mxu0 %vm383_vm1, %v26402_v29 }
 0x18d   : > { %21957 = vmatprep.mubr.msk.f32.mxu0 %vm383_vm1, %v25790_v8  ;;  %v29066_v8 = vld [vmem:[#allocation25_spill] sm:$0xff] }
 0x18e   : > { %22469 = vmatmul.mubr.msk.f32.gmra.mrb[22].mxu1 %vm383_vm1, %v25854_v54  ;;  %v29067_v54 = vld [vmem:[#allocation26_spill] sm:$0xff] }
 0x18f   : > { %22471 = vmatprep.mubr.msk.f32.mxu1 %vm383_vm1, %v25856_v59  ;;  %v26429_v59 = vld [vmem:[#allocation2 + $0x4c] sm:$0xff] }
 0x190   : > { %21958 = vmatmul.mubr.msk.f32.gmra.mrb[12].mxu0 %vm383_vm1, %v29064_v45  ;;  %v26447_v45 = vld [vmem:[#allocation2 + $0x64] sm:$0xff] }
 0x191   : > { %21960 = vmatprep.mubr.msk.f32.mxu0 %vm383_vm1, %v25803_v39  ;;  %v4195_v39 = vld [vmem:[%s28905_s1 + $0x40] sm:$0xf] }
 0x192   : > { %22472 = vmatmul.mubr.msk.f32.gmra.mrb[24].mxu1 %vm383_vm1, %v25866_v12  ;;  %v26431_v12 = vld [vmem:[#allocation2 + $0x183] sm:$0xff] }
 0x193   : > { %22474 = vmatprep.mubr.msk.f32.mxu1 %vm383_vm1, %v29065_v47  ;;  %v26457_v47 = vld [vmem:[#allocation2 + $0x6c] sm:$0xff] }
 0x194   : > { %21961 = vmatmul.mubr.msk.f32.gmra.mrb[14].mxu0 %vm383_vm1, %v25817_v43  ;;  %v29068_v43 = vld [vmem:[#allocation27_spill] sm:$0xff] }
 0x195   : > { %21965 = vmatprep.mubr.msk.f32.mxu0 %vm383_vm1, %v3720_v49  ;;  %v29069_v49 = vld [vmem:[#allocation30_spill] sm:$0xff] }
 0x196   : > { %22475 = vmatmul.mubr.msk.f32.gmra.mrb[26].mxu1 %vm383_vm1, %v29066_v8  ;;  %v26461_v8 = vld [vmem:[#allocation2 + $0x7c] sm:$0xff] }
 0x197   : > { %22477 = vmatprep.mubr.msk.f32.mxu1 %vm383_vm1, %v29067_v54  ;;  %v26472_v54 = vld [vmem:[#allocation2 + $0x84] sm:$0xff] }
 0x198   : > { %21966 = vmatmul.mubr.msk.f32.vlgmr.msra.gmra.mrb[0].mxu0 %vm383_vm1, %v3721_v52  ;;  %v29070_v52 = vld [vmem:[#allocation8_spill] sm:$0xff] }
 0x199   : > { %21968 = vmatprep.mubr.msk.f32.mxu0 %vm383_vm1, %v26429_v59  ;;  %21990 = vmatpush3.msk.msra.mxu0 %vm577_vm0, %v3966_v26  ;;  %v8820_v26 = vld [vmem:[%s28905_s1 + $0x2c] sm:$0xf] }
 0x19a   : > { %22478 = vmatmul.mubr.msk.f32.gmra.mrb[28].mxu1 %vm383_vm1, %v29068_v43  ;;  %22015 = vmatprep.subr.msk.mxu0 %vm577_vm0, %v4195_v39  ;;  %v29071_v43 = vld [vmem:[#allocation9_spill] sm:$0xff] }
 0x19b   : > { %22480 = vmatprep.mubr.msk.f32.mxu1 %vm383_vm1, %v26431_v12 }
 0x19c   : > { %21969 = vmatmul.mubr.msk.f32.gmra.mrb[2].mxu0 %vm383_vm1, %v26441_v4 }
 0x19d   : > { %21971 = vmatprep.mubr.msk.f32.mxu0 %vm383_vm1, %v26447_v45 }
 0x19e   : > { %22481 = vmatmul.mubr.msk.f32.gmra.mrb[30].mxu1 %vm383_vm1, %v26445_v5 }
 0x19f   : > { %22485 = vmatprep.mubr.msk.f32.mxu1 %vm383_vm1, %v29069_v49 }
 0x1a0   : > { %21972 = vmatmul.mubr.msk.f32.gmra.mrb[4].mxu0 %vm383_vm1, %v26457_v47 }
 0x1a1   : > { %21974 = vmatprep.mubr.msk.f32.mxu0 %vm383_vm1, %v26461_v8 }
 0x1a2   : > { %22486 = vmatmul.mubr.msk.f32.vlgmr.msra.gmra.mrb[16].mxu1 %vm383_vm1, %v29070_v52 }
 0x1a3   : > { %22510 = vmatpush3.msk.msra.mxu1 %vm577_vm0, %v8591_v34  ;;  %22488 = vmatprep.mubr.msk.f32.mxu1 %vm383_vm1, %v29071_v43  ;;  %v26490_v34 = vld [vmem:[#allocation2 + $0xac] sm:$0xff]  ;;  %v29075_v43 = vld [vmem:[#allocation12_spill] sm:$0xff] }
 0x1a4   : > { %22535 = vmatprep.subr.msk.mxu1 %vm577_vm0, %v8820_v26  ;;  %21975 = vmatmul.mubr.msk.f32.gmra.mrb[6].mxu0 %vm383_vm1, %v26472_v54  ;;  %29074 = vst [vmem:[#allocation21_spill] sm:$0xff] %v26490_v34 }
 0x1a5   : > { %21977 = vmatprep.mubr.msk.f32.mxu0 %vm383_vm1, %v26477_v56 }
 0x1a6   : > { %22489 = vmatmul.mubr.msk.f32.gmra.mrb[18].mxu1 %vm383_vm1, %v29072_v50  ;;  %v26498_v50 = vld [vmem:[#allocation2 + $0xb4] sm:$0xff] }
 0x1a7   : > { %22491 = vmatprep.mubr.msk.f32.mxu1 %vm383_vm1, %v29073_v30  ;;  %v29076_v30 = vld [vmem:[#allocation13_spill] sm:$0xff] }
 0x1a8   : > { %21978 = vmatmul.mubr.msk.f32.gmra.mrb[8].mxu0 %vm383_vm1, %v26486_v58 }
 0x1a9   : > { %21980 = vmatprep.mubr.msk.f32.mxu0 %vm383_vm1, %v26490_v34  ;;  %v29080_v34 = vld [vmem:[#allocation15_spill] sm:$0xff] }
 0x1aa   : > { %22492 = vmatmul.mubr.msk.f32.gmra.mrb[20].mxu1 %vm383_vm1, %v25954_v1  ;;  %v29079_v1 = vld [vmem:[#allocation29_spill] sm:$0xff] }
 0x1ab   : > { %22494 = vmatprep.mubr.msk.f32.mxu1 %vm383_vm1, %v29075_v43  ;;  %v29081_v43 = vld [vmem:[#allocation16_spill] sm:$0xff] }
 0x1ac   : > { %21981 = vmatmul.mubr.msk.f32.gmra.mrb[10].mxu0 %vm383_vm1, %v26498_v50 }
 0x1ad   : > { %21983 = vmatprep.mubr.msk.f32.mxu0 %vm383_vm1, %v29077_v17  ;;  %v29082_v17 = vld [vmem:[#allocation31_spill] sm:$0xff] }
 0x1ae   : > { %22495 = vmatmul.mubr.msk.f32.gmra.mrb[22].mxu1 %vm383_vm1, %v29076_v30  ;;  %v29084_v30 = vld [vmem:[#allocation33_spill] sm:$0xff] }
 0x1af   : > { %22497 = vmatprep.mubr.msk.f32.mxu1 %vm383_vm1, %v29078_v25  ;;  %v26526_v25 = vld [vmem:[#allocation2 + $0x184] sm:$0xff] }
 0x1b0   : > { %21984 = vmatmul.mubr.msk.f32.gmra.mrb[12].mxu0 %vm383_vm1, %v29079_v1  ;;  %v29086_v1 = vld [vmem:[#allocation35_spill] sm:$0xff] }
 0x1b1   : > { %21986 = vmatprep.mubr.msk.f32.mxu0 %vm383_vm1, %v29069_v49  ;;  %v4424_v49 = vld [vmem:[%s28905_s1 + $0x44] sm:$0xf] }
 0x1b2   : > { %22498 = vmatmul.mubr.msk.f32.gmra.mrb[24].mxu1 %vm383_vm1, %v29080_v34  ;;  %v29083_v34 = vld [vmem:[#allocation32_spill] sm:$0xff] }
 0x1b3   : > { %22500 = vmatprep.mubr.msk.f32.mxu1 %vm383_vm1, %v29081_v43  ;;  %v29087_v43 = vld [vmem:[#allocation36_spill] sm:$0xff] }
 0x1b4   : > { %21987 = vmatmul.mubr.msk.f32.gmra.mrb[14].mxu0 %vm383_vm1, %v29070_v52  ;;  %v29085_v52 = vld [vmem:[#allocation34_spill] sm:$0xff] }
 0x1b5   : > { %21991 = vmatprep.mubr.msk.f32.mxu0 %vm383_vm1, %v25991_v41  ;;  %v26542_v41 = vld [vmem:[#allocation2 + $0xf0] sm:$0xff] }
 0x1b6   : > { %22501 = vmatmul.mubr.msk.f32.gmra.mrb[26].mxu1 %vm383_vm1, %v25989_v14  ;;  %v26539_v14 = vld [vmem:[#allocation2 + $0x18c] sm:$0xff] }
 0x1b7   : > { %22503 = vmatprep.mubr.msk.f32.mxu1 %vm383_vm1, %v29082_v17  ;;  %v26553_v17 = vld [vmem:[#allocation2 + $0xf8] sm:$0xff] }
 0x1b8   : > { %21992 = vmatmul.mubr.msk.f32.vlgmr.msra.gmra.mrb[0].mxu0 %vm383_vm1, %v29083_v34  ;;  %v26555_v34 = vld [vmem:[#allocation2 + $0x108] sm:$0xff] }
 0x1b9   : > { %21994 = vmatprep.mubr.msk.f32.mxu0 %vm383_vm1, %v29085_v52  ;;  %22016 = vmatpush3.msk.msra.mxu0 %vm577_vm0, %v4195_v39  ;;  %v9049_v39 = vld [vmem:[%s28905_s1 + $0x30] sm:$0xf]  ;;  %v26571_v52 = vld [vmem:[#allocation2 + $0x120] sm:$0xff] }
 0x1ba   : > { %22504 = vmatmul.mubr.msk.f32.gmra.mrb[28].mxu1 %vm383_vm1, %v29084_v30  ;;  %22041 = vmatprep.subr.msk.mxu0 %vm577_vm0, %v4424_v49  ;;  %v26569_v30 = vld [vmem:[#allocation2 + $0x110] sm:$0xff] }
 0x1bb   : > { %22506 = vmatprep.mubr.msk.f32.mxu1 %vm383_vm1, %v26526_v25 }
 0x1bc   : > { %21995 = vmatmul.mubr.msk.f32.gmra.mrb[2].mxu0 %vm383_vm1, %v29086_v1  ;;  %v26600_v1 = vld [vmem:[#allocation2 + $0xd8] sm:$0xff] }
 0x1bd   : > { %21997 = vmatprep.mubr.msk.f32.mxu0 %vm383_vm1, %v29087_v43  ;;  %29090 = vst [vmem:[#allocation24_spill] sm:$0xff] %v26600_v1  ;;  %v26602_v43 = vld [vmem:[#allocation2 + $0x150] sm:$0xff] }
 0x1be   : > { %22507 = vmatmul.mubr.msk.f32.gmra.mrb[30].mxu1 %vm383_vm1, %v26539_v14 }
 0x1bf   : > { %22511 = vmatprep.mubr.msk.f32.mxu1 %vm383_vm1, %v26542_v41 }
 0x1c0   : > { %21998 = vmatmul.mubr.msk.f32.gmra.mrb[4].mxu0 %vm383_vm1, %v26044_v28  ;;  %v26582_v28 = vld [vmem:[#allocation2 + $0x128] sm:$0xff] }
 0x1c1   : > { %22000 = vmatprep.mubr.msk.f32.mxu0 %vm383_vm1, %v26050_v37  ;;  %v26584_v37 = vld [vmem:[#allocation2 + $0xc0] sm:$0xff] }
 0x1c2   : > { %22512 = vmatmul.mubr.msk.f32.vlgmr.msra.gmra.mrb[16].mxu1 %vm383_vm1, %v26553_v17  ;;  %29088 = vst [vmem:[#allocation22_spill] sm:$0xff] %v26584_v37 }
 0x1c3   : > { %22536 = vmatpush3.msk.msra.mxu1 %vm577_vm0, %v8820_v26  ;;  %22514 = vmatprep.mubr.msk.f32.mxu1 %vm383_vm1, %v26555_v34  ;;  %v26586_v26 = vld [vmem:[#allocation2 + $0x138] sm:$0xff] }
 0x1c4   : > { %22561 = vmatprep.subr.msk.mxu1 %vm577_vm0, %v9049_v39  ;;  %22001 = vmatmul.mubr.msk.f32.gmra.mrb[6].mxu0 %vm383_vm1, %v26064_v57  ;;  %29089 = vst [vmem:[#allocation23_spill] sm:$0xff] %v26586_v26  ;;  %v26594_v57 = vld [vmem:[#allocation2 + $0xc8] sm:$0xff] }
 0x1c5   : > { %22003 = vmatprep.mubr.msk.f32.mxu0 %vm383_vm1, %v26068_v32  ;;  %v26598_v32 = vld [vmem:[#allocation2 + $0x140] sm:$0xff] }
 0x1c6   : > { %22515 = vmatmul.mubr.msk.f32.gmra.mrb[18].mxu1 %vm383_vm1, %v26569_v30 }
 0x1c7   : > { %22517 = vmatprep.mubr.msk.f32.mxu1 %vm383_vm1, %v26571_v52 }
 0x1c8   : > { %22004 = vmatmul.mubr.msk.f32.gmra.mrb[8].mxu0 %vm383_vm1, %v26080_v33  ;;  %v26610_v33 = vld [vmem:[#allocation2 + $0xe0] sm:$0xff] }
 0x1c9   : > { %22006 = vmatprep.mubr.msk.f32.mxu0 %vm383_vm1, %v26584_v37  ;;  %v26616_v37 = vld [vmem:[#allocation2 + $0x168] sm:$0xff] }
 0x1ca   : > { %22518 = vmatmul.mubr.msk.f32.gmra.mrb[20].mxu1 %vm383_vm1, %v26582_v28  ;;  %29092 = vst [vmem:[#allocation26_spill] sm:$0xff] %v26616_v37 }
 0x1cb   : > { %22520 = vmatprep.mubr.msk.f32.mxu1 %vm383_vm1, %v26586_v26  ;;  %v26614_v26 = vld [vmem:[#allocation2 + $0x158] sm:$0xff] }
 0x1cc   : > { %22007 = vmatmul.mubr.msk.f32.gmra.mrb[10].mxu0 %vm383_vm1, %v26594_v57  ;;  %29091 = vst [vmem:[#allocation25_spill] sm:$0xff] %v26614_v26 }
 0x1cd   : > { %22009 = vmatprep.mubr.msk.f32.mxu0 %vm383_vm1, %v26600_v1  ;;  %v26626_v1 = vld [vmem:[#allocation2 + $0x170] sm:$0xff] }
 0x1ce   : > { %22521 = vmatmul.mubr.msk.f32.gmra.mrb[22].mxu1 %vm383_vm1, %v26598_v32 }
 0x1cf   : > { %22523 = vmatprep.mubr.msk.f32.mxu1 %vm383_vm1, %v26602_v43 }
 0x1d0   : > { %22010 = vmatmul.mubr.msk.f32.gmra.mrb[12].mxu0 %vm383_vm1, %v26610_v33 }
 0x1d1   : > { %22012 = vmatprep.mubr.msk.f32.mxu0 %vm383_vm1, %v26542_v41 }
 0x1d2   : > { %22524 = vmatmul.mubr.msk.f32.gmra.mrb[24].mxu1 %vm383_vm1, %v26614_v26  ;;  %v26636_v26 = vld [vmem:[#allocation2 + $0x198] sm:$0xff] }
 0x1d3   : > { %22526 = vmatprep.mubr.msk.f32.mxu1 %vm383_vm1, %v26616_v37  ;;  %v4653_v37 = vld [vmem:[%s28905_s1 + $0x48] sm:$0xf] }
 0x1d4   : > { %22013 = vmatmul.mubr.msk.f32.gmra.mrb[14].mxu0 %vm383_vm1, %v26553_v17 }
 0x1d5   : > { %22017 = vmatprep.mubr.msk.f32.mxu0 %vm383_vm1, %v26107_v42  ;;  %v26649_v42 = vld [vmem:[#allocation2 + $0x1a0] sm:$0xff] }
 0x1d6   : > { %22527 = vmatmul.mubr.msk.f32.gmra.mrb[26].mxu1 %vm383_vm1, %v26626_v1 }
 0x1d7   : > { %22529 = vmatprep.mubr.msk.f32.mxu1 %vm383_vm1, %v26109_v44  ;;  %v26652_v44 = vld [vmem:[#allocation2 + $0xf1] sm:$0xff] }
 0x1d8   : > { %22018 = vmatmul.mubr.msk.f32.vlgmr.msra.gmra.mrb[0].mxu0 %vm383_vm1, %v26121_v31  ;;  %v26663_v31 = vld [vmem:[#allocation2 + $0xf9] sm:$0xff] }
 0x1d9   : > { %22020 = vmatprep.mubr.msk.f32.mxu0 %vm383_vm1, %v26127_v51  ;;  %22042 = vmatpush3.msk.msra.mxu0 %vm577_vm0, %v4424_v49  ;;  %v9278_v51 = vld [vmem:[%s28905_s1 + $0x34] sm:$0xf]  ;;  %v26696_v49 = vld [vmem:[#allocation2 + $0x139] sm:$0xff] }
 0x1da   : > { %22530 = vmatmul.mubr.msk.f32.gmra.mrb[28].mxu1 %vm383_vm1, %v26125_v46  ;;  %22067 = vmatprep.subr.msk.mxu0 %vm577_vm0, %v4653_v37  ;;  %v26665_v46 = vld [vmem:[#allocation2 + $0x109] sm:$0xff]  ;;  %29095 = vst [vmem:[#allocation8_spill] sm:$0xff] %v26696_v49 }
 0x1db   : > { %22532 = vmatprep.mubr.msk.f32.mxu1 %vm383_vm1, %v26636_v26 }
 0x1dc   : > { %22021 = vmatmul.mubr.msk.f32.gmra.mrb[2].mxu0 %vm383_vm1, %v26139_v23  ;;  %v26679_v23 = vld [vmem:[#allocation2 + $0x111] sm:$0xff] }
 0x1dd   : > { %22023 = vmatprep.mubr.msk.f32.mxu0 %vm383_vm1, %v26143_v63  ;;  %v26681_v63 = vld [vmem:[#allocation2 + $0x121] sm:$0xff] }
 0x1de   : > { %22533 = vmatmul.mubr.msk.f32.gmra.mrb[30].mxu1 %vm383_vm1, %v26649_v42  ;;  %29093 = vst [vmem:[#allocation27_spill] sm:$0xff] %v26681_v63 }
 0x1df   : > { %22537 = vmatprep.mubr.msk.f32.mxu1 %vm383_vm1, %v26652_v44 }
 0x1e0   : > { %22024 = vmatmul.mubr.msk.f32.gmra.mrb[4].mxu0 %vm383_vm1, %v26160_v40  ;;  %v26692_v40 = vld [vmem:[#allocation2 + $0x129] sm:$0xff] }
 0x1e1   : > { %22026 = vmatprep.mubr.msk.f32.mxu0 %vm383_vm1, %v26166_v61  ;;  %v26694_v61 = vld [vmem:[#allocation2 + $0xc1] sm:$0xff] }
 0x1e2   : > { %22538 = vmatmul.mubr.msk.f32.vlgmr.msra.gmra.mrb[16].mxu1 %vm383_vm1, %v26663_v31  ;;  %29094 = vst [vmem:[#allocation30_spill] sm:$0xff] %v26694_v61 }
 0x1e3   : > { %22562 = vmatpush3.msk.msra.mxu1 %vm577_vm0, %v9049_v39  ;;  %22540 = vmatprep.mubr.msk.f32.mxu1 %vm383_vm1, %v26665_v46  ;;  %v26710_v39 = vld [vmem:[#allocation2 + $0xd9] sm:$0xff] }
 0x1e4   : > { %22587 = vmatprep.subr.msk.mxu1 %vm577_vm0, %v9278_v51  ;;  %22027 = vmatmul.mubr.msk.f32.gmra.mrb[6].mxu0 %vm383_vm1, %v26180_v55  ;;  %v26704_v55 = vld [vmem:[#allocation2 + $0xc9] sm:$0xff]  ;;  %29096 = vst [vmem:[#allocation9_spill] sm:$0xff] %v26710_v39 }
 0x1e5   : > { %22029 = vmatprep.mubr.msk.f32.mxu0 %vm383_vm1, %v26184_v11  ;;  %v26708_v11 = vld [vmem:[#allocation2 + $0x141] sm:$0xff] }
 0x1e6   : > { %22541 = vmatmul.mubr.msk.f32.gmra.mrb[18].mxu1 %vm383_vm1, %v26679_v23 }
 0x1e7   : > { %22543 = vmatprep.mubr.msk.f32.mxu1 %vm383_vm1, %v26681_v63  ;;  %v26712_v63 = vld [vmem:[#allocation2 + $0x151] sm:$0xff] }
 0x1e8   : > { %22030 = vmatmul.mubr.msk.f32.gmra.mrb[8].mxu0 %vm383_vm1, %v26196_v24  ;;  %v26720_v24 = vld [vmem:[#allocation2 + $0xe1] sm:$0xff] }
 0x1e9   : > { %22032 = vmatprep.mubr.msk.f32.mxu0 %vm383_vm1, %v26694_v61  ;;  %v26726_v61 = vld [vmem:[#allocation2 + $0x169] sm:$0xff] }
 0x1ea   : > { %22544 = vmatmul.mubr.msk.f32.gmra.mrb[20].mxu1 %vm383_vm1, %v26692_v40  ;;  %29098 = vst [vmem:[#allocation11_spill] sm:$0xff] %v26726_v61 }
 0x1eb   : > { %22546 = vmatprep.mubr.msk.f32.mxu1 %vm383_vm1, %v26696_v49  ;;  %v26724_v49 = vld [vmem:[#allocation2 + $0x159] sm:$0xff] }
 0x1ec   : > { %22033 = vmatmul.mubr.msk.f32.gmra.mrb[10].mxu0 %vm383_vm1, %v26704_v55  ;;  %29097 = vst [vmem:[#allocation10_spill] sm:$0xff] %v26724_v49 }
 0x1ed   : > { %22035 = vmatprep.mubr.msk.f32.mxu0 %vm383_vm1, %v26710_v39  ;;  %v26736_v39 = vld [vmem:[#allocation2 + $0x171] sm:$0xff] }
 0x1ee   : > { %22547 = vmatmul.mubr.msk.f32.gmra.mrb[22].mxu1 %vm383_vm1, %v26708_v11 }
 0x1ef   : > { %22549 = vmatprep.mubr.msk.f32.mxu1 %vm383_vm1, %v26712_v63 }
 0x1f0   : > { %22036 = vmatmul.mubr.msk.f32.gmra.mrb[12].mxu0 %vm383_vm1, %v26720_v24 }
 0x1f1   : > { %22038 = vmatprep.mubr.msk.f32.mxu0 %vm383_vm1, %v26652_v44 }
 0x1f2   : > { %22550 = vmatmul.mubr.msk.f32.gmra.mrb[24].mxu1 %vm383_vm1, %v26724_v49  ;;  %v26746_v49 = vld [vmem:[#allocation2 + $0x199] sm:$0xff] }
 0x1f3   : > { %22552 = vmatprep.mubr.msk.f32.mxu1 %vm383_vm1, %v26726_v61  ;;  %v4882_v61 = vld [vmem:[%s28905_s1 + $0x4c] sm:$0xf] }
 0x1f4   : > { %22039 = vmatmul.mubr.msk.f32.gmra.mrb[14].mxu0 %vm383_vm1, %v26663_v31 }
 0x1f5   : > { %22043 = vmatprep.mubr.msk.f32.mxu0 %vm383_vm1, %v26235_v19  ;;  %v26759_v19 = vld [vmem:[#allocation2 + $0x1a1] sm:$0xff] }
 0x1f6   : > { %22553 = vmatmul.mubr.msk.f32.gmra.mrb[26].mxu1 %vm383_vm1, %v26736_v39 }
 0x1f7   : > { %22555 = vmatprep.mubr.msk.f32.mxu1 %vm383_vm1, %v26237_v62  ;;  %v26762_v62 = vld [vmem:[#allocation2 + $0xf2] sm:$0xff] }
 0x1f8   : > { %22044 = vmatmul.mubr.msk.f32.vlgmr.msra.gmra.mrb[0].mxu0 %vm383_vm1, %v26247_v60  ;;  %v26773_v60 = vld [vmem:[#allocation2 + $0xfa] sm:$0xff] }
 0x1f9   : > { %22046 = vmatprep.mubr.msk.f32.mxu0 %vm383_vm1, %v26253_v2  ;;  %22068 = vmatpush3.msk.msra.mxu0 %vm577_vm0, %v4653_v37  ;;  %v9507_v2 = vld [vmem:[%s28905_s1 + $0x38] sm:$0xf] }
 0x1fa   : > { %22556 = vmatmul.mubr.msk.f32.gmra.mrb[28].mxu1 %vm383_vm1, %v26251_v48  ;;  %22093 = vmatprep.subr.msk.mxu0 %vm577_vm0, %v4882_v61  ;;  %v26775_v48 = vld [vmem:[#allocation2 + $0x10a] sm:$0xff]  ;;  %v26806_v37 = vld [vmem:[#allocation2 + $0x13a] sm:$0xff] }
 0x1fb   : > { %22558 = vmatprep.mubr.msk.f32.mxu1 %vm383_vm1, %v26746_v49  ;;  %29101 = vst [vmem:[#allocation28_spill] sm:$0xff] %v26806_v37 }
 0x1fc   : > { %22047 = vmatmul.mubr.msk.f32.gmra.mrb[2].mxu0 %vm383_vm1, %v26264_v15  ;;  %v26789_v15 = vld [vmem:[#allocation2 + $0x112] sm:$0xff] }
 0x1fd   : > { %22049 = vmatprep.mubr.msk.f32.mxu0 %vm383_vm1, %v26268_v36  ;;  %v26791_v36 = vld [vmem:[#allocation2 + $0x122] sm:$0xff] }
 0x1fe   : > { %22559 = vmatmul.mubr.msk.f32.gmra.mrb[30].mxu1 %vm383_vm1, %v26759_v19  ;;  %29099 = vst [vmem:[#allocation12_spill] sm:$0xff] %v26791_v36 }
 0x1ff   : > { %22563 = vmatprep.mubr.msk.f32.mxu1 %vm383_vm1, %v26762_v62 }
 0x200   : > { %22050 = vmatmul.mubr.msk.f32.gmra.mrb[4].mxu0 %vm383_vm1, %v26279_v53  ;;  %v26802_v53 = vld [vmem:[#allocation2 + $0x12a] sm:$0xff] }
 0x201   : > { %22052 = vmatprep.mubr.msk.f32.mxu0 %vm383_vm1, %v26285_v38  ;;  %v26804_v38 = vld [vmem:[#allocation2 + $0xc2] sm:$0xff] }
 0x202   : > { %22564 = vmatmul.mubr.msk.f32.vlgmr.msra.gmra.mrb[16].mxu1 %vm383_vm1, %v26773_v60  ;;  %29100 = vst [vmem:[#allocation13_spill] sm:$0xff] %v26804_v38 }
 0x203   : > { %22588 = vmatpush3.msk.msra.mxu1 %vm577_vm0, %v9278_v51  ;;  %22566 = vmatprep.mubr.msk.f32.mxu1 %vm383_vm1, %v26775_v48  ;;  %v26820_v51 = vld [vmem:[#allocation2 + $0xda] sm:$0xff] }
 0x204   : > { %22613 = vmatprep.subr.msk.mxu1 %vm577_vm0, %v9507_v2  ;;  %22053 = vmatmul.mubr.msk.f32.gmra.mrb[6].mxu0 %vm383_vm1, %v26294_v13  ;;  %v26814_v13 = vld [vmem:[#allocation2 + $0xca] sm:$0xff]  ;;  %29102 = vst [vmem:[#allocation14_spill] sm:$0xff] %v26820_v51 }
 0x205   : > { %22055 = vmatprep.mubr.msk.f32.mxu0 %vm383_vm1, %v26298_v35  ;;  %v26818_v35 = vld [vmem:[#allocation2 + $0x142] sm:$0xff] }
 0x206   : > { %22567 = vmatmul.mubr.msk.f32.gmra.mrb[18].mxu1 %vm383_vm1, %v26789_v15 }
 0x207   : > { %22569 = vmatprep.mubr.msk.f32.mxu1 %vm383_vm1, %v26791_v36  ;;  %v26822_v36 = vld [vmem:[#allocation2 + $0x152] sm:$0xff] }
 0x208   : > { %22056 = vmatmul.mubr.msk.f32.gmra.mrb[8].mxu0 %vm383_vm1, %v26306_v18  ;;  %v26830_v18 = vld [vmem:[#allocation2 + $0xe2] sm:$0xff] }
 0x209   : > { %22058 = vmatprep.mubr.msk.f32.mxu0 %vm383_vm1, %v26804_v38  ;;  %v26836_v38 = vld [vmem:[#allocation2 + $0x16a] sm:$0xff] }
 0x20a   : > { %22570 = vmatmul.mubr.msk.f32.gmra.mrb[20].mxu1 %vm383_vm1, %v26802_v53  ;;  %29104 = vst [vmem:[#allocation15_spill] sm:$0xff] %v26836_v38 }
 0x20b   : > { %22572 = vmatprep.mubr.msk.f32.mxu1 %vm383_vm1, %v26806_v37  ;;  %v26834_v37 = vld [vmem:[#allocation2 + $0x15a] sm:$0xff] }
 0x20c   : > { %22059 = vmatmul.mubr.msk.f32.gmra.mrb[10].mxu0 %vm383_vm1, %v26814_v13  ;;  %29103 = vst [vmem:[#allocation29_spill] sm:$0xff] %v26834_v37 }
 0x20d   : > { %22061 = vmatprep.mubr.msk.f32.mxu0 %vm383_vm1, %v26820_v51  ;;  %v26846_v51 = vld [vmem:[#allocation2 + $0x172] sm:$0xff] }
 0x20e   : > { %22573 = vmatmul.mubr.msk.f32.gmra.mrb[22].mxu1 %vm383_vm1, %v26818_v35 }
 0x20f   : > { %22575 = vmatprep.mubr.msk.f32.mxu1 %vm383_vm1, %v26822_v36 }
 0x210   : > { %22062 = vmatmul.mubr.msk.f32.gmra.mrb[12].mxu0 %vm383_vm1, %v26830_v18 }
 0x211   : > { %22064 = vmatprep.mubr.msk.f32.mxu0 %vm383_vm1, %v26762_v62 }
 0x212   : > { %22576 = vmatmul.mubr.msk.f32.gmra.mrb[24].mxu1 %vm383_vm1, %v26834_v37  ;;  %v26856_v37 = vld [vmem:[#allocation2 + $0x19a] sm:$0xff] }
 0x213   : > { %22578 = vmatprep.mubr.msk.f32.mxu1 %vm383_vm1, %v26836_v38  ;;  %v5112_v38 = vld [vmem:[%s28905_s1 + $0x50] sm:$0xf] }
 0x214   : > { %22065 = vmatmul.mubr.msk.f32.gmra.mrb[14].mxu0 %vm383_vm1, %v26773_v60 }
 0x215   : > { %22069 = vmatprep.mubr.msk.f32.mxu0 %vm383_vm1, %v26333_v6  ;;  %v26869_v6 = vld [vmem:[#allocation2 + $0x1a2] sm:$0xff] }
 0x216   : > { %22579 = vmatmul.mubr.msk.f32.gmra.mrb[26].mxu1 %vm383_vm1, %v26846_v51 }
 0x217   : > { %22581 = vmatprep.mubr.msk.f32.mxu1 %vm383_vm1, %v26335_v0  ;;  %v26872_v0 = vld [vmem:[#allocation2 + $0xf3] sm:$0xff] }
 0x218   : > { %22070 = vmatmul.mubr.msk.f32.vlgmr.msra.gmra.mrb[0].mxu0 %vm383_vm1, %v26345_v7  ;;  %v26883_v7 = vld [vmem:[#allocation2 + $0xfb] sm:$0xff] }
 0x219   : > { %22072 = vmatprep.mubr.msk.f32.mxu0 %vm383_vm1, %v26351_v3  ;;  %22094 = vmatpush3.msk.msra.mxu0 %vm577_vm0, %v4882_v61  ;;  %v9737_v3 = vld [vmem:[%s28905_s1 + $0x3c] sm:$0xf] }
 0x21a   : > { %22582 = vmatmul.mubr.msk.f32.gmra.mrb[28].mxu1 %vm383_vm1, %v26349_v10  ;;  %22119 = vmatprep.subr.msk.mxu0 %vm577_vm0, %v5112_v38  ;;  %v26885_v10 = vld [vmem:[#allocation2 + $0x10b] sm:$0xff]  ;;  %v26916_v61 = vld [vmem:[#allocation2 + $0x13b] sm:$0xff] }
 0x21b   : > { %22584 = vmatprep.mubr.msk.f32.mxu1 %vm383_vm1, %v26856_v37  ;;  %29107 = vst [vmem:[#allocation32_spill] sm:$0xff] %v26916_v61 }
 0x21c   : > { %22073 = vmatmul.mubr.msk.f32.gmra.mrb[2].mxu0 %vm383_vm1, %v26361_v16  ;;  %v26899_v16 = vld [vmem:[#allocation2 + $0x113] sm:$0xff] }
 0x21d   : > { %22075 = vmatprep.mubr.msk.f32.mxu0 %vm383_vm1, %v26365_v20  ;;  %v26901_v20 = vld [vmem:[#allocation2 + $0x123] sm:$0xff] }
 0x21e   : > { %22585 = vmatmul.mubr.msk.f32.gmra.mrb[30].mxu1 %vm383_vm1, %v26869_v6  ;;  %29105 = vst [vmem:[#allocation16_spill] sm:$0xff] %v26901_v20 }
 0x21f   : > { %22589 = vmatprep.mubr.msk.f32.mxu1 %vm383_vm1, %v26872_v0 }
 0x220   : > { %22076 = vmatmul.mubr.msk.f32.gmra.mrb[4].mxu0 %vm383_vm1, %v26376_v22  ;;  %v26912_v22 = vld [vmem:[#allocation2 + $0x12b] sm:$0xff] }
 0x221   : > { %22078 = vmatprep.mubr.msk.f32.mxu0 %vm383_vm1, %v26381_v9  ;;  %v26914_v9 = vld [vmem:[#allocation2 + $0xc3] sm:$0xff] }
 0x222   : > { %22590 = vmatmul.mubr.msk.f32.vlgmr.msra.gmra.mrb[16].mxu1 %vm383_vm1, %v26883_v7  ;;  %29106 = vst [vmem:[#allocation31_spill] sm:$0xff] %v26914_v9 }
 0x223   : > { %22614 = vmatpush3.msk.msra.mxu1 %vm577_vm0, %v9507_v2  ;;  %22592 = vmatprep.mubr.msk.f32.mxu1 %vm383_vm1, %v26885_v10  ;;  %v26930_v2 = vld [vmem:[#allocation2 + $0xdb] sm:$0xff] }
 0x224   : > { %22639 = vmatprep.subr.msk.mxu1 %vm577_vm0, %v9737_v3  ;;  %22079 = vmatmul.mubr.msk.f32.gmra.mrb[6].mxu0 %vm383_vm1, %v26390_v21  ;;  %v26924_v21 = vld [vmem:[#allocation2 + $0xcb] sm:$0xff]  ;;  %29108 = vst [vmem:[#allocation33_spill] sm:$0xff] %v26930_v2 }
 0x225   : > { %22081 = vmatprep.mubr.msk.f32.mxu0 %vm383_vm1, %v26394_v27  ;;  %v26928_v27 = vld [vmem:[#allocation2 + $0x143] sm:$0xff] }
 0x226   : > { %22593 = vmatmul.mubr.msk.f32.gmra.mrb[18].mxu1 %vm383_vm1, %v26899_v16 }
 0x227   : > { %22595 = vmatprep.mubr.msk.f32.mxu1 %vm383_vm1, %v26901_v20  ;;  %v26932_v20 = vld [vmem:[#allocation2 + $0x153] sm:$0xff] }
 0x228   : > { %22082 = vmatmul.mubr.msk.f32.gmra.mrb[8].mxu0 %vm383_vm1, %v26402_v29  ;;  %v26940_v29 = vld [vmem:[#allocation2 + $0xe3] sm:$0xff] }
 0x229   : > { %22084 = vmatprep.mubr.msk.f32.mxu0 %vm383_vm1, %v26914_v9  ;;  %v26946_v9 = vld [vmem:[#allocation2 + $0x16b] sm:$0xff] }
 0x22a   : > { %22596 = vmatmul.mubr.msk.f32.gmra.mrb[20].mxu1 %vm383_vm1, %v26912_v22  ;;  %29110 = vst [vmem:[#allocation35_spill] sm:$0xff] %v26946_v9 }
 0x22b   : > { %22598 = vmatprep.mubr.msk.f32.mxu1 %vm383_vm1, %v26916_v61  ;;  %v26944_v61 = vld [vmem:[#allocation2 + $0x15b] sm:$0xff] }
 0x22c   : > { %22085 = vmatmul.mubr.msk.f32.gmra.mrb[10].mxu0 %vm383_vm1, %v26924_v21  ;;  %29109 = vst [vmem:[#allocation34_spill] sm:$0xff] %v26944_v61 }
 0x22d   : > { %22087 = vmatprep.mubr.msk.f32.mxu0 %vm383_vm1, %v26930_v2  ;;  %v26956_v2 = vld [vmem:[#allocation2 + $0x173] sm:$0xff] }
 0x22e   : > { %22599 = vmatmul.mubr.msk.f32.gmra.mrb[22].mxu1 %vm383_vm1, %v26928_v27 }
 0x22f   : > { %22601 = vmatprep.mubr.msk.f32.mxu1 %vm383_vm1, %v26932_v20 }
 0x230   : > { %22088 = vmatmul.mubr.msk.f32.gmra.mrb[12].mxu0 %vm383_vm1, %v26940_v29 }
 0x231   : > { %22090 = vmatprep.mubr.msk.f32.mxu0 %vm383_vm1, %v26872_v0 }
 0x232   : > { %22602 = vmatmul.mubr.msk.f32.gmra.mrb[24].mxu1 %vm383_vm1, %v26944_v61  ;;  %v26966_v61 = vld [vmem:[#allocation2 + $0x19b] sm:$0xff] }
 0x233   : > { %22604 = vmatprep.mubr.msk.f32.mxu1 %vm383_vm1, %v26946_v9  ;;  %v26973_v9 = vld [vmem:[%s28905_s1 + $0x54] sm:$0xf] }
 0x234   : > { %22091 = vmatmul.mubr.msk.f32.gmra.mrb[14].mxu0 %vm383_vm1, %v26883_v7 }
 0x235   : > { %22095 = vmatprep.mubr.msk.f32.mxu0 %vm383_vm1, %v26429_v59  ;;  %v26981_v59 = vld [vmem:[#allocation2 + $0x1a3] sm:$0xff] }
 0x236   : > { %22605 = vmatmul.mubr.msk.f32.gmra.mrb[26].mxu1 %vm383_vm1, %v26956_v2 }
 0x237   : > { %22607 = vmatprep.mubr.msk.f32.mxu1 %vm383_vm1, %v26431_v12  ;;  %v26984_v12 = vld [vmem:[#allocation2 + $0xf4] sm:$0xff] }
 0x238   : > { %22096 = vmatmul.mubr.msk.f32.vlgmr.msra.gmra.mrb[0].mxu0 %vm383_vm1, %v26441_v4  ;;  %29111 = vst [vmem:[#allocation36_spill] sm:$0xff] %v26984_v12  ;;  %v26996_v4 = vld [vmem:[#allocation2 + $0xfc] sm:$0xff] }
 0x239   : > { %22098 = vmatprep.mubr.msk.f32.mxu0 %vm383_vm1, %v26447_v45  ;;  %22120 = vmatpush3.msk.msra.mxu0 %vm577_vm0, %v5112_v38  ;;  %v27005_v45 = vld [vmem:[%s28905_s1 + $0x40] sm:$0xf]  ;;  %v27030_v38 = vld [vmem:[#allocation2 + $0xc4] sm:$0xff] }
 0x23a   : > { %22608 = vmatmul.mubr.msk.f32.gmra.mrb[28].mxu1 %vm383_vm1, %v26445_v5  ;;  %22145 = vmatprep.subr.msk.mxu0 %vm577_vm0, %v26973_v9  ;;  %v26998_v5 = vld [vmem:[#allocation2 + $0x10c] sm:$0xff] }
 0x23b   : > { %22610 = vmatprep.mubr.msk.f32.mxu1 %vm383_vm1, %v26966_v61 }
 0x23c   : > { %22099 = vmatmul.mubr.msk.f32.gmra.mrb[2].mxu0 %vm383_vm1, %v26457_v47  ;;  %v27014_v47 = vld [vmem:[#allocation2 + $0x114] sm:$0xff] }
 0x23d   : > { %22101 = vmatprep.mubr.msk.f32.mxu0 %vm383_vm1, %v26461_v8  ;;  %29112 = vst [vmem:[#allocation49_spill] sm:$0xff] %v27014_v47  ;;  %v27016_v8 = vld [vmem:[#allocation2 + $0x124] sm:$0xff] }
 0x23e   : > { %22611 = vmatmul.mubr.msk.f32.gmra.mrb[30].mxu1 %vm383_vm1, %v26981_v59  ;;  %29113 = vst [vmem:[#allocation50_spill] sm:$0xff] %v27016_v8 }
 0x23f   : > { %22615 = vmatprep.mubr.msk.f32.mxu1 %vm383_vm1, %v26984_v12 }
 0x240   : > { %22102 = vmatmul.mubr.msk.f32.gmra.mrb[4].mxu0 %vm383_vm1, %v26472_v54  ;;  %v29114_v54 = vld [vmem:[#allocation21_spill] sm:$0xff] }
 0x241   : > { %22104 = vmatprep.mubr.msk.f32.mxu0 %vm383_vm1, %v26477_v56  ;;  %v27028_v56 = vld [vmem:[#allocation2 + $0x12c] sm:$0xff]  ;;  %29115 = vst [vmem:[#allocation21_spill] sm:$0xff] %v27030_v38 }
 0x242   : > { %22616 = vmatmul.mubr.msk.f32.vlgmr.msra.gmra.mrb[16].mxu1 %vm383_vm1, %v26996_v4 }
 0x243   : > { %22640 = vmatpush3.msk.msra.mxu1 %vm577_vm0, %v9737_v3  ;;  %22618 = vmatprep.mubr.msk.f32.mxu1 %vm383_vm1, %v26998_v5  ;;  %v27032_v3 = vld [vmem:[#allocation2 + $0x13c] sm:$0xff] }
 0x244   : > { %22665 = vmatprep.subr.msk.mxu1 %vm577_vm0, %v27005_v45  ;;  %22105 = vmatmul.mubr.msk.f32.gmra.mrb[6].mxu0 %vm383_vm1, %v26486_v58  ;;  %29116 = vst [vmem:[#allocation51_spill] sm:$0xff] %v27032_v3  ;;  %v27040_v58 = vld [vmem:[#allocation2 + $0xcc] sm:$0xff] }
 0x245   : > { %22107 = vmatprep.mubr.msk.f32.mxu0 %vm383_vm1, %v29114_v54  ;;  %v27044_v54 = vld [vmem:[#allocation2 + $0x144] sm:$0xff] }
 0x246   : > { %22619 = vmatmul.mubr.msk.f32.gmra.mrb[18].mxu1 %vm383_vm1, %v27014_v47  ;;  %29117 = vst [vmem:[#allocation52_spill] sm:$0xff] %v27044_v54  ;;  %v27048_v47 = vld [vmem:[#allocation2 + $0x154] sm:$0xff] }
 0x247   : > { %22621 = vmatprep.mubr.msk.f32.mxu1 %vm383_vm1, %v27016_v8  ;;  %v27046_v8 = vld [vmem:[#allocation2 + $0xdc] sm:$0xff] }
 0x248   : > { %22108 = vmatmul.mubr.msk.f32.gmra.mrb[8].mxu0 %vm383_vm1, %v26498_v50  ;;  %29118 = vst [vmem:[#allocation53_spill] sm:$0xff] %v27046_v8  ;;  %v27056_v50 = vld [vmem:[#allocation2 + $0xe4] sm:$0xff] }
 0x249   : > { %22110 = vmatprep.mubr.msk.f32.mxu0 %vm383_vm1, %v27030_v38  ;;  %29119 = vst [vmem:[#allocation54_spill] sm:$0xff] %v27056_v50  ;;  %v27062_v38 = vld [vmem:[#allocation2 + $0x16c] sm:$0xff] }
 0x24a   : > { %22622 = vmatmul.mubr.msk.f32.gmra.mrb[20].mxu1 %vm383_vm1, %v27028_v56  ;;  %29121 = vst [vmem:[#allocation56_spill] sm:$0xff] %v27062_v38 }
 0x24b   : > { %22624 = vmatprep.mubr.msk.f32.mxu1 %vm383_vm1, %v27032_v3  ;;  %v27060_v3 = vld [vmem:[#allocation2 + $0x15c] sm:$0xff] }
 0x24c   : > { %22111 = vmatmul.mubr.msk.f32.gmra.mrb[10].mxu0 %vm383_vm1, %v27040_v58  ;;  %29120 = vst [vmem:[#allocation55_spill] sm:$0xff] %v27060_v3 }
 0x24d   : > { %22113 = vmatprep.mubr.msk.f32.mxu0 %vm383_vm1, %v27046_v8  ;;  %v27072_v8 = vld [vmem:[#allocation2 + $0x174] sm:$0xff] }
 0x24e   : > { %22625 = vmatmul.mubr.msk.f32.gmra.mrb[22].mxu1 %vm383_vm1, %v27044_v54  ;;  %29122 = vst [vmem:[#allocation57_spill] sm:$0xff] %v27072_v8  ;;  %v5096_v54 = vld [vmem:[#allocation2 + $0x60] sm:$0xff] }
 0x24f   : > { %22627 = vmatprep.mubr.msk.f32.mxu1 %vm383_vm1, %v27048_v47 }
 0x250   : > { %22114 = vmatmul.mubr.msk.f32.gmra.mrb[12].mxu0 %vm383_vm1, %v27056_v50  ;;  %v5097_v50 = vld [vmem:[#allocation2 + $0x68] sm:$0xff] }
 0x251   : > { %22116 = vmatprep.mubr.msk.f32.mxu0 %vm383_vm1, %v26984_v12  ;;  %v27081_v12 = vld [vmem:[#allocation2 + $0x19c] sm:$0xff] }
 0x252   : > { %22628 = vmatmul.mubr.msk.f32.gmra.mrb[24].mxu1 %vm383_vm1, %v27060_v3  ;;  %v5098_v3 = vld [vmem:[#allocation2 + $0x78] sm:$0xff] }
 0x253   : > { %22630 = vmatprep.mubr.msk.f32.mxu1 %vm383_vm1, %v27062_v38  ;;  %v5570_v38 = vld [vmem:[%s28905_s1 + $0x58] sm:$0xf] }
 0x254   : > { %22117 = vmatmul.mubr.msk.f32.gmra.mrb[14].mxu0 %vm383_vm1, %v26996_v4 }
 0x255   : > { %22121 = vmatprep.mubr.msk.f32.mxu0 %vm383_vm1, %v5096_v54  ;;  %v27092_v54 = vld [vmem:[#allocation2 + $0x1a4] sm:$0xff] }
 0x256   : > { %22631 = vmatmul.mubr.msk.f32.gmra.mrb[26].mxu1 %vm383_vm1, %v27072_v8  ;;  %v5099_v8 = vld [vmem:[#allocation2 + $0x80] sm:$0xff] }
 0x257   : > { %22633 = vmatprep.mubr.msk.f32.mxu1 %vm383_vm1, %v26526_v25  ;;  %v5100_v25 = vld [vmem:[#allocation2 + $0x90] sm:$0xff] }
 0x258   : > { %22122 = vmatmul.mubr.msk.f32.vlgmr.msra.gmra.mrb[0].mxu0 %vm383_vm1, %v5097_v50  ;;  %v29123_v50 = vld [vmem:[#allocation22_spill] sm:$0xff] }
 0x259   : > { %22124 = vmatprep.mubr.msk.f32.mxu0 %vm383_vm1, %v5098_v3  ;;  %22146 = vmatpush3.msk.msra.mxu0 %vm577_vm0, %v26973_v9  ;;  %v5102_v3 = vld [vmem:[#allocation2 + $0xa8] sm:$0xff]  ;;  %v10195_v9 = vld [vmem:[%s28905_s1 + $0x44] sm:$0xf] }
 0x25a   : > { %22634 = vmatmul.mubr.msk.f32.gmra.mrb[28].mxu1 %vm383_vm1, %v26539_v14  ;;  %22171 = vmatprep.subr.msk.mxu0 %vm577_vm0, %v5570_v38  ;;  %v5101_v14 = vld [vmem:[#allocation2 + $0x98] sm:$0xff] }
 0x25b   : > { %22636 = vmatprep.mubr.msk.f32.mxu1 %vm383_vm1, %v27081_v12 }
 0x25c   : > { %22125 = vmatmul.mubr.msk.f32.gmra.mrb[2].mxu0 %vm383_vm1, %v5099_v8  ;;  %v5103_v8 = vld [vmem:[#allocation2 + $0xb0] sm:$0xff] }
 0x25d   : > { %22127 = vmatprep.mubr.msk.f32.mxu0 %vm383_vm1, %v5100_v25  ;;  %v29124_v25 = vld [vmem:[#allocation23_spill] sm:$0xff] }
 0x25e   : > { %22637 = vmatmul.mubr.msk.f32.gmra.mrb[30].mxu1 %vm383_vm1, %v27092_v54 }
 0x25f   : > { %22641 = vmatprep.mubr.msk.f32.mxu1 %vm383_vm1, %v26555_v34 }
 0x260   : > { %22128 = vmatmul.mubr.msk.f32.gmra.mrb[4].mxu0 %vm383_vm1, %v5101_v14  ;;  %v5331_v14 = vld [vmem:[#allocation2 + $0xa9] sm:$0xff] }
 0x261   : > { %22130 = vmatprep.mubr.msk.f32.mxu0 %vm383_vm1, %v5102_v3  ;;  %v5332_v3 = vld [vmem:[#allocation2 + $0xb1] sm:$0xff] }
 0x262   : > { %22642 = vmatmul.mubr.msk.f32.vlgmr.msra.gmra.mrb[16].mxu1 %vm383_vm1, %v26569_v30 }
 0x263   : > { %22666 = vmatpush3.msk.msra.mxu1 %vm577_vm0, %v27005_v45  ;;  %22644 = vmatprep.mubr.msk.f32.mxu1 %vm383_vm1, %v26571_v52  ;;  %v29125_v52 = vld [vmem:[#allocation24_spill] sm:$0xff]  ;;  %v29127_v45 = vld [vmem:[#allocation26_spill] sm:$0xff] }
 0x264   : > { %22691 = vmatprep.subr.msk.mxu1 %vm577_vm0, %v10195_v9  ;;  %22131 = vmatmul.mubr.msk.f32.gmra.mrb[6].mxu0 %vm383_vm1, %v5103_v8  ;;  %v29128_v8 = vld [vmem:[#allocation27_spill] sm:$0xff] }
 0x265   : > { %22133 = vmatprep.mubr.msk.f32.mxu0 %vm383_vm1, %v29123_v50  ;;  %v29129_v50 = vld [vmem:[#allocation30_spill] sm:$0xff] }
 0x266   : > { %22645 = vmatmul.mubr.msk.f32.gmra.mrb[18].mxu1 %vm383_vm1, %v26582_v28  ;;  %v29126_v28 = vld [vmem:[#allocation25_spill] sm:$0xff] }
 0x267   : > { %22647 = vmatprep.mubr.msk.f32.mxu1 %vm383_vm1, %v29124_v25  ;;  %v29130_v25 = vld [vmem:[#allocation8_spill] sm:$0xff] }
 0x268   : > { %22134 = vmatmul.mubr.msk.f32.gmra.mrb[8].mxu0 %vm383_vm1, %v26594_v57  ;;  %v27138_v57 = vld [vmem:[#allocation2 + $0x180] sm:$0xff] }
 0x269   : > { %22136 = vmatprep.mubr.msk.f32.mxu0 %vm383_vm1, %v29125_v52  ;;  %v29133_v52 = vld [vmem:[#allocation11_spill] sm:$0xff] }
 0x26a   : > { %22648 = vmatmul.mubr.msk.f32.gmra.mrb[20].mxu1 %vm383_vm1, %v26598_v32  ;;  %v27148_v32 = vld [vmem:[#allocation2 + $0x188] sm:$0xff] }
 0x26b   : > { %22650 = vmatprep.mubr.msk.f32.mxu1 %vm383_vm1, %v26602_v43  ;;  %v5799_v43 = vld [vmem:[%s28905_s1 + $0x5c] sm:$0xf] }
 0x26c   : > { %22137 = vmatmul.mubr.msk.f32.gmra.mrb[10].mxu0 %vm383_vm1, %v26610_v33  ;;  %v27168_v33 = vld [vmem:[#allocation2 + $0x1b8] sm:$0xff] }
 0x26d   : > { %22139 = vmatprep.mubr.msk.f32.mxu0 %vm383_vm1, %v26542_v41  ;;  %v5325_v41 = vld [vmem:[#allocation2 + $0x61] sm:$0xff] }
 0x26e   : > { %22651 = vmatmul.mubr.msk.f32.gmra.mrb[22].mxu1 %vm383_vm1, %v29126_v28  ;;  %v5560_v28 = vld [vmem:[#allocation2 + $0xaa] sm:$0xff] }
 0x26f   : > { %22653 = vmatprep.mubr.msk.f32.mxu1 %vm383_vm1, %v29127_v45  ;;  %v10653_v45 = vld [vmem:[%s28905_s1 + $0x4c] sm:$0xf] }
 0x270   : > { %22140 = vmatmul.mubr.msk.f32.gmra.mrb[12].mxu0 %vm383_vm1, %v26553_v17  ;;  %v5326_v17 = vld [vmem:[#allocation2 + $0x69] sm:$0xff] }
 0x271   : > { %22142 = vmatprep.mubr.msk.f32.mxu0 %vm383_vm1, %v26555_v34  ;;  %v27157_v34 = vld [vmem:[#allocation2 + $0x1b0] sm:$0xff] }
 0x272   : > { %22654 = vmatmul.mubr.msk.f32.gmra.mrb[24].mxu1 %vm383_vm1, %v26626_v1  ;;  %v5327_v1 = vld [vmem:[#allocation2 + $0x79] sm:$0xff] }
 0x273   : > { %22656 = vmatprep.mubr.msk.f32.mxu1 %vm383_vm1, %v27138_v57 }
 0x274   : > { %22143 = vmatmul.mubr.msk.f32.gmra.mrb[14].mxu0 %vm383_vm1, %v26569_v30  ;;  %v5328_v30 = vld [vmem:[#allocation2 + $0x81] sm:$0xff] }
 0x275   : > { %22147 = vmatprep.mubr.msk.f32.mxu0 %vm383_vm1, %v5325_v41  ;;  %v5561_v41 = vld [vmem:[#allocation2 + $0xb2] sm:$0xff] }
 0x276   : > { %22657 = vmatmul.mubr.msk.f32.gmra.mrb[26].mxu1 %vm383_vm1, %v27148_v32 }
 0x277   : > { %22659 = vmatprep.mubr.msk.f32.mxu1 %vm383_vm1, %v26636_v26  ;;  %v5329_v26 = vld [vmem:[#allocation2 + $0x91] sm:$0xff] }
 0x278   : > { %22148 = vmatmul.mubr.msk.f32.vlgmr.msra.gmra.mrb[0].mxu0 %vm383_vm1, %v5326_v17  ;;  %v29134_v17 = vld [vmem:[#allocation12_spill] sm:$0xff] }
 0x279   : > { %22150 = vmatprep.mubr.msk.f32.mxu0 %vm383_vm1, %v5327_v1  ;;  %22172 = vmatpush3.msk.msra.mxu0 %vm577_vm0, %v5570_v38  ;;  %v10424_v38 = vld [vmem:[%s28905_s1 + $0x48] sm:$0xf] }
 0x27a   : > { %22660 = vmatmul.mubr.msk.f32.gmra.mrb[28].mxu1 %vm383_vm1, %v26649_v42  ;;  %22197 = vmatprep.subr.msk.mxu0 %vm577_vm0, %v5799_v43  ;;  %v5330_v42 = vld [vmem:[#allocation2 + $0x99] sm:$0xff]  ;;  %v29135_v1 = vld [vmem:[#allocation13_spill] sm:$0xff] }
 0x27b   : > { %22662 = vmatprep.mubr.msk.f32.mxu1 %vm383_vm1, %v27157_v34 }
 0x27c   : > { %22151 = vmatmul.mubr.msk.f32.gmra.mrb[2].mxu0 %vm383_vm1, %v5328_v30  ;;  %v29137_v30 = vld [vmem:[#allocation14_spill] sm:$0xff] }
 0x27d   : > { %22153 = vmatprep.mubr.msk.f32.mxu0 %vm383_vm1, %v5329_v26  ;;  %v29139_v26 = vld [vmem:[#allocation15_spill] sm:$0xff] }
 0x27e   : > { %22663 = vmatmul.mubr.msk.f32.gmra.mrb[30].mxu1 %vm383_vm1, %v27168_v33 }
 0x27f   : > { %22667 = vmatprep.mubr.msk.f32.mxu1 %vm383_vm1, %v26665_v46 }
 0x280   : > { %22154 = vmatmul.mubr.msk.f32.gmra.mrb[4].mxu0 %vm383_vm1, %v5330_v42  ;;  %v10883_v42 = vld [vmem:[%s28905_s1 + $0x50] sm:$0xf] }
 0x281   : > { %22156 = vmatprep.mubr.msk.f32.mxu0 %vm383_vm1, %v5331_v14  ;;  %v5790_v14 = vld [vmem:[#allocation2 + $0xb3] sm:$0xff] }
 0x282   : > { %22668 = vmatmul.mubr.msk.f32.vlgmr.msra.gmra.mrb[16].mxu1 %vm383_vm1, %v26679_v23 }
 0x283   : > { %22692 = vmatpush3.msk.msra.mxu1 %vm577_vm0, %v10195_v9  ;;  %22670 = vmatprep.mubr.msk.f32.mxu1 %vm383_vm1, %v29128_v8  ;;  %v29131_v9 = vld [vmem:[#allocation9_spill] sm:$0xff]  ;;  %v29142_v8 = vld [vmem:[#allocation32_spill] sm:$0xff] }
 0x284   : > { %22717 = vmatprep.subr.msk.mxu1 %vm577_vm0, %v10424_v38  ;;  %22157 = vmatmul.mubr.msk.f32.gmra.mrb[6].mxu0 %vm383_vm1, %v5332_v3  ;;  %v29141_v3 = vld [vmem:[#allocation31_spill] sm:$0xff] }
 0x285   : > { %22159 = vmatprep.mubr.msk.f32.mxu0 %vm383_vm1, %v29129_v50  ;;  %v29143_v50 = vld [vmem:[#allocation33_spill] sm:$0xff] }
 0x286   : > { %22671 = vmatmul.mubr.msk.f32.gmra.mrb[18].mxu1 %vm383_vm1, %v26692_v40  ;;  %v29132_v40 = vld [vmem:[#allocation10_spill] sm:$0xff] }
 0x287   : > { %22673 = vmatprep.mubr.msk.f32.mxu1 %vm383_vm1, %v29130_v25  ;;  %v29145_v25 = vld [vmem:[#allocation35_spill] sm:$0xff] }
 0x288   : > { %22160 = vmatmul.mubr.msk.f32.gmra.mrb[8].mxu0 %vm383_vm1, %v26704_v55  ;;  %v27212_v55 = vld [vmem:[#allocation2 + $0x181] sm:$0xff] }
 0x289   : > { %22162 = vmatprep.mubr.msk.f32.mxu0 %vm383_vm1, %v29131_v9  ;;  %v11112_v9 = vld [vmem:[%s28905_s1 + $0x54] sm:$0xf] }
 0x28a   : > { %22674 = vmatmul.mubr.msk.f32.gmra.mrb[20].mxu1 %vm383_vm1, %v26708_v11  ;;  %v5556_v11 = vld [vmem:[#allocation2 + $0x7a] sm:$0xff] }
 0x28b   : > { %22676 = vmatprep.mubr.msk.f32.mxu1 %vm383_vm1, %v26712_v63  ;;  %v27222_v63 = vld [vmem:[#allocation2 + $0x189] sm:$0xff] }
 0x28c   : > { %22163 = vmatmul.mubr.msk.f32.gmra.mrb[10].mxu0 %vm383_vm1, %v26720_v24  ;;  %v27242_v24 = vld [vmem:[#allocation2 + $0x1b9] sm:$0xff] }
 0x28d   : > { %22165 = vmatprep.mubr.msk.f32.mxu0 %vm383_vm1, %v26652_v44  ;;  %v5554_v44 = vld [vmem:[#allocation2 + $0x62] sm:$0xff] }
 0x28e   : > { %22677 = vmatmul.mubr.msk.f32.gmra.mrb[22].mxu1 %vm383_vm1, %v29132_v40  ;;  %v29146_v40 = vld [vmem:[#allocation49_spill] sm:$0xff] }
 0x28f   : > { %22679 = vmatprep.mubr.msk.f32.mxu1 %vm383_vm1, %v29133_v52  ;;  %v6019_v52 = vld [vmem:[#allocation2 + $0xb4] sm:$0xff] }
 0x290   : > { %22166 = vmatmul.mubr.msk.f32.gmra.mrb[12].mxu0 %vm383_vm1, %v26663_v31  ;;  %v5555_v31 = vld [vmem:[#allocation2 + $0x6a] sm:$0xff] }
 0x291   : > { %22168 = vmatprep.mubr.msk.f32.mxu0 %vm383_vm1, %v26665_v46  ;;  %v27231_v46 = vld [vmem:[#allocation2 + $0x1b1] sm:$0xff] }
 0x292   : > { %22680 = vmatmul.mubr.msk.f32.gmra.mrb[24].mxu1 %vm383_vm1, %v26736_v39  ;;  %v6028_v39 = vld [vmem:[%s28905_s1 + $0x60] sm:$0xf] }
 0x293   : > { %22682 = vmatprep.mubr.msk.f32.mxu1 %vm383_vm1, %v27212_v55 }
 0x294   : > { %22169 = vmatmul.mubr.msk.f32.gmra.mrb[14].mxu0 %vm383_vm1, %v26679_v23  ;;  %v5557_v23 = vld [vmem:[#allocation2 + $0x82] sm:$0xff] }
 0x295   : > { %22173 = vmatprep.mubr.msk.f32.mxu0 %vm383_vm1, %v5554_v44  ;;  %v29147_v44 = vld [vmem:[#allocation50_spill] sm:$0xff] }
 0x296   : > { %22683 = vmatmul.mubr.msk.f32.gmra.mrb[26].mxu1 %vm383_vm1, %v27222_v63 }
 0x297   : > { %22685 = vmatprep.mubr.msk.f32.mxu1 %vm383_vm1, %v26746_v49  ;;  %v5558_v49 = vld [vmem:[#allocation2 + $0x92] sm:$0xff] }
 0x298   : > { %22174 = vmatmul.mubr.msk.f32.vlgmr.msra.gmra.mrb[0].mxu0 %vm383_vm1, %v5555_v31  ;;  %v29148_v31 = vld [vmem:[#allocation21_spill] sm:$0xff] }
 0x299   : > { %22176 = vmatprep.mubr.msk.f32.mxu0 %vm383_vm1, %v5556_v11  ;;  %22198 = vmatpush3.msk.msra.mxu0 %vm577_vm0, %v5799_v43  ;;  %v29136_v43 = vld [vmem:[#allocation28_spill] sm:$0xff]  ;;  %v29149_v11 = vld [vmem:[#allocation51_spill] sm:$0xff] }
 0x29a   : > { %22686 = vmatmul.mubr.msk.f32.gmra.mrb[28].mxu1 %vm383_vm1, %v26759_v19  ;;  %22223 = vmatprep.subr.msk.mxu0 %vm577_vm0, %v6028_v39  ;;  %v5559_v19 = vld [vmem:[#allocation2 + $0x9a] sm:$0xff] }
 0x29b   : > { %22688 = vmatprep.mubr.msk.f32.mxu1 %vm383_vm1, %v27231_v46 }
 0x29c   : > { %22177 = vmatmul.mubr.msk.f32.gmra.mrb[2].mxu0 %vm383_vm1, %v5557_v23  ;;  %v29151_v23 = vld [vmem:[#allocation53_spill] sm:$0xff] }
 0x29d   : > { %22179 = vmatprep.mubr.msk.f32.mxu0 %vm383_vm1, %v5558_v49  ;;  %v29152_v49 = vld [vmem:[#allocation54_spill] sm:$0xff] }
 0x29e   : > { %22689 = vmatmul.mubr.msk.f32.gmra.mrb[30].mxu1 %vm383_vm1, %v27242_v24 }
 0x29f   : > { %22693 = vmatprep.mubr.msk.f32.mxu1 %vm383_vm1, %v26775_v48 }
 0x2a0   : > { %22180 = vmatmul.mubr.msk.f32.gmra.mrb[4].mxu0 %vm383_vm1, %v5559_v19  ;;  %v29154_v19 = vld [vmem:[#allocation36_spill] sm:$0xff] }
 0x2a1   : > { %22182 = vmatprep.mubr.msk.f32.mxu0 %vm383_vm1, %v5560_v28  ;;  %v29155_v28 = vld [vmem:[#allocation56_spill] sm:$0xff] }
 0x2a2   : > { %22694 = vmatmul.mubr.msk.f32.vlgmr.msra.gmra.mrb[16].mxu1 %vm383_vm1, %v26789_v15 }
 0x2a3   : > { %22718 = vmatpush3.msk.msra.mxu1 %vm577_vm0, %v10424_v38  ;;  %22696 = vmatprep.mubr.msk.f32.mxu1 %vm383_vm1, %v29134_v17  ;;  %v29140_v38 = vld [vmem:[#allocation16_spill] sm:$0xff]  ;;  %v10868_v17 = vld [vmem:[#allocation2 + $0x128] sm:$0xff] }
 0x2a4   : > { %22743 = vmatprep.subr.msk.mxu1 %vm577_vm0, %v10653_v45  ;;  %22183 = vmatmul.mubr.msk.f32.gmra.mrb[6].mxu0 %vm383_vm1, %v5561_v41  ;;  %v10867_v41 = vld [vmem:[#allocation2 + $0x120] sm:$0xff] }
 0x2a5   : > { %22185 = vmatprep.mubr.msk.f32.mxu0 %vm383_vm1, %v29135_v1  ;;  %v10869_v1 = vld [vmem:[#allocation2 + $0x138] sm:$0xff] }
 0x2a6   : > { %22697 = vmatmul.mubr.msk.f32.gmra.mrb[18].mxu1 %vm383_vm1, %v26802_v53  ;;  %v29138_v53 = vld [vmem:[#allocation29_spill] sm:$0xff] }
 0x2a7   : > { %22699 = vmatprep.mubr.msk.f32.mxu1 %vm383_vm1, %v29136_v43  ;;  %v11341_v43 = vld [vmem:[%s28905_s1 + $0x58] sm:$0xf] }
 0x2a8   : > { %22186 = vmatmul.mubr.msk.f32.gmra.mrb[8].mxu0 %vm383_vm1, %v26814_v13  ;;  %v27286_v13 = vld [vmem:[#allocation2 + $0x182] sm:$0xff] }
 0x2a9   : > { %22188 = vmatprep.mubr.msk.f32.mxu0 %vm383_vm1, %v29137_v30  ;;  %v10870_v30 = vld [vmem:[#allocation2 + $0x140] sm:$0xff] }
 0x2aa   : > { %22700 = vmatmul.mubr.msk.f32.gmra.mrb[20].mxu1 %vm383_vm1, %v26818_v35  ;;  %v5785_v35 = vld [vmem:[#allocation2 + $0x7b] sm:$0xff] }
 0x2ab   : > { %22702 = vmatprep.mubr.msk.f32.mxu1 %vm383_vm1, %v26822_v36  ;;  %v27296_v36 = vld [vmem:[#allocation2 + $0x18a] sm:$0xff] }
 0x2ac   : > { %22189 = vmatmul.mubr.msk.f32.gmra.mrb[10].mxu0 %vm383_vm1, %v26830_v18  ;;  %v5787_v18 = vld [vmem:[#allocation2 + $0x93] sm:$0xff] }
 0x2ad   : > { %22191 = vmatprep.mubr.msk.f32.mxu0 %vm383_vm1, %v26762_v62  ;;  %v5783_v62 = vld [vmem:[#allocation2 + $0x63] sm:$0xff] }
 0x2ae   : > { %22703 = vmatmul.mubr.msk.f32.gmra.mrb[22].mxu1 %vm383_vm1, %v29138_v53  ;;  %v10871_v53 = vld [vmem:[#allocation2 + $0x150] sm:$0xff] }
 0x2af   : > { %22705 = vmatprep.mubr.msk.f32.mxu1 %vm383_vm1, %v29139_v26  ;;  %v10872_v26 = vld [vmem:[#allocation2 + $0x158] sm:$0xff] }
 0x2b0   : > { %22192 = vmatmul.mubr.msk.f32.gmra.mrb[12].mxu0 %vm383_vm1, %v26773_v60  ;;  %v5784_v60 = vld [vmem:[#allocation2 + $0x6b] sm:$0xff] }
 0x2b1   : > { %22194 = vmatprep.mubr.msk.f32.mxu0 %vm383_vm1, %v26775_v48  ;;  %v27305_v48 = vld [vmem:[#allocation2 + $0x1b2] sm:$0xff] }
 0x2b2   : > { %22706 = vmatmul.mubr.msk.f32.gmra.mrb[24].mxu1 %vm383_vm1, %v26846_v51  ;;  %v27313_v51 = vld [vmem:[#allocation2 + $0x1ba] sm:$0xff] }
 0x2b3   : > { %22708 = vmatprep.mubr.msk.f32.mxu1 %vm383_vm1, %v27286_v13 }
 0x2b4   : > { %22195 = vmatmul.mubr.msk.f32.gmra.mrb[14].mxu0 %vm383_vm1, %v26789_v15  ;;  %v5786_v15 = vld [vmem:[#allocation2 + $0x83] sm:$0xff] }
 0x2b5   : > { %22199 = vmatprep.mubr.msk.f32.mxu0 %vm383_vm1, %v5783_v62  ;;  %v10873_v62 = vld [vmem:[#allocation2 + $0x168] sm:$0xff] }
 0x2b6   : > { %22709 = vmatmul.mubr.msk.f32.gmra.mrb[26].mxu1 %vm383_vm1, %v27296_v36 }
 0x2b7   : > { %22711 = vmatprep.mubr.msk.f32.mxu1 %vm383_vm1, %v26856_v37  ;;  %v5788_v37 = vld [vmem:[#allocation2 + $0x9b] sm:$0xff] }
 0x2b8   : > { %22200 = vmatmul.mubr.msk.f32.vlgmr.msra.gmra.mrb[0].mxu0 %vm383_vm1, %v5784_v60  ;;  %v10874_v60 = vld [vmem:[#allocation2 + $0x170] sm:$0xff] }
 0x2b9   : > { %22202 = vmatprep.mubr.msk.f32.mxu0 %vm383_vm1, %v5785_v35  ;;  %22224 = vmatpush3.msk.msra.mxu0 %vm577_vm0, %v6028_v39  ;;  %v29150_v39 = vld [vmem:[#allocation52_spill] sm:$0xff]  ;;  %v10877_v35 = vld [vmem:[#allocation2 + $0x198] sm:$0xff] }
 0x2ba   : > { %22712 = vmatmul.mubr.msk.f32.gmra.mrb[28].mxu1 %vm383_vm1, %v26869_v6  ;;  %v5789_v6 = vld [vmem:[#allocation2 + $0xab] sm:$0xff] }
 0x2bb   : > { %22714 = vmatprep.mubr.msk.f32.mxu1 %vm383_vm1, %v27305_v48 }
 0x2bc   : > { %22203 = vmatmul.mubr.msk.f32.gmra.mrb[2].mxu0 %vm383_vm1, %v5786_v15  ;;  %v10878_v15 = vld [vmem:[#allocation2 + $0x1a0] sm:$0xff] }
 0x2bd   : > { %22205 = vmatprep.mubr.msk.f32.mxu0 %vm383_vm1, %v5787_v18  ;;  %v10881_v18 = vld [vmem:[#allocation2 + $0x1c8] sm:$0xff] }
 0x2be   : > { %22715 = vmatmul.mubr.msk.f32.gmra.mrb[30].mxu1 %vm383_vm1, %v27313_v51 }
 0x2bf   : > { %22719 = vmatprep.mubr.msk.f32.mxu1 %vm383_vm1, %v26885_v10 }
 0x2c0   : > { %22206 = vmatmul.mubr.msk.f32.gmra.mrb[4].mxu0 %vm383_vm1, %v5788_v37  ;;  %v10882_v37 = vld [vmem:[#allocation2 + $0x1d0] sm:$0xff] }
 0x2c1   : > { %22208 = vmatprep.mubr.msk.f32.mxu0 %vm383_vm1, %v5789_v6  ;;  %v11098_v6 = vld [vmem:[#allocation2 + $0x139] sm:$0xff] }
 0x2c2   : > { %22720 = vmatmul.mubr.msk.f32.vlgmr.msra.gmra.mrb[16].mxu1 %vm383_vm1, %v26899_v16 }
 0x2c3   : > { %22744 = vmatpush3.msk.msra.mxu1 %vm577_vm0, %v10653_v45  ;;  %22722 = vmatprep.mubr.msk.f32.mxu1 %vm383_vm1, %v29140_v38  ;;  %v29156_v45 = vld [vmem:[#allocation57_spill] sm:$0xff] }
 0x2c4   : > { %22769 = vmatprep.subr.msk.mxu1 %vm577_vm0, %v10883_v42  ;;  %22209 = vmatmul.mubr.msk.f32.gmra.mrb[6].mxu0 %vm383_vm1, %v5790_v14  ;;  %v11101_v14 = vld [vmem:[#allocation2 + $0x159] sm:$0xff]  ;;  %v11102_v38 = vld [vmem:[#allocation2 + $0x169] sm:$0xff] }
 0x2c5   : > { %22211 = vmatprep.mubr.msk.f32.mxu0 %vm383_vm1, %v29141_v3  ;;  %v11103_v3 = vld [vmem:[#allocation2 + $0x171] sm:$0xff] }
 0x2c6   : > { %22723 = vmatmul.mubr.msk.f32.gmra.mrb[18].mxu1 %vm383_vm1, %v26912_v22  ;;  %v29144_v22 = vld [vmem:[#allocation34_spill] sm:$0xff] }
 0x2c7   : > { %22725 = vmatprep.mubr.msk.f32.mxu1 %vm383_vm1, %v29142_v8  ;;  %v11106_v8 = vld [vmem:[#allocation2 + $0x199] sm:$0xff] }
 0x2c8   : > { %22212 = vmatmul.mubr.msk.f32.gmra.mrb[8].mxu0 %vm383_vm1, %v26924_v21  ;;  %v27356_v21 = vld [vmem:[#allocation2 + $0x183] sm:$0xff] }
 0x2c9   : > { %22214 = vmatprep.mubr.msk.f32.mxu0 %vm383_vm1, %v29143_v50  ;;  %v29157_v50 = vmov 0.0  }
 0x2ca   : > { %22726 = vmatmul.mubr.msk.f32.gmra.mrb[20].mxu1 %vm383_vm1, %v26928_v27  ;;  %v6014_v27 = vld [vmem:[#allocation2 + $0x7c] sm:$0xff]  ;;  %12132 = vst.msk [vmem:[#allocation4] sm:$0xff] %vm6257_vm4, %v29157_v50  ;;  %12135 = vst.msk [vmem:[#allocation4 + $0x10] sm:$0xff] %vm6257_vm4, %v29157_v50 }
 0x2cb   : > { %22728 = vmatprep.mubr.msk.f32.mxu1 %vm383_vm1, %v26932_v20  ;;  %v27366_v20 = vld [vmem:[#allocation2 + $0x18b] sm:$0xff]  ;;  %12138 = vst.msk [vmem:[#allocation4 + $0xa0] sm:$0xff] %vm6257_vm4, %v29157_v50  ;;  %12140 = vst.msk [vmem:[#allocation4 + $0xb0] sm:$0xff] %vm6257_vm4, %v29157_v50 }
 0x2cc   : > { %22215 = vmatmul.mubr.msk.f32.gmra.mrb[10].mxu0 %vm383_vm1, %v26940_v29  ;;  %v6016_v29 = vld [vmem:[#allocation2 + $0x94] sm:$0xff]  ;;  %12143 = vst.msk [vmem:[#allocation4] sm:$0x3] %vm12142_vm5, %v29157_v50  ;;  %12144 = vst.msk [vmem:[#allocation4 + $0x10] sm:$0x3] %vm12142_vm5, %v29157_v50 }
 0x2cd   : > { %22217 = vmatprep.mubr.msk.f32.mxu0 %vm383_vm1, %v26872_v0  ;;  %v6012_v0 = vld [vmem:[#allocation2 + $0x64] sm:$0xff]  ;;  %12145 = vst.msk [vmem:[#allocation4 + $0x20] sm:$0x3] %vm12142_vm5, %v29157_v50  ;;  %12146 = vst.msk [vmem:[#allocation4 + $0x30] sm:$0x3] %vm12142_vm5, %v29157_v50 }
 0x2ce   : > { %22729 = vmatmul.mubr.msk.f32.gmra.mrb[22].mxu1 %vm383_vm1, %v29144_v22  ;;  %v11110_v22 = vld [vmem:[#allocation2 + $0x1c9] sm:$0xff]  ;;  %12147 = vst.msk [vmem:[#allocation4 + $0x40] sm:$0x3] %vm12142_vm5, %v29157_v50  ;;  %12148 = vst.msk [vmem:[#allocation4 + $0x50] sm:$0x3] %vm12142_vm5, %v29157_v50 }
 0x2cf   : > { %22731 = vmatprep.mubr.msk.f32.mxu1 %vm383_vm1, %v29145_v25  ;;  %v11111_v25 = vld [vmem:[#allocation2 + $0x1d1] sm:$0xff]  ;;  %12149 = vst.msk [vmem:[#allocation4 + $0x60] sm:$0x3] %vm12142_vm5, %v29157_v50  ;;  %12150 = vst.msk [vmem:[#allocation4 + $0x70] sm:$0x3] %vm12142_vm5, %v29157_v50 }
 0x2d0   : > { %22218 = vmatmul.mubr.msk.f32.gmra.mrb[12].mxu0 %vm383_vm1, %v26883_v7  ;;  %v6013_v7 = vld [vmem:[#allocation2 + $0x6c] sm:$0xff]  ;;  %12151 = vst.msk [vmem:[#allocation4 + $0x80] sm:$0x3] %vm12142_vm5, %v29157_v50  ;;  %12152 = vst.msk [vmem:[#allocation4 + $0x90] sm:$0x3] %vm12142_vm5, %v29157_v50 }
 0x2d1   : > { %22220 = vmatprep.mubr.msk.f32.mxu0 %vm383_vm1, %v26885_v10  ;;  %v27375_v10 = vld [vmem:[#allocation2 + $0x1b3] sm:$0xff]  ;;  %12153 = vst.msk [vmem:[#allocation4 + $0xa0] sm:$0x3] %vm12142_vm5, %v29157_v50  ;;  %12154 = vst.msk [vmem:[#allocation4 + $0xb0] sm:$0x3] %vm12142_vm5, %v29157_v50 }
 0x2d2   : > { %22732 = vmatmul.mubr.msk.f32.gmra.mrb[24].mxu1 %vm383_vm1, %v26956_v2  ;;  %v27383_v2 = vld [vmem:[#allocation2 + $0x1bb] sm:$0xff]  ;;  %12157 = vst.msk [vmem:[#allocation4 + $0x2a] sm:$0x3] %vm12142_vm5, %v29157_v50  ;;  %12158 = vst.msk [vmem:[#allocation4 + $0x3a] sm:$0x3] %vm12142_vm5, %v29157_v50 }
 0x2d3   : > { %22734 = vmatprep.mubr.msk.f32.mxu1 %vm383_vm1, %v27356_v21  ;;  %12159 = vst.msk [vmem:[#allocation4 + $0x4a] sm:$0x3] %vm12142_vm5, %v29157_v50  ;;  %12160 = vst.msk [vmem:[#allocation4 + $0x5a] sm:$0x3] %vm12142_vm5, %v29157_v50 }
 0x2d4   : > { %22221 = vmatmul.mubr.msk.f32.gmra.mrb[14].mxu0 %vm383_vm1, %v26899_v16  ;;  %v6015_v16 = vld [vmem:[#allocation2 + $0x84] sm:$0xff]  ;;  %12161 = vst.msk [vmem:[#allocation4 + $0x6a] sm:$0x3] %vm12142_vm5, %v29157_v50  ;;  %12162 = vst.msk [vmem:[#allocation4 + $0x7a] sm:$0x3] %vm12142_vm5, %v29157_v50 }
 0x2d5   : > { %22225 = vmatprep.mubr.msk.f32.mxu0 %vm383_vm1, %v6012_v0  ;;  %v11325_v0 = vld [vmem:[#allocation2 + $0x122] sm:$0xff]  ;;  %12163 = vst.msk [vmem:[#allocation4 + $0x8a] sm:$0x3] %vm12142_vm5, %v29157_v50  ;;  %12164 = vst.msk [vmem:[#allocation4 + $0x9a] sm:$0x3] %vm12142_vm5, %v29157_v50 }
 0x2d6   : > { %22735 = vmatmul.mubr.msk.f32.gmra.mrb[26].mxu1 %vm383_vm1, %v27366_v20  ;;  %12134 = vst.msk [vmem:[#allocation4 + $0x8] sm:$0xf] %vm12133_vm6, %v29157_v50  ;;  %12136 = vst.msk [vmem:[#allocation4 + $0x18] sm:$0xf] %vm12133_vm6, %v29157_v50 }
 0x2d7   : > { %22737 = vmatprep.mubr.msk.f32.mxu1 %vm383_vm1, %v26966_v61  ;;  %v6017_v61 = vld [vmem:[#allocation2 + $0x9c] sm:$0xff]  ;;  %12139 = vst.msk [vmem:[#allocation4 + $0xa8] sm:$0xf] %vm12133_vm6, %v29157_v50  ;;  %12141 = vst.msk [vmem:[#allocation4 + $0xb8] sm:$0xf] %vm12133_vm6, %v29157_v50 }
 0x2d8   : > { %22226 = vmatmul.mubr.msk.f32.vlgmr.msra.gmra.mrb[0].mxu0 %vm383_vm1, %v6013_v7  ;;  %v11327_v7 = vld [vmem:[#allocation2 + $0x13a] sm:$0xff]  ;;  %12155 = vst.msk [vmem:[#allocation4 + $0xa] sm:$0x3] %vm12142_vm5, %v29157_v50  ;;  %12156 = vst.msk [vmem:[#allocation4 + $0x1a] sm:$0x3] %vm12142_vm5, %v29157_v50 }
 0x2d9   : > { %22228 = vmatprep.mubr.msk.f32.mxu0 %vm383_vm1, %v6014_v27  ;;  %v11329_v27 = vld [vmem:[#allocation2 + $0x152] sm:$0xff]  ;;  %12165 = vst.msk [vmem:[#allocation4 + $0xaa] sm:$0x3] %vm12142_vm5, %v29157_v50  ;;  %12166 = vst.msk [vmem:[#allocation4 + $0xba] sm:$0x3] %vm12142_vm5, %v29157_v50 }
 0x2da   : > { %22738 = vmatmul.mubr.msk.f32.gmra.mrb[28].mxu1 %vm383_vm1, %v26981_v59  ;;  %v6018_v59 = vld [vmem:[#allocation2 + $0xac] sm:$0xff]  ;;  %15897 = vst.msk [vmem:[#allocation6] sm:$0xff] %vm15845_vm9, %v29157_v50  ;;  %15900 = vst.msk [vmem:[#allocation6 + $0x10] sm:$0xff] %vm15845_vm9, %v29157_v50 }
 0x2db   : > { %22740 = vmatprep.mubr.msk.f32.mxu1 %vm383_vm1, %v27375_v10  ;;  %15903 = vst.msk [vmem:[#allocation6 + $0x60] sm:$0xff] %vm15845_vm9, %v29157_v50  ;;  %15905 = vst.msk [vmem:[#allocation6 + $0x70] sm:$0xff] %vm15845_vm9, %v29157_v50 }
 0x2dc   : > { %22229 = vmatmul.mubr.msk.f32.gmra.mrb[2].mxu0 %vm383_vm1, %v6015_v16  ;;  %v12192_v16 = vld [vmem:[%s28907_s3] sm:$0xff]  ;;  %15899 = vst.msk [vmem:[#allocation6 + $0x8] sm:$0xf] %vm15898_vm10, %v29157_v50  ;;  %15901 = vst.msk [vmem:[#allocation6 + $0x18] sm:$0xf] %vm15898_vm10, %v29157_v50 }
 0x2dd   : > { %22231 = vmatprep.mubr.msk.f32.mxu0 %vm383_vm1, %v6016_v29  ;;  %v11330_v29 = vld [vmem:[#allocation2 + $0x15a] sm:$0xff]  ;;  %22899 = vmatprep.subr.mxu0 %v12192_v16  ;;  %15904 = vst.msk [vmem:[#allocation6 + $0x68] sm:$0xf] %vm15898_vm10, %v29157_v50  ;;  %15906 = vst.msk [vmem:[#allocation6 + $0x78] sm:$0xf] %vm15898_vm10, %v29157_v50 }
 0x2de   : > { %22741 = vmatmul.mubr.msk.f32.gmra.mrb[30].mxu1 %vm383_vm1, %v27383_v2  ;;  %22900 = vmatpush3.msra.mxu0 %v12192_v16  ;;  %15908 = vst.msk [vmem:[#allocation6] sm:$0x3] %vm15907_vm11, %v29157_v50  ;;  %15909 = vst.msk [vmem:[#allocation6 + $0x10] sm:$0x3] %vm15907_vm11, %v29157_v50 }
 0x2df   : > { %22745 = vmatprep.mubr.msk.f32.mxu1 %vm383_vm1, %v26998_v5  ;;  %15917 = vst.msk [vmem:[#allocation6 + $0x6] sm:$0x3f] %vm15916_vm12, %v29157_v50  ;;  %15919 = vst.msk [vmem:[#allocation6 + $0x26] sm:$0x3f] %vm15916_vm12, %v29157_v50 }
 0x2e0   : > { %22232 = vmatmul.mubr.msk.f32.gmra.mrb[4].mxu0 %vm383_vm1, %v6017_v61  ;;  %v12184_v61 = vld [vmem:[#allocation4] sm:$0xff]  ;;  %15910 = vst.msk [vmem:[#allocation6 + $0x20] sm:$0x3] %vm15907_vm11, %v29157_v50  ;;  %15911 = vst.msk [vmem:[#allocation6 + $0x30] sm:$0x3] %vm15907_vm11, %v29157_v50 }
 0x2e1   : > { %22234 = vmatprep.mubr.msk.f32.mxu0 %vm383_vm1, %v6018_v59  ;;  %v11331_v59 = vld [vmem:[#allocation2 + $0x16a] sm:$0xff]  ;;  %15912 = vst.msk [vmem:[#allocation6 + $0x40] sm:$0x3] %vm15907_vm11, %v29157_v50  ;;  %15913 = vst.msk [vmem:[#allocation6 + $0x50] sm:$0x3] %vm15907_vm11, %v29157_v50 }
 0x2e2   : > { %22746 = vmatmul.mubr.msk.f32.vlgmr.msra.gmra.mrb[16].mxu1 %vm383_vm1, %v29146_v40  ;;  %15914 = vst.msk [vmem:[#allocation6 + $0x60] sm:$0x3] %vm15907_vm11, %v29157_v50  ;;  %15915 = vst.msk [vmem:[#allocation6 + $0x70] sm:$0x3] %vm15907_vm11, %v29157_v50 }
 0x2e3   : > { %22770 = vmatpush3.msk.msra.mxu1 %vm577_vm0, %v10883_v42  ;;  %22748 = vmatprep.mubr.msk.f32.mxu1 %vm383_vm1, %v29147_v44  ;;  %v11570_v42 = vld [vmem:[%s28905_s1 + $0x5c] sm:$0xf]  ;;  %v11336_v44 = vld [vmem:[#allocation2 + $0x1a2] sm:$0xff]  ;;  %15920 = vst.msk [vmem:[#allocation6 + $0x36] sm:$0x3f] %vm15916_vm12, %v29157_v50 }
 0x2e4   : > { %22795 = vmatprep.subr.msk.mxu1 %vm577_vm0, %v11112_v9  ;;  %22235 = vmatmul.mubr.msk.f32.gmra.mrb[6].mxu0 %vm383_vm1, %v6019_v52  ;;  %v11335_v52 = vld [vmem:[#allocation2 + $0x19a] sm:$0xff]  ;;  %15921 = vst.msk [vmem:[#allocation6 + $0x46] sm:$0x3f] %vm15916_vm12, %v29157_v50  ;;  %15922 = vst.msk [vmem:[#allocation6 + $0x56] sm:$0x3f] %vm15916_vm12, %v29157_v50 }
 0x2e5   : > { %22237 = vmatprep.mubr.msk.f32.mxu0 %vm383_vm1, %v29148_v31  ;;  %v11339_v31 = vld [vmem:[#allocation2 + $0x1ca] sm:$0xff]  ;;  %15918 = vst.msk [vmem:[#allocation6 + $0x16] sm:$0x3f] %vm15916_vm12, %v29157_v50  ;;  %15923 = vst.msk [vmem:[#allocation6 + $0x66] sm:$0x3f] %vm15916_vm12, %v29157_v50 }
 0x2e6   : > { %22749 = vmatmul.mubr.msk.f32.gmra.mrb[18].mxu1 %vm383_vm1, %v27028_v56  ;;  %v29153_v56 = vld [vmem:[#allocation55_spill] sm:$0xff]  ;;  %15924 = vst.msk [vmem:[#allocation6 + $0x76] sm:$0x3f] %vm15916_vm12, %v29157_v50 }
 0x2e7   : > { %22751 = vmatprep.mubr.msk.f32.mxu1 %vm383_vm1, %v29149_v11  ;;  %v11340_v11 = vld [vmem:[#allocation2 + $0x1d2] sm:$0xff] }
 0x2e8   : > { %22238 = vmatmul.mubr.msk.f32.gmra.mrb[8].mxu0 %vm383_vm1, %v27040_v58  ;;  %v27425_v58 = vld [vmem:[#allocation2 + $0x184] sm:$0xff] }
 0x2e9   : > { %22240 = vmatprep.mubr.msk.f32.mxu0 %vm383_vm1, %v29151_v23  ;;  %v11558_v23 = vld [vmem:[#allocation2 + $0x153] sm:$0xff] }
 0x2ea   : > { %22752 = vmatmul.mubr.msk.f32.gmra.mrb[20].mxu1 %vm383_vm1, %v29150_v39  ;;  %v11556_v39 = vld [vmem:[#allocation2 + $0x13b] sm:$0xff] }
 0x2eb   : > { %22754 = vmatprep.mubr.msk.f32.mxu1 %vm383_vm1, %v27048_v47  ;;  %v27435_v47 = vld [vmem:[#allocation2 + $0x18c] sm:$0xff] }
 0x2ec   : > { %22241 = vmatmul.mubr.msk.f32.gmra.mrb[10].mxu0 %vm383_vm1, %v29152_v49  ;;  %v11560_v49 = vld [vmem:[#allocation2 + $0x16b] sm:$0xff] }
 0x2ed   : > { %22243 = vmatprep.mubr.msk.f32.mxu0 %vm383_vm1, %v29154_v19  ;;  %v11564_v19 = vld [vmem:[#allocation2 + $0x19b] sm:$0xff] }
 0x2ee   : > { %22755 = vmatmul.mubr.msk.f32.gmra.mrb[22].mxu1 %vm383_vm1, %v29153_v56  ;;  %v11561_v56 = vld [vmem:[#allocation2 + $0x173] sm:$0xff] }
 0x2ef   : > { %22757 = vmatprep.mubr.msk.f32.mxu1 %vm383_vm1, %v29155_v28  ;;  %v11565_v28 = vld [vmem:[#allocation2 + $0x1a3] sm:$0xff] }
 0x2f0   : > { %22244 = vmatmul.mubr.msk.f32.gmra.mrb[12].mxu0 %vm383_vm1, %v26996_v4  ;;  %v27443_v4 = vld [vmem:[#allocation2 + $0x1b4] sm:$0xff] }
 0x2f1   : > { %22246 = vmatprep.mubr.msk.f32.mxu0 %vm383_vm1, %v26998_v5  ;;  %v27449_v5 = vld [vmem:[#allocation2 + $0x1bc] sm:$0xff] }
 0x2f2   : > { %22758 = vmatmul.mubr.msk.f32.gmra.mrb[24].mxu1 %vm383_vm1, %v29156_v45  ;;  %v11568_v45 = vld [vmem:[#allocation2 + $0x1cb] sm:$0xff] }
 0x2f3   : > { %22760 = vmatprep.mubr.msk.f32.mxu1 %vm383_vm1, %v27425_v58 }
 0x2f4   : > { %22247 = vmatmul.mubr.msk.f32.gmra.mrb[14].mxu0 %vm383_vm1, %v29146_v40  ;;  %v11332_v40 = vld [vmem:[#allocation2 + $0x172] sm:$0xff] }
 0x2f5   : > { %22901 = vmatprep.mubr.msk.f32.mxu0 %vm6257_vm4, %v12184_v61 }
 0x2f6   : > { %22761 = vmatmul.mubr.msk.f32.gmra.mrb[26].mxu1 %vm383_vm1, %v27435_v47 }
 0x2f7   : > { %22763 = vmatprep.mubr.msk.f32.mxu1 %vm383_vm1, %v27081_v12 }
 0x2fa   : > { %22764 = vmatmul.mubr.msk.f32.gmra.mrb[28].mxu1 %vm383_vm1, %v27092_v54 }
 0x2fb   : > { %22766 = vmatprep.mubr.msk.f32.mxu1 %vm383_vm1, %v27443_v4 }
 0x2fe   : > { %22767 = vmatmul.mubr.msk.f32.gmra.mrb[30].mxu1 %vm383_vm1, %v27449_v5 }
 0x2ff   : > { %22771 = vmatprep.mubr.msk.f32.mxu1 %vm383_vm1, %v10867_v41  ;;  %v11569_v41 = vld [vmem:[#allocation2 + $0x1d3] sm:$0xff] }
 0x302   : > { %22772 = vmatmul.mubr.msk.f32.vlgmr.msra.gmra.mrb[16].mxu1 %vm383_vm1, %v10868_v17  ;;  %v11785_v17 = vld [vmem:[#allocation2 + $0x13c] sm:$0xff] }
 0x303   : > { %22796 = vmatpush3.msk.msra.mxu1 %vm577_vm0, %v11112_v9  ;;  %22774 = vmatprep.mubr.msk.f32.mxu1 %vm383_vm1, %v10869_v1  ;;  %v27565_v9 = vld [vmem:[#allocation4 + $0x10] sm:$0xff]  ;;  %v11786_v1 = vld [vmem:[#allocation2 + $0x144] sm:$0xff] }
 0x304   : > { %22821 = vmatprep.subr.msk.mxu1 %vm577_vm0, %v11341_v43  ;;  %22902 = vmatmul.mubr.msk.f32.vlgmr.msra.gmra.mrb[16].mxu0 %vm6257_vm4, %v27565_v9 }
 0x306   : > { %22775 = vmatmul.mubr.msk.f32.gmra.mrb[18].mxu1 %vm383_vm1, %v10870_v30  ;;  %v11790_v30 = vld [vmem:[#allocation2 + $0x174] sm:$0xff] }
 0x307   : > { %22777 = vmatprep.mubr.msk.f32.mxu1 %vm383_vm1, %v10871_v53  ;;  %v11797_v53 = vld [vmem:[#allocation2 + $0x1cc] sm:$0xff] }
 0x30a   : > { %22778 = vmatmul.mubr.msk.f32.gmra.mrb[20].mxu1 %vm383_vm1, %v10872_v26  ;;  %v11798_v26 = vld [vmem:[#allocation2 + $0x1d4] sm:$0xff] }
 0x30b   : > { %22780 = vmatprep.mubr.msk.f32.mxu1 %vm383_vm1, %v10873_v62 }
 0x30e   : > { %22781 = vmatmul.mubr.msk.f32.gmra.mrb[22].mxu1 %vm383_vm1, %v10874_v60 }
 0x30f   : > { %22783 = vmatprep.mubr.msk.f32.mxu1 %vm383_vm1, %v27138_v57  ;;  %v11096_v57 = vld [vmem:[#allocation2 + $0x121] sm:$0xff] }
 0x312   : > { %22784 = vmatmul.mubr.msk.f32.gmra.mrb[24].mxu1 %vm383_vm1, %v27148_v32  ;;  %v11097_v32 = vld [vmem:[#allocation2 + $0x129] sm:$0xff] }
 0x313   : > { %22786 = vmatprep.mubr.msk.f32.mxu1 %vm383_vm1, %v10877_v35 }
 0x316   : > { %22787 = vmatmul.mubr.msk.f32.gmra.mrb[26].mxu1 %vm383_vm1, %v10878_v15  ;;  %v29160_v15 = vld [vmem:[#allocation39_spill] sm:$0xff] }
 0x317   : > { %22789 = vmatprep.mubr.msk.f32.mxu1 %vm383_vm1, %v27157_v34  ;;  %v11099_v34 = vld [vmem:[#allocation2 + $0x141] sm:$0xff] }
 0x31a   : > { %22790 = vmatmul.mubr.msk.f32.gmra.mrb[28].mxu1 %vm383_vm1, %v27168_v33  ;;  %v11100_v33 = vld [vmem:[#allocation2 + $0x151] sm:$0xff] }
 0x31b   : > { %22792 = vmatprep.mubr.msk.f32.mxu1 %vm383_vm1, %v10881_v18 }
 0x31e   : > { %22793 = vmatmul.mubr.msk.f32.gmra.mrb[30].mxu1 %vm383_vm1, %v10882_v37 }
 0x31f   : > { %22797 = vmatprep.mubr.msk.f32.mxu1 %vm383_vm1, %v11096_v57  ;;  %v29161_v57 = vld [vmem:[#allocation40_spill] sm:$0xff] }
 0x322   : > { %22798 = vmatmul.mubr.msk.f32.vlgmr.msra.gmra.mrb[16].mxu1 %vm383_vm1, %v11097_v32 }
 0x323   : > { %22822 = vmatpush3.msk.msra.mxu1 %vm577_vm0, %v11341_v43  ;;  %22800 = vmatprep.mubr.msk.f32.mxu1 %vm383_vm1, %v11098_v6  ;;  %v11789_v43 = vld [vmem:[#allocation2 + $0x16c] sm:$0xff] }
 0x324   : > { %22847 = vmatprep.subr.msk.mxu1 %vm577_vm0, %v11570_v42 }
 0x326   : > { %22801 = vmatmul.mubr.msk.f32.gmra.mrb[18].mxu1 %vm383_vm1, %v11099_v34 }
 0x327   : > { %22803 = vmatprep.mubr.msk.f32.mxu1 %vm383_vm1, %v11100_v33 }
 0x32a   : > { %22804 = vmatmul.mubr.msk.f32.gmra.mrb[20].mxu1 %vm383_vm1, %v11101_v14 }
 0x32b   : > { %22806 = vmatprep.mubr.msk.f32.mxu1 %vm383_vm1, %v11102_v38  ;;  %v29162_v38 = vld [vmem:[#allocation41_spill] sm:$0xff] }
 0x32e   : > { %22807 = vmatmul.mubr.msk.f32.gmra.mrb[22].mxu1 %vm383_vm1, %v11103_v3 }
 0x32f   : > { %22809 = vmatprep.mubr.msk.f32.mxu1 %vm383_vm1, %v27212_v55  ;;  %v11107_v55 = vld [vmem:[#allocation2 + $0x1a1] sm:$0xff] }
 0x332   : > { %22810 = vmatmul.mubr.msk.f32.gmra.mrb[24].mxu1 %vm383_vm1, %v27222_v63  ;;  %v11326_v63 = vld [vmem:[#allocation2 + $0x12a] sm:$0xff] }
 0x333   : > { %22812 = vmatprep.mubr.msk.f32.mxu1 %vm383_vm1, %v11106_v8 }
 0x336   : > { %22813 = vmatmul.mubr.msk.f32.gmra.mrb[26].mxu1 %vm383_vm1, %v11107_v55  ;;  %v29163_v55 = vld [vmem:[#allocation42_spill] sm:$0xff] }
 0x337   : > { %22815 = vmatprep.mubr.msk.f32.mxu1 %vm383_vm1, %v27231_v46  ;;  %v11799_v46 = vld [vmem:[%s28905_s1 + $0x60] sm:$0xf] }
 0x33a   : > { %22816 = vmatmul.mubr.msk.f32.gmra.mrb[28].mxu1 %vm383_vm1, %v27242_v24  ;;  %v11328_v24 = vld [vmem:[#allocation2 + $0x142] sm:$0xff] }
 0x33b   : > { %22818 = vmatprep.mubr.msk.f32.mxu1 %vm383_vm1, %v11110_v22 }
 0x33e   : > { %22819 = vmatmul.mubr.msk.f32.gmra.mrb[30].mxu1 %vm383_vm1, %v11111_v25 }
 0x33f   : > { %22823 = vmatprep.mubr.msk.f32.mxu1 %vm383_vm1, %v11325_v0 }
 0x342   : > { %22824 = vmatmul.mubr.msk.f32.vlgmr.msra.gmra.mrb[16].mxu1 %vm383_vm1, %v11326_v63 }
 0x343   : > { %22848 = vmatpush3.msk.msra.mxu1 %vm577_vm0, %v11570_v42  ;;  %22826 = vmatprep.mubr.msk.f32.mxu1 %vm383_vm1, %v11327_v7 }
 0x344   : > { %22873 = vmatprep.subr.msk.mxu1 %vm577_vm0, %v11799_v46 }
 0x346   : > { %22827 = vmatmul.mubr.msk.f32.gmra.mrb[18].mxu1 %vm383_vm1, %v11328_v24  ;;  %v29164_v24 = vld [vmem:[#allocation17_spill] sm:$0xff] }
 0x347   : > { %22829 = vmatprep.mubr.msk.f32.mxu1 %vm383_vm1, %v11329_v27 }
 0x34a   : > { %22830 = vmatmul.mubr.msk.f32.gmra.mrb[20].mxu1 %vm383_vm1, %v11330_v29  ;;  %v29165_v29 = vld [vmem:[#allocation18_spill] sm:$0xff] }
 0x34b   : > { %22832 = vmatprep.mubr.msk.f32.mxu1 %vm383_vm1, %v11331_v59 }
 0x34e   : > { %22833 = vmatmul.mubr.msk.f32.gmra.mrb[22].mxu1 %vm383_vm1, %v11332_v40 }
 0x34f   : > { %22835 = vmatprep.mubr.msk.f32.mxu1 %vm383_vm1, %v27286_v13  ;;  %v11554_v13 = vld [vmem:[#allocation2 + $0x123] sm:$0xff] }
 0x352   : > { %22836 = vmatmul.mubr.msk.f32.gmra.mrb[24].mxu1 %vm383_vm1, %v27296_v36  ;;  %v11555_v36 = vld [vmem:[#allocation2 + $0x12b] sm:$0xff] }
 0x353   : > { %22838 = vmatprep.mubr.msk.f32.mxu1 %vm383_vm1, %v11335_v52 }
 0x356   : > { %22839 = vmatmul.mubr.msk.f32.gmra.mrb[26].mxu1 %vm383_vm1, %v11336_v44 }
 0x357   : > { %22841 = vmatprep.mubr.msk.f32.mxu1 %vm383_vm1, %v27305_v48  ;;  %v11557_v48 = vld [vmem:[#allocation2 + $0x143] sm:$0xff] }
 0x35a   : > { %22842 = vmatmul.mubr.msk.f32.gmra.mrb[28].mxu1 %vm383_vm1, %v27313_v51  ;;  %v11559_v51 = vld [vmem:[#allocation2 + $0x15b] sm:$0xff] }
 0x35b   : > { %22844 = vmatprep.mubr.msk.f32.mxu1 %vm383_vm1, %v11339_v31 }
 0x35e   : > { %22845 = vmatmul.mubr.msk.f32.gmra.mrb[30].mxu1 %vm383_vm1, %v11340_v11  ;;  %v29166_v11 = vld [vmem:[#allocation43_spill] sm:$0xff] }
 0x35f   : > { %22849 = vmatprep.mubr.msk.f32.mxu1 %vm383_vm1, %v11554_v13 }
 0x362   : > { %22850 = vmatmul.mubr.msk.f32.vlgmr.msra.gmra.mrb[16].mxu1 %vm383_vm1, %v11555_v36 }
 0x363   : > { %22874 = vmatpush3.msk.msra.mxu1 %vm577_vm0, %v11799_v46  ;;  %22852 = vmatprep.mubr.msk.f32.mxu1 %vm383_vm1, %v11556_v39  ;;  %vm19110_vm0 = vcmask 253952  }
 0x366   : > { %22853 = vmatmul.mubr.msk.f32.gmra.mrb[18].mxu1 %vm383_vm1, %v11557_v48 }
 0x367   : > { %22855 = vmatprep.mubr.msk.f32.mxu1 %vm383_vm1, %v11558_v23  ;;  %v29167_v23 = vld [vmem:[#allocation44_spill] sm:$0xff] }
 0x36a   : > { %22856 = vmatmul.mubr.msk.f32.gmra.mrb[20].mxu1 %vm383_vm1, %v11559_v51 }
 0x36b   : > { %22858 = vmatprep.mubr.msk.f32.mxu1 %vm383_vm1, %v11560_v49 }
 0x36e   : > { %22859 = vmatmul.mubr.msk.f32.gmra.mrb[22].mxu1 %vm383_vm1, %v11561_v56 }
 0x36f   : > { %22861 = vmatprep.mubr.msk.f32.mxu1 %vm383_vm1, %v27356_v21  ;;  %v11783_v21 = vld [vmem:[#allocation2 + $0x124] sm:$0xff] }
 0x372   : > { %22862 = vmatmul.mubr.msk.f32.gmra.mrb[24].mxu1 %vm383_vm1, %v27366_v20  ;;  %v11784_v20 = vld [vmem:[#allocation2 + $0x12c] sm:$0xff] }
 0x373   : > { %22864 = vmatprep.mubr.msk.f32.mxu1 %vm383_vm1, %v11564_v19 }
 0x376   : > { %22865 = vmatmul.mubr.msk.f32.gmra.mrb[26].mxu1 %vm383_vm1, %v11565_v28 }
 0x377   : > { %22867 = vmatprep.mubr.msk.f32.mxu1 %vm383_vm1, %v27375_v10  ;;  %v11787_v10 = vld [vmem:[#allocation2 + $0x154] sm:$0xff] }
 0x37a   : > { %22868 = vmatmul.mubr.msk.f32.gmra.mrb[28].mxu1 %vm383_vm1, %v27383_v2  ;;  %v11788_v2 = vld [vmem:[#allocation2 + $0x15c] sm:$0xff] }
 0x37b   : > { %22870 = vmatprep.mubr.msk.f32.mxu1 %vm383_vm1, %v11568_v45 }
 0x37e   : > { %22871 = vmatmul.mubr.msk.f32.gmra.mrb[30].mxu1 %vm383_vm1, %v11569_v41 }
 0x37f   : > { %22875 = vmatprep.mubr.msk.f32.mxu1 %vm383_vm1, %v11783_v21 }
 0x382   : > { %22876 = vmatmul.mubr.msk.f32.vlgmr.msra.gmra.mrb[16].mxu1 %vm383_vm1, %v11784_v20 }
 0x383   : > { %22878 = vmatprep.mubr.msk.f32.mxu1 %vm383_vm1, %v11785_v17 }
 0x386   : > { %22879 = vmatmul.mubr.msk.f32.gmra.mrb[18].mxu1 %vm383_vm1, %v11786_v1  ;;  %v29168_v1 = vld [vmem:[#allocation45_spill] sm:$0xff] }
 0x387   : > { %22881 = vmatprep.mubr.msk.f32.mxu1 %vm383_vm1, %v11787_v10 }
 0x38a   : > { %22882 = vmatmul.mubr.msk.f32.gmra.mrb[20].mxu1 %vm383_vm1, %v11788_v2 }
 0x38b   : > { %22884 = vmatprep.mubr.msk.f32.mxu1 %vm383_vm1, %v11789_v43  ;;  %v29169_v43 = vld [vmem:[#allocation46_spill] sm:$0xff] }
 0x38e   : > { %22885 = vmatmul.mubr.msk.f32.gmra.mrb[22].mxu1 %vm383_vm1, %v11790_v30 }
 0x38f   : > { %22887 = vmatprep.mubr.msk.f32.mxu1 %vm383_vm1, %v27425_v58  ;;  %v27630_v58 = vld [vmem:[%s28906_s2] ss:$0 sm:$0xff] }
 0x390   : > { %v23726_v18 = vadd.f32 %v29160_v15, %v27630_v58  ;;  %v23728_v32 = vadd.f32 %v27630_v58, %v29161_v57  ;;  %v23730_v3 = vadd.f32 %v29162_v38, %v27630_v58  ;;  %v23732_v22 = vadd.f32 %v27630_v58, %v29163_v55 }
 0x391   : > { %v23734_v27 = vadd.f32 %v29164_v24, %v27630_v58  ;;  %v23736_v61 = vadd.f32 %v27630_v58, %v29165_v29  ;;  %v23738_v13 = vadd.f32 %v29166_v11, %v27630_v58  ;;  %v23740_v51 = vadd.f32 %v27630_v58, %v29167_v23 }
 0x392   : > { %22888 = vmatmul.mubr.msk.f32.gmra.mrb[24].mxu1 %vm383_vm1, %v27435_v47  ;;  %v29159_v47 = vld [vmem:[#allocation38_spill] sm:$0xff]  ;;  %v23742_v10 = vadd.f32 %v29168_v1, %v27630_v58  ;;  %v23744_v30 = vadd.f32 %v27630_v58, %v29169_v43 }
 0x393   : > { %22890 = vmatprep.mubr.msk.f32.mxu1 %vm383_vm1, %v27081_v12  ;;  %v29158_v12 = vld [vmem:[#allocation37_spill] sm:$0xff] }
 0x396   : > { %22891 = vmatmul.mubr.msk.f32.gmra.mrb[26].mxu1 %vm383_vm1, %v27092_v54  ;;  %v23722_v54 = vadd.f32 %v29158_v12, %v27630_v58 }
 0x397   : > { %22893 = vmatprep.mubr.msk.f32.mxu1 %vm383_vm1, %v27443_v4  ;;  %v23724_v4 = vadd.f32 %v27630_v58, %v29159_v47 }
 0x39a   : > { %22894 = vmatmul.mubr.msk.f32.gmra.mrb[28].mxu1 %vm383_vm1, %v27449_v5 }
 0x39b   : > { %22896 = vmatprep.mubr.msk.f32.mxu1 %vm383_vm1, %v11797_v53 }
 0x39e   : > { %22897 = vmatmul.mubr.msk.f32.gmra.mrb[30].mxu1 %vm383_vm1, %v11798_v26 }
 0x3ab   : > { %v22227_v62 = vpop.f32.mrb[0].mxu0 }
 0x3ac   : > { %v23723_v60 = vadd.f32 %v23722_v54, %v22227_v62  ;;  %v6146_v35 = vpop.f32.mrb[1].mxu0  ;;  %v29170_v62 = vld [vmem:[#allocation47_spill] sm:$0xff] }
 0x3ad   : > { %v23725_v5 = vadd.f32 %v23724_v4, %v6146_v35 }
 0x3ae   : > { %v6242_v37 = vmax.f32 %v23723_v60, 0.0  ;;  %v23746_v60 = vadd.f32 %v29170_v62, %v27630_v58 }
 0x3af   : > { %v6241_v6 = vmax.f32 %v23725_v5, 0.0  ;;  %v22230_v42 = vpop.f32.mrb[2].mxu0 }
 0x3b0   : > { %6259 = vst.msk [vmem:[#allocation3 + $0x8] sm:$0xff] %vm6257_vm4, %v6242_v37  ;;  %v23727_v34 = vadd.f32 %v23726_v18, %v22230_v42  ;;  %v6156_v33 = vpop.f32.mrb[3].mxu0  ;;  %v29171_v18 = vld [vmem:[#allocation48_spill] sm:$0xff] }
 0x3b1   : > { %6258 = vst.msk [vmem:[#allocation3] sm:$0xff] %vm6257_vm4, %v6241_v6  ;;  %v23729_v14 = vadd.f32 %v23728_v32, %v6156_v33  ;;  %v23748_v37 = vadd.f32 %v27630_v58, %v29171_v18 }
 0x3b2   : > { %v6244_v8 = vmax.f32 %v23727_v34, 0.0 }
 0x3b3   : > { %v6243_v25 = vmax.f32 %v23729_v14, 0.0  ;;  %v22233_v0 = vpop.f32.mrb[4].mxu0 }
 0x3b4   : > { %6261 = vst.msk [vmem:[#allocation3 + $0x18] sm:$0xff] %vm6257_vm4, %v6244_v8  ;;  %v23731_v63 = vadd.f32 %v23730_v3, %v22233_v0  ;;  %v6166_v7 = vpop.f32.mrb[5].mxu0  ;;  %v29172_v8 = vld [vmem:[#allocation19_spill] sm:$0xff] }
 0x3b5   : > { %6260 = vst.msk [vmem:[#allocation3 + $0x10] sm:$0xff] %vm6257_vm4, %v6243_v25  ;;  %v23733_v46 = vadd.f32 %v23732_v22, %v6166_v7  ;;  %v23750_v55 = vadd.f32 %v29172_v8, %v27630_v58  ;;  %v29173_v25 = vld [vmem:[#allocation20_spill] sm:$0xff] }
 0x3b6   : > { %v6246_v16 = vmax.f32 %v23731_v63, 0.0  ;;  %v23752_v0 = vadd.f32 %v27630_v58, %v29173_v25 }
 0x3b7   : > { %v6245_v59 = vmax.f32 %v23733_v46, 0.0  ;;  %v22236_v40 = vpop.f32.mrb[6].mxu0 }
 0x3b8   : > { %6263 = vst.msk [vmem:[#allocation3 + $0x28] sm:$0xff] %vm6257_vm4, %v6246_v16  ;;  %v23735_v52 = vadd.f32 %v23734_v27, %v22236_v40  ;;  %v6176_v44 = vpop.f32.mrb[7].mxu0  ;;  %v12045_v36 = vld [vmem:[#allocation3] ss:$2 sm:$0xff]  ;;  %v12077_v39 = vld [vmem:[#allocation3 + $0x1] ss:$2 sm:$0xff] }
 0x3b9   : > { %6262 = vst.msk [vmem:[#allocation3 + $0x20] sm:$0xff] %vm6257_vm4, %v6245_v59  ;;  %v23737_v31 = vadd.f32 %v23736_v61, %v6176_v44  ;;  %v12108_v21 = vmax.f32 %v12045_v36, %v12077_v39 }
 0x3ba   : > { %v6248_v48 = vmax.f32 %v23735_v52, 0.0 }
 0x3bb   : > { %v6247_v49 = vmax.f32 %v23737_v31, 0.0  ;;  %v22239_v56 = vpop.f32.mrb[8].mxu0 }
 0x3bc   : > { %v12047_v19 = vld [vmem:[#allocation3 + $0x10] ss:$2 sm:$0xff]  ;;  %v12079_v28 = vld [vmem:[#allocation3 + $0x11] ss:$2 sm:$0xff]  ;;  %6265 = vst.msk [vmem:[#allocation3 + $0x38] sm:$0xff] %vm6257_vm4, %v6248_v48  ;;  %v23739_v45 = vadd.f32 %v23738_v13, %v22239_v56  ;;  %v6186_v41 = vpop.f32.mrb[9].mxu0 }
 0x3bd   : > { %v12109_v20 = vmax.f32 %v12047_v19, %v12079_v28  ;;  %6264 = vst.msk [vmem:[#allocation3 + $0x30] sm:$0xff] %vm6257_vm4, %v6247_v49  ;;  %v23741_v17 = vadd.f32 %v23740_v51, %v6186_v41  ;;  %v12338_v41 = vld [vmem:[%s28907_s3 + $0x8] sm:$0xff] }
 0x3be   : > { %v6250_v2 = vmax.f32 %v23739_v45, 0.0  ;;  %22913 = vmatprep.subr.mxu0 %v12338_v41 }
 0x3bf   : > { %v6249_v53 = vmax.f32 %v23741_v17, 0.0  ;;  %v22242_v26 = vpop.f32.mrb[10].mxu0  ;;  %v12124_v12 = vmax.f32 %v12108_v21, %v12109_v20  ;;  %22914 = vmatpush3.msra.mxu0 %v12338_v41  ;;  %v27718_v21 = vld [vmem:[%s28907_s3 + $0x10] sm:$0xff]  ;;  %v27724_v20 = vld [vmem:[%s28906_s2] ss:$0 sm:$0xff] }
 0x3c0   : > { %6267 = vst.msk [vmem:[#allocation3 + $0x48] sm:$0xff] %vm6257_vm4, %v6250_v2  ;;  %v23743_v54 = vadd.f32 %v23742_v10, %v22242_v26  ;;  %v6196_v47 = vpop.f32.mrb[11].mxu0  ;;  %v12049_v35 = vld [vmem:[#allocation3 + $0x20] ss:$2 sm:$0xff]  ;;  %v12081_v5 = vld [vmem:[#allocation3 + $0x21] ss:$2 sm:$0xff]  ;;  %22927 = vmatprep.subr.mxu0 %v27718_v21 }
 0x3c1   : > { %6266 = vst.msk [vmem:[#allocation3 + $0x40] sm:$0xff] %vm6257_vm4, %v6249_v53  ;;  %v23745_v4 = vadd.f32 %v23744_v30, %v6196_v47  ;;  %12168 = vst.msk [vmem:[#allocation4 + $0x22] sm:$0xff] %vm6257_vm4, %v12124_v12  ;;  %v12110_v14 = vmax.f32 %v12049_v35, %v12081_v5 }
 0x3c2   : > { %v6252_v15 = vmax.f32 %v23743_v54, 0.0 }
 0x3c3   : > { %v6251_v57 = vmax.f32 %v23745_v4, 0.0  ;;  %v22245_v32 = vpop.f32.mrb[12].mxu0 }
 0x3c4   : > { %v12051_v6 = vld [vmem:[#allocation3 + $0x30] ss:$2 sm:$0xff]  ;;  %v12083_v42 = vld [vmem:[#allocation3 + $0x31] ss:$2 sm:$0xff]  ;;  %6269 = vst.msk [vmem:[#allocation3 + $0x58] sm:$0xff] %vm6257_vm4, %v6252_v15  ;;  %v23747_v34 = vadd.f32 %v23746_v60, %v22245_v32  ;;  %v6206_v33 = vpop.f32.mrb[13].mxu0 }
 0x3c5   : > { %v12111_v38 = vmax.f32 %v12051_v6, %v12083_v42  ;;  %6268 = vst.msk [vmem:[#allocation3 + $0x50] sm:$0xff] %vm6257_vm4, %v6251_v57  ;;  %v23749_v3 = vadd.f32 %v23748_v37, %v6206_v33 }
 0x3c6   : > { %v6254_v22 = vmax.f32 %v23747_v34, 0.0 }
 0x3c7   : > { %v6253_v63 = vmax.f32 %v23749_v3, 0.0  ;;  %v22248_v7 = vpop.f32.mrb[14].mxu0  ;;  %v12125_v46 = vmax.f32 %v12110_v14, %v12111_v38 }
 0x3c8   : > { %6271 = vst.msk [vmem:[#allocation3 + $0x68] sm:$0xff] %vm6257_vm4, %v6254_v22  ;;  %v23751_v24 = vadd.f32 %v23750_v55, %v22248_v7  ;;  %v6216_v27 = vpop.f32.mrb[15].mxu0  ;;  %v27678_v16 = vld [vmem:[#allocation4 + $0x20] sm:$0xff] }
 0x3c9   : > { %6270 = vst.msk [vmem:[#allocation3 + $0x60] sm:$0xff] %vm6257_vm4, %v6253_v63  ;;  %v23753_v29 = vadd.f32 %v23752_v0, %v6216_v27  ;;  %22904 = vmatprep.mubr.msk.f32.mxu0 %vm6257_vm4, %v27678_v16  ;;  %12169 = vst.msk [vmem:[#allocation4 + $0x32] sm:$0xff] %vm6257_vm4, %v12125_v46  ;;  %v12053_v61 = vld [vmem:[#allocation3 + $0x40] ss:$2 sm:$0xff]  ;;  %v12085_v59 = vld [vmem:[#allocation3 + $0x41] ss:$2 sm:$0xff] }
 0x3ca   : > { %v6256_v58 = vmax.f32 %v23751_v24, 0.0  ;;  %v12112_v31 = vmax.f32 %v12053_v61, %v12085_v59 }
 0x3cb   : > { %v6255_v40 = vmax.f32 %v23753_v29, 0.0 }
 0x3cc   : > { %v12055_v52 = vld [vmem:[#allocation3 + $0x50] ss:$2 sm:$0xff]  ;;  %v12087_v44 = vld [vmem:[#allocation3 + $0x51] ss:$2 sm:$0xff]  ;;  %6273 = vst.msk [vmem:[#allocation3 + $0x78] sm:$0xff] %vm6257_vm4, %v6256_v58 }
 0x3cd   : > { %v12113_v11 = vmax.f32 %v12055_v52, %v12087_v44  ;;  %6272 = vst.msk [vmem:[#allocation3 + $0x70] sm:$0xff] %vm6257_vm4, %v6255_v40 }
 0x3cf   : > { %v12126_v13 = vmax.f32 %v12112_v31, %v12113_v11 }
 0x3d0   : > { %v27686_v36 = vld [vmem:[#allocation4 + $0x30] sm:$0xff]  ;;  %v12057_v39 = vld [vmem:[#allocation3 + $0x60] ss:$2 sm:$0xff]  ;;  %v12089_v48 = vld [vmem:[#allocation3 + $0x61] ss:$2 sm:$0xff] }
 0x3d1   : > { %22905 = vmatmul.mubr.msk.f32.gmra.mrb[18].mxu0 %vm6257_vm4, %v27686_v36  ;;  %12170 = vst.msk [vmem:[#allocation4 + $0x42] sm:$0xff] %vm6257_vm4, %v12126_v13  ;;  %v12114_v49 = vmax.f32 %v12057_v39, %v12089_v48 }
 0x3d4   : > { %v12059_v23 = vld [vmem:[#allocation3 + $0x70] ss:$2 sm:$0xff]  ;;  %v12091_v51 = vld [vmem:[#allocation3 + $0x71] ss:$2 sm:$0xff] }
 0x3d5   : > { %v12115_v56 = vmax.f32 %v12059_v23, %v12091_v51 }
 0x3d7   : > { %v12127_v19 = vmax.f32 %v12114_v49, %v12115_v56 }
 0x3d8   : > { %v27691_v28 = vld [vmem:[#allocation4 + $0x40] sm:$0xff] }
 0x3d9   : > { %22907 = vmatprep.mubr.msk.f32.mxu0 %vm6257_vm4, %v27691_v28  ;;  %12171 = vst.msk [vmem:[#allocation4 + $0x52] sm:$0xff] %vm6257_vm4, %v12127_v19 }
 0x3e0   : > { %v27696_v45 = vld [vmem:[#allocation4 + $0x50] sm:$0xff] }
 0x3e1   : > { %22908 = vmatmul.mubr.msk.f32.gmra.mrb[20].mxu0 %vm6257_vm4, %v27696_v45 }
 0x455   : > { %v22877_v17 = vpop.f32.mrb[16].mxu1 }
 0x456   : > { %v23754_v1 = vadd.f32 %v22877_v17, %v27724_v20  ;;  %v11917_v10 = vpop.f32.mrb[17].mxu1 }
 0x457   : > { %v23755_v2 = vadd.f32 %v27724_v20, %v11917_v10 }
 0x458   : > { %v12013_v43 = vmax.f32 %v23754_v1, 0.0 }
 0x459   : > { %v12012_v30 = vmax.f32 %v23755_v2, 0.0  ;;  %v22880_v53 = vpop.f32.mrb[18].mxu1 }
 0x45a   : > { %12030 = vst.msk [vmem:[#allocation3 + $0x88] sm:$0xff] %vm6257_vm4, %v12013_v43  ;;  %v23756_v26 = vadd.f32 %v22880_v53, %v27724_v20  ;;  %v11927_v12 = vpop.f32.mrb[19].mxu1 }
 0x45b   : > { %12029 = vst.msk [vmem:[#allocation3 + $0x80] sm:$0xff] %vm6257_vm4, %v12012_v30  ;;  %v23757_v54 = vadd.f32 %v27724_v20, %v11927_v12 }
 0x45c   : > { %v12015_v47 = vmax.f32 %v23756_v26, 0.0 }
 0x45d   : > { %v12014_v4 = vmax.f32 %v23757_v54, 0.0  ;;  %v22883_v62 = vpop.f32.mrb[20].mxu1 }
 0x45e   : > { %12032 = vst.msk [vmem:[#allocation3 + $0x98] sm:$0xff] %vm6257_vm4, %v12015_v47  ;;  %v23758_v60 = vadd.f32 %v22883_v62, %v27724_v20  ;;  %v11937_v35 = vpop.f32.mrb[21].mxu1 }
 0x45f   : > { %12031 = vst.msk [vmem:[#allocation3 + $0x90] sm:$0xff] %vm6257_vm4, %v12014_v4  ;;  %v23759_v5 = vadd.f32 %v27724_v20, %v11937_v35 }
 0x460   : > { %v12017_v15 = vmax.f32 %v23758_v60, 0.0  ;;  %v12330_v60 = vld [vmem:[#allocation4 + $0x1] sm:$0xff] }
 0x461   : > { %v12016_v18 = vmax.f32 %v23759_v5, 0.0  ;;  %v22886_v37 = vpop.f32.mrb[22].mxu1 }
 0x462   : > { %12034 = vst.msk [vmem:[#allocation3 + $0xa8] sm:$0xff] %vm6257_vm4, %v12017_v15  ;;  %v23760_v57 = vadd.f32 %v22886_v37, %v27724_v20  ;;  %v11947_v32 = vpop.f32.mrb[23].mxu1  ;;  %v12061_v42 = vld [vmem:[#allocation3 + $0x80] ss:$2 sm:$0xff]  ;;  %v12093_v34 = vld [vmem:[#allocation3 + $0x81] ss:$2 sm:$0xff] }
 0x463   : > { %12033 = vst.msk [vmem:[#allocation3 + $0xa0] sm:$0xff] %vm6257_vm4, %v12016_v18  ;;  %v23761_v6 = vadd.f32 %v27724_v20, %v11947_v32  ;;  %v12116_v25 = vmax.f32 %v12061_v42, %v12093_v34  ;;  %v27770_v18 = vld [vmem:[#allocation4 + $0x11] sm:$0xff]  ;;  %v27777_v34 = vld [vmem:[#allocation4 + $0x21] sm:$0xff] }
 0x464   : > { %v12019_v33 = vmax.f32 %v23760_v57, 0.0  ;;  %v12630_v32 = vld [vmem:[%s28907_s3 + $0x18] sm:$0xff] }
 0x465   : > { %v12018_v14 = vmax.f32 %v23761_v6, 0.0  ;;  %v22889_v38 = vpop.f32.mrb[24].mxu1 }
 0x466   : > { %v12063_v3 = vld [vmem:[#allocation3 + $0x90] ss:$2 sm:$0xff]  ;;  %v12095_v8 = vld [vmem:[#allocation3 + $0x91] ss:$2 sm:$0xff]  ;;  %12036 = vst.msk [vmem:[#allocation3 + $0xb8] sm:$0xff] %vm6257_vm4, %v12019_v33  ;;  %v23762_v55 = vadd.f32 %v22889_v38, %v27724_v20  ;;  %v11957_v22 = vpop.f32.mrb[25].mxu1 }
 0x467   : > { %v12117_v0 = vmax.f32 %v12063_v3, %v12095_v8  ;;  %12035 = vst.msk [vmem:[#allocation3 + $0xb0] sm:$0xff] %vm6257_vm4, %v12018_v14  ;;  %v23763_v63 = vadd.f32 %v27724_v20, %v11957_v22  ;;  %v27782_v14 = vld [vmem:[#allocation4 + $0x31] sm:$0xff]  ;;  %v27786_v38 = vld [vmem:[#allocation4 + $0x41] sm:$0xff] }
 0x468   : > { %v12021_v7 = vmax.f32 %v23762_v55, 0.0  ;;  %v27791_v3 = vld [vmem:[#allocation4 + $0x51] sm:$0xff]  ;;  %v12476_v8 = vld [vmem:[#allocation4 + $0x2] sm:$0xff] }
 0x469   : > { %v12020_v46 = vmax.f32 %v23763_v63, 0.0  ;;  %v22892_v24 = vpop.f32.mrb[26].mxu1  ;;  %v12128_v27 = vmax.f32 %v12116_v25, %v12117_v0  ;;  %v27804_v22 = vld [vmem:[#allocation4 + $0x12] sm:$0xff]  ;;  %v12776_v25 = vld [vmem:[%s28907_s3 + $0x20] sm:$0xff] }
 0x46a   : > { %12038 = vst.msk [vmem:[#allocation3 + $0xc8] sm:$0xff] %vm6257_vm4, %v12021_v7  ;;  %v23764_v29 = vadd.f32 %v22892_v24, %v27724_v20  ;;  %v11967_v61 = vpop.f32.mrb[27].mxu1  ;;  %v12065_v58 = vld [vmem:[#allocation3 + $0xa0] ss:$2 sm:$0xff]  ;;  %v12097_v40 = vld [vmem:[#allocation3 + $0xa1] ss:$2 sm:$0xff] }
 0x46b   : > { %12037 = vst.msk [vmem:[#allocation3 + $0xc0] sm:$0xff] %vm6257_vm4, %v12020_v46  ;;  %v23765_v59 = vadd.f32 %v27724_v20, %v11967_v61  ;;  %12172 = vst.msk [vmem:[#allocation4 + $0x62] sm:$0xff] %vm6257_vm4, %v12128_v27  ;;  %v12118_v23 = vmax.f32 %v12065_v58, %v12097_v40  ;;  %v27811_v0 = vld [vmem:[#allocation4 + $0x22] sm:$0xff]  ;;  %v27815_v63 = vld [vmem:[#allocation4 + $0x32] sm:$0xff] }
 0x46c   : > { %v12023_v52 = vmax.f32 %v23764_v29, 0.0  ;;  %v27819_v7 = vld [vmem:[#allocation4 + $0x42] sm:$0xff]  ;;  %v27823_v46 = vld [vmem:[#allocation4 + $0x52] sm:$0xff] }
 0x46d   : > { %v12022_v44 = vmax.f32 %v23765_v59, 0.0  ;;  %v22895_v31 = vpop.f32.mrb[28].mxu1  ;;  %v12622_v27 = vld [vmem:[#allocation4 + $0x3] sm:$0xff]  ;;  %v27836_v61 = vld [vmem:[#allocation4 + $0x13] sm:$0xff] }
 0x46e   : > { %v12067_v11 = vld [vmem:[#allocation3 + $0xb0] ss:$2 sm:$0xff]  ;;  %v12099_v13 = vld [vmem:[#allocation3 + $0xb1] ss:$2 sm:$0xff]  ;;  %12040 = vst.msk [vmem:[#allocation3 + $0xd8] sm:$0xff] %vm6257_vm4, %v12023_v52  ;;  %v23766_v39 = vadd.f32 %v22895_v31, %v27724_v20  ;;  %v11977_v48 = vpop.f32.mrb[29].mxu1 }
 0x46f   : > { %v12119_v51 = vmax.f32 %v12067_v11, %v12099_v13  ;;  %12039 = vst.msk [vmem:[#allocation3 + $0xd0] sm:$0xff] %vm6257_vm4, %v12022_v44  ;;  %v23767_v49 = vadd.f32 %v27724_v20, %v11977_v48  ;;  %v12923_v59 = vld [vmem:[%s28907_s3 + $0x28] sm:$0xff]  ;;  %v27847_v40 = vld [vmem:[#allocation4 + $0x33] sm:$0xff] }
 0x470   : > { %v12025_v56 = vmax.f32 %v23766_v39, 0.0  ;;  %v27843_v58 = vld [vmem:[#allocation4 + $0x23] sm:$0xff]  ;;  %v27855_v44 = vld [vmem:[#allocation4 + $0x53] sm:$0xff] }
 0x471   : > { %v12024_v19 = vmax.f32 %v23767_v49, 0.0  ;;  %v22898_v41 = vpop.f32.mrb[30].mxu1  ;;  %v12129_v17 = vmax.f32 %v12118_v23, %v12119_v51  ;;  %v27851_v52 = vld [vmem:[#allocation4 + $0x43] sm:$0xff]  ;;  %v27868_v39 = vld [vmem:[#allocation4 + $0x14] sm:$0xff] }
 0x472   : > { %12042 = vst.msk [vmem:[#allocation3 + $0xe8] sm:$0xff] %vm6257_vm4, %v12025_v56  ;;  %v23768_v1 = vadd.f32 %v22898_v41, %v27724_v20  ;;  %v11987_v10 = vpop.f32.mrb[31].mxu1  ;;  %v27755_v2 = vld [vmem:[#allocation4 + $0x60] sm:$0xff]  ;;  %v13069_v48 = vld [vmem:[%s28907_s3 + $0x30] sm:$0xff] }
 0x473   : > { %12041 = vst.msk [vmem:[#allocation3 + $0xe0] sm:$0xff] %vm6257_vm4, %v12024_v19  ;;  %v23769_v43 = vadd.f32 %v27724_v20, %v11987_v10  ;;  %22910 = vmatprep.mubr.msk.f32.mxu0 %vm6257_vm4, %v27755_v2  ;;  %12173 = vst.msk [vmem:[#allocation4 + $0x72] sm:$0xff] %vm6257_vm4, %v12129_v17  ;;  %v12069_v30 = vld [vmem:[#allocation3 + $0xc0] ss:$2 sm:$0xff]  ;;  %v12101_v53 = vld [vmem:[#allocation3 + $0xc1] ss:$2 sm:$0xff] }
 0x474   : > { %v12027_v26 = vmax.f32 %v23768_v1, 0.0  ;;  %v12120_v4 = vmax.f32 %v12069_v30, %v12101_v53  ;;  %v27827_v24 = vld [vmem:[#allocation4 + $0x62] sm:$0xff]  ;;  %v27879_v51 = vld [vmem:[#allocation4 + $0x34] sm:$0xff] }
 0x475   : > { %v12026_v12 = vmax.f32 %v23769_v43, 0.0  ;;  %v27859_v31 = vld [vmem:[#allocation4 + $0x63] sm:$0xff]  ;;  %v27887_v56 = vld [vmem:[#allocation4 + $0x54] sm:$0xff] }
 0x476   : > { %v12071_v54 = vld [vmem:[#allocation3 + $0xd0] ss:$2 sm:$0xff]  ;;  %v12103_v47 = vld [vmem:[#allocation3 + $0xd1] ss:$2 sm:$0xff]  ;;  %12044 = vst.msk [vmem:[#allocation3 + $0xf8] sm:$0xff] %vm6257_vm4, %v12027_v26  ;;  %v12768_v11 = vld [vmem:[#allocation4 + $0x4] sm:$0xff] }
 0x477   : > { %v12121_v62 = vmax.f32 %v12071_v54, %v12103_v47  ;;  %12043 = vst.msk [vmem:[#allocation3 + $0xf0] sm:$0xff] %vm6257_vm4, %v12026_v12  ;;  %v27875_v23 = vld [vmem:[#allocation4 + $0x24] sm:$0xff]  ;;  %v13215_v17 = vld [vmem:[%s28907_s3 + $0x38] sm:$0xff]  ;;  %v13653_v53 = vld [vmem:[%s28907_s3 + $0x50] sm:$0xff] }
 0x478   : > { %v27883_v49 = vld [vmem:[#allocation4 + $0x44] sm:$0xff]  ;;  %v13799_v12 = vld [vmem:[%s28907_s3 + $0x58] sm:$0xff] }
 0x479   : > { %v12130_v35 = vmax.f32 %v12120_v4, %v12121_v62  ;;  %v27891_v19 = vld [vmem:[#allocation4 + $0x64] sm:$0xff] }
 0x47a   : > { %v27764_v20 = vld [vmem:[#allocation4 + $0x70] sm:$0xff]  ;;  %v12073_v5 = vld [vmem:[#allocation3 + $0xe0] ss:$2 sm:$0xff]  ;;  %v12105_v15 = vld [vmem:[#allocation3 + $0xe1] ss:$2 sm:$0xff] }
 0x47b   : > { %22911 = vmatmul.mubr.msk.f32.gmra.mrb[22].mxu0 %vm6257_vm4, %v27764_v20  ;;  %12174 = vst.msk [vmem:[#allocation4 + $0x82] sm:$0xff] %vm6257_vm4, %v12130_v35  ;;  %v12122_v6 = vmax.f32 %v12073_v5, %v12105_v15  ;;  %v27799_v55 = vld [vmem:[#allocation4 + $0x71] sm:$0xff]  ;;  %v13361_v1 = vld [vmem:[%s28907_s3 + $0x40] sm:$0xff]  ;;  %v13507_v43 = vld [vmem:[%s28907_s3 + $0x48] sm:$0xff] }
 0x47c   : > { %22915 = vmatprep.mubr.msk.f32.mxu0 %vm6257_vm4, %v12330_v60  ;;  %v27831_v29 = vld [vmem:[#allocation4 + $0x72] sm:$0xff]  ;;  %v13945_v47 = vld [vmem:[%s28907_s3 + $0x60] sm:$0xff]  ;;  %v14091_v4 = vld [vmem:[%s28907_s3 + $0x68] sm:$0xff] }
 0x47d   : > { %v27863_v13 = vld [vmem:[#allocation4 + $0x73] sm:$0xff] }
 0x47e   : > { %v12075_v37 = vld [vmem:[#allocation3 + $0xf0] ss:$2 sm:$0xff]  ;;  %v12107_v57 = vld [vmem:[#allocation3 + $0xf1] ss:$2 sm:$0xff] }
 0x47f   : > { %v12123_v42 = vmax.f32 %v12075_v37, %v12107_v57  ;;  %22916 = vmatmul.mubr.msk.f32.vlgmr.msra.gmra.mrb[16].mxu0 %vm6257_vm4, %v27770_v18  ;;  %v27895_v41 = vld [vmem:[#allocation4 + $0x74] sm:$0xff]  ;;  %v14676_v57 = vld [vmem:[%s28907_s3 + $0x88] sm:$0xff] }
 0x480   : > { %22928 = vmatpush3.msra.mxu0 %v27718_v21  ;;  %22918 = vmatprep.mubr.msk.f32.mxu0 %vm6257_vm4, %v27777_v34  ;;  %v27795_v21 = vld [vmem:[#allocation4 + $0x61] sm:$0xff]  ;;  %v14237_v60 = vld [vmem:[%s28907_s3 + $0x70] sm:$0xff]  ;;  %v14384_v5 = vld [vmem:[%s28907_s3 + $0x78] sm:$0xff] }
 0x481   : > { %22941 = vmatprep.subr.mxu0 %v12630_v32  ;;  %v12131_v33 = vmax.f32 %v12122_v6, %v12123_v42  ;;  %v28147_v6 = vld [vmem:[#allocation4 + $0xa1] sm:$0xff] }
 0x482   : > { %v27937_v10 = vld [vmem:[#allocation4 + $0x81] sm:$0xff] }
 0x483   : > { %22919 = vmatmul.mubr.msk.f32.gmra.mrb[18].mxu0 %vm6257_vm4, %v27782_v14  ;;  %12175 = vst.msk [vmem:[#allocation4 + $0x92] sm:$0xff] %vm6257_vm4, %v12131_v33  ;;  %v27958_v30 = vld [vmem:[#allocation4 + $0x82] sm:$0xff] }
 0x484   : > { %22921 = vmatprep.mubr.msk.f32.mxu0 %vm6257_vm4, %v27786_v38  ;;  %v27979_v26 = vld [vmem:[#allocation4 + $0x83] sm:$0xff] }
 0x485   : > { %v28000_v54 = vld [vmem:[#allocation4 + $0x84] sm:$0xff] }
 0x486   : > { %v15942_v42 = vld [vmem:[%s28909_s5] sm:$0xff] }
 0x487   : > { %22922 = vmatmul.mubr.msk.f32.gmra.mrb[20].mxu0 %vm6257_vm4, %v27791_v3 }
 0x488   : > { %22924 = vmatprep.mubr.msk.f32.mxu0 %vm6257_vm4, %v27795_v21 }
 0x48a   : > { %v28042_v62 = vld [vmem:[#allocation4 + $0x91] sm:$0xff] }
 0x48b   : > { %22925 = vmatmul.mubr.msk.f32.gmra.mrb[22].mxu0 %vm6257_vm4, %v27799_v55  ;;  %v28063_v35 = vld [vmem:[#allocation4 + $0x92] sm:$0xff] }
 0x48c   : > { %22929 = vmatprep.mubr.msk.f32.mxu0 %vm6257_vm4, %v12476_v8  ;;  %v28084_v15 = vld [vmem:[#allocation4 + $0x93] sm:$0xff] }
 0x48d   : > { %v28105_v37 = vld [vmem:[#allocation4 + $0x94] sm:$0xff] }
 0x48e   : > { %v14968_v8 = vld [vmem:[%s28907_s3 + $0x98] sm:$0xff] }
 0x48f   : > { %22930 = vmatmul.mubr.msk.f32.vlgmr.msra.gmra.mrb[16].mxu0 %vm6257_vm4, %v27804_v22 }
 0x490   : > { %22942 = vmatpush3.msra.mxu0 %v12630_v32  ;;  %22932 = vmatprep.mubr.msk.f32.mxu0 %vm6257_vm4, %v27811_v0  ;;  %v14822_v32 = vld [vmem:[%s28907_s3 + $0x90] sm:$0xff] }
 0x491   : > { %22955 = vmatprep.subr.mxu0 %v12776_v25 }
 0x493   : > { %22933 = vmatmul.mubr.msk.f32.gmra.mrb[18].mxu0 %vm6257_vm4, %v27815_v63 }
 0x494   : > { %22935 = vmatprep.mubr.msk.f32.mxu0 %vm6257_vm4, %v27819_v7 }
 0x497   : > { %22936 = vmatmul.mubr.msk.f32.gmra.mrb[20].mxu0 %vm6257_vm4, %v27823_v46 }
 0x498   : > { %22938 = vmatprep.mubr.msk.f32.mxu0 %vm6257_vm4, %v27827_v24 }
 0x49b   : > { %22939 = vmatmul.mubr.msk.f32.gmra.mrb[22].mxu0 %vm6257_vm4, %v27831_v29 }
 0x49c   : > { %22943 = vmatprep.mubr.msk.f32.mxu0 %vm6257_vm4, %v12622_v27  ;;  %v14967_v27 = vld [vmem:[#allocation4 + $0xa4] sm:$0xff] }
 0x49f   : > { %22944 = vmatmul.mubr.msk.f32.vlgmr.msra.gmra.mrb[16].mxu0 %vm6257_vm4, %v27836_v61 }
 0x4a0   : > { %22956 = vmatpush3.msra.mxu0 %v12776_v25  ;;  %22946 = vmatprep.mubr.msk.f32.mxu0 %vm6257_vm4, %v27843_v58  ;;  %v15115_v25 = vld [vmem:[%s28907_s3 + $0xa0] sm:$0xff] }
 0x4a1   : > { %22969 = vmatprep.subr.mxu0 %v12923_v59 }
 0x4a3   : > { %22947 = vmatmul.mubr.msk.f32.gmra.mrb[18].mxu0 %vm6257_vm4, %v27847_v40 }
 0x4a4   : > { %22949 = vmatprep.mubr.msk.f32.mxu0 %vm6257_vm4, %v27851_v52 }
 0x4a7   : > { %22950 = vmatmul.mubr.msk.f32.gmra.mrb[20].mxu0 %vm6257_vm4, %v27855_v44 }
 0x4a8   : > { %22952 = vmatprep.mubr.msk.f32.mxu0 %vm6257_vm4, %v27859_v31 }
 0x4ab   : > { %22953 = vmatmul.mubr.msk.f32.gmra.mrb[22].mxu0 %vm6257_vm4, %v27863_v13 }
 0x4ac   : > { %22957 = vmatprep.mubr.msk.f32.mxu0 %vm6257_vm4, %v12768_v11 }
 0x4af   : > { %22958 = vmatmul.mubr.msk.f32.vlgmr.msra.gmra.mrb[16].mxu0 %vm6257_vm4, %v27868_v39 }
 0x4b0   : > { %22970 = vmatpush3.msra.mxu0 %v12923_v59  ;;  %22960 = vmatprep.mubr.msk.f32.mxu0 %vm6257_vm4, %v27875_v23  ;;  %v16162_v59 = vld [vmem:[%s28909_s5 + $0x18] sm:$0xff] }
 0x4b1   : > { %22983 = vmatprep.subr.mxu0 %v13069_v48 }
 0x4b3   : > { %22961 = vmatmul.mubr.msk.f32.gmra.mrb[18].mxu0 %vm6257_vm4, %v27879_v51 }
 0x4b4   : > { %22963 = vmatprep.mubr.msk.f32.mxu0 %vm6257_vm4, %v27883_v49 }
 0x4b7   : > { %22964 = vmatmul.mubr.msk.f32.gmra.mrb[20].mxu0 %vm6257_vm4, %v27887_v56 }
 0x4b8   : > { %22966 = vmatprep.mubr.msk.f32.mxu0 %vm6257_vm4, %v27891_v19 }
 0x4bb   : > { %22967 = vmatmul.mubr.msk.f32.gmra.mrb[22].mxu0 %vm6257_vm4, %v27895_v41 }
 0x4bc   : > { %22971 = vmatprep.mubr.msk.f32.mxu0 %vm6257_vm4, %v27565_v9  ;;  %v27916_v9 = vld [vmem:[#allocation4 + $0x80] sm:$0xff] }
 0x4bf   : > { %22972 = vmatmul.mubr.msk.f32.vlgmr.msra.gmra.mrb[16].mxu0 %vm6257_vm4, %v27678_v16 }
 0x4c0   : > { %22984 = vmatpush3.msra.mxu0 %v13069_v48  ;;  %22974 = vmatprep.mubr.msk.f32.mxu0 %vm6257_vm4, %v27686_v36 }
 0x4c1   : > { %22997 = vmatprep.subr.mxu0 %v13215_v17 }
 0x4c3   : > { %22975 = vmatmul.mubr.msk.f32.gmra.mrb[18].mxu0 %vm6257_vm4, %v27691_v28 }
 0x4c4   : > { %22977 = vmatprep.mubr.msk.f32.mxu0 %vm6257_vm4, %v27696_v45 }
 0x4c7   : > { %22978 = vmatmul.mubr.msk.f32.gmra.mrb[20].mxu0 %vm6257_vm4, %v27755_v2 }
 0x4c8   : > { %22980 = vmatprep.mubr.msk.f32.mxu0 %vm6257_vm4, %v27764_v20 }
 0x4cb   : > { %22981 = vmatmul.mubr.msk.f32.gmra.mrb[22].mxu0 %vm6257_vm4, %v27916_v9 }
 0x4cc   : > { %22985 = vmatprep.mubr.msk.f32.mxu0 %vm6257_vm4, %v27770_v18  ;;  %v14530_v18 = vld [vmem:[%s28907_s3 + $0x80] sm:$0xff] }
 0x4cf   : > { %22986 = vmatmul.mubr.msk.f32.vlgmr.msra.gmra.mrb[16].mxu0 %vm6257_vm4, %v27777_v34 }
 0x4d0   : > { %22998 = vmatpush3.msra.mxu0 %v13215_v17  ;;  %22988 = vmatprep.mubr.msk.f32.mxu0 %vm6257_vm4, %v27782_v14 }
 0x4d1   : > { %23011 = vmatprep.subr.mxu0 %v13361_v1 }
 0x4d3   : > { %22989 = vmatmul.mubr.msk.f32.gmra.mrb[18].mxu0 %vm6257_vm4, %v27786_v38 }
 0x4d4   : > { %22991 = vmatprep.mubr.msk.f32.mxu0 %vm6257_vm4, %v27791_v3 }
 0x4d7   : > { %22992 = vmatmul.mubr.msk.f32.gmra.mrb[20].mxu0 %vm6257_vm4, %v27795_v21 }
 0x4d8   : > { %22994 = vmatprep.mubr.msk.f32.mxu0 %vm6257_vm4, %v27799_v55 }
 0x4db   : > { %22995 = vmatmul.mubr.msk.f32.gmra.mrb[22].mxu0 %vm6257_vm4, %v27937_v10 }
 0x4dc   : > { %22999 = vmatprep.mubr.msk.f32.mxu0 %vm6257_vm4, %v27804_v22  ;;  %v14675_v22 = vld [vmem:[#allocation4 + $0xa2] sm:$0xff] }
 0x4df   : > { %23000 = vmatmul.mubr.msk.f32.vlgmr.msra.gmra.mrb[16].mxu0 %vm6257_vm4, %v27811_v0 }
 0x4e0   : > { %23012 = vmatpush3.msra.mxu0 %v13361_v1  ;;  %23002 = vmatprep.mubr.msk.f32.mxu0 %vm6257_vm4, %v27815_v63 }
 0x4e1   : > { %23025 = vmatprep.subr.mxu0 %v13507_v43 }
 0x4e3   : > { %23003 = vmatmul.mubr.msk.f32.gmra.mrb[18].mxu0 %vm6257_vm4, %v27819_v7 }
 0x4e4   : > { %23005 = vmatprep.mubr.msk.f32.mxu0 %vm6257_vm4, %v27823_v46 }
 0x4e7   : > { %23006 = vmatmul.mubr.msk.f32.gmra.mrb[20].mxu0 %vm6257_vm4, %v27827_v24 }
 0x4e8   : > { %23008 = vmatprep.mubr.msk.f32.mxu0 %vm6257_vm4, %v27831_v29 }
 0x4eb   : > { %23009 = vmatmul.mubr.msk.f32.gmra.mrb[22].mxu0 %vm6257_vm4, %v27958_v30 }
 0x4ec   : > { %23013 = vmatprep.mubr.msk.f32.mxu0 %vm6257_vm4, %v27836_v61  ;;  %v15407_v61 = vld [vmem:[%s28907_s3 + $0xb0] sm:$0xff] }
 0x4ef   : > { %23014 = vmatmul.mubr.msk.f32.vlgmr.msra.gmra.mrb[16].mxu0 %vm6257_vm4, %v27843_v58 }
 0x4f0   : > { %23026 = vmatpush3.msra.mxu0 %v13507_v43  ;;  %23016 = vmatprep.mubr.msk.f32.mxu0 %vm6257_vm4, %v27847_v40 }
 0x4f1   : > { %23039 = vmatprep.subr.mxu0 %v13653_v53 }
 0x4f3   : > { %23017 = vmatmul.mubr.msk.f32.gmra.mrb[18].mxu0 %vm6257_vm4, %v27851_v52 }
 0x4f4   : > { %23019 = vmatprep.mubr.msk.f32.mxu0 %vm6257_vm4, %v27855_v44 }
 0x4f7   : > { %23020 = vmatmul.mubr.msk.f32.gmra.mrb[20].mxu0 %vm6257_vm4, %v27859_v31 }
 0x4f8   : > { %23022 = vmatprep.mubr.msk.f32.mxu0 %vm6257_vm4, %v27863_v13 }
 0x4fb   : > { %23023 = vmatmul.mubr.msk.f32.gmra.mrb[22].mxu0 %vm6257_vm4, %v27979_v26 }
 0x4fc   : > { %23027 = vmatprep.mubr.msk.f32.mxu0 %vm6257_vm4, %v27868_v39 }
 0x4ff   : > { %23028 = vmatmul.mubr.msk.f32.vlgmr.msra.gmra.mrb[16].mxu0 %vm6257_vm4, %v27875_v23 }
 0x500   : > { %23040 = vmatpush3.msra.mxu0 %v13653_v53  ;;  %23030 = vmatprep.mubr.msk.f32.mxu0 %vm6257_vm4, %v27879_v51 }
 0x501   : > { %23053 = vmatprep.subr.mxu0 %v13799_v12 }
 0x503   : > { %23031 = vmatmul.mubr.msk.f32.gmra.mrb[18].mxu0 %vm6257_vm4, %v27883_v49 }
 0x504   : > { %23033 = vmatprep.mubr.msk.f32.mxu0 %vm6257_vm4, %v27887_v56 }
 0x507   : > { %23034 = vmatmul.mubr.msk.f32.gmra.mrb[20].mxu0 %vm6257_vm4, %v27891_v19 }
 0x508   : > { %23036 = vmatprep.mubr.msk.f32.mxu0 %vm6257_vm4, %v27895_v41 }
 0x50b   : > { %23037 = vmatmul.mubr.msk.f32.gmra.mrb[22].mxu0 %vm6257_vm4, %v28000_v54 }
 0x50c   : > { %23041 = vmatprep.mubr.msk.f32.mxu0 %vm6257_vm4, %v27678_v16  ;;  %v28021_v16 = vld [vmem:[#allocation4 + $0x90] sm:$0xff] }
 0x50f   : > { %23042 = vmatmul.mubr.msk.f32.vlgmr.msra.gmra.mrb[16].mxu0 %vm6257_vm4, %v27686_v36 }
 0x510   : > { %23054 = vmatpush3.msra.mxu0 %v13799_v12  ;;  %23044 = vmatprep.mubr.msk.f32.mxu0 %vm6257_vm4, %v27691_v28 }
 0x511   : > { %23067 = vmatprep.subr.mxu0 %v13945_v47 }
 0x513   : > { %23045 = vmatmul.mubr.msk.f32.gmra.mrb[18].mxu0 %vm6257_vm4, %v27696_v45 }
 0x514   : > { %23047 = vmatprep.mubr.msk.f32.mxu0 %vm6257_vm4, %v27755_v2 }
 0x517   : > { %23048 = vmatmul.mubr.msk.f32.gmra.mrb[20].mxu0 %vm6257_vm4, %v27764_v20 }
 0x518   : > { %23050 = vmatprep.mubr.msk.f32.mxu0 %vm6257_vm4, %v27916_v9 }
 0x51b   : > { %23051 = vmatmul.mubr.msk.f32.gmra.mrb[22].mxu0 %vm6257_vm4, %v28021_v16 }
 0x51c   : > { %23055 = vmatprep.mubr.msk.f32.mxu0 %vm6257_vm4, %v27777_v34  ;;  %v15943_v34 = vld [vmem:[%s28909_s5 + $0x8] sm:$0xf] }
 0x51d   : > { %v23546_v33 = vpack.c.bf16 %v15943_v34, %v15942_v42 }
 0x51f   : > { %23056 = vmatmul.mubr.msk.f32.vlgmr.msra.gmra.mrb[16].mxu0 %vm6257_vm4, %v27782_v14  ;;  %23548 = vmatprep.subr.msk.bf16.mxu1 %vm28160_vm8, %v23546_v33 }
 0x520   : > { %23068 = vmatpush3.msra.mxu0 %v13945_v47  ;;  %23058 = vmatprep.mubr.msk.f32.mxu0 %vm6257_vm4, %v27786_v38 }
 0x521   : > { %23081 = vmatprep.subr.mxu0 %v14091_v4  ;;  %23551 = vmatpush3.bf16.msk.msra.mxu1 %vm28160_vm8, %v23546_v33 }
 0x523   : > { %23059 = vmatmul.mubr.msk.f32.gmra.mrb[18].mxu0 %vm6257_vm4, %v27791_v3 }
 0x524   : > { %23061 = vmatprep.mubr.msk.f32.mxu0 %vm6257_vm4, %v27795_v21 }
 0x527   : > { %23062 = vmatmul.mubr.msk.f32.gmra.mrb[20].mxu0 %vm6257_vm4, %v27799_v55 }
 0x528   : > { %23064 = vmatprep.mubr.msk.f32.mxu0 %vm6257_vm4, %v27937_v10 }
 0x52b   : > { %23065 = vmatmul.mubr.msk.f32.gmra.mrb[22].mxu0 %vm6257_vm4, %v28042_v62 }
 0x52c   : > { %23069 = vmatprep.mubr.msk.f32.mxu0 %vm6257_vm4, %v27811_v0  ;;  %v14821_v0 = vld [vmem:[#allocation4 + $0xa3] sm:$0xff] }
 0x52f   : > { %23070 = vmatmul.mubr.msk.f32.vlgmr.msra.gmra.mrb[16].mxu0 %vm6257_vm4, %v27815_v63 }
 0x530   : > { %23082 = vmatpush3.msra.mxu0 %v14091_v4  ;;  %23072 = vmatprep.mubr.msk.f32.mxu0 %vm6257_vm4, %v27819_v7 }
 0x531   : > { %23095 = vmatprep.subr.mxu0 %v14237_v60 }
 0x533   : > { %23073 = vmatmul.mubr.msk.f32.gmra.mrb[18].mxu0 %vm6257_vm4, %v27823_v46 }
 0x534   : > { %23075 = vmatprep.mubr.msk.f32.mxu0 %vm6257_vm4, %v27827_v24 }
 0x537   : > { %23076 = vmatmul.mubr.msk.f32.gmra.mrb[20].mxu0 %vm6257_vm4, %v27831_v29 }
 0x538   : > { %23078 = vmatprep.mubr.msk.f32.mxu0 %vm6257_vm4, %v27958_v30 }
 0x53b   : > { %23079 = vmatmul.mubr.msk.f32.gmra.mrb[22].mxu0 %vm6257_vm4, %v28063_v35 }
 0x53c   : > { %23083 = vmatprep.mubr.msk.f32.mxu0 %vm6257_vm4, %v27843_v58  ;;  %v16163_v58 = vld [vmem:[%s28909_s5 + $0x20] sm:$0xf] }
 0x53f   : > { %23084 = vmatmul.mubr.msk.f32.vlgmr.msra.gmra.mrb[16].mxu0 %vm6257_vm4, %v27847_v40 }
 0x540   : > { %23096 = vmatpush3.msra.mxu0 %v14237_v60  ;;  %23086 = vmatprep.mubr.msk.f32.mxu0 %vm6257_vm4, %v27851_v52 }
 0x541   : > { %23109 = vmatprep.subr.mxu0 %v14384_v5 }
 0x543   : > { %23087 = vmatmul.mubr.msk.f32.gmra.mrb[18].mxu0 %vm6257_vm4, %v27855_v44 }
 0x544   : > { %23089 = vmatprep.mubr.msk.f32.mxu0 %vm6257_vm4, %v27859_v31 }
 0x547   : > { %23090 = vmatmul.mubr.msk.f32.gmra.mrb[20].mxu0 %vm6257_vm4, %v27863_v13 }
 0x548   : > { %23092 = vmatprep.mubr.msk.f32.mxu0 %vm6257_vm4, %v27979_v26 }
 0x54b   : > { %23093 = vmatmul.mubr.msk.f32.gmra.mrb[22].mxu0 %vm6257_vm4, %v28084_v15 }
 0x54c   : > { %23097 = vmatprep.mubr.msk.f32.mxu0 %vm6257_vm4, %v27875_v23 }
 0x54f   : > { %23098 = vmatmul.mubr.msk.f32.vlgmr.msra.gmra.mrb[16].mxu0 %vm6257_vm4, %v27879_v51 }
 0x550   : > { %23110 = vmatpush3.msra.mxu0 %v14384_v5  ;;  %23100 = vmatprep.mubr.msk.f32.mxu0 %vm6257_vm4, %v27883_v49 }
 0x551   : > { %23123 = vmatprep.subr.mxu0 %v14530_v18 }
 0x553   : > { %23101 = vmatmul.mubr.msk.f32.gmra.mrb[18].mxu0 %vm6257_vm4, %v27887_v56 }
 0x554   : > { %23103 = vmatprep.mubr.msk.f32.mxu0 %vm6257_vm4, %v27891_v19 }
 0x557   : > { %23104 = vmatmul.mubr.msk.f32.gmra.mrb[20].mxu0 %vm6257_vm4, %v27895_v41 }
 0x558   : > { %23106 = vmatprep.mubr.msk.f32.mxu0 %vm6257_vm4, %v28000_v54 }
 0x55b   : > { %23107 = vmatmul.mubr.msk.f32.gmra.mrb[22].mxu0 %vm6257_vm4, %v28105_v37 }
 0x55c   : > { %23111 = vmatprep.mubr.msk.f32.mxu0 %vm6257_vm4, %v27686_v36  ;;  %v28126_v36 = vld [vmem:[#allocation4 + $0xa0] sm:$0xff] }
 0x55f   : > { %23112 = vmatmul.mubr.msk.f32.vlgmr.msra.gmra.mrb[16].mxu0 %vm6257_vm4, %v27691_v28 }
 0x560   : > { %23124 = vmatpush3.msra.mxu0 %v14530_v18  ;;  %23114 = vmatprep.mubr.msk.f32.mxu0 %vm6257_vm4, %v27696_v45 }
 0x561   : > { %23137 = vmatprep.subr.mxu0 %v14676_v57 }
 0x563   : > { %23115 = vmatmul.mubr.msk.f32.gmra.mrb[18].mxu0 %vm6257_vm4, %v27755_v2 }
 0x564   : > { %23117 = vmatprep.mubr.msk.f32.mxu0 %vm6257_vm4, %v27764_v20 }
 0x567   : > { %23118 = vmatmul.mubr.msk.f32.gmra.mrb[20].mxu0 %vm6257_vm4, %v27916_v9 }
 0x568   : > { %23120 = vmatprep.mubr.msk.f32.mxu0 %vm6257_vm4, %v28021_v16 }
 0x56b   : > { %23121 = vmatmul.mubr.msk.f32.gmra.mrb[22].mxu0 %vm6257_vm4, %v28126_v36 }
 0x56c   : > { %23125 = vmatprep.mubr.msk.f32.mxu0 %vm6257_vm4, %v27782_v14  ;;  %v18722_v14 = vld [vmem:[%s28911_s7] sm:$0xff] }
 0x56f   : > { %23126 = vmatmul.mubr.msk.f32.vlgmr.msra.gmra.mrb[16].mxu0 %vm6257_vm4, %v27786_v38 }
 0x570   : > { %23138 = vmatpush3.msra.mxu0 %v14676_v57  ;;  %23128 = vmatprep.mubr.msk.f32.mxu0 %vm6257_vm4, %v27791_v3 }
 0x571   : > { %23151 = vmatprep.subr.mxu0 %v14822_v32 }
 0x573   : > { %23129 = vmatmul.mubr.msk.f32.gmra.mrb[18].mxu0 %vm6257_vm4, %v27795_v21 }
 0x574   : > { %23131 = vmatprep.mubr.msk.f32.mxu0 %vm6257_vm4, %v27799_v55 }
 0x577   : > { %23132 = vmatmul.mubr.msk.f32.gmra.mrb[20].mxu0 %vm6257_vm4, %v27937_v10 }
 0x578   : > { %23134 = vmatprep.mubr.msk.f32.mxu0 %vm6257_vm4, %v28042_v62 }
 0x57b   : > { %23135 = vmatmul.mubr.msk.f32.gmra.mrb[22].mxu0 %vm6257_vm4, %v28147_v6 }
 0x57c   : > { %23139 = vmatprep.mubr.msk.f32.mxu0 %vm6257_vm4, %v27815_v63  ;;  %v15261_v63 = vld [vmem:[%s28907_s3 + $0xa8] sm:$0xff] }
 0x57f   : > { %23140 = vmatmul.mubr.msk.f32.vlgmr.msra.gmra.mrb[16].mxu0 %vm6257_vm4, %v27819_v7 }
 0x580   : > { %23152 = vmatpush3.msra.mxu0 %v14822_v32  ;;  %23142 = vmatprep.mubr.msk.f32.mxu0 %vm6257_vm4, %v27823_v46 }
 0x581   : > { %23165 = vmatprep.subr.mxu0 %v14968_v8 }
 0x583   : > { %23143 = vmatmul.mubr.msk.f32.gmra.mrb[18].mxu0 %vm6257_vm4, %v27827_v24 }
 0x584   : > { %23145 = vmatprep.mubr.msk.f32.mxu0 %vm6257_vm4, %v27831_v29 }
 0x587   : > { %23146 = vmatmul.mubr.msk.f32.gmra.mrb[20].mxu0 %vm6257_vm4, %v27958_v30 }
 0x588   : > { %23148 = vmatprep.mubr.msk.f32.mxu0 %vm6257_vm4, %v28063_v35 }
 0x58b   : > { %23149 = vmatmul.mubr.msk.f32.gmra.mrb[22].mxu0 %vm6257_vm4, %v14675_v22 }
 0x58c   : > { %23153 = vmatprep.mubr.msk.f32.mxu0 %vm6257_vm4, %v27847_v40  ;;  %v28360_v40 = vpack.c.bf16 %v16163_v58, %v16162_v59 }
 0x58f   : > { %23154 = vmatmul.mubr.msk.f32.vlgmr.msra.gmra.mrb[16].mxu0 %vm6257_vm4, %v27851_v52 }
 0x590   : > { %23166 = vmatpush3.msra.mxu0 %v14968_v8  ;;  %23156 = vmatprep.mubr.msk.f32.mxu0 %vm6257_vm4, %v27855_v44 }
 0x591   : > { %23179 = vmatprep.subr.mxu0 %v15115_v25 }
 0x593   : > { %23157 = vmatmul.mubr.msk.f32.gmra.mrb[18].mxu0 %vm6257_vm4, %v27859_v31 }
 0x594   : > { %23159 = vmatprep.mubr.msk.f32.mxu0 %vm6257_vm4, %v27863_v13 }
 0x597   : > { %23160 = vmatmul.mubr.msk.f32.gmra.mrb[20].mxu0 %vm6257_vm4, %v27979_v26 }
 0x598   : > { %23162 = vmatprep.mubr.msk.f32.mxu0 %vm6257_vm4, %v28084_v15 }
 0x59b   : > { %23163 = vmatmul.mubr.msk.f32.gmra.mrb[22].mxu0 %vm6257_vm4, %v14821_v0 }
 0x59c   : > { %23167 = vmatprep.mubr.msk.f32.mxu0 %vm6257_vm4, %v27879_v51 }
 0x59f   : > { %23168 = vmatmul.mubr.msk.f32.vlgmr.msra.gmra.mrb[16].mxu0 %vm6257_vm4, %v27883_v49 }
 0x5a0   : > { %23180 = vmatpush3.msra.mxu0 %v15115_v25  ;;  %23170 = vmatprep.mubr.msk.f32.mxu0 %vm6257_vm4, %v27887_v56 }
 0x5a1   : > { %23193 = vmatprep.subr.mxu0 %v15261_v63 }
 0x5a3   : > { %23171 = vmatmul.mubr.msk.f32.gmra.mrb[18].mxu0 %vm6257_vm4, %v27891_v19 }
 0x5a4   : > { %23173 = vmatprep.mubr.msk.f32.mxu0 %vm6257_vm4, %v27895_v41 }
 0x5a7   : > { %23174 = vmatmul.mubr.msk.f32.gmra.mrb[20].mxu0 %vm6257_vm4, %v28000_v54 }
 0x5a8   : > { %23176 = vmatprep.mubr.msk.f32.mxu0 %vm6257_vm4, %v28105_v37 }
 0x5ab   : > { %23177 = vmatmul.mubr.msk.f32.gmra.mrb[22].mxu0 %vm6257_vm4, %v14967_v27 }
 0x5ac   : > { %23181 = vmatprep.mubr.msk.f32.mxu0 %vm6257_vm4, %v27691_v28  ;;  %v15114_v28 = vld [vmem:[#allocation4 + $0xb0] sm:$0xff] }
 0x5af   : > { %23182 = vmatmul.mubr.msk.f32.vlgmr.msra.gmra.mrb[16].mxu0 %vm6257_vm4, %v27696_v45  ;;  %v15553_v45 = vld [vmem:[%s28907_s3 + $0xb8] sm:$0xff] }
 0x5b0   : > { %23194 = vmatpush3.msra.mxu0 %v15261_v63  ;;  %23184 = vmatprep.mubr.msk.f32.mxu0 %vm6257_vm4, %v27755_v2  ;;  %v15260_v2 = vld [vmem:[#allocation4 + $0xb1] sm:$0xff] }
 0x5b1   : > { %23207 = vmatprep.subr.mxu0 %v15407_v61 }
 0x5b3   : > { %23185 = vmatmul.mubr.msk.f32.gmra.mrb[18].mxu0 %vm6257_vm4, %v27764_v20  ;;  %v15699_v20 = vld [vmem:[%s28907_s3 + $0xc0] sm:$0xff] }
 0x5b4   : > { %23187 = vmatprep.mubr.msk.f32.mxu0 %vm6257_vm4, %v27916_v9 }
 0x5b7   : > { %23188 = vmatmul.mubr.msk.f32.gmra.mrb[20].mxu0 %vm6257_vm4, %v28021_v16 }
 0x5b8   : > { %23190 = vmatprep.mubr.msk.f32.mxu0 %vm6257_vm4, %v28126_v36 }
 0x5bb   : > { %23191 = vmatmul.mubr.msk.f32.gmra.mrb[22].mxu0 %vm6257_vm4, %v15114_v28 }
 0x5bc   : > { %23195 = vmatprep.mubr.msk.f32.mxu0 %vm6257_vm4, %v27786_v38  ;;  %v15406_v38 = vld [vmem:[#allocation4 + $0xb2] sm:$0xff] }
 0x5bf   : > { %23196 = vmatmul.mubr.msk.f32.vlgmr.msra.gmra.mrb[16].mxu0 %vm6257_vm4, %v27791_v3  ;;  %v15552_v3 = vld [vmem:[#allocation4 + $0xb3] sm:$0xff] }
 0x5c0   : > { %23208 = vmatpush3.msra.mxu0 %v15407_v61  ;;  %23198 = vmatprep.mubr.msk.f32.mxu0 %vm6257_vm4, %v27795_v21  ;;  %v15698_v21 = vld [vmem:[#allocation4 + $0xb4] sm:$0xff]  ;;  %v16048_v61 = vld [vmem:[#allocation6 + $0x1] sm:$0xff] }
 0x5c1   : > { %23221 = vmatprep.subr.mxu0 %v15553_v45 }
 0x5c3   : > { %23199 = vmatmul.mubr.msk.f32.gmra.mrb[18].mxu0 %vm6257_vm4, %v27799_v55  ;;  %v15938_v55 = vld [vmem:[#allocation6] sm:$0xff] }
 0x5c4   : > { %23201 = vmatprep.mubr.msk.f32.mxu0 %vm6257_vm4, %v27937_v10  ;;  %23253 = vmatprep.mubr.msk.f32.mxu1 %vm15845_vm9, %v15938_v55 }
 0x5c7   : > { %23202 = vmatmul.mubr.msk.f32.gmra.mrb[20].mxu0 %vm6257_vm4, %v28042_v62 }
 0x5c8   : > { %23204 = vmatprep.mubr.msk.f32.mxu0 %vm6257_vm4, %v28147_v6 }
 0x5cb   : > { %23205 = vmatmul.mubr.msk.f32.gmra.mrb[22].mxu0 %vm6257_vm4, %v15260_v2 }
 0x5cc   : > { %23209 = vmatprep.mubr.msk.f32.mxu0 %vm6257_vm4, %v27819_v7  ;;  %v28342_v7 = vld [vmem:[#allocation6 + $0x10] sm:$0xff] }
 0x5cd   : > { %23254 = vmatmul.mubr.msk.f32.vlgmr.msra.gmra.mrb[32].mxu1 %vm15845_vm9, %v28342_v7 }
 0x5cf   : > { %23210 = vmatmul.mubr.msk.f32.vlgmr.msra.gmra.mrb[16].mxu0 %vm6257_vm4, %v27823_v46  ;;  %v16052_v46 = vld [vmem:[%s28909_s5 + $0xc] sm:$0xff] }
 0x5d0   : > { %23222 = vmatpush3.msra.mxu0 %v15553_v45  ;;  %23212 = vmatprep.mubr.msk.f32.mxu0 %vm6257_vm4, %v27827_v24  ;;  %v16053_v24 = vld [vmem:[%s28909_s5 + $0x14] sm:$0xf] }
 0x5d1   : > { %23235 = vmatprep.subr.mxu0 %v15699_v20 }
 0x5d3   : > { %23213 = vmatmul.mubr.msk.f32.gmra.mrb[18].mxu0 %vm6257_vm4, %v27831_v29  ;;  %v23552_v29 = vpack.c.bf16 %v16053_v24, %v16052_v46  ;;  %v16272_v46 = vld [vmem:[%s28909_s5 + $0x24] sm:$0xff]  ;;  %v16273_v24 = vld [vmem:[%s28909_s5 + $0x2c] sm:$0xf] }
 0x5d4   : > { %23215 = vmatprep.mubr.msk.f32.mxu0 %vm6257_vm4, %v27958_v30  ;;  %v23564_v58 = vpack.c.bf16 %v16273_v24, %v16272_v46  ;;  %v17595_v46 = vld [vmem:[%s28909_s5 + $0xbc] sm:$0xf] }
 0x5d5   : > { %23554 = vmatprep.subr.msk.bf16.mxu1 %vm28160_vm8, %v23552_v29 }
 0x5d6   : > { %23557 = vmatpush3.bf16.msk.msra.mxu1 %vm28160_vm8, %v23552_v29  ;;  %v16049_v29 = vld [vmem:[#allocation6 + $0x11] sm:$0xff] }
 0x5d7   : > { %23216 = vmatmul.mubr.msk.f32.gmra.mrb[20].mxu0 %vm6257_vm4, %v28063_v35  ;;  %23560 = vmatprep.subr.msk.bf16.mxu1 %vm28160_vm8, %v28360_v40 }
 0x5d8   : > { %23218 = vmatprep.mubr.msk.f32.mxu0 %vm6257_vm4, %v14675_v22 }
 0x5db   : > { %23219 = vmatmul.mubr.msk.f32.gmra.mrb[22].mxu0 %vm6257_vm4, %v15406_v38 }
 0x5dc   : > { %23223 = vmatprep.mubr.msk.f32.mxu0 %vm6257_vm4, %v27851_v52  ;;  %v20018_v52 = vld [vmem:[%s28908_s4] ss:$0 sm:$0xff] }
 0x5df   : > { %23224 = vmatmul.mubr.msk.f32.vlgmr.msra.gmra.mrb[16].mxu0 %vm6257_vm4, %v27855_v44 }
 0x5e0   : > { %23236 = vmatpush3.msra.mxu0 %v15699_v20  ;;  %23226 = vmatprep.mubr.msk.f32.mxu0 %vm6257_vm4, %v27859_v31 }
 0x5e3   : > { %23227 = vmatmul.mubr.msk.f32.gmra.mrb[18].mxu0 %vm6257_vm4, %v27863_v13 }
 0x5e4   : > { %23229 = vmatprep.mubr.msk.f32.mxu0 %vm6257_vm4, %v27979_v26 }
 0x5e7   : > { %23230 = vmatmul.mubr.msk.f32.gmra.mrb[20].mxu0 %vm6257_vm4, %v28084_v15 }
 0x5e8   : > { %23232 = vmatprep.mubr.msk.f32.mxu0 %vm6257_vm4, %v14821_v0 }
 0x5eb   : > { %23233 = vmatmul.mubr.msk.f32.gmra.mrb[22].mxu0 %vm6257_vm4, %v15552_v3 }
 0x5ec   : > { %23237 = vmatprep.mubr.msk.f32.mxu0 %vm6257_vm4, %v27883_v49 }
 0x5ef   : > { %23238 = vmatmul.mubr.msk.f32.vlgmr.msra.gmra.mrb[16].mxu0 %vm6257_vm4, %v27887_v56 }
 0x5f0   : > { %23240 = vmatprep.mubr.msk.f32.mxu0 %vm6257_vm4, %v27891_v19 }
 0x5f3   : > { %23241 = vmatmul.mubr.msk.f32.gmra.mrb[18].mxu0 %vm6257_vm4, %v27895_v41 }
 0x5f4   : > { %23243 = vmatprep.mubr.msk.f32.mxu0 %vm6257_vm4, %v28000_v54 }
 0x5f7   : > { %23244 = vmatmul.mubr.msk.f32.gmra.mrb[20].mxu0 %vm6257_vm4, %v28105_v37 }
 0x5f8   : > { %23246 = vmatprep.mubr.msk.f32.mxu0 %vm6257_vm4, %v14967_v27 }
 0x5fb   : > { %23247 = vmatmul.mubr.msk.f32.gmra.mrb[22].mxu0 %vm6257_vm4, %v15698_v21 }
 0x6c2   : > { %v23239_v44 = vpop.f32.mrb[16].mxu0 }
 0x6c3   : > { %v23770_v31 = vadd.f32 %v23239_v44, %v20018_v52  ;;  %v15790_v11 = vpop.f32.mrb[17].mxu0  ;;  %v16158_v44 = vld [vmem:[#allocation6 + $0x2] sm:$0xff] }
 0x6c4   : > { %v23771_v13 = vadd.f32 %v20018_v52, %v15790_v11  ;;  %v16382_v11 = vld [vmem:[%s28909_s5 + $0x30] sm:$0xff] }
 0x6c5   : > { %v15838_v39 = vmax.f32 %v23770_v31, 0.0 }
 0x6c6   : > { %v15837_v48 = vmax.f32 %v23771_v13, 0.0  ;;  %v23242_v23 = vpop.f32.mrb[18].mxu0  ;;  %v16383_v13 = vld [vmem:[%s28909_s5 + $0x38] sm:$0xf] }
 0x6c7   : > { %15847 = vst.msk [vmem:[#allocation5 + $0x8] sm:$0xff] %vm15845_vm9, %v15838_v39  ;;  %v23772_v51 = vadd.f32 %v23242_v23, %v20018_v52  ;;  %v15800_v49 = vpop.f32.mrb[19].mxu0  ;;  %v23570_v39 = vpack.c.bf16 %v16383_v13, %v16382_v11  ;;  %v16268_v23 = vld [vmem:[#allocation6 + $0x3] sm:$0xff]  ;;  %v17814_v11 = vld [vmem:[%s28909_s5 + $0xcc] sm:$0xff]  ;;  %v17815_v13 = vld [vmem:[%s28909_s5 + $0xd4] sm:$0xf] }
 0x6c8   : > { %15846 = vst.msk [vmem:[#allocation5] sm:$0xff] %vm15845_vm9, %v15837_v48  ;;  %v23773_v56 = vadd.f32 %v20018_v52, %v15800_v49  ;;  %v16493_v49 = vld [vmem:[%s28909_s5 + $0x3c] sm:$0xff] }
 0x6c9   : > { %v15840_v19 = vmax.f32 %v23772_v51, 0.0 }
 0x6ca   : > { %v15839_v41 = vmax.f32 %v23773_v56, 0.0  ;;  %v23245_v17 = vpop.f32.mrb[20].mxu0  ;;  %v16494_v56 = vld [vmem:[%s28909_s5 + $0x44] sm:$0xf] }
 0x6cb   : > { %15849 = vst.msk [vmem:[#allocation5 + $0x18] sm:$0xff] %vm15845_vm9, %v15840_v19  ;;  %v23774_v9 = vadd.f32 %v23245_v17, %v20018_v52  ;;  %v15810_v1 = vpop.f32.mrb[21].mxu0  ;;  %v16269_v19 = vld [vmem:[#allocation6 + $0x13] sm:$0xff] }
 0x6cc   : > { %15848 = vst.msk [vmem:[#allocation5 + $0x10] sm:$0xff] %vm15845_vm9, %v15839_v41  ;;  %v23775_v10 = vadd.f32 %v20018_v52, %v15810_v1  ;;  %v23576_v41 = vpack.c.bf16 %v16494_v56, %v16493_v49  ;;  %v17703_v49 = vld [vmem:[#allocation6 + $0x61] sm:$0xff] }
 0x6cd   : > { %v15842_v43 = vmax.f32 %v23774_v9, 0.0  ;;  %v16378_v9 = vld [vmem:[#allocation6 + $0x4] sm:$0xff] }
 0x6ce   : > { %v15856_v30 = vld [vmem:[#allocation5 + $0x8] ss:$2 sm:$0xf]  ;;  %v15872_v53 = vld [vmem:[#allocation5 + $0x9] ss:$2 sm:$0xf] }
 0x6cf   : > { %v15886_v26 = vmax.f32 %v15856_v30, %v15872_v53  ;;  %v15854_v12 = vld [vmem:[#allocation5] ss:$2 sm:$0xf]  ;;  %v15870_v54 = vld [vmem:[#allocation5 + $0x1] ss:$2 sm:$0xf] }
 0x6d0   : > { %15851 = vst.msk [vmem:[#allocation5 + $0x28] sm:$0xff] %vm15845_vm9, %v15842_v43  ;;  %v15885_v47 = vmax.f32 %v15854_v12, %v15870_v54  ;;  %v15841_v16 = vmax.f32 %v23775_v10, 0.0  ;;  %v23248_v4 = vpop.f32.mrb[22].mxu0  ;;  %v16603_v10 = vld [vmem:[%s28909_s5 + $0x48] sm:$0xff]  ;;  %v16604_v43 = vld [vmem:[%s28909_s5 + $0x50] sm:$0xf] }
 0x6d1   : > { %v23776_v62 = vadd.f32 %v23248_v4, %v20018_v52  ;;  %v15820_v60 = vpop.f32.mrb[23].mxu0  ;;  %v16379_v30 = vld [vmem:[#allocation6 + $0x14] sm:$0xff]  ;;  %v23582_v53 = vpack.c.bf16 %v16604_v43, %v16603_v10  ;;  %v18034_v56 = vld [vmem:[%s28909_s5 + $0xe4] sm:$0xff]  ;;  %v18255_v43 = vld [vmem:[%s28909_s5 + $0xfc] sm:$0xff] }
 0x6d2   : > { %v15860_v35 = vld [vmem:[#allocation5 + $0x18] ss:$2 sm:$0xf]  ;;  %v15876_v5 = vld [vmem:[#allocation5 + $0x19] ss:$2 sm:$0xf]  ;;  %v23777_v15 = vadd.f32 %v20018_v52, %v15820_v60  ;;  %v15893_v18 = vmax.f32 %v15885_v47, %v15886_v26 }
 0x6d3   : > { %15850 = vst.msk [vmem:[#allocation5 + $0x20] sm:$0xff] %vm15845_vm9, %v15841_v16  ;;  %v15888_v37 = vmax.f32 %v15860_v35, %v15876_v5  ;;  %v15858_v57 = vld [vmem:[#allocation5 + $0x10] ss:$2 sm:$0xf]  ;;  %v15844_v6 = vmax.f32 %v23776_v62, 0.0  ;;  %v16823_v62 = vld [vmem:[%s28909_s5 + $0x60] sm:$0xff] }
 0x6d4   : > { %v15874_v36 = vld [vmem:[#allocation5 + $0x11] ss:$2 sm:$0xf]  ;;  %v15843_v42 = vmax.f32 %v23777_v15, 0.0  ;;  %15926 = vst.msk [vmem:[#allocation6 + $0x22] sm:$0xf] %vm15898_vm10, %v15893_v18 }
 0x6d5   : > { %v15887_v32 = vmax.f32 %v15858_v57, %v15874_v36  ;;  %15853 = vst.msk [vmem:[#allocation5 + $0x38] sm:$0xff] %vm15845_vm9, %v15844_v6  ;;  %v16713_v54 = vld [vmem:[%s28909_s5 + $0x54] sm:$0xff]  ;;  %v16714_v47 = vld [vmem:[%s28909_s5 + $0x5c] sm:$0xf]  ;;  %v16933_v5 = vld [vmem:[%s28909_s5 + $0x6c] sm:$0xff] }
 0x6d6   : > { %15852 = vst.msk [vmem:[#allocation5 + $0x30] sm:$0xff] %vm15845_vm9, %v15843_v42  ;;  %v23588_v16 = vpack.c.bf16 %v16714_v47, %v16713_v54  ;;  %v16934_v15 = vld [vmem:[%s28909_s5 + $0x74] sm:$0xf]  ;;  %v17043_v57 = vld [vmem:[%s28909_s5 + $0x78] sm:$0xff]  ;;  %v17044_v36 = vld [vmem:[%s28909_s5 + $0x80] sm:$0xf] }
 0x6d7   : > { %v15864_v34 = vld [vmem:[#allocation5 + $0x28] ss:$2 sm:$0xf]  ;;  %v15880_v33 = vld [vmem:[#allocation5 + $0x29] ss:$2 sm:$0xf]  ;;  %v15894_v8 = vmax.f32 %v15887_v32, %v15888_v37  ;;  %v23600_v18 = vpack.c.bf16 %v16934_v15, %v16933_v5  ;;  %v23606_v32 = vpack.c.bf16 %v17044_v36, %v17043_v57 }
 0x6d8   : > { %v15890_v22 = vmax.f32 %v15864_v34, %v15880_v33  ;;  %v17153_v42 = vld [vmem:[%s28909_s5 + $0x84] sm:$0xff]  ;;  %v17154_v34 = vld [vmem:[%s28909_s5 + $0x8c] sm:$0xf]  ;;  %v18144_v47 = vld [vmem:[#allocation6 + $0x70] sm:$0xff]  ;;  %v24851_v36 = vmov 0.0|0.0  }
 0x6d9   : > { %15927 = vst.msk [vmem:[#allocation6 + $0x32] sm:$0xf] %vm15898_vm10, %v15894_v8  ;;  %v23612_v33 = vpack.c.bf16 %v17154_v34, %v17153_v42  ;;  %v17923_v10 = vld [vmem:[#allocation6 + $0x63] sm:$0xff]  ;;  %v18364_v15 = vld [vmem:[#allocation6 + $0x72] sm:$0xff] }
 0x6da   : > { %v15862_v25 = vld [vmem:[#allocation5 + $0x20] ss:$2 sm:$0xf]  ;;  %v15878_v0 = vld [vmem:[#allocation5 + $0x21] ss:$2 sm:$0xf] }
 0x6db   : > { %v15889_v63 = vmax.f32 %v15862_v25, %v15878_v0  ;;  %v28380_v27 = vld [vmem:[#allocation6 + $0x20] sm:$0xff]  ;;  %v17264_v25 = vld [vmem:[%s28909_s5 + $0x98] sm:$0xf]  ;;  %v18723_v57 = vld [vmem:[%s28911_s7 + $0x8] sm:$0xff] }
 0x6dc   : > { %23256 = vmatprep.mubr.msk.f32.mxu1 %vm15845_vm9, %v28380_v27  ;;  %v15868_v45 = vld [vmem:[#allocation5 + $0x38] ss:$2 sm:$0xf]  ;;  %v15884_v2 = vld [vmem:[#allocation5 + $0x39] ss:$2 sm:$0xf] }
 0x6dd   : > { %v15895_v28 = vmax.f32 %v15889_v63, %v15890_v22  ;;  %v15892_v20 = vmax.f32 %v15868_v45, %v15884_v2  ;;  %v15866_v38 = vld [vmem:[#allocation5 + $0x30] ss:$2 sm:$0xf]  ;;  %v15882_v3 = vld [vmem:[#allocation5 + $0x31] ss:$2 sm:$0xf] }
 0x6de   : > { %v15891_v21 = vmax.f32 %v15866_v38, %v15882_v3  ;;  %v28398_v52 = vld [vmem:[#allocation6 + $0x21] sm:$0xff]  ;;  %v17263_v22 = vld [vmem:[%s28909_s5 + $0x90] sm:$0xff] }
 0x6df   : > { %15928 = vst.msk [vmem:[#allocation6 + $0x42] sm:$0xf] %vm15898_vm10, %v15895_v28  ;;  %v28419_v48 = vld [vmem:[#allocation6 + $0x22] sm:$0xff]  ;;  %v23618_v0 = vpack.c.bf16 %v17264_v25, %v17263_v22 }
 0x6e0   : > { %v28385_v55 = vld [vmem:[#allocation6 + $0x30] sm:$0xff]  ;;  %v15896_v59 = vmax.f32 %v15891_v21, %v15892_v20  ;;  %v28439_v17 = vld [vmem:[#allocation6 + $0x23] sm:$0xff] }
 0x6e1   : > { %23257 = vmatmul.mubr.msk.f32.gmra.mrb[34].mxu1 %vm15845_vm9, %v28385_v55  ;;  %v28407_v31 = vld [vmem:[#allocation6 + $0x31] sm:$0xff]  ;;  %v28459_v26 = vld [vmem:[#allocation6 + $0x24] sm:$0xff] }
 0x6e2   : > { %23263 = vmatprep.mubr.msk.f32.mxu1 %vm15845_vm9, %v16048_v61  ;;  %15929 = vst.msk [vmem:[#allocation6 + $0x52] sm:$0xf] %vm15898_vm10, %v15896_v59  ;;  %v28427_v51 = vld [vmem:[#allocation6 + $0x32] sm:$0xff]  ;;  %v17373_v61 = vld [vmem:[%s28909_s5 + $0x9c] sm:$0xff]  ;;  %v17483_v2 = vld [vmem:[%s28909_s5 + $0xa8] sm:$0xff] }
 0x6e3   : > { %v28447_v1 = vld [vmem:[#allocation6 + $0x33] sm:$0xff]  ;;  %v17704_v59 = vld [vmem:[%s28909_s5 + $0xc0] sm:$0xff] }
 0x6e4   : > { %v28467_v12 = vld [vmem:[#allocation6 + $0x34] sm:$0xff]  ;;  %v17484_v20 = vld [vmem:[%s28909_s5 + $0xb0] sm:$0xf] }
 0x6e5   : > { %23264 = vmatmul.mubr.msk.f32.vlgmr.msra.gmra.mrb[32].mxu1 %vm15845_vm9, %v16049_v29  ;;  %v23630_v38 = vpack.c.bf16 %v17484_v20, %v17483_v2  ;;  %v17594_v21 = vld [vmem:[%s28909_s5 + $0xb4] sm:$0xff] }
 0x6e6   : > { %23563 = vmatpush3.bf16.msk.msra.mxu1 %vm28160_vm8, %v28360_v40  ;;  %23266 = vmatprep.mubr.msk.f32.mxu1 %vm15845_vm9, %v28398_v52  ;;  %v16159_v40 = vld [vmem:[#allocation6 + $0x12] sm:$0xff]  ;;  %v28487_v4 = vld [vmem:[#allocation6 + $0x40] sm:$0xff]  ;;  %v23636_v24 = vpack.c.bf16 %v17595_v46, %v17594_v21 }
 0x6e7   : > { %23566 = vmatprep.subr.msk.bf16.mxu1 %vm28160_vm8, %v23564_v58  ;;  %v28506_v35 = vld [vmem:[#allocation6 + $0x41] sm:$0xff]  ;;  %v18798_v2 = vld [vmem:[%s28911_s7 + $0x10] sm:$0xff]  ;;  %v18799_v20 = vld [vmem:[%s28911_s7 + $0x18] sm:$0xff] }
 0x6e8   : > { %v28525_v37 = vld [vmem:[#allocation6 + $0x42] sm:$0xff] }
 0x6e9   : > { %23267 = vmatmul.mubr.msk.f32.gmra.mrb[34].mxu1 %vm15845_vm9, %v28407_v31  ;;  %v28544_v6 = vld [vmem:[#allocation6 + $0x43] sm:$0xff]  ;;  %v28583_v63 = vld [vmem:[#allocation6 + $0x50] sm:$0xff] }
 0x6ea   : > { %23273 = vmatprep.mubr.msk.f32.mxu1 %vm15845_vm9, %v16158_v44  ;;  %v28563_v8 = vld [vmem:[#allocation6 + $0x44] sm:$0xff]  ;;  %v28603_v45 = vld [vmem:[#allocation6 + $0x51] sm:$0xff] }
 0x6eb   : > { %v28623_v3 = vld [vmem:[#allocation6 + $0x52] sm:$0xff] }
 0x6ec   : > { %v28663_v44 = vld [vmem:[#allocation6 + $0x54] sm:$0xff] }
 0x6ed   : > { %23274 = vmatmul.mubr.msk.f32.vlgmr.msra.gmra.mrb[32].mxu1 %vm15845_vm9, %v16159_v40 }
 0x6ee   : > { %23569 = vmatpush3.bf16.msk.msra.mxu1 %vm28160_vm8, %v23564_v58  ;;  %23276 = vmatprep.mubr.msk.f32.mxu1 %vm15845_vm9, %v28419_v48  ;;  %v17705_v58 = vld [vmem:[%s28909_s5 + $0xc8] sm:$0xf] }
 0x6ef   : > { %23572 = vmatprep.subr.msk.bf16.mxu1 %vm28160_vm8, %v23570_v39 }
 0x6f1   : > { %23277 = vmatmul.mubr.msk.f32.gmra.mrb[34].mxu1 %vm15845_vm9, %v28427_v51 }
 0x6f2   : > { %23283 = vmatprep.mubr.msk.f32.mxu1 %vm15845_vm9, %v16268_v23 }
 0x6f5   : > { %23284 = vmatmul.mubr.msk.f32.vlgmr.msra.gmra.mrb[32].mxu1 %vm15845_vm9, %v16269_v19 }
 0x6f6   : > { %23575 = vmatpush3.bf16.msk.msra.mxu1 %vm28160_vm8, %v23570_v39  ;;  %23286 = vmatprep.mubr.msk.f32.mxu1 %vm15845_vm9, %v28439_v17  ;;  %v17593_v39 = vld [vmem:[#allocation6 + $0x60] sm:$0xff] }
 0x6f7   : > { %23578 = vmatprep.subr.msk.bf16.mxu1 %vm28160_vm8, %v23576_v41 }
 0x6f9   : > { %23287 = vmatmul.mubr.msk.f32.gmra.mrb[34].mxu1 %vm15845_vm9, %v28447_v1 }
 0x6fa   : > { %23293 = vmatprep.mubr.msk.f32.mxu1 %vm15845_vm9, %v16378_v9 }
 0x6fd   : > { %23294 = vmatmul.mubr.msk.f32.vlgmr.msra.gmra.mrb[32].mxu1 %vm15845_vm9, %v16379_v30 }
 0x6fe   : > { %23581 = vmatpush3.bf16.msk.msra.mxu1 %vm28160_vm8, %v23576_v41  ;;  %23296 = vmatprep.mubr.msk.f32.mxu1 %vm15845_vm9, %v28459_v26  ;;  %v17813_v41 = vld [vmem:[#allocation6 + $0x62] sm:$0xff] }
 0x6ff   : > { %23584 = vmatprep.subr.msk.bf16.mxu1 %vm28160_vm8, %v23582_v53 }
 0x701   : > { %23297 = vmatmul.mubr.msk.f32.gmra.mrb[34].mxu1 %vm15845_vm9, %v28467_v12 }
 0x702   : > { %23303 = vmatprep.mubr.msk.f32.mxu1 %vm15845_vm9, %v28342_v7  ;;  %v16824_v7 = vld [vmem:[%s28909_s5 + $0x68] sm:$0xf] }
 0x703   : > { %v23594_v60 = vpack.c.bf16 %v16824_v7, %v16823_v62  ;;  %v18254_v7 = vld [vmem:[#allocation6 + $0x71] sm:$0xff] }
 0x705   : > { %23304 = vmatmul.mubr.msk.f32.vlgmr.msra.gmra.mrb[32].mxu1 %vm15845_vm9, %v28380_v27 }
 0x706   : > { %23587 = vmatpush3.bf16.msk.msra.mxu1 %vm28160_vm8, %v23582_v53  ;;  %23306 = vmatprep.mubr.msk.f32.mxu1 %vm15845_vm9, %v28385_v55  ;;  %v18033_v53 = vld [vmem:[#allocation6 + $0x64] sm:$0xff] }
 0x707   : > { %23590 = vmatprep.subr.msk.bf16.mxu1 %vm28160_vm8, %v23588_v16 }
 0x709   : > { %23307 = vmatmul.mubr.msk.f32.gmra.mrb[34].mxu1 %vm15845_vm9, %v28487_v4 }
 0x70a   : > { %23313 = vmatprep.mubr.msk.f32.mxu1 %vm15845_vm9, %v16049_v29  ;;  %v28643_v29 = vld [vmem:[#allocation6 + $0x53] sm:$0xff] }
 0x70d   : > { %23314 = vmatmul.mubr.msk.f32.vlgmr.msra.gmra.mrb[32].mxu1 %vm15845_vm9, %v28398_v52 }
 0x70e   : > { %23593 = vmatpush3.bf16.msk.msra.mxu1 %vm28160_vm8, %v23588_v16  ;;  %23316 = vmatprep.mubr.msk.f32.mxu1 %vm15845_vm9, %v28407_v31  ;;  %v18475_v16 = vld [vmem:[%s28909_s5 + $0x114] sm:$0xff] }
 0x70f   : > { %23596 = vmatprep.subr.msk.bf16.mxu1 %vm28160_vm8, %v23594_v60 }
 0x711   : > { %23317 = vmatmul.mubr.msk.f32.gmra.mrb[34].mxu1 %vm15845_vm9, %v28506_v35 }
 0x712   : > { %23323 = vmatprep.mubr.msk.f32.mxu1 %vm15845_vm9, %v16159_v40  ;;  %v23648_v40 = vpack.c.bf16 %v17815_v13, %v17814_v11 }
 0x715   : > { %23324 = vmatmul.mubr.msk.f32.vlgmr.msra.gmra.mrb[32].mxu1 %vm15845_vm9, %v28419_v48 }
 0x716   : > { %23599 = vmatpush3.bf16.msk.msra.mxu1 %vm28160_vm8, %v23594_v60  ;;  %23326 = vmatprep.mubr.msk.f32.mxu1 %vm15845_vm9, %v28427_v51  ;;  %v18585_v60 = vld [vmem:[%s28909_s5 + $0x120] sm:$0xff] }
 0x717   : > { %23602 = vmatprep.subr.msk.bf16.mxu1 %vm28160_vm8, %v23600_v18 }
 0x719   : > { %23327 = vmatmul.mubr.msk.f32.gmra.mrb[34].mxu1 %vm15845_vm9, %v28525_v37 }
 0x71a   : > { %23333 = vmatprep.mubr.msk.f32.mxu1 %vm15845_vm9, %v16269_v19 }
 0x71d   : > { %23334 = vmatmul.mubr.msk.f32.vlgmr.msra.gmra.mrb[32].mxu1 %vm15845_vm9, %v28439_v17 }
 0x71e   : > { %23605 = vmatpush3.bf16.msk.msra.mxu1 %vm28160_vm8, %v23600_v18  ;;  %23336 = vmatprep.mubr.msk.f32.mxu1 %vm15845_vm9, %v28447_v1  ;;  %v18474_v18 = vld [vmem:[#allocation6 + $0x73] sm:$0xff] }
 0x71f   : > { %23608 = vmatprep.subr.msk.bf16.mxu1 %vm28160_vm8, %v23606_v32 }
 0x721   : > { %23337 = vmatmul.mubr.msk.f32.gmra.mrb[34].mxu1 %vm15845_vm9, %v28544_v6 }
 0x722   : > { %23343 = vmatprep.mubr.msk.f32.mxu1 %vm15845_vm9, %v16379_v30 }
 0x725   : > { %23344 = vmatmul.mubr.msk.f32.vlgmr.msra.gmra.mrb[32].mxu1 %vm15845_vm9, %v28459_v26 }
 0x726   : > { %23611 = vmatpush3.bf16.msk.msra.mxu1 %vm28160_vm8, %v23606_v32  ;;  %23346 = vmatprep.mubr.msk.f32.mxu1 %vm15845_vm9, %v28467_v12  ;;  %v23697_v32 = vpack.c.bf16 %v18723_v57, %v18722_v14 }
 0x727   : > { %23614 = vmatprep.subr.msk.bf16.mxu1 %vm28160_vm8, %v23612_v33 }
 0x729   : > { %23347 = vmatmul.mubr.msk.f32.gmra.mrb[34].mxu1 %vm15845_vm9, %v28563_v8 }
 0x72a   : > { %23353 = vmatprep.mubr.msk.f32.mxu1 %vm15845_vm9, %v28380_v27  ;;  %v17374_v27 = vld [vmem:[%s28909_s5 + $0xa4] sm:$0xf] }
 0x72b   : > { %v23624_v28 = vpack.c.bf16 %v17374_v27, %v17373_v61 }
 0x72d   : > { %23354 = vmatmul.mubr.msk.f32.vlgmr.msra.gmra.mrb[32].mxu1 %vm15845_vm9, %v28385_v55 }
 0x72e   : > { %23617 = vmatpush3.bf16.msk.msra.mxu1 %vm28160_vm8, %v23612_v33  ;;  %23356 = vmatprep.mubr.msk.f32.mxu1 %vm15845_vm9, %v28487_v4 }
 0x72f   : > { %23620 = vmatprep.subr.msk.bf16.mxu1 %vm28160_vm8, %v23618_v0 }
 0x731   : > { %23357 = vmatmul.mubr.msk.f32.gmra.mrb[34].mxu1 %vm15845_vm9, %v28583_v63 }
 0x732   : > { %23363 = vmatprep.mubr.msk.f32.mxu1 %vm15845_vm9, %v28398_v52  ;;  %v23642_v52 = vpack.c.bf16 %v17705_v58, %v17704_v59  ;;  %v23700_v59 = vpack.c.bf16 %v18799_v20, %v18798_v2 }
 0x735   : > { %23364 = vmatmul.mubr.msk.f32.vlgmr.msra.gmra.mrb[32].mxu1 %vm15845_vm9, %v28407_v31 }
 0x736   : > { %23623 = vmatpush3.bf16.msk.msra.mxu1 %vm28160_vm8, %v23618_v0  ;;  %23366 = vmatprep.mubr.msk.f32.mxu1 %vm15845_vm9, %v28506_v35 }
 0x737   : > { %23626 = vmatprep.subr.msk.bf16.mxu1 %vm28160_vm8, %v23624_v28 }
 0x739   : > { %23367 = vmatmul.mubr.msk.f32.gmra.mrb[34].mxu1 %vm15845_vm9, %v28603_v45 }
 0x73a   : > { %23373 = vmatprep.mubr.msk.f32.mxu1 %vm15845_vm9, %v28419_v48  ;;  %v17924_v48 = vld [vmem:[%s28909_s5 + $0xd8] sm:$0xff] }
 0x73d   : > { %23374 = vmatmul.mubr.msk.f32.vlgmr.msra.gmra.mrb[32].mxu1 %vm15845_vm9, %v28427_v51 }
 0x73e   : > { %23629 = vmatpush3.bf16.msk.msra.mxu1 %vm28160_vm8, %v23624_v28  ;;  %23376 = vmatprep.mubr.msk.f32.mxu1 %vm15845_vm9, %v28525_v37 }
 0x73f   : > { %23632 = vmatprep.subr.msk.bf16.mxu1 %vm28160_vm8, %v23630_v38 }
 0x741   : > { %23377 = vmatmul.mubr.msk.f32.gmra.mrb[34].mxu1 %vm15845_vm9, %v28623_v3 }
 0x742   : > { %23383 = vmatprep.mubr.msk.f32.mxu1 %vm15845_vm9, %v28439_v17  ;;  %v18145_v17 = vld [vmem:[%s28909_s5 + $0xf0] sm:$0xff] }
 0x745   : > { %23384 = vmatmul.mubr.msk.f32.vlgmr.msra.gmra.mrb[32].mxu1 %vm15845_vm9, %v28447_v1 }
 0x746   : > { %23635 = vmatpush3.bf16.msk.msra.mxu1 %vm28160_vm8, %v23630_v38  ;;  %23386 = vmatprep.mubr.msk.f32.mxu1 %vm15845_vm9, %v28544_v6 }
 0x747   : > { %23638 = vmatprep.subr.msk.bf16.mxu1 %vm28160_vm8, %v23636_v24 }
 0x749   : > { %23387 = vmatmul.mubr.msk.f32.gmra.mrb[34].mxu1 %vm15845_vm9, %v28643_v29 }
 0x74a   : > { %23393 = vmatprep.mubr.msk.f32.mxu1 %vm15845_vm9, %v28459_v26  ;;  %v18365_v26 = vld [vmem:[%s28909_s5 + $0x108] sm:$0xff] }
 0x74d   : > { %23394 = vmatmul.mubr.msk.f32.vlgmr.msra.gmra.mrb[32].mxu1 %vm15845_vm9, %v28467_v12 }
 0x74e   : > { %23641 = vmatpush3.bf16.msk.msra.mxu1 %vm28160_vm8, %v23636_v24  ;;  %23396 = vmatprep.mubr.msk.f32.mxu1 %vm15845_vm9, %v28563_v8 }
 0x74f   : > { %23644 = vmatprep.subr.msk.bf16.mxu1 %vm28160_vm8, %v23642_v52 }
 0x751   : > { %23397 = vmatmul.mubr.msk.f32.gmra.mrb[34].mxu1 %vm15845_vm9, %v28663_v44 }
 0x752   : > { %23403 = vmatprep.mubr.msk.f32.mxu1 %vm15845_vm9, %v28385_v55  ;;  %v17925_v55 = vld [vmem:[%s28909_s5 + $0xe0] sm:$0xf] }
 0x753   : > { %v23654_v23 = vpack.c.bf16 %v17925_v55, %v17924_v48 }
 0x755   : > { %23404 = vmatmul.mubr.msk.f32.vlgmr.msra.gmra.mrb[32].mxu1 %vm15845_vm9, %v28487_v4 }
 0x756   : > { %23647 = vmatpush3.bf16.msk.msra.mxu1 %vm28160_vm8, %v23642_v52  ;;  %23406 = vmatprep.mubr.msk.f32.mxu1 %vm15845_vm9, %v28583_v63  ;;  %v18874_v52 = vld [vmem:[%s28911_s7 + $0x20] sm:$0xff] }
 0x757   : > { %23650 = vmatprep.subr.msk.bf16.mxu1 %vm28160_vm8, %v23648_v40 }
 0x759   : > { %23407 = vmatmul.mubr.msk.f32.gmra.mrb[34].mxu1 %vm15845_vm9, %v17593_v39 }
 0x75a   : > { %23413 = vmatprep.mubr.msk.f32.mxu1 %vm15845_vm9, %v28407_v31  ;;  %v18035_v31 = vld [vmem:[%s28909_s5 + $0xec] sm:$0xf] }
 0x75b   : > { %v23660_v19 = vpack.c.bf16 %v18035_v31, %v18034_v56  ;;  %v18950_v56 = vld [vmem:[%s28911_s7 + $0x30] sm:$0xff]  ;;  %v18951_v31 = vld [vmem:[%s28911_s7 + $0x38] sm:$0xff] }
 0x75d   : > { %23414 = vmatmul.mubr.msk.f32.vlgmr.msra.gmra.mrb[32].mxu1 %vm15845_vm9, %v28506_v35 }
 0x75e   : > { %23653 = vmatpush3.bf16.msk.msra.mxu1 %vm28160_vm8, %v23648_v40  ;;  %23416 = vmatprep.mubr.msk.f32.mxu1 %vm15845_vm9, %v28603_v45 }
 0x75f   : > { %23656 = vmatprep.subr.msk.bf16.mxu1 %vm28160_vm8, %v23654_v23 }
 0x761   : > { %23417 = vmatmul.mubr.msk.f32.gmra.mrb[34].mxu1 %vm15845_vm9, %v17703_v49 }
 0x762   : > { %23423 = vmatprep.mubr.msk.f32.mxu1 %vm15845_vm9, %v28427_v51  ;;  %v18146_v51 = vld [vmem:[%s28909_s5 + $0xf8] sm:$0xf] }
 0x763   : > { %v23666_v9 = vpack.c.bf16 %v18146_v51, %v18145_v17  ;;  %v19027_v17 = vld [vmem:[%s28913_s9] sm:$0xff]  ;;  %v19028_v51 = vld [vmem:[%s28913_s9 + $0x8] sm:$0xff] }
 0x765   : > { %23424 = vmatmul.mubr.msk.f32.vlgmr.msra.gmra.mrb[32].mxu1 %vm15845_vm9, %v28525_v37 }
 0x766   : > { %23659 = vmatpush3.bf16.msk.msra.mxu1 %vm28160_vm8, %v23654_v23  ;;  %23426 = vmatprep.mubr.msk.f32.mxu1 %vm15845_vm9, %v28623_v3 }
 0x767   : > { %23662 = vmatprep.subr.msk.bf16.mxu1 %vm28160_vm8, %v23660_v19 }
 0x769   : > { %23427 = vmatmul.mubr.msk.f32.gmra.mrb[34].mxu1 %vm15845_vm9, %v17813_v41 }
 0x76a   : > { %23433 = vmatprep.mubr.msk.f32.mxu1 %vm15845_vm9, %v28447_v1  ;;  %v18256_v1 = vld [vmem:[%s28909_s5 + $0x104] sm:$0xf] }
 0x76b   : > { %v23672_v30 = vpack.c.bf16 %v18256_v1, %v18255_v43  ;;  %v19029_v43 = vld [vmem:[%s28913_s9 + $0x10] sm:$0xff]  ;;  %v19030_v1 = vld [vmem:[%s28913_s9 + $0x18] sm:$0xff] }
 0x76d   : > { %23434 = vmatmul.mubr.msk.f32.vlgmr.msra.gmra.mrb[32].mxu1 %vm15845_vm9, %v28544_v6 }
 0x76e   : > { %23665 = vmatpush3.bf16.msk.msra.mxu1 %vm28160_vm8, %v23660_v19  ;;  %23436 = vmatprep.mubr.msk.f32.mxu1 %vm15845_vm9, %v28643_v29  ;;  %v23706_v19 = vpack.c.bf16 %v18951_v31, %v18950_v56 }
 0x76f   : > { %23668 = vmatprep.subr.msk.bf16.mxu1 %vm28160_vm8, %v23666_v9 }
 0x771   : > { %23437 = vmatmul.mubr.msk.f32.gmra.mrb[34].mxu1 %vm15845_vm9, %v17923_v10 }
 0x772   : > { %23443 = vmatprep.mubr.msk.f32.mxu1 %vm15845_vm9, %v28467_v12  ;;  %v18366_v12 = vld [vmem:[%s28909_s5 + $0x110] sm:$0xf] }
 0x773   : > { %v23678_v54 = vpack.c.bf16 %v18366_v12, %v18365_v26  ;;  %v19032_v26 = vld [vmem:[%s28913_s9 + $0x28] sm:$0xff] }
 0x775   : > { %23444 = vmatmul.mubr.msk.f32.vlgmr.msra.gmra.mrb[32].mxu1 %vm15845_vm9, %v28563_v8 }
 0x776   : > { %23671 = vmatpush3.bf16.msk.msra.mxu1 %vm28160_vm8, %v23666_v9  ;;  %23446 = vmatprep.mubr.msk.f32.mxu1 %vm15845_vm9, %v28663_v44  ;;  %v23709_v9 = vpack.c.bf16 %v19028_v51, %v19027_v17 }
 0x777   : > { %23674 = vmatprep.subr.msk.bf16.mxu1 %vm28160_vm8, %v23672_v30 }
 0x779   : > { %23447 = vmatmul.mubr.msk.f32.gmra.mrb[34].mxu1 %vm15845_vm9, %v18033_v53 }
 0x77a   : > { %23453 = vmatprep.mubr.msk.f32.mxu1 %vm15845_vm9, %v28487_v4  ;;  %v18476_v4 = vld [vmem:[%s28909_s5 + $0x11c] sm:$0xf] }
 0x77b   : > { %v23684_v62 = vpack.c.bf16 %v18476_v4, %v18475_v16  ;;  %v18721_v16 = vld [vmem:[%s28912_s8] sm:$0x1] }
 0x77d   : > { %23454 = vmatmul.mubr.msk.f32.vlgmr.msra.gmra.mrb[32].mxu1 %vm15845_vm9, %v28583_v63 }
 0x77e   : > { %23677 = vmatpush3.bf16.msk.msra.mxu1 %vm28160_vm8, %v23672_v30  ;;  %23456 = vmatprep.mubr.msk.f32.mxu1 %vm15845_vm9, %v17593_v39  ;;  %v23712_v30 = vpack.c.bf16 %v19030_v1, %v19029_v43 }
 0x77f   : > { %23680 = vmatprep.subr.msk.bf16.mxu1 %vm28160_vm8, %v23678_v54 }
 0x781   : > { %23457 = vmatmul.mubr.msk.f32.gmra.mrb[34].mxu1 %vm15845_vm9, %v18144_v47 }
 0x782   : > { %23463 = vmatprep.mubr.msk.f32.mxu1 %vm15845_vm9, %v28506_v35  ;;  %v18586_v35 = vld [vmem:[%s28909_s5 + $0x128] sm:$0xf] }
 0x783   : > { %v23690_v5 = vpack.c.bf16 %v18586_v35, %v18585_v60  ;;  %v19035_v35 = vld [vmem:[%s28914_s10] sm:$0x1] }
 0x785   : > { %23464 = vmatmul.mubr.msk.f32.vlgmr.msra.gmra.mrb[32].mxu1 %vm15845_vm9, %v28603_v45 }
 0x786   : > { %23683 = vmatpush3.bf16.msk.msra.mxu1 %vm28160_vm8, %v23678_v54  ;;  %23466 = vmatprep.mubr.msk.f32.mxu1 %vm15845_vm9, %v17703_v49  ;;  %v19034_v54 = vld [vmem:[%s28913_s9 + $0x38] sm:$0xff] }
 0x787   : > { %23686 = vmatprep.subr.msk.bf16.mxu1 %vm28160_vm8, %v23684_v62 }
 0x789   : > { %23467 = vmatmul.mubr.msk.f32.gmra.mrb[34].mxu1 %vm15845_vm9, %v18254_v7 }
 0x78a   : > { %23473 = vmatprep.mubr.msk.f32.mxu1 %vm15845_vm9, %v28525_v37  ;;  %v18584_v37 = vld [vmem:[#allocation6 + $0x74] sm:$0xff] }
 0x78d   : > { %23474 = vmatmul.mubr.msk.f32.vlgmr.msra.gmra.mrb[32].mxu1 %vm15845_vm9, %v28623_v3 }
 0x78e   : > { %23689 = vmatpush3.bf16.msk.msra.mxu1 %vm28160_vm8, %v23684_v62  ;;  %23476 = vmatprep.mubr.msk.f32.mxu1 %vm15845_vm9, %v17813_v41 }
 0x78f   : > { %23692 = vmatprep.subr.msk.bf16.mxu1 %vm28160_vm8, %v23690_v5 }
 0x791   : > { %23477 = vmatmul.mubr.msk.f32.gmra.mrb[34].mxu1 %vm15845_vm9, %v18364_v15 }
 0x792   : > { %23483 = vmatprep.mubr.msk.f32.mxu1 %vm15845_vm9, %v28544_v6  ;;  %v20219_v6 = vld [vmem:[%s28910_s6] ss:$0 sm:$0xff] }
 0x795   : > { %23484 = vmatmul.mubr.msk.f32.vlgmr.msra.gmra.mrb[32].mxu1 %vm15845_vm9, %v28643_v29 }
 0x796   : > { %23695 = vmatpush3.bf16.msk.msra.mxu1 %vm28160_vm8, %v23690_v5  ;;  %23486 = vmatprep.mubr.msk.f32.mxu1 %vm15845_vm9, %v17923_v10 }
 0x797   : > { %23696 = vmatprep.subr.bf16.mxu1 %v24851_v36 }
 0x799   : > { %23487 = vmatmul.mubr.msk.f32.gmra.mrb[34].mxu1 %vm15845_vm9, %v18474_v18 }
 0x79a   : > { %23493 = vmatprep.mubr.msk.f32.mxu1 %vm15845_vm9, %v28563_v8 }
 0x79d   : > { %23494 = vmatmul.mubr.msk.f32.vlgmr.msra.gmra.mrb[32].mxu1 %vm15845_vm9, %v28663_v44  ;;  %v18875_v44 = vld [vmem:[%s28911_s7 + $0x28] sm:$0xff] }
 0x79e   : > { %23496 = vmatprep.mubr.msk.f32.mxu1 %vm15845_vm9, %v18033_v53  ;;  %23698 = vmatpush3.bf16.msra.mxu1 %v23697_v32  ;;  %v23703_v11 = vpack.c.bf16 %v18875_v44, %v18874_v52  ;;  %v19031_v53 = vld [vmem:[%s28913_s9 + $0x20] sm:$0xff] }
 0x79f   : > { %23699 = vmatprep.subr.bf16.mxu1 %v24851_v36  ;;  %v23715_v12 = vpack.c.bf16 %v19032_v26, %v19031_v53 }
 0x7a1   : > { %23497 = vmatmul.mubr.msk.f32.gmra.mrb[34].mxu1 %vm15845_vm9, %v18584_v37 }
 0x7a2   : > { %23503 = vmatprep.mubr.msk.f32.mxu1 %vm24852_vm13, %v29157_v50 }
 0x870   : > { %v23495_v42 = vpop.f32.mrb[32].mxu1 }
 0x871   : > { %v23778_v34 = vadd.f32 %v23495_v42, %v20219_v6  ;;  %v18668_v33 = vpop.f32.mrb[33].mxu1 }
 0x872   : > { %v23779_v8 = vadd.f32 %v20219_v6, %v18668_v33 }
 0x873   : > { %v18692_v22 = vmax.f32 %v23778_v34, 0.0 }
 0x874   : > { %v18691_v25 = vmax.f32 %v23779_v8, 0.0  ;;  %v23498_v0 = vpop.f32.mrb[34].mxu1 }
 0x875   : > { %18697 = vst.msk [vmem:[#allocation7 + $0x8] sm:$0xff] %vm18695_vm14, %v18692_v22  ;;  %v23780_v63 = vadd.f32 %v23498_v0, %v20219_v6  ;;  %v18678_v61 = vpop.f32.mrb[35].mxu1 }
 0x876   : > { %18696 = vst.msk [vmem:[#allocation7] sm:$0xff] %vm18695_vm14, %v18691_v25  ;;  %v23781_v27 = vadd.f32 %v20219_v6, %v18678_v61 }
 0x877   : > { %v18694_v28 = vmax.f32 %v23780_v63, 0.0 }
 0x878   : > { %v18693_v45 = vmax.f32 %v23781_v27, 0.0 }
 0x879   : > { %18699 = vst.msk [vmem:[#allocation7 + $0x18] sm:$0xff] %vm18695_vm14, %v18694_v28 }
 0x87a   : > { %18698 = vst.msk [vmem:[#allocation7 + $0x10] sm:$0xff] %vm18695_vm14, %v18693_v45 }
 0x87c   : > { %v18702_v38 = vld [vmem:[#allocation7 + $0x8] ss:$2 sm:$0x3]  ;;  %v18710_v3 = vld [vmem:[#allocation7 + $0x9] ss:$2 sm:$0x3] }
 0x87d   : > { %v18700_v21 = vld [vmem:[#allocation7] ss:$2 sm:$0x3]  ;;  %v18708_v46 = vld [vmem:[#allocation7 + $0x1] ss:$2 sm:$0x3]  ;;  %v18716_v24 = vmax.f32 %v18702_v38, %v18710_v3 }
 0x87e   : > { %v18715_v29 = vmax.f32 %v18700_v21, %v18708_v46 }
 0x880   : > { %v18719_v58 = vmax.f32 %v18715_v29, %v18716_v24  ;;  %v18706_v13 = vld [vmem:[#allocation7 + $0x18] ss:$2 sm:$0x3]  ;;  %v18714_v39 = vld [vmem:[#allocation7 + $0x19] ss:$2 sm:$0x3] }
 0x881   : > { %v18704_v48 = vld [vmem:[#allocation7 + $0x10] ss:$2 sm:$0x3]  ;;  %v18712_v55 = vld [vmem:[#allocation7 + $0x11] ss:$2 sm:$0x3]  ;;  %v18718_v49 = vmax.f32 %v18706_v13, %v18714_v39 }
 0x882   : > { %23504 = vmatmul.mubr.msk.f32.vlgmr.msra.gmra.mrb[36].mxu1 %vm18695_vm14, %v18719_v58  ;;  %v18800_v40 = vrot.slane %v18719_v58, 1  ;;  %v18717_v23 = vmax.f32 %v18704_v48, %v18712_v55 }
 0x883   : > { %23701 = vmatpush3.bf16.msra.mxu1 %v23700_v59  ;;  %23510 = vmatprep.mubr.msk.f32.mxu1 %vm24852_vm13, %v29157_v50 }
 0x884   : > { %23702 = vmatprep.subr.bf16.mxu1 %v24851_v36  ;;  %v18720_v41 = vmax.f32 %v18717_v23, %v18718_v49 }
 0x886   : > { %v18952_v10 = vrot.slane %v18720_v41, 1 }
 0x88a   : > { %23511 = vmatmul.mubr.msk.f32.vlgmr.msra.gmra.mrb[36].mxu1 %vm18695_vm14, %v18800_v40 }
 0x88b   : > { %23704 = vmatpush3.bf16.msra.mxu1 %v23703_v11  ;;  %23517 = vmatprep.mubr.msk.f32.mxu1 %vm24852_vm13, %v29157_v50 }
 0x88c   : > { %23705 = vmatprep.subr.bf16.mxu1 %v24851_v36 }
 0x892   : > { %23518 = vmatmul.mubr.msk.f32.vlgmr.msra.gmra.mrb[36].mxu1 %vm18695_vm14, %v18720_v41 }
 0x893   : > { %23707 = vmatpush3.bf16.msra.mxu1 %v23706_v19  ;;  %23524 = vmatprep.mubr.msk.f32.mxu1 %vm24852_vm13, %v29157_v50 }
 0x894   : > { %23708 = vmatprep.subr.bf16.mxu1 %v24851_v36 }
 0x89a   : > { %23525 = vmatmul.mubr.msk.f32.vlgmr.msra.gmra.mrb[36].mxu1 %vm18695_vm14, %v18952_v10 }
 0x89b   : > { %23710 = vmatpush3.bf16.msra.mxu1 %v23709_v9  ;;  %23543 = vmatprep.mubr.msk.f32.mxu1 %vm24852_vm13, %v29157_v50  ;;  %v19033_v50 = vld [vmem:[%s28913_s9 + $0x30] sm:$0xff] }
 0x89c   : > { %23711 = vmatprep.subr.bf16.mxu1 %v24851_v36  ;;  %v23718_v47 = vpack.c.bf16 %v19034_v54, %v19033_v50 }
 0x89f   : > { %23713 = vmatpush3.bf16.msra.mxu1 %v23712_v30 }
 0x8a0   : > { %23714 = vmatprep.subr.bf16.mxu1 %v24851_v36 }
 0x8a3   : > { %23716 = vmatpush3.bf16.msra.mxu1 %v23715_v12 }
 0x8a4   : > { %23717 = vmatprep.subr.bf16.mxu1 %v24851_v36 }
 0x8a7   : > { %23719 = vmatpush3.bf16.msra.mxu1 %v23718_v47 }
 0x96d   : > { %v19021_v4 = vpop.f32.mrb[36].mxu1 }
 0x96e   : > { %v23782_v62 = vadd.f32 %v19021_v4, %v18721_v16  ;;  %v23526_v7 = vpop.f32.mrb[37].mxu1 }
 0x970   : > { %v19026_v60 = vmax.f32 %v23782_v62, 0.0 }
 0x972   : > { %23544 = vmatmul.mubr.msk.f32.vlgmr.msra.gmra.mrb[38].mxu1 %vm19036_vm15, %v19026_v60 }
 0xa45   : > { %v19106_v5 = vpop.f32.mrb[38].mxu1 }
 0xa46   : > { %v19107_v15 = vadd.f32 %v19106_v5, %v19035_v35  ;;  %v23545_v18 = vpop.f32.mrb[39].mxu1 }
 0xa48   : > { %19111 = vst.msk [vmem:[%s382_s14] sm:$0x1] %vm19110_vm0, %v19107_v15 }
 0xa49 PF: > { %s21_s17 = sadd.s32 1, %s24847_s17  }
 0xa4a   : > { %p18_p4 = scmp.ge.s32.totalorder %s21_s17, 4  }
 0xa4c   :  { %20 = sbr.rel (!%p18_p4) target bundleno = 1 (0x1), region = 168 }

</bundles_post_ra>
